<compile_context>
chip_gen: v6e
topology: v6e:2x2x1
jax: 0.10.0
libtpu: 0.0.40
codegen_flags: <defaults>
</compile_context>

<pallas_src>
import functools

import jax
import jax.numpy as jnp
import numpy as np
from jax.experimental import pallas as pl
from jax.experimental.pallas import tpu as pltpu


# ----------------------------------------------------------------------------
# Bilinear interpolation matrices (align_corners=True), built host-side.
# ----------------------------------------------------------------------------
def _interp_matrix(n_in, n_out):
    if n_in == 1:
        return np.ones((n_out, 1), np.float32)
    src = np.arange(n_out, dtype=np.float64) * (n_in - 1) / (n_out - 1)
    i0 = np.clip(np.floor(src).astype(np.int64), 0, n_in - 1)
    i1 = np.minimum(i0 + 1, n_in - 1)
    w1 = src - i0
    w0 = 1.0 - w1
    A = np.zeros((n_out, n_in), np.float64)
    A[np.arange(n_out), i0] += w0
    A[np.arange(n_out), i1] += w1
    return A.astype(np.float32)


def _upsample2x_matrix(H, W):
    ah = _interp_matrix(H, 2 * H)          # (2H, H)
    aw = _interp_matrix(W, 2 * W)          # (2W, W)
    # M[(ho*2W + wo), (h*W + w)] = ah[ho, h] * aw[wo, w]
    return np.kron(ah, aw).astype(np.float32)   # (4*H*W, H*W)


# ----------------------------------------------------------------------------
# Fused FFM kernel (single grid step; all intermediates resident in VMEM).
# ----------------------------------------------------------------------------
def _ffm_kernel(*refs, up_first):
    (low_ref, high_ref, m_ref,
     f1w1, f1b1, f1w2, f1sc, f1sh, f1w3, f1b3,
     f2w1, f2b1, f2w2, f2sc, f2sh, f2w3, f2b3,
     out_ref, *pads) = refs

    N, H, W, _ = low_ref.shape
    Cmid = f1w1.shape[-1]
    Cout = f2w1.shape[-1]
    Ho, Wo = 2 * H, 2 * W
    HW = H * W

    if up_first:
        pad_a, pad_b, pad_b2, pad_c = pads
    else:
        pad_a, pad_b, pad_c = pads

    def conv3x3(x4, pad_ref, w_ref):
        # x4: (n, h, w, cin) f32 value.  Returns (n*h*w, cout) f32.
        n, h, w, cin = x4.shape
        cout = w_ref.shape[-1]
        # In-kernel zero padding: zero the scratch, write the interior.
        pad_ref[...] = jnp.zeros(pad_ref.shape, jnp.float32)
        pad_ref[:, 1:h + 1, 1:w + 1, :] = x4
        acc = jnp.zeros((n * h * w, cout), jnp.float32)
        # 9 taps accumulated into one f32 accumulator; all batch images share a
        # single matmul per tap (M = n*h*w).  Default MXU precision.
        for ky in range(3):
            for kx in range(3):
                tap = pad_ref[:, ky:ky + h, kx:kx + w, :].reshape(n * h * w, cin)
                acc = acc + jnp.dot(tap, w_ref[ky, kx],
                                    preferred_element_type=jnp.float32)
        return acc

    def ftb(x4, pad_in, pad_mid, wp):
        # FTB: y = conv1(x); out = relu(y + conv3(relu(BN(conv2(relu(y))))))
        w1, b1, w2, sc, sh, w3, b3 = wp
        n, h, w, _ = x4.shape
        cm = w1.shape[-1]
        y = conv3x3(x4, pad_in, w1) + b1[...]                 # (n*h*w, cm)
        t = jnp.maximum(y, 0.0)
        t = conv3x3(t.reshape(n, h, w, cm), pad_mid, w2)
        t = t * sc[...] + sh[...]                             # BN (conv2 bias folded)
        t = jnp.maximum(t, 0.0)
        t = conv3x3(t.reshape(n, h, w, cm), pad_mid, w3) + b3[...]
        return jnp.maximum(y + t, 0.0)                        # (n*h*w, cm)

    ftb1_w = (f1w1, f1b1, f1w2, f1sc, f1sh, f1w3, f1b3)
    ftb2_w = (f2w1, f2b1, f2w2, f2sc, f2sh, f2w3, f2b3)

    x = low_ref[...].astype(jnp.float32)
    z = ftb(x, pad_a, pad_b, ftb1_w)                                    # (N*HW, Cmid)
    z = z + high_ref[...].astype(jnp.float32).reshape(N * HW, Cmid)     # + high_x

    m = m_ref[...]                                                      # (4HW, HW)
    if up_first:
        ups = [jnp.dot(m, z[n * HW:(n + 1) * HW, :],
                       preferred_element_type=jnp.float32)
               for n in range(N)]
        zu = jnp.stack(ups, axis=0).reshape(N, Ho, Wo, Cmid)
        z2 = ftb(zu, pad_b2, pad_c, ftb2_w)                             # (N*4HW, Cout)
        for n in range(N):
            out_ref[n, :, :, :] = (
                z2[n * Ho * Wo:(n + 1) * Ho * Wo, :].reshape(Ho, Wo, Cout))
    else:
        z2 = ftb(z.reshape(N, H, W, Cmid), pad_b, pad_c, ftb2_w)        # (N*HW, Cout)
        for n in range(N):
            un = jnp.dot(m, z2[n * HW:(n + 1) * HW, :],
                         preferred_element_type=jnp.float32)            # (4HW, Cout)
            out_ref[n, :, :, :] = un.reshape(Ho, Wo, Cout)


# ----------------------------------------------------------------------------
# Wrapper (PyTorch-style NCHW in/out; transposes at the boundary are glue).
# ----------------------------------------------------------------------------
def _prep_ftb_params(p):
    w1, b1 = p['conv1']
    w2, b2 = p['conv2']
    sc, sh = p['bn']
    w3, b3 = p['conv3']
    cm = w1.shape[-1]
    # Fold conv2's bias into the BN shift: (x + b2)*sc + sh = x*sc + (b2*sc + sh).
    sh2 = b2 * sc + sh
    return (w1.astype(jnp.float32),
            b1.reshape(1, cm).astype(jnp.float32),
            w2.astype(jnp.float32),
            sc.reshape(1, cm).astype(jnp.float32),
            sh2.reshape(1, cm).astype(jnp.float32),
            w3.astype(jnp.float32),
            b3.reshape(1, cm).astype(jnp.float32))


def _full_spec(shape):
    zeros = (0,) * len(shape)
    return pl.BlockSpec(tuple(shape), lambda i: zeros)


def ffm_forward(params, low_x_nchw, high_x_nchw, up_first=False):
    """FFM forward; inputs/outputs are PyTorch-style NCHW float32."""
    low = jnp.transpose(low_x_nchw, (0, 2, 3, 1)).astype(jnp.float32)    # NHWC
    high = jnp.transpose(high_x_nchw, (0, 2, 3, 1)).astype(jnp.float32)  # NHWC
    N, H, W, Cin = low.shape
    Cmid = high.shape[-1]
    f1 = _prep_ftb_params(params['ftb1'])
    f2 = _prep_ftb_params(params['ftb2'])
    Cout = f2[0].shape[-1]
    Ho, Wo = 2 * H, 2 * W

    m_up = jnp.asarray(_upsample2x_matrix(H, W))      # (Ho*Wo, H*W)

    inputs = [low, high, m_up, *f1, *f2]
    in_specs = [_full_spec(a.shape) for a in inputs]

    scratch = [pltpu.VMEM((N, H + 2, W + 2, Cin), jnp.float32),
               pltpu.VMEM((N, H + 2, W + 2, Cmid), jnp.float32)]
    if up_first:
        scratch += [pltpu.VMEM((N, Ho + 2, Wo + 2, Cmid), jnp.float32),
                    pltpu.VMEM((N, Ho + 2, Wo + 2, Cout), jnp.float32)]
    else:
        scratch += [pltpu.VMEM((N, H + 2, W + 2, Cout), jnp.float32)]

    out_nhwc = pl.pallas_call(
        functools.partial(_ffm_kernel, up_first=up_first),
        out_shape=jax.ShapeDtypeStruct((N, Ho, Wo, Cout), jnp.float32),
        grid=(1,),
        in_specs=in_specs,
        out_specs=_full_spec((N, Ho, Wo, Cout)),
        scratch_shapes=scratch,
        compiler_params=pltpu.CompilerParams(
            dimension_semantics=("arbitrary",)),
    )(*inputs)
    return jnp.transpose(out_nhwc, (0, 3, 1, 2))      # back to NCHW


# ----------------------------------------------------------------------------
# Parameter init (deterministic, PyTorch-shaped).
# ----------------------------------------------------------------------------
def init_conv(key, cin, cout):
    k1, k2 = jax.random.split(key)
    bound = 1.0 / np.sqrt(cin * 9)
    w = jax.random.uniform(k1, (3, 3, cin, cout), jnp.float32, -bound, bound)
    b = jax.random.uniform(k2, (cout,), jnp.float32, -bound, bound)
    return w, b


def init_bn(key, c, eps=1e-5):
    k1, k2, k3, k4 = jax.random.split(key, 4)
    gamma = 1.0 + 0.1 * jax.random.normal(k1, (c,), jnp.float32)
    beta = 0.1 * jax.random.normal(k2, (c,), jnp.float32)
    mean = 0.1 * jax.random.normal(k3, (c,), jnp.float32)
    var = jax.random.uniform(k4, (c,), jnp.float32, 0.5, 1.5)
    scale = gamma / jnp.sqrt(var + eps)
    shift = beta - mean * scale
    return scale, shift


def init_ftb(key, cin, cmid):
    k1, k2, k3, k4 = jax.random.split(key, 4)
    return dict(conv1=init_conv(k1, cin, cmid),
                conv2=init_conv(k2, cmid, cmid),
                bn=init_bn(k3, cmid),
                conv3=init_conv(k4, cmid, cmid))


def init_ffm(key, cin, cmid, cout):
    k1, k2 = jax.random.split(key)
    return dict(ftb1=init_ftb(k1, cin, cmid), ftb2=init_ftb(k2, cmid, cout))


# ----------------------------------------------------------------------------
# Pure-JAX reference (for self-check).
# ----------------------------------------------------------------------------
def _ref_conv(x, w, b):
    y = jax.lax.conv_general_dilated(
        x, w, window_strides=(1, 1), padding='SAME',
        dimension_numbers=('NHWC', 'HWIO', 'NHWC'),
        precision=jax.lax.Precision.HIGHEST)
    return y + b


def _ref_ftb(p, x):
    w1, b1 = p['conv1']; w2, b2 = p['conv2']; sc, sh = p['bn']; w3, b3 = p['conv3']
    y = _ref_conv(x, w1, b1)
    t = jax.nn.relu(y)
    t = _ref_conv(t, w2, b2) * sc + sh
    t = jax.nn.relu(t)
    t = _ref_conv(t, w3, b3)
    return jax.nn.relu(y + t)


def _ref_ffm(params, low_nchw, high_nchw, up_first=False):
    low = jnp.transpose(low_nchw, (0, 2, 3, 1))
    high = jnp.transpose(high_nchw, (0, 2, 3, 1))
    x = _ref_ftb(params['ftb1'], low) + high
    H, W = x.shape[1], x.shape[2]
    ah = jnp.asarray(_interp_matrix(H, 2 * H))
    aw = jnp.asarray(_interp_matrix(W, 2 * W))
    if up_first:
        x = jnp.einsum('oh,nhwc,pw->nopc', ah, x, aw,
                       precision=jax.lax.Precision.HIGHEST)
        x = _ref_ftb(params['ftb2'], x)
    else:
        x = _ref_ftb(params['ftb2'], x)
        x = jnp.einsum('oh,nhwc,pw->nopc', ah, x, aw,
                       precision=jax.lax.Precision.HIGHEST)
    return jnp.transpose(x, (0, 3, 1, 2))


# ----------------------------------------------------------------------------
if __name__ == "__main__":
    N, Cin, Cmid, Cout, H, W = 2, 4, 8, 8, 8, 8

    key = jax.random.PRNGKey(0)
    kp, klow, khigh = jax.random.split(key, 3)
    params = init_ffm(kp, Cin, Cmid, Cout)

    low_x = jax.random.normal(klow, (N, Cin, H, W), jnp.float32)     # NCHW
    high_x = jax.random.normal(khigh, (N, Cmid, H, W), jnp.float32)  # NCHW

    out = ffm_forward(params, low_x, high_x, up_first=False)
    out = jax.block_until_ready(out)
    assert out.shape == (N, Cout, 2 * H, 2 * W), out.shape

    ref = jax.block_until_ready(_ref_ffm(params, low_x, high_x, up_first=False))
    np.testing.assert_allclose(np.asarray(out), np.asarray(ref),
                               atol=2e-2, rtol=2e-2)

    print("KERNEL_OK")
</pallas_src>

<mosaic_0001>
module attributes {stable_mosaic.version = 11 : i64} {
  func.func @_ffm_kernel(%arg0: i32, %arg1: memref<2x8x8x4xf32, #tpu.memory_space<vmem>>, %arg2: memref<2x8x8x8xf32, #tpu.memory_space<vmem>>, %arg3: memref<256x64xf32, #tpu.memory_space<vmem>>, %arg4: memref<3x3x4x8xf32, #tpu.memory_space<vmem>>, %arg5: memref<1x8xf32, #tpu.memory_space<vmem>>, %arg6: memref<3x3x8x8xf32, #tpu.memory_space<vmem>>, %arg7: memref<1x8xf32, #tpu.memory_space<vmem>>, %arg8: memref<1x8xf32, #tpu.memory_space<vmem>>, %arg9: memref<3x3x8x8xf32, #tpu.memory_space<vmem>>, %arg10: memref<1x8xf32, #tpu.memory_space<vmem>>, %arg11: memref<3x3x8x8xf32, #tpu.memory_space<vmem>>, %arg12: memref<1x8xf32, #tpu.memory_space<vmem>>, %arg13: memref<3x3x8x8xf32, #tpu.memory_space<vmem>>, %arg14: memref<1x8xf32, #tpu.memory_space<vmem>>, %arg15: memref<1x8xf32, #tpu.memory_space<vmem>>, %arg16: memref<3x3x8x8xf32, #tpu.memory_space<vmem>>, %arg17: memref<1x8xf32, #tpu.memory_space<vmem>>, %arg18: memref<2x16x16x8xf32, #tpu.memory_space<vmem>>, %arg19: memref<2x10x10x4xf32, #tpu.memory_space<vmem>>, %arg20: memref<2x10x10x8xf32, #tpu.memory_space<vmem>>, %arg21: memref<2x10x10x8xf32, #tpu.memory_space<vmem>>) attributes {dimension_semantics = [#tpu.dimension_semantics<arbitrary>], iteration_bounds = array<i64: 1>, scalar_prefetch = 0 : i64, scratch_operands = 3 : i64, tpu.core_type = #tpu.core_type<tc>, window_params = [{pipeline_mode = #tpu.pipeline_mode<synchronous>, transform_indices = @transform_0, window_bounds = array<i64: 2, 8, 8, 4>}, {pipeline_mode = #tpu.pipeline_mode<synchronous>, transform_indices = @transform_1, window_bounds = array<i64: 2, 8, 8, 8>}, {pipeline_mode = #tpu.pipeline_mode<synchronous>, transform_indices = @transform_2, window_bounds = array<i64: 256, 64>}, {pipeline_mode = #tpu.pipeline_mode<synchronous>, transform_indices = @transform_3, window_bounds = array<i64: 3, 3, 4, 8>}, {pipeline_mode = #tpu.pipeline_mode<synchronous>, transform_indices = @transform_4, window_bounds = array<i64: 1, 8>}, {pipeline_mode = #tpu.pipeline_mode<synchronous>, transform_indices = @transform_5, window_bounds = array<i64: 3, 3, 8, 8>}, {pipeline_mode = #tpu.pipeline_mode<synchronous>, transform_indices = @transform_6, window_bounds = array<i64: 1, 8>}, {pipeline_mode = #tpu.pipeline_mode<synchronous>, transform_indices = @transform_7, window_bounds = array<i64: 1, 8>}, {pipeline_mode = #tpu.pipeline_mode<synchronous>, transform_indices = @transform_8, window_bounds = array<i64: 3, 3, 8, 8>}, {pipeline_mode = #tpu.pipeline_mode<synchronous>, transform_indices = @transform_9, window_bounds = array<i64: 1, 8>}, {pipeline_mode = #tpu.pipeline_mode<synchronous>, transform_indices = @transform_10, window_bounds = array<i64: 3, 3, 8, 8>}, {pipeline_mode = #tpu.pipeline_mode<synchronous>, transform_indices = @transform_11, window_bounds = array<i64: 1, 8>}, {pipeline_mode = #tpu.pipeline_mode<synchronous>, transform_indices = @transform_12, window_bounds = array<i64: 3, 3, 8, 8>}, {pipeline_mode = #tpu.pipeline_mode<synchronous>, transform_indices = @transform_13, window_bounds = array<i64: 1, 8>}, {pipeline_mode = #tpu.pipeline_mode<synchronous>, transform_indices = @transform_14, window_bounds = array<i64: 1, 8>}, {pipeline_mode = #tpu.pipeline_mode<synchronous>, transform_indices = @transform_15, window_bounds = array<i64: 3, 3, 8, 8>}, {pipeline_mode = #tpu.pipeline_mode<synchronous>, transform_indices = @transform_16, window_bounds = array<i64: 1, 8>}, {pipeline_mode = #tpu.pipeline_mode<synchronous>, transform_indices = @transform_17, window_bounds = array<i64: 2, 16, 16, 8>}]} {
    %c0 = arith.constant 0 : index
    %c0_0 = arith.constant 0 : index
    %c0_1 = arith.constant 0 : index
    %c0_2 = arith.constant 0 : index
    %0 = vector.load %arg1[%c0, %c0_0, %c0_1, %c0_2] : memref<2x8x8x4xf32, #tpu.memory_space<vmem>>, vector<2x8x8x4xf32>
    %cst = arith.constant 0.000000e+00 : f32
    %1 = vector.broadcast %cst : f32 to vector<2x10x10x4xf32>
    %c0_3 = arith.constant 0 : index
    %c0_4 = arith.constant 0 : index
    %c0_5 = arith.constant 0 : index
    %c0_6 = arith.constant 0 : index
    %2 = vector.load %arg19[%c0_3, %c0_4, %c0_5, %c0_6] : memref<2x10x10x4xf32, #tpu.memory_space<vmem>>, vector<2x10x10x4xf32>
    tpu.vector_store %arg19[%c0_3, %c0_4, %c0_5, %c0_6], %1 {strides = array<i32>} : memref<2x10x10x4xf32, #tpu.memory_space<vmem>>, vector<2x10x10x4xf32>,
    %c0_7 = arith.constant 0 : index
    %c1 = arith.constant 1 : index
    %c1_8 = arith.constant 1 : index
    %c0_9 = arith.constant 0 : index
    %3 = vector.load %arg19[%c0_7, %c1, %c1_8, %c0_9] : memref<2x10x10x4xf32, #tpu.memory_space<vmem>>, vector<2x8x8x4xf32>
    tpu.vector_store %arg19[%c0_7, %c1, %c1_8, %c0_9], %0 {strides = array<i32>} : memref<2x10x10x4xf32, #tpu.memory_space<vmem>>, vector<2x8x8x4xf32>,
    %cst_10 = arith.constant 0.000000e+00 : f32
    %4 = vector.broadcast %cst_10 : f32 to vector<128x8xf32>
    %c0_11 = arith.constant 0 : index
    %c0_12 = arith.constant 0 : index
    %c0_13 = arith.constant 0 : index
    %c0_14 = arith.constant 0 : index
    %5 = vector.load %arg19[%c0_11, %c0_12, %c0_13, %c0_14] : memref<2x10x10x4xf32, #tpu.memory_space<vmem>>, vector<2x8x8x4xf32>
    %6 = vector.shape_cast %5 : vector<2x8x8x4xf32> to vector<128x4xf32>
    %c0_15 = arith.constant 0 : index
    %c0_16 = arith.constant 0 : index
    %c0_17 = arith.constant 0 : index
    %c0_18 = arith.constant 0 : index
    %7 = vector.load %arg4[%c0_15, %c0_16, %c0_17, %c0_18] : memref<3x3x4x8xf32, #tpu.memory_space<vmem>>, vector<1x1x4x8xf32>
    %8 = vector.shape_cast %7 : vector<1x1x4x8xf32> to vector<4x8xf32>
    %cst_19 = arith.constant dense<0.000000e+00> : vector<128x8xf32>
    %9 = tpu.matmul %6, %8, %cst_19 {dimension_numbers = #tpu.dot_dimension_numbers<[1], [0], [0], [1], [0, 0, 1, 1], [], []>} : vector<128x4xf32>, vector<4x8xf32>, vector<128x8xf32> -> vector<128x8xf32>
    %10 = arith.addf %4, %9 : vector<128x8xf32>
    %c0_20 = arith.constant 0 : index
    %c0_21 = arith.constant 0 : index
    %c1_22 = arith.constant 1 : index
    %c0_23 = arith.constant 0 : index
    %11 = vector.load %arg19[%c0_20, %c0_21, %c1_22, %c0_23] : memref<2x10x10x4xf32, #tpu.memory_space<vmem>>, vector<2x8x8x4xf32>
    %12 = vector.shape_cast %11 : vector<2x8x8x4xf32> to vector<128x4xf32>
    %c0_24 = arith.constant 0 : index
    %c1_25 = arith.constant 1 : index
    %c0_26 = arith.constant 0 : index
    %c0_27 = arith.constant 0 : index
    %13 = vector.load %arg4[%c0_24, %c1_25, %c0_26, %c0_27] : memref<3x3x4x8xf32, #tpu.memory_space<vmem>>, vector<1x1x4x8xf32>
    %14 = vector.shape_cast %13 : vector<1x1x4x8xf32> to vector<4x8xf32>
    %cst_28 = arith.constant dense<0.000000e+00> : vector<128x8xf32>
    %15 = tpu.matmul %12, %14, %cst_28 {dimension_numbers = #tpu.dot_dimension_numbers<[1], [0], [0], [1], [0, 0, 1, 1], [], []>} : vector<128x4xf32>, vector<4x8xf32>, vector<128x8xf32> -> vector<128x8xf32>
    %16 = arith.addf %10, %15 : vector<128x8xf32>
    %c0_29 = arith.constant 0 : index
    %c0_30 = arith.constant 0 : index
    %c2 = arith.constant 2 : index
    %c0_31 = arith.constant 0 : index
    %17 = vector.load %arg19[%c0_29, %c0_30, %c2, %c0_31] : memref<2x10x10x4xf32, #tpu.memory_space<vmem>>, vector<2x8x8x4xf32>
    %18 = vector.shape_cast %17 : vector<2x8x8x4xf32> to vector<128x4xf32>
    %c0_32 = arith.constant 0 : index
    %c2_33 = arith.constant 2 : index
    %c0_34 = arith.constant 0 : index
    %c0_35 = arith.constant 0 : index
    %19 = vector.load %arg4[%c0_32, %c2_33, %c0_34, %c0_35] : memref<3x3x4x8xf32, #tpu.memory_space<vmem>>, vector<1x1x4x8xf32>
    %20 = vector.shape_cast %19 : vector<1x1x4x8xf32> to vector<4x8xf32>
    %cst_36 = arith.constant dense<0.000000e+00> : vector<128x8xf32>
    %21 = tpu.matmul %18, %20, %cst_36 {dimension_numbers = #tpu.dot_dimension_numbers<[1], [0], [0], [1], [0, 0, 1, 1], [], []>} : vector<128x4xf32>, vector<4x8xf32>, vector<128x8xf32> -> vector<128x8xf32>
    %22 = arith.addf %16, %21 : vector<128x8xf32>
    %c0_37 = arith.constant 0 : index
    %c1_38 = arith.constant 1 : index
    %c0_39 = arith.constant 0 : index
    %c0_40 = arith.constant 0 : index
    %23 = vector.load %arg19[%c0_37, %c1_38, %c0_39, %c0_40] : memref<2x10x10x4xf32, #tpu.memory_space<vmem>>, vector<2x8x8x4xf32>
    %24 = vector.shape_cast %23 : vector<2x8x8x4xf32> to vector<128x4xf32>
    %c1_41 = arith.constant 1 : index
    %c0_42 = arith.constant 0 : index
    %c0_43 = arith.constant 0 : index
    %c0_44 = arith.constant 0 : index
    %25 = vector.load %arg4[%c1_41, %c0_42, %c0_43, %c0_44] : memref<3x3x4x8xf32, #tpu.memory_space<vmem>>, vector<1x1x4x8xf32>
    %26 = vector.shape_cast %25 : vector<1x1x4x8xf32> to vector<4x8xf32>
    %cst_45 = arith.constant dense<0.000000e+00> : vector<128x8xf32>
    %27 = tpu.matmul %24, %26, %cst_45 {dimension_numbers = #tpu.dot_dimension_numbers<[1], [0], [0], [1], [0, 0, 1, 1], [], []>} : vector<128x4xf32>, vector<4x8xf32>, vector<128x8xf32> -> vector<128x8xf32>
    %28 = arith.addf %22, %27 : vector<128x8xf32>
    %c0_46 = arith.constant 0 : index
    %c1_47 = arith.constant 1 : index
    %c1_48 = arith.constant 1 : index
    %c0_49 = arith.constant 0 : index
    %29 = vector.load %arg19[%c0_46, %c1_47, %c1_48, %c0_49] : memref<2x10x10x4xf32, #tpu.memory_space<vmem>>, vector<2x8x8x4xf32>
    %30 = vector.shape_cast %29 : vector<2x8x8x4xf32> to vector<128x4xf32>
    %c1_50 = arith.constant 1 : index
    %c1_51 = arith.constant 1 : index
    %c0_52 = arith.constant 0 : index
    %c0_53 = arith.constant 0 : index
    %31 = vector.load %arg4[%c1_50, %c1_51, %c0_52, %c0_53] : memref<3x3x4x8xf32, #tpu.memory_space<vmem>>, vector<1x1x4x8xf32>
    %32 = vector.shape_cast %31 : vector<1x1x4x8xf32> to vector<4x8xf32>
    %cst_54 = arith.constant dense<0.000000e+00> : vector<128x8xf32>
    %33 = tpu.matmul %30, %32, %cst_54 {dimension_numbers = #tpu.dot_dimension_numbers<[1], [0], [0], [1], [0, 0, 1, 1], [], []>} : vector<128x4xf32>, vector<4x8xf32>, vector<128x8xf32> -> vector<128x8xf32>
    %34 = arith.addf %28, %33 : vector<128x8xf32>
    %c0_55 = arith.constant 0 : index
    %c1_56 = arith.constant 1 : index
    %c2_57 = arith.constant 2 : index
    %c0_58 = arith.constant 0 : index
    %35 = vector.load %arg19[%c0_55, %c1_56, %c2_57, %c0_58] : memref<2x10x10x4xf32, #tpu.memory_space<vmem>>, vector<2x8x8x4xf32>
    %36 = vector.shape_cast %35 : vector<2x8x8x4xf32> to vector<128x4xf32>
    %c1_59 = arith.constant 1 : index
    %c2_60 = arith.constant 2 : index
    %c0_61 = arith.constant 0 : index
    %c0_62 = arith.constant 0 : index
    %37 = vector.load %arg4[%c1_59, %c2_60, %c0_61, %c0_62] : memref<3x3x4x8xf32, #tpu.memory_space<vmem>>, vector<1x1x4x8xf32>
    %38 = vector.shape_cast %37 : vector<1x1x4x8xf32> to vector<4x8xf32>
    %cst_63 = arith.constant dense<0.000000e+00> : vector<128x8xf32>
    %39 = tpu.matmul %36, %38, %cst_63 {dimension_numbers = #tpu.dot_dimension_numbers<[1], [0], [0], [1], [0, 0, 1, 1], [], []>} : vector<128x4xf32>, vector<4x8xf32>, vector<128x8xf32> -> vector<128x8xf32>
    %40 = arith.addf %34, %39 : vector<128x8xf32>
    %c0_64 = arith.constant 0 : index
    %c2_65 = arith.constant 2 : index
    %c0_66 = arith.constant 0 : index
    %c0_67 = arith.constant 0 : index
    %41 = vector.load %arg19[%c0_64, %c2_65, %c0_66, %c0_67] : memref<2x10x10x4xf32, #tpu.memory_space<vmem>>, vector<2x8x8x4xf32>
    %42 = vector.shape_cast %41 : vector<2x8x8x4xf32> to vector<128x4xf32>
    %c2_68 = arith.constant 2 : index
    %c0_69 = arith.constant 0 : index
    %c0_70 = arith.constant 0 : index
    %c0_71 = arith.constant 0 : index
    %43 = vector.load %arg4[%c2_68, %c0_69, %c0_70, %c0_71] : memref<3x3x4x8xf32, #tpu.memory_space<vmem>>, vector<1x1x4x8xf32>
    %44 = vector.shape_cast %43 : vector<1x1x4x8xf32> to vector<4x8xf32>
    %cst_72 = arith.constant dense<0.000000e+00> : vector<128x8xf32>
    %45 = tpu.matmul %42, %44, %cst_72 {dimension_numbers = #tpu.dot_dimension_numbers<[1], [0], [0], [1], [0, 0, 1, 1], [], []>} : vector<128x4xf32>, vector<4x8xf32>, vector<128x8xf32> -> vector<128x8xf32>
    %46 = arith.addf %40, %45 : vector<128x8xf32>
    %c0_73 = arith.constant 0 : index
    %c2_74 = arith.constant 2 : index
    %c1_75 = arith.constant 1 : index
    %c0_76 = arith.constant 0 : index
    %47 = vector.load %arg19[%c0_73, %c2_74, %c1_75, %c0_76] : memref<2x10x10x4xf32, #tpu.memory_space<vmem>>, vector<2x8x8x4xf32>
    %48 = vector.shape_cast %47 : vector<2x8x8x4xf32> to vector<128x4xf32>
    %c2_77 = arith.constant 2 : index
    %c1_78 = arith.constant 1 : index
    %c0_79 = arith.constant 0 : index
    %c0_80 = arith.constant 0 : index
    %49 = vector.load %arg4[%c2_77, %c1_78, %c0_79, %c0_80] : memref<3x3x4x8xf32, #tpu.memory_space<vmem>>, vector<1x1x4x8xf32>
    %50 = vector.shape_cast %49 : vector<1x1x4x8xf32> to vector<4x8xf32>
    %cst_81 = arith.constant dense<0.000000e+00> : vector<128x8xf32>
    %51 = tpu.matmul %48, %50, %cst_81 {dimension_numbers = #tpu.dot_dimension_numbers<[1], [0], [0], [1], [0, 0, 1, 1], [], []>} : vector<128x4xf32>, vector<4x8xf32>, vector<128x8xf32> -> vector<128x8xf32>
    %52 = arith.addf %46, %51 : vector<128x8xf32>
    %c0_82 = arith.constant 0 : index
    %c2_83 = arith.constant 2 : index
    %c2_84 = arith.constant 2 : index
    %c0_85 = arith.constant 0 : index
    %53 = vector.load %arg19[%c0_82, %c2_83, %c2_84, %c0_85] : memref<2x10x10x4xf32, #tpu.memory_space<vmem>>, vector<2x8x8x4xf32>
    %54 = vector.shape_cast %53 : vector<2x8x8x4xf32> to vector<128x4xf32>
    %c2_86 = arith.constant 2 : index
    %c2_87 = arith.constant 2 : index
    %c0_88 = arith.constant 0 : index
    %c0_89 = arith.constant 0 : index
    %55 = vector.load %arg4[%c2_86, %c2_87, %c0_88, %c0_89] : memref<3x3x4x8xf32, #tpu.memory_space<vmem>>, vector<1x1x4x8xf32>
    %56 = vector.shape_cast %55 : vector<1x1x4x8xf32> to vector<4x8xf32>
    %cst_90 = arith.constant dense<0.000000e+00> : vector<128x8xf32>
    %57 = tpu.matmul %54, %56, %cst_90 {dimension_numbers = #tpu.dot_dimension_numbers<[1], [0], [0], [1], [0, 0, 1, 1], [], []>} : vector<128x4xf32>, vector<4x8xf32>, vector<128x8xf32> -> vector<128x8xf32>
    %58 = arith.addf %52, %57 : vector<128x8xf32>
    %c0_91 = arith.constant 0 : index
    %c0_92 = arith.constant 0 : index
    %59 = vector.load %arg5[%c0_91, %c0_92] : memref<1x8xf32, #tpu.memory_space<vmem>>, vector<1x8xf32>
    %60 = vector.broadcast %59 : vector<1x8xf32> to vector<128x8xf32>
    %61 = arith.addf %58, %60 : vector<128x8xf32>
    %cst_93 = arith.constant 0.000000e+00 : f32
    %62 = vector.broadcast %cst_93 : f32 to vector<128x8xf32>
    %63 = arith.maximumf %61, %62 : vector<128x8xf32>
    %64 = vector.shape_cast %63 : vector<128x8xf32> to vector<2x8x8x8xf32>
    %cst_94 = arith.constant 0.000000e+00 : f32
    %65 = vector.broadcast %cst_94 : f32 to vector<2x10x10x8xf32>
    %c0_95 = arith.constant 0 : index
    %c0_96 = arith.constant 0 : index
    %c0_97 = arith.constant 0 : index
    %c0_98 = arith.constant 0 : index
    %66 = vector.load %arg20[%c0_95, %c0_96, %c0_97, %c0_98] : memref<2x10x10x8xf32, #tpu.memory_space<vmem>>, vector<2x10x10x8xf32>
    tpu.vector_store %arg20[%c0_95, %c0_96, %c0_97, %c0_98], %65 {strides = array<i32>} : memref<2x10x10x8xf32, #tpu.memory_space<vmem>>, vector<2x10x10x8xf32>,
    %c0_99 = arith.constant 0 : index
    %c1_100 = arith.constant 1 : index
    %c1_101 = arith.constant 1 : index
    %c0_102 = arith.constant 0 : index
    %67 = vector.load %arg20[%c0_99, %c1_100, %c1_101, %c0_102] : memref<2x10x10x8xf32, #tpu.memory_space<vmem>>, vector<2x8x8x8xf32>
    tpu.vector_store %arg20[%c0_99, %c1_100, %c1_101, %c0_102], %64 {strides = array<i32>} : memref<2x10x10x8xf32, #tpu.memory_space<vmem>>, vector<2x8x8x8xf32>,
    %cst_103 = arith.constant 0.000000e+00 : f32
    %68 = vector.broadcast %cst_103 : f32 to vector<128x8xf32>
    %c0_104 = arith.constant 0 : index
    %c0_105 = arith.constant 0 : index
    %c0_106 = arith.constant 0 : index
    %c0_107 = arith.constant 0 : index
    %69 = vector.load %arg20[%c0_104, %c0_105, %c0_106, %c0_107] : memref<2x10x10x8xf32, #tpu.memory_space<vmem>>, vector<2x8x8x8xf32>
    %70 = vector.shape_cast %69 : vector<2x8x8x8xf32> to vector<128x8xf32>
    %c0_108 = arith.constant 0 : index
    %c0_109 = arith.constant 0 : index
    %c0_110 = arith.constant 0 : index
    %c0_111 = arith.constant 0 : index
    %71 = vector.load %arg6[%c0_108, %c0_109, %c0_110, %c0_111] : memref<3x3x8x8xf32, #tpu.memory_space<vmem>>, vector<1x1x8x8xf32>
    %72 = vector.shape_cast %71 : vector<1x1x8x8xf32> to vector<8x8xf32>
    %cst_112 = arith.constant dense<0.000000e+00> : vector<128x8xf32>
    %73 = tpu.matmul %70, %72, %cst_112 {dimension_numbers = #tpu.dot_dimension_numbers<[1], [0], [0], [1], [0, 0, 1, 1], [], []>} : vector<128x8xf32>, vector<8x8xf32>, vector<128x8xf32> -> vector<128x8xf32>
    %74 = arith.addf %68, %73 : vector<128x8xf32>
    %c0_113 = arith.constant 0 : index
    %c0_114 = arith.constant 0 : index
    %c1_115 = arith.constant 1 : index
    %c0_116 = arith.constant 0 : index
    %75 = vector.load %arg20[%c0_113, %c0_114, %c1_115, %c0_116] : memref<2x10x10x8xf32, #tpu.memory_space<vmem>>, vector<2x8x8x8xf32>
    %76 = vector.shape_cast %75 : vector<2x8x8x8xf32> to vector<128x8xf32>
    %c0_117 = arith.constant 0 : index
    %c1_118 = arith.constant 1 : index
    %c0_119 = arith.constant 0 : index
    %c0_120 = arith.constant 0 : index
    %77 = vector.load %arg6[%c0_117, %c1_118, %c0_119, %c0_120] : memref<3x3x8x8xf32, #tpu.memory_space<vmem>>, vector<1x1x8x8xf32>
    %78 = vector.shape_cast %77 : vector<1x1x8x8xf32> to vector<8x8xf32>
    %cst_121 = arith.constant dense<0.000000e+00> : vector<128x8xf32>
    %79 = tpu.matmul %76, %78, %cst_121 {dimension_numbers = #tpu.dot_dimension_numbers<[1], [0], [0], [1], [0, 0, 1, 1], [], []>} : vector<128x8xf32>, vector<8x8xf32>, vector<128x8xf32> -> vector<128x8xf32>
    %80 = arith.addf %74, %79 : vector<128x8xf32>
    %c0_122 = arith.constant 0 : index
    %c0_123 = arith.constant 0 : index
    %c2_124 = arith.constant 2 : index
    %c0_125 = arith.constant 0 : index
    %81 = vector.load %arg20[%c0_122, %c0_123, %c2_124, %c0_125] : memref<2x10x10x8xf32, #tpu.memory_space<vmem>>, vector<2x8x8x8xf32>
    %82 = vector.shape_cast %81 : vector<2x8x8x8xf32> to vector<128x8xf32>
    %c0_126 = arith.constant 0 : index
    %c2_127 = arith.constant 2 : index
    %c0_128 = arith.constant 0 : index
    %c0_129 = arith.constant 0 : index
    %83 = vector.load %arg6[%c0_126, %c2_127, %c0_128, %c0_129] : memref<3x3x8x8xf32, #tpu.memory_space<vmem>>, vector<1x1x8x8xf32>
    %84 = vector.shape_cast %83 : vector<1x1x8x8xf32> to vector<8x8xf32>
    %cst_130 = arith.constant dense<0.000000e+00> : vector<128x8xf32>
    %85 = tpu.matmul %82, %84, %cst_130 {dimension_numbers = #tpu.dot_dimension_numbers<[1], [0], [0], [1], [0, 0, 1, 1], [], []>} : vector<128x8xf32>, vector<8x8xf32>, vector<128x8xf32> -> vector<128x8xf32>
    %86 = arith.addf %80, %85 : vector<128x8xf32>
    %c0_131 = arith.constant 0 : index
    %c1_132 = arith.constant 1 : index
    %c0_133 = arith.constant 0 : index
    %c0_134 = arith.constant 0 : index
    %87 = vector.load %arg20[%c0_131, %c1_132, %c0_133, %c0_134] : memref<2x10x10x8xf32, #tpu.memory_space<vmem>>, vector<2x8x8x8xf32>
    %88 = vector.shape_cast %87 : vector<2x8x8x8xf32> to vector<128x8xf32>
    %c1_135 = arith.constant 1 : index
    %c0_136 = arith.constant 0 : index
    %c0_137 = arith.constant 0 : index
    %c0_138 = arith.constant 0 : index
    %89 = vector.load %arg6[%c1_135, %c0_136, %c0_137, %c0_138] : memref<3x3x8x8xf32, #tpu.memory_space<vmem>>, vector<1x1x8x8xf32>
    %90 = vector.shape_cast %89 : vector<1x1x8x8xf32> to vector<8x8xf32>
    %cst_139 = arith.constant dense<0.000000e+00> : vector<128x8xf32>
    %91 = tpu.matmul %88, %90, %cst_139 {dimension_numbers = #tpu.dot_dimension_numbers<[1], [0], [0], [1], [0, 0, 1, 1], [], []>} : vector<128x8xf32>, vector<8x8xf32>, vector<128x8xf32> -> vector<128x8xf32>
    %92 = arith.addf %86, %91 : vector<128x8xf32>
    %c0_140 = arith.constant 0 : index
    %c1_141 = arith.constant 1 : index
    %c1_142 = arith.constant 1 : index
    %c0_143 = arith.constant 0 : index
    %93 = vector.load %arg20[%c0_140, %c1_141, %c1_142, %c0_143] : memref<2x10x10x8xf32, #tpu.memory_space<vmem>>, vector<2x8x8x8xf32>
    %94 = vector.shape_cast %93 : vector<2x8x8x8xf32> to vector<128x8xf32>
    %c1_144 = arith.constant 1 : index
    %c1_145 = arith.constant 1 : index
    %c0_146 = arith.constant 0 : index
    %c0_147 = arith.constant 0 : index
    %95 = vector.load %arg6[%c1_144, %c1_145, %c0_146, %c0_147] : memref<3x3x8x8xf32, #tpu.memory_space<vmem>>, vector<1x1x8x8xf32>
    %96 = vector.shape_cast %95 : vector<1x1x8x8xf32> to vector<8x8xf32>
    %cst_148 = arith.constant dense<0.000000e+00> : vector<128x8xf32>
    %97 = tpu.matmul %94, %96, %cst_148 {dimension_numbers = #tpu.dot_dimension_numbers<[1], [0], [0], [1], [0, 0, 1, 1], [], []>} : vector<128x8xf32>, vector<8x8xf32>, vector<128x8xf32> -> vector<128x8xf32>
    %98 = arith.addf %92, %97 : vector<128x8xf32>
    %c0_149 = arith.constant 0 : index
    %c1_150 = arith.constant 1 : index
    %c2_151 = arith.constant 2 : index
    %c0_152 = arith.constant 0 : index
    %99 = vector.load %arg20[%c0_149, %c1_150, %c2_151, %c0_152] : memref<2x10x10x8xf32, #tpu.memory_space<vmem>>, vector<2x8x8x8xf32>
    %100 = vector.shape_cast %99 : vector<2x8x8x8xf32> to vector<128x8xf32>
    %c1_153 = arith.constant 1 : index
    %c2_154 = arith.constant 2 : index
    %c0_155 = arith.constant 0 : index
    %c0_156 = arith.constant 0 : index
    %101 = vector.load %arg6[%c1_153, %c2_154, %c0_155, %c0_156] : memref<3x3x8x8xf32, #tpu.memory_space<vmem>>, vector<1x1x8x8xf32>
    %102 = vector.shape_cast %101 : vector<1x1x8x8xf32> to vector<8x8xf32>
    %cst_157 = arith.constant dense<0.000000e+00> : vector<128x8xf32>
    %103 = tpu.matmul %100, %102, %cst_157 {dimension_numbers = #tpu.dot_dimension_numbers<[1], [0], [0], [1], [0, 0, 1, 1], [], []>} : vector<128x8xf32>, vector<8x8xf32>, vector<128x8xf32> -> vector<128x8xf32>
    %104 = arith.addf %98, %103 : vector<128x8xf32>
    %c0_158 = arith.constant 0 : index
    %c2_159 = arith.constant 2 : index
    %c0_160 = arith.constant 0 : index
    %c0_161 = arith.constant 0 : index
    %105 = vector.load %arg20[%c0_158, %c2_159, %c0_160, %c0_161] : memref<2x10x10x8xf32, #tpu.memory_space<vmem>>, vector<2x8x8x8xf32>
    %106 = vector.shape_cast %105 : vector<2x8x8x8xf32> to vector<128x8xf32>
    %c2_162 = arith.constant 2 : index
    %c0_163 = arith.constant 0 : index
    %c0_164 = arith.constant 0 : index
    %c0_165 = arith.constant 0 : index
    %107 = vector.load %arg6[%c2_162, %c0_163, %c0_164, %c0_165] : memref<3x3x8x8xf32, #tpu.memory_space<vmem>>, vector<1x1x8x8xf32>
    %108 = vector.shape_cast %107 : vector<1x1x8x8xf32> to vector<8x8xf32>
    %cst_166 = arith.constant dense<0.000000e+00> : vector<128x8xf32>
    %109 = tpu.matmul %106, %108, %cst_166 {dimension_numbers = #tpu.dot_dimension_numbers<[1], [0], [0], [1], [0, 0, 1, 1], [], []>} : vector<128x8xf32>, vector<8x8xf32>, vector<128x8xf32> -> vector<128x8xf32>
    %110 = arith.addf %104, %109 : vector<128x8xf32>
    %c0_167 = arith.constant 0 : index
    %c2_168 = arith.constant 2 : index
    %c1_169 = arith.constant 1 : index
    %c0_170 = arith.constant 0 : index
    %111 = vector.load %arg20[%c0_167, %c2_168, %c1_169, %c0_170] : memref<2x10x10x8xf32, #tpu.memory_space<vmem>>, vector<2x8x8x8xf32>
    %112 = vector.shape_cast %111 : vector<2x8x8x8xf32> to vector<128x8xf32>
    %c2_171 = arith.constant 2 : index
    %c1_172 = arith.constant 1 : index
    %c0_173 = arith.constant 0 : index
    %c0_174 = arith.constant 0 : index
    %113 = vector.load %arg6[%c2_171, %c1_172, %c0_173, %c0_174] : memref<3x3x8x8xf32, #tpu.memory_space<vmem>>, vector<1x1x8x8xf32>
    %114 = vector.shape_cast %113 : vector<1x1x8x8xf32> to vector<8x8xf32>
    %cst_175 = arith.constant dense<0.000000e+00> : vector<128x8xf32>
    %115 = tpu.matmul %112, %114, %cst_175 {dimension_numbers = #tpu.dot_dimension_numbers<[1], [0], [0], [1], [0, 0, 1, 1], [], []>} : vector<128x8xf32>, vector<8x8xf32>, vector<128x8xf32> -> vector<128x8xf32>
    %116 = arith.addf %110, %115 : vector<128x8xf32>
    %c0_176 = arith.constant 0 : index
    %c2_177 = arith.constant 2 : index
    %c2_178 = arith.constant 2 : index
    %c0_179 = arith.constant 0 : index
    %117 = vector.load %arg20[%c0_176, %c2_177, %c2_178, %c0_179] : memref<2x10x10x8xf32, #tpu.memory_space<vmem>>, vector<2x8x8x8xf32>
    %118 = vector.shape_cast %117 : vector<2x8x8x8xf32> to vector<128x8xf32>
    %c2_180 = arith.constant 2 : index
    %c2_181 = arith.constant 2 : index
    %c0_182 = arith.constant 0 : index
    %c0_183 = arith.constant 0 : index
    %119 = vector.load %arg6[%c2_180, %c2_181, %c0_182, %c0_183] : memref<3x3x8x8xf32, #tpu.memory_space<vmem>>, vector<1x1x8x8xf32>
    %120 = vector.shape_cast %119 : vector<1x1x8x8xf32> to vector<8x8xf32>
    %cst_184 = arith.constant dense<0.000000e+00> : vector<128x8xf32>
    %121 = tpu.matmul %118, %120, %cst_184 {dimension_numbers = #tpu.dot_dimension_numbers<[1], [0], [0], [1], [0, 0, 1, 1], [], []>} : vector<128x8xf32>, vector<8x8xf32>, vector<128x8xf32> -> vector<128x8xf32>
    %122 = arith.addf %116, %121 : vector<128x8xf32>
    %c0_185 = arith.constant 0 : index
    %c0_186 = arith.constant 0 : index
    %123 = vector.load %arg7[%c0_185, %c0_186] : memref<1x8xf32, #tpu.memory_space<vmem>>, vector<1x8xf32>
    %124 = vector.broadcast %123 : vector<1x8xf32> to vector<128x8xf32>
    %125 = arith.mulf %122, %124 : vector<128x8xf32>
    %c0_187 = arith.constant 0 : index
    %c0_188 = arith.constant 0 : index
    %126 = vector.load %arg8[%c0_187, %c0_188] : memref<1x8xf32, #tpu.memory_space<vmem>>, vector<1x8xf32>
    %127 = vector.broadcast %126 : vector<1x8xf32> to vector<128x8xf32>
    %128 = arith.addf %125, %127 : vector<128x8xf32>
    %cst_189 = arith.constant 0.000000e+00 : f32
    %129 = vector.broadcast %cst_189 : f32 to vector<128x8xf32>
    %130 = arith.maximumf %128, %129 : vector<128x8xf32>
    %131 = vector.shape_cast %130 : vector<128x8xf32> to vector<2x8x8x8xf32>
    %cst_190 = arith.constant 0.000000e+00 : f32
    %132 = vector.broadcast %cst_190 : f32 to vector<2x10x10x8xf32>
    %c0_191 = arith.constant 0 : index
    %c0_192 = arith.constant 0 : index
    %c0_193 = arith.constant 0 : index
    %c0_194 = arith.constant 0 : index
    %133 = vector.load %arg20[%c0_191, %c0_192, %c0_193, %c0_194] : memref<2x10x10x8xf32, #tpu.memory_space<vmem>>, vector<2x10x10x8xf32>
    tpu.vector_store %arg20[%c0_191, %c0_192, %c0_193, %c0_194], %132 {strides = array<i32>} : memref<2x10x10x8xf32, #tpu.memory_space<vmem>>, vector<2x10x10x8xf32>,
    %c0_195 = arith.constant 0 : index
    %c1_196 = arith.constant 1 : index
    %c1_197 = arith.constant 1 : index
    %c0_198 = arith.constant 0 : index
    %134 = vector.load %arg20[%c0_195, %c1_196, %c1_197, %c0_198] : memref<2x10x10x8xf32, #tpu.memory_space<vmem>>, vector<2x8x8x8xf32>
    tpu.vector_store %arg20[%c0_195, %c1_196, %c1_197, %c0_198], %131 {strides = array<i32>} : memref<2x10x10x8xf32, #tpu.memory_space<vmem>>, vector<2x8x8x8xf32>,
    %cst_199 = arith.constant 0.000000e+00 : f32
    %135 = vector.broadcast %cst_199 : f32 to vector<128x8xf32>
    %c0_200 = arith.constant 0 : index
    %c0_201 = arith.constant 0 : index
    %c0_202 = arith.constant 0 : index
    %c0_203 = arith.constant 0 : index
    %136 = vector.load %arg20[%c0_200, %c0_201, %c0_202, %c0_203] : memref<2x10x10x8xf32, #tpu.memory_space<vmem>>, vector<2x8x8x8xf32>
    %137 = vector.shape_cast %136 : vector<2x8x8x8xf32> to vector<128x8xf32>
    %c0_204 = arith.constant 0 : index
    %c0_205 = arith.constant 0 : index
    %c0_206 = arith.constant 0 : index
    %c0_207 = arith.constant 0 : index
    %138 = vector.load %arg9[%c0_204, %c0_205, %c0_206, %c0_207] : memref<3x3x8x8xf32, #tpu.memory_space<vmem>>, vector<1x1x8x8xf32>
    %139 = vector.shape_cast %138 : vector<1x1x8x8xf32> to vector<8x8xf32>
    %cst_208 = arith.constant dense<0.000000e+00> : vector<128x8xf32>
    %140 = tpu.matmul %137, %139, %cst_208 {dimension_numbers = #tpu.dot_dimension_numbers<[1], [0], [0], [1], [0, 0, 1, 1], [], []>} : vector<128x8xf32>, vector<8x8xf32>, vector<128x8xf32> -> vector<128x8xf32>
    %141 = arith.addf %135, %140 : vector<128x8xf32>
    %c0_209 = arith.constant 0 : index
    %c0_210 = arith.constant 0 : index
    %c1_211 = arith.constant 1 : index
    %c0_212 = arith.constant 0 : index
    %142 = vector.load %arg20[%c0_209, %c0_210, %c1_211, %c0_212] : memref<2x10x10x8xf32, #tpu.memory_space<vmem>>, vector<2x8x8x8xf32>
    %143 = vector.shape_cast %142 : vector<2x8x8x8xf32> to vector<128x8xf32>
    %c0_213 = arith.constant 0 : index
    %c1_214 = arith.constant 1 : index
    %c0_215 = arith.constant 0 : index
    %c0_216 = arith.constant 0 : index
    %144 = vector.load %arg9[%c0_213, %c1_214, %c0_215, %c0_216] : memref<3x3x8x8xf32, #tpu.memory_space<vmem>>, vector<1x1x8x8xf32>
    %145 = vector.shape_cast %144 : vector<1x1x8x8xf32> to vector<8x8xf32>
    %cst_217 = arith.constant dense<0.000000e+00> : vector<128x8xf32>
    %146 = tpu.matmul %143, %145, %cst_217 {dimension_numbers = #tpu.dot_dimension_numbers<[1], [0], [0], [1], [0, 0, 1, 1], [], []>} : vector<128x8xf32>, vector<8x8xf32>, vector<128x8xf32> -> vector<128x8xf32>
    %147 = arith.addf %141, %146 : vector<128x8xf32>
    %c0_218 = arith.constant 0 : index
    %c0_219 = arith.constant 0 : index
    %c2_220 = arith.constant 2 : index
    %c0_221 = arith.constant 0 : index
    %148 = vector.load %arg20[%c0_218, %c0_219, %c2_220, %c0_221] : memref<2x10x10x8xf32, #tpu.memory_space<vmem>>, vector<2x8x8x8xf32>
    %149 = vector.shape_cast %148 : vector<2x8x8x8xf32> to vector<128x8xf32>
    %c0_222 = arith.constant 0 : index
    %c2_223 = arith.constant 2 : index
    %c0_224 = arith.constant 0 : index
    %c0_225 = arith.constant 0 : index
    %150 = vector.load %arg9[%c0_222, %c2_223, %c0_224, %c0_225] : memref<3x3x8x8xf32, #tpu.memory_space<vmem>>, vector<1x1x8x8xf32>
    %151 = vector.shape_cast %150 : vector<1x1x8x8xf32> to vector<8x8xf32>
    %cst_226 = arith.constant dense<0.000000e+00> : vector<128x8xf32>
    %152 = tpu.matmul %149, %151, %cst_226 {dimension_numbers = #tpu.dot_dimension_numbers<[1], [0], [0], [1], [0, 0, 1, 1], [], []>} : vector<128x8xf32>, vector<8x8xf32>, vector<128x8xf32> -> vector<128x8xf32>
    %153 = arith.addf %147, %152 : vector<128x8xf32>
    %c0_227 = arith.constant 0 : index
    %c1_228 = arith.constant 1 : index
    %c0_229 = arith.constant 0 : index
    %c0_230 = arith.constant 0 : index
    %154 = vector.load %arg20[%c0_227, %c1_228, %c0_229, %c0_230] : memref<2x10x10x8xf32, #tpu.memory_space<vmem>>, vector<2x8x8x8xf32>
    %155 = vector.shape_cast %154 : vector<2x8x8x8xf32> to vector<128x8xf32>
    %c1_231 = arith.constant 1 : index
    %c0_232 = arith.constant 0 : index
    %c0_233 = arith.constant 0 : index
    %c0_234 = arith.constant 0 : index
    %156 = vector.load %arg9[%c1_231, %c0_232, %c0_233, %c0_234] : memref<3x3x8x8xf32, #tpu.memory_space<vmem>>, vector<1x1x8x8xf32>
    %157 = vector.shape_cast %156 : vector<1x1x8x8xf32> to vector<8x8xf32>
    %cst_235 = arith.constant dense<0.000000e+00> : vector<128x8xf32>
    %158 = tpu.matmul %155, %157, %cst_235 {dimension_numbers = #tpu.dot_dimension_numbers<[1], [0], [0], [1], [0, 0, 1, 1], [], []>} : vector<128x8xf32>, vector<8x8xf32>, vector<128x8xf32> -> vector<128x8xf32>
    %159 = arith.addf %153, %158 : vector<128x8xf32>
    %c0_236 = arith.constant 0 : index
    %c1_237 = arith.constant 1 : index
    %c1_238 = arith.constant 1 : index
    %c0_239 = arith.constant 0 : index
    %160 = vector.load %arg20[%c0_236, %c1_237, %c1_238, %c0_239] : memref<2x10x10x8xf32, #tpu.memory_space<vmem>>, vector<2x8x8x8xf32>
    %161 = vector.shape_cast %160 : vector<2x8x8x8xf32> to vector<128x8xf32>
    %c1_240 = arith.constant 1 : index
    %c1_241 = arith.constant 1 : index
    %c0_242 = arith.constant 0 : index
    %c0_243 = arith.constant 0 : index
    %162 = vector.load %arg9[%c1_240, %c1_241, %c0_242, %c0_243] : memref<3x3x8x8xf32, #tpu.memory_space<vmem>>, vector<1x1x8x8xf32>
    %163 = vector.shape_cast %162 : vector<1x1x8x8xf32> to vector<8x8xf32>
    %cst_244 = arith.constant dense<0.000000e+00> : vector<128x8xf32>
    %164 = tpu.matmul %161, %163, %cst_244 {dimension_numbers = #tpu.dot_dimension_numbers<[1], [0], [0], [1], [0, 0, 1, 1], [], []>} : vector<128x8xf32>, vector<8x8xf32>, vector<128x8xf32> -> vector<128x8xf32>
    %165 = arith.addf %159, %164 : vector<128x8xf32>
    %c0_245 = arith.constant 0 : index
    %c1_246 = arith.constant 1 : index
    %c2_247 = arith.constant 2 : index
    %c0_248 = arith.constant 0 : index
    %166 = vector.load %arg20[%c0_245, %c1_246, %c2_247, %c0_248] : memref<2x10x10x8xf32, #tpu.memory_space<vmem>>, vector<2x8x8x8xf32>
    %167 = vector.shape_cast %166 : vector<2x8x8x8xf32> to vector<128x8xf32>
    %c1_249 = arith.constant 1 : index
    %c2_250 = arith.constant 2 : index
    %c0_251 = arith.constant 0 : index
    %c0_252 = arith.constant 0 : index
    %168 = vector.load %arg9[%c1_249, %c2_250, %c0_251, %c0_252] : memref<3x3x8x8xf32, #tpu.memory_space<vmem>>, vector<1x1x8x8xf32>
    %169 = vector.shape_cast %168 : vector<1x1x8x8xf32> to vector<8x8xf32>
    %cst_253 = arith.constant dense<0.000000e+00> : vector<128x8xf32>
    %170 = tpu.matmul %167, %169, %cst_253 {dimension_numbers = #tpu.dot_dimension_numbers<[1], [0], [0], [1], [0, 0, 1, 1], [], []>} : vector<128x8xf32>, vector<8x8xf32>, vector<128x8xf32> -> vector<128x8xf32>
    %171 = arith.addf %165, %170 : vector<128x8xf32>
    %c0_254 = arith.constant 0 : index
    %c2_255 = arith.constant 2 : index
    %c0_256 = arith.constant 0 : index
    %c0_257 = arith.constant 0 : index
    %172 = vector.load %arg20[%c0_254, %c2_255, %c0_256, %c0_257] : memref<2x10x10x8xf32, #tpu.memory_space<vmem>>, vector<2x8x8x8xf32>
    %173 = vector.shape_cast %172 : vector<2x8x8x8xf32> to vector<128x8xf32>
    %c2_258 = arith.constant 2 : index
    %c0_259 = arith.constant 0 : index
    %c0_260 = arith.constant 0 : index
    %c0_261 = arith.constant 0 : index
    %174 = vector.load %arg9[%c2_258, %c0_259, %c0_260, %c0_261] : memref<3x3x8x8xf32, #tpu.memory_space<vmem>>, vector<1x1x8x8xf32>
    %175 = vector.shape_cast %174 : vector<1x1x8x8xf32> to vector<8x8xf32>
    %cst_262 = arith.constant dense<0.000000e+00> : vector<128x8xf32>
    %176 = tpu.matmul %173, %175, %cst_262 {dimension_numbers = #tpu.dot_dimension_numbers<[1], [0], [0], [1], [0, 0, 1, 1], [], []>} : vector<128x8xf32>, vector<8x8xf32>, vector<128x8xf32> -> vector<128x8xf32>
    %177 = arith.addf %171, %176 : vector<128x8xf32>
    %c0_263 = arith.constant 0 : index
    %c2_264 = arith.constant 2 : index
    %c1_265 = arith.constant 1 : index
    %c0_266 = arith.constant 0 : index
    %178 = vector.load %arg20[%c0_263, %c2_264, %c1_265, %c0_266] : memref<2x10x10x8xf32, #tpu.memory_space<vmem>>, vector<2x8x8x8xf32>
    %179 = vector.shape_cast %178 : vector<2x8x8x8xf32> to vector<128x8xf32>
    %c2_267 = arith.constant 2 : index
    %c1_268 = arith.constant 1 : index
    %c0_269 = arith.constant 0 : index
    %c0_270 = arith.constant 0 : index
    %180 = vector.load %arg9[%c2_267, %c1_268, %c0_269, %c0_270] : memref<3x3x8x8xf32, #tpu.memory_space<vmem>>, vector<1x1x8x8xf32>
    %181 = vector.shape_cast %180 : vector<1x1x8x8xf32> to vector<8x8xf32>
    %cst_271 = arith.constant dense<0.000000e+00> : vector<128x8xf32>
    %182 = tpu.matmul %179, %181, %cst_271 {dimension_numbers = #tpu.dot_dimension_numbers<[1], [0], [0], [1], [0, 0, 1, 1], [], []>} : vector<128x8xf32>, vector<8x8xf32>, vector<128x8xf32> -> vector<128x8xf32>
    %183 = arith.addf %177, %182 : vector<128x8xf32>
    %c0_272 = arith.constant 0 : index
    %c2_273 = arith.constant 2 : index
    %c2_274 = arith.constant 2 : index
    %c0_275 = arith.constant 0 : index
    %184 = vector.load %arg20[%c0_272, %c2_273, %c2_274, %c0_275] : memref<2x10x10x8xf32, #tpu.memory_space<vmem>>, vector<2x8x8x8xf32>
    %185 = vector.shape_cast %184 : vector<2x8x8x8xf32> to vector<128x8xf32>
    %c2_276 = arith.constant 2 : index
    %c2_277 = arith.constant 2 : index
    %c0_278 = arith.constant 0 : index
    %c0_279 = arith.constant 0 : index
    %186 = vector.load %arg9[%c2_276, %c2_277, %c0_278, %c0_279] : memref<3x3x8x8xf32, #tpu.memory_space<vmem>>, vector<1x1x8x8xf32>
    %187 = vector.shape_cast %186 : vector<1x1x8x8xf32> to vector<8x8xf32>
    %cst_280 = arith.constant dense<0.000000e+00> : vector<128x8xf32>
    %188 = tpu.matmul %185, %187, %cst_280 {dimension_numbers = #tpu.dot_dimension_numbers<[1], [0], [0], [1], [0, 0, 1, 1], [], []>} : vector<128x8xf32>, vector<8x8xf32>, vector<128x8xf32> -> vector<128x8xf32>
    %189 = arith.addf %183, %188 : vector<128x8xf32>
    %c0_281 = arith.constant 0 : index
    %c0_282 = arith.constant 0 : index
    %190 = vector.load %arg10[%c0_281, %c0_282] : memref<1x8xf32, #tpu.memory_space<vmem>>, vector<1x8xf32>
    %191 = vector.broadcast %190 : vector<1x8xf32> to vector<128x8xf32>
    %192 = arith.addf %189, %191 : vector<128x8xf32>
    %193 = arith.addf %61, %192 : vector<128x8xf32>
    %cst_283 = arith.constant 0.000000e+00 : f32
    %194 = vector.broadcast %cst_283 : f32 to vector<128x8xf32>
    %195 = arith.maximumf %193, %194 : vector<128x8xf32>
    %c0_284 = arith.constant 0 : index
    %c0_285 = arith.constant 0 : index
    %c0_286 = arith.constant 0 : index
    %c0_287 = arith.constant 0 : index
    %196 = vector.load %arg2[%c0_284, %c0_285, %c0_286, %c0_287] : memref<2x8x8x8xf32, #tpu.memory_space<vmem>>, vector<2x8x8x8xf32>
    %197 = vector.shape_cast %196 : vector<2x8x8x8xf32> to vector<128x8xf32>
    %198 = arith.addf %195, %197 : vector<128x8xf32>
    %c0_288 = arith.constant 0 : index
    %c0_289 = arith.constant 0 : index
    %199 = vector.load %arg3[%c0_288, %c0_289] : memref<256x64xf32, #tpu.memory_space<vmem>>, vector<256x64xf32>
    %200 = vector.shape_cast %198 : vector<128x8xf32> to vector<2x8x8x8xf32>
    %cst_290 = arith.constant 0.000000e+00 : f32
    %201 = vector.broadcast %cst_290 : f32 to vector<2x10x10x8xf32>
    %c0_291 = arith.constant 0 : index
    %c0_292 = arith.constant 0 : index
    %c0_293 = arith.constant 0 : index
    %c0_294 = arith.constant 0 : index
    %202 = vector.load %arg20[%c0_291, %c0_292, %c0_293, %c0_294] : memref<2x10x10x8xf32, #tpu.memory_space<vmem>>, vector<2x10x10x8xf32>
    tpu.vector_store %arg20[%c0_291, %c0_292, %c0_293, %c0_294], %201 {strides = array<i32>} : memref<2x10x10x8xf32, #tpu.memory_space<vmem>>, vector<2x10x10x8xf32>,
    %c0_295 = arith.constant 0 : index
    %c1_296 = arith.constant 1 : index
    %c1_297 = arith.constant 1 : index
    %c0_298 = arith.constant 0 : index
    %203 = vector.load %arg20[%c0_295, %c1_296, %c1_297, %c0_298] : memref<2x10x10x8xf32, #tpu.memory_space<vmem>>, vector<2x8x8x8xf32>
    tpu.vector_store %arg20[%c0_295, %c1_296, %c1_297, %c0_298], %200 {strides = array<i32>} : memref<2x10x10x8xf32, #tpu.memory_space<vmem>>, vector<2x8x8x8xf32>,
    %cst_299 = arith.constant 0.000000e+00 : f32
    %204 = vector.broadcast %cst_299 : f32 to vector<128x8xf32>
    %c0_300 = arith.constant 0 : index
    %c0_301 = arith.constant 0 : index
    %c0_302 = arith.constant 0 : index
    %c0_303 = arith.constant 0 : index
    %205 = vector.load %arg20[%c0_300, %c0_301, %c0_302, %c0_303] : memref<2x10x10x8xf32, #tpu.memory_space<vmem>>, vector<2x8x8x8xf32>
    %206 = vector.shape_cast %205 : vector<2x8x8x8xf32> to vector<128x8xf32>
    %c0_304 = arith.constant 0 : index
    %c0_305 = arith.constant 0 : index
    %c0_306 = arith.constant 0 : index
    %c0_307 = arith.constant 0 : index
    %207 = vector.load %arg11[%c0_304, %c0_305, %c0_306, %c0_307] : memref<3x3x8x8xf32, #tpu.memory_space<vmem>>, vector<1x1x8x8xf32>
    %208 = vector.shape_cast %207 : vector<1x1x8x8xf32> to vector<8x8xf32>
    %cst_308 = arith.constant dense<0.000000e+00> : vector<128x8xf32>
    %209 = tpu.matmul %206, %208, %cst_308 {dimension_numbers = #tpu.dot_dimension_numbers<[1], [0], [0], [1], [0, 0, 1, 1], [], []>} : vector<128x8xf32>, vector<8x8xf32>, vector<128x8xf32> -> vector<128x8xf32>
    %210 = arith.addf %204, %209 : vector<128x8xf32>
    %c0_309 = arith.constant 0 : index
    %c0_310 = arith.constant 0 : index
    %c1_311 = arith.constant 1 : index
    %c0_312 = arith.constant 0 : index
    %211 = vector.load %arg20[%c0_309, %c0_310, %c1_311, %c0_312] : memref<2x10x10x8xf32, #tpu.memory_space<vmem>>, vector<2x8x8x8xf32>
    %212 = vector.shape_cast %211 : vector<2x8x8x8xf32> to vector<128x8xf32>
    %c0_313 = arith.constant 0 : index
    %c1_314 = arith.constant 1 : index
    %c0_315 = arith.constant 0 : index
    %c0_316 = arith.constant 0 : index
    %213 = vector.load %arg11[%c0_313, %c1_314, %c0_315, %c0_316] : memref<3x3x8x8xf32, #tpu.memory_space<vmem>>, vector<1x1x8x8xf32>
    %214 = vector.shape_cast %213 : vector<1x1x8x8xf32> to vector<8x8xf32>
    %cst_317 = arith.constant dense<0.000000e+00> : vector<128x8xf32>
    %215 = tpu.matmul %212, %214, %cst_317 {dimension_numbers = #tpu.dot_dimension_numbers<[1], [0], [0], [1], [0, 0, 1, 1], [], []>} : vector<128x8xf32>, vector<8x8xf32>, vector<128x8xf32> -> vector<128x8xf32>
    %216 = arith.addf %210, %215 : vector<128x8xf32>
    %c0_318 = arith.constant 0 : index
    %c0_319 = arith.constant 0 : index
    %c2_320 = arith.constant 2 : index
    %c0_321 = arith.constant 0 : index
    %217 = vector.load %arg20[%c0_318, %c0_319, %c2_320, %c0_321] : memref<2x10x10x8xf32, #tpu.memory_space<vmem>>, vector<2x8x8x8xf32>
    %218 = vector.shape_cast %217 : vector<2x8x8x8xf32> to vector<128x8xf32>
    %c0_322 = arith.constant 0 : index
    %c2_323 = arith.constant 2 : index
    %c0_324 = arith.constant 0 : index
    %c0_325 = arith.constant 0 : index
    %219 = vector.load %arg11[%c0_322, %c2_323, %c0_324, %c0_325] : memref<3x3x8x8xf32, #tpu.memory_space<vmem>>, vector<1x1x8x8xf32>
    %220 = vector.shape_cast %219 : vector<1x1x8x8xf32> to vector<8x8xf32>
    %cst_326 = arith.constant dense<0.000000e+00> : vector<128x8xf32>
    %221 = tpu.matmul %218, %220, %cst_326 {dimension_numbers = #tpu.dot_dimension_numbers<[1], [0], [0], [1], [0, 0, 1, 1], [], []>} : vector<128x8xf32>, vector<8x8xf32>, vector<128x8xf32> -> vector<128x8xf32>
    %222 = arith.addf %216, %221 : vector<128x8xf32>
    %c0_327 = arith.constant 0 : index
    %c1_328 = arith.constant 1 : index
    %c0_329 = arith.constant 0 : index
    %c0_330 = arith.constant 0 : index
    %223 = vector.load %arg20[%c0_327, %c1_328, %c0_329, %c0_330] : memref<2x10x10x8xf32, #tpu.memory_space<vmem>>, vector<2x8x8x8xf32>
    %224 = vector.shape_cast %223 : vector<2x8x8x8xf32> to vector<128x8xf32>
    %c1_331 = arith.constant 1 : index
    %c0_332 = arith.constant 0 : index
    %c0_333 = arith.constant 0 : index
    %c0_334 = arith.constant 0 : index
    %225 = vector.load %arg11[%c1_331, %c0_332, %c0_333, %c0_334] : memref<3x3x8x8xf32, #tpu.memory_space<vmem>>, vector<1x1x8x8xf32>
    %226 = vector.shape_cast %225 : vector<1x1x8x8xf32> to vector<8x8xf32>
    %cst_335 = arith.constant dense<0.000000e+00> : vector<128x8xf32>
    %227 = tpu.matmul %224, %226, %cst_335 {dimension_numbers = #tpu.dot_dimension_numbers<[1], [0], [0], [1], [0, 0, 1, 1], [], []>} : vector<128x8xf32>, vector<8x8xf32>, vector<128x8xf32> -> vector<128x8xf32>
    %228 = arith.addf %222, %227 : vector<128x8xf32>
    %c0_336 = arith.constant 0 : index
    %c1_337 = arith.constant 1 : index
    %c1_338 = arith.constant 1 : index
    %c0_339 = arith.constant 0 : index
    %229 = vector.load %arg20[%c0_336, %c1_337, %c1_338, %c0_339] : memref<2x10x10x8xf32, #tpu.memory_space<vmem>>, vector<2x8x8x8xf32>
    %230 = vector.shape_cast %229 : vector<2x8x8x8xf32> to vector<128x8xf32>
    %c1_340 = arith.constant 1 : index
    %c1_341 = arith.constant 1 : index
    %c0_342 = arith.constant 0 : index
    %c0_343 = arith.constant 0 : index
    %231 = vector.load %arg11[%c1_340, %c1_341, %c0_342, %c0_343] : memref<3x3x8x8xf32, #tpu.memory_space<vmem>>, vector<1x1x8x8xf32>
    %232 = vector.shape_cast %231 : vector<1x1x8x8xf32> to vector<8x8xf32>
    %cst_344 = arith.constant dense<0.000000e+00> : vector<128x8xf32>
    %233 = tpu.matmul %230, %232, %cst_344 {dimension_numbers = #tpu.dot_dimension_numbers<[1], [0], [0], [1], [0, 0, 1, 1], [], []>} : vector<128x8xf32>, vector<8x8xf32>, vector<128x8xf32> -> vector<128x8xf32>
    %234 = arith.addf %228, %233 : vector<128x8xf32>
    %c0_345 = arith.constant 0 : index
    %c1_346 = arith.constant 1 : index
    %c2_347 = arith.constant 2 : index
    %c0_348 = arith.constant 0 : index
    %235 = vector.load %arg20[%c0_345, %c1_346, %c2_347, %c0_348] : memref<2x10x10x8xf32, #tpu.memory_space<vmem>>, vector<2x8x8x8xf32>
    %236 = vector.shape_cast %235 : vector<2x8x8x8xf32> to vector<128x8xf32>
    %c1_349 = arith.constant 1 : index
    %c2_350 = arith.constant 2 : index
    %c0_351 = arith.constant 0 : index
    %c0_352 = arith.constant 0 : index
    %237 = vector.load %arg11[%c1_349, %c2_350, %c0_351, %c0_352] : memref<3x3x8x8xf32, #tpu.memory_space<vmem>>, vector<1x1x8x8xf32>
    %238 = vector.shape_cast %237 : vector<1x1x8x8xf32> to vector<8x8xf32>
    %cst_353 = arith.constant dense<0.000000e+00> : vector<128x8xf32>
    %239 = tpu.matmul %236, %238, %cst_353 {dimension_numbers = #tpu.dot_dimension_numbers<[1], [0], [0], [1], [0, 0, 1, 1], [], []>} : vector<128x8xf32>, vector<8x8xf32>, vector<128x8xf32> -> vector<128x8xf32>
    %240 = arith.addf %234, %239 : vector<128x8xf32>
    %c0_354 = arith.constant 0 : index
    %c2_355 = arith.constant 2 : index
    %c0_356 = arith.constant 0 : index
    %c0_357 = arith.constant 0 : index
    %241 = vector.load %arg20[%c0_354, %c2_355, %c0_356, %c0_357] : memref<2x10x10x8xf32, #tpu.memory_space<vmem>>, vector<2x8x8x8xf32>
    %242 = vector.shape_cast %241 : vector<2x8x8x8xf32> to vector<128x8xf32>
    %c2_358 = arith.constant 2 : index
    %c0_359 = arith.constant 0 : index
    %c0_360 = arith.constant 0 : index
    %c0_361 = arith.constant 0 : index
    %243 = vector.load %arg11[%c2_358, %c0_359, %c0_360, %c0_361] : memref<3x3x8x8xf32, #tpu.memory_space<vmem>>, vector<1x1x8x8xf32>
    %244 = vector.shape_cast %243 : vector<1x1x8x8xf32> to vector<8x8xf32>
    %cst_362 = arith.constant dense<0.000000e+00> : vector<128x8xf32>
    %245 = tpu.matmul %242, %244, %cst_362 {dimension_numbers = #tpu.dot_dimension_numbers<[1], [0], [0], [1], [0, 0, 1, 1], [], []>} : vector<128x8xf32>, vector<8x8xf32>, vector<128x8xf32> -> vector<128x8xf32>
    %246 = arith.addf %240, %245 : vector<128x8xf32>
    %c0_363 = arith.constant 0 : index
    %c2_364 = arith.constant 2 : index
    %c1_365 = arith.constant 1 : index
    %c0_366 = arith.constant 0 : index
    %247 = vector.load %arg20[%c0_363, %c2_364, %c1_365, %c0_366] : memref<2x10x10x8xf32, #tpu.memory_space<vmem>>, vector<2x8x8x8xf32>
    %248 = vector.shape_cast %247 : vector<2x8x8x8xf32> to vector<128x8xf32>
    %c2_367 = arith.constant 2 : index
    %c1_368 = arith.constant 1 : index
    %c0_369 = arith.constant 0 : index
    %c0_370 = arith.constant 0 : index
    %249 = vector.load %arg11[%c2_367, %c1_368, %c0_369, %c0_370] : memref<3x3x8x8xf32, #tpu.memory_space<vmem>>, vector<1x1x8x8xf32>
    %250 = vector.shape_cast %249 : vector<1x1x8x8xf32> to vector<8x8xf32>
    %cst_371 = arith.constant dense<0.000000e+00> : vector<128x8xf32>
    %251 = tpu.matmul %248, %250, %cst_371 {dimension_numbers = #tpu.dot_dimension_numbers<[1], [0], [0], [1], [0, 0, 1, 1], [], []>} : vector<128x8xf32>, vector<8x8xf32>, vector<128x8xf32> -> vector<128x8xf32>
    %252 = arith.addf %246, %251 : vector<128x8xf32>
    %c0_372 = arith.constant 0 : index
    %c2_373 = arith.constant 2 : index
    %c2_374 = arith.constant 2 : index
    %c0_375 = arith.constant 0 : index
    %253 = vector.load %arg20[%c0_372, %c2_373, %c2_374, %c0_375] : memref<2x10x10x8xf32, #tpu.memory_space<vmem>>, vector<2x8x8x8xf32>
    %254 = vector.shape_cast %253 : vector<2x8x8x8xf32> to vector<128x8xf32>
    %c2_376 = arith.constant 2 : index
    %c2_377 = arith.constant 2 : index
    %c0_378 = arith.constant 0 : index
    %c0_379 = arith.constant 0 : index
    %255 = vector.load %arg11[%c2_376, %c2_377, %c0_378, %c0_379] : memref<3x3x8x8xf32, #tpu.memory_space<vmem>>, vector<1x1x8x8xf32>
    %256 = vector.shape_cast %255 : vector<1x1x8x8xf32> to vector<8x8xf32>
    %cst_380 = arith.constant dense<0.000000e+00> : vector<128x8xf32>
    %257 = tpu.matmul %254, %256, %cst_380 {dimension_numbers = #tpu.dot_dimension_numbers<[1], [0], [0], [1], [0, 0, 1, 1], [], []>} : vector<128x8xf32>, vector<8x8xf32>, vector<128x8xf32> -> vector<128x8xf32>
    %258 = arith.addf %252, %257 : vector<128x8xf32>
    %c0_381 = arith.constant 0 : index
    %c0_382 = arith.constant 0 : index
    %259 = vector.load %arg12[%c0_381, %c0_382] : memref<1x8xf32, #tpu.memory_space<vmem>>, vector<1x8xf32>
    %260 = vector.broadcast %259 : vector<1x8xf32> to vector<128x8xf32>
    %261 = arith.addf %258, %260 : vector<128x8xf32>
    %cst_383 = arith.constant 0.000000e+00 : f32
    %262 = vector.broadcast %cst_383 : f32 to vector<128x8xf32>
    %263 = arith.maximumf %261, %262 : vector<128x8xf32>
    %264 = vector.shape_cast %263 : vector<128x8xf32> to vector<2x8x8x8xf32>
    %cst_384 = arith.constant 0.000000e+00 : f32
    %265 = vector.broadcast %cst_384 : f32 to vector<2x10x10x8xf32>
    %c0_385 = arith.constant 0 : index
    %c0_386 = arith.constant 0 : index
    %c0_387 = arith.constant 0 : index
    %c0_388 = arith.constant 0 : index
    %266 = vector.load %arg21[%c0_385, %c0_386, %c0_387, %c0_388] : memref<2x10x10x8xf32, #tpu.memory_space<vmem>>, vector<2x10x10x8xf32>
    tpu.vector_store %arg21[%c0_385, %c0_386, %c0_387, %c0_388], %265 {strides = array<i32>} : memref<2x10x10x8xf32, #tpu.memory_space<vmem>>, vector<2x10x10x8xf32>,
    %c0_389 = arith.constant 0 : index
    %c1_390 = arith.constant 1 : index
    %c1_391 = arith.constant 1 : index
    %c0_392 = arith.constant 0 : index
    %267 = vector.load %arg21[%c0_389, %c1_390, %c1_391, %c0_392] : memref<2x10x10x8xf32, #tpu.memory_space<vmem>>, vector<2x8x8x8xf32>
    tpu.vector_store %arg21[%c0_389, %c1_390, %c1_391, %c0_392], %264 {strides = array<i32>} : memref<2x10x10x8xf32, #tpu.memory_space<vmem>>, vector<2x8x8x8xf32>,
    %cst_393 = arith.constant 0.000000e+00 : f32
    %268 = vector.broadcast %cst_393 : f32 to vector<128x8xf32>
    %c0_394 = arith.constant 0 : index
    %c0_395 = arith.constant 0 : index
    %c0_396 = arith.constant 0 : index
    %c0_397 = arith.constant 0 : index
    %269 = vector.load %arg21[%c0_394, %c0_395, %c0_396, %c0_397] : memref<2x10x10x8xf32, #tpu.memory_space<vmem>>, vector<2x8x8x8xf32>
    %270 = vector.shape_cast %269 : vector<2x8x8x8xf32> to vector<128x8xf32>
    %c0_398 = arith.constant 0 : index
    %c0_399 = arith.constant 0 : index
    %c0_400 = arith.constant 0 : index
    %c0_401 = arith.constant 0 : index
    %271 = vector.load %arg13[%c0_398, %c0_399, %c0_400, %c0_401] : memref<3x3x8x8xf32, #tpu.memory_space<vmem>>, vector<1x1x8x8xf32>
    %272 = vector.shape_cast %271 : vector<1x1x8x8xf32> to vector<8x8xf32>
    %cst_402 = arith.constant dense<0.000000e+00> : vector<128x8xf32>
    %273 = tpu.matmul %270, %272, %cst_402 {dimension_numbers = #tpu.dot_dimension_numbers<[1], [0], [0], [1], [0, 0, 1, 1], [], []>} : vector<128x8xf32>, vector<8x8xf32>, vector<128x8xf32> -> vector<128x8xf32>
    %274 = arith.addf %268, %273 : vector<128x8xf32>
    %c0_403 = arith.constant 0 : index
    %c0_404 = arith.constant 0 : index
    %c1_405 = arith.constant 1 : index
    %c0_406 = arith.constant 0 : index
    %275 = vector.load %arg21[%c0_403, %c0_404, %c1_405, %c0_406] : memref<2x10x10x8xf32, #tpu.memory_space<vmem>>, vector<2x8x8x8xf32>
    %276 = vector.shape_cast %275 : vector<2x8x8x8xf32> to vector<128x8xf32>
    %c0_407 = arith.constant 0 : index
    %c1_408 = arith.constant 1 : index
    %c0_409 = arith.constant 0 : index
    %c0_410 = arith.constant 0 : index
    %277 = vector.load %arg13[%c0_407, %c1_408, %c0_409, %c0_410] : memref<3x3x8x8xf32, #tpu.memory_space<vmem>>, vector<1x1x8x8xf32>
    %278 = vector.shape_cast %277 : vector<1x1x8x8xf32> to vector<8x8xf32>
    %cst_411 = arith.constant dense<0.000000e+00> : vector<128x8xf32>
    %279 = tpu.matmul %276, %278, %cst_411 {dimension_numbers = #tpu.dot_dimension_numbers<[1], [0], [0], [1], [0, 0, 1, 1], [], []>} : vector<128x8xf32>, vector<8x8xf32>, vector<128x8xf32> -> vector<128x8xf32>
    %280 = arith.addf %274, %279 : vector<128x8xf32>
    %c0_412 = arith.constant 0 : index
    %c0_413 = arith.constant 0 : index
    %c2_414 = arith.constant 2 : index
    %c0_415 = arith.constant 0 : index
    %281 = vector.load %arg21[%c0_412, %c0_413, %c2_414, %c0_415] : memref<2x10x10x8xf32, #tpu.memory_space<vmem>>, vector<2x8x8x8xf32>
    %282 = vector.shape_cast %281 : vector<2x8x8x8xf32> to vector<128x8xf32>
    %c0_416 = arith.constant 0 : index
    %c2_417 = arith.constant 2 : index
    %c0_418 = arith.constant 0 : index
    %c0_419 = arith.constant 0 : index
    %283 = vector.load %arg13[%c0_416, %c2_417, %c0_418, %c0_419] : memref<3x3x8x8xf32, #tpu.memory_space<vmem>>, vector<1x1x8x8xf32>
    %284 = vector.shape_cast %283 : vector<1x1x8x8xf32> to vector<8x8xf32>
    %cst_420 = arith.constant dense<0.000000e+00> : vector<128x8xf32>
    %285 = tpu.matmul %282, %284, %cst_420 {dimension_numbers = #tpu.dot_dimension_numbers<[1], [0], [0], [1], [0, 0, 1, 1], [], []>} : vector<128x8xf32>, vector<8x8xf32>, vector<128x8xf32> -> vector<128x8xf32>
    %286 = arith.addf %280, %285 : vector<128x8xf32>
    %c0_421 = arith.constant 0 : index
    %c1_422 = arith.constant 1 : index
    %c0_423 = arith.constant 0 : index
    %c0_424 = arith.constant 0 : index
    %287 = vector.load %arg21[%c0_421, %c1_422, %c0_423, %c0_424] : memref<2x10x10x8xf32, #tpu.memory_space<vmem>>, vector<2x8x8x8xf32>
    %288 = vector.shape_cast %287 : vector<2x8x8x8xf32> to vector<128x8xf32>
    %c1_425 = arith.constant 1 : index
    %c0_426 = arith.constant 0 : index
    %c0_427 = arith.constant 0 : index
    %c0_428 = arith.constant 0 : index
    %289 = vector.load %arg13[%c1_425, %c0_426, %c0_427, %c0_428] : memref<3x3x8x8xf32, #tpu.memory_space<vmem>>, vector<1x1x8x8xf32>
    %290 = vector.shape_cast %289 : vector<1x1x8x8xf32> to vector<8x8xf32>
    %cst_429 = arith.constant dense<0.000000e+00> : vector<128x8xf32>
    %291 = tpu.matmul %288, %290, %cst_429 {dimension_numbers = #tpu.dot_dimension_numbers<[1], [0], [0], [1], [0, 0, 1, 1], [], []>} : vector<128x8xf32>, vector<8x8xf32>, vector<128x8xf32> -> vector<128x8xf32>
    %292 = arith.addf %286, %291 : vector<128x8xf32>
    %c0_430 = arith.constant 0 : index
    %c1_431 = arith.constant 1 : index
    %c1_432 = arith.constant 1 : index
    %c0_433 = arith.constant 0 : index
    %293 = vector.load %arg21[%c0_430, %c1_431, %c1_432, %c0_433] : memref<2x10x10x8xf32, #tpu.memory_space<vmem>>, vector<2x8x8x8xf32>
    %294 = vector.shape_cast %293 : vector<2x8x8x8xf32> to vector<128x8xf32>
    %c1_434 = arith.constant 1 : index
    %c1_435 = arith.constant 1 : index
    %c0_436 = arith.constant 0 : index
    %c0_437 = arith.constant 0 : index
    %295 = vector.load %arg13[%c1_434, %c1_435, %c0_436, %c0_437] : memref<3x3x8x8xf32, #tpu.memory_space<vmem>>, vector<1x1x8x8xf32>
    %296 = vector.shape_cast %295 : vector<1x1x8x8xf32> to vector<8x8xf32>
    %cst_438 = arith.constant dense<0.000000e+00> : vector<128x8xf32>
    %297 = tpu.matmul %294, %296, %cst_438 {dimension_numbers = #tpu.dot_dimension_numbers<[1], [0], [0], [1], [0, 0, 1, 1], [], []>} : vector<128x8xf32>, vector<8x8xf32>, vector<128x8xf32> -> vector<128x8xf32>
    %298 = arith.addf %292, %297 : vector<128x8xf32>
    %c0_439 = arith.constant 0 : index
    %c1_440 = arith.constant 1 : index
    %c2_441 = arith.constant 2 : index
    %c0_442 = arith.constant 0 : index
    %299 = vector.load %arg21[%c0_439, %c1_440, %c2_441, %c0_442] : memref<2x10x10x8xf32, #tpu.memory_space<vmem>>, vector<2x8x8x8xf32>
    %300 = vector.shape_cast %299 : vector<2x8x8x8xf32> to vector<128x8xf32>
    %c1_443 = arith.constant 1 : index
    %c2_444 = arith.constant 2 : index
    %c0_445 = arith.constant 0 : index
    %c0_446 = arith.constant 0 : index
    %301 = vector.load %arg13[%c1_443, %c2_444, %c0_445, %c0_446] : memref<3x3x8x8xf32, #tpu.memory_space<vmem>>, vector<1x1x8x8xf32>
    %302 = vector.shape_cast %301 : vector<1x1x8x8xf32> to vector<8x8xf32>
    %cst_447 = arith.constant dense<0.000000e+00> : vector<128x8xf32>
    %303 = tpu.matmul %300, %302, %cst_447 {dimension_numbers = #tpu.dot_dimension_numbers<[1], [0], [0], [1], [0, 0, 1, 1], [], []>} : vector<128x8xf32>, vector<8x8xf32>, vector<128x8xf32> -> vector<128x8xf32>
    %304 = arith.addf %298, %303 : vector<128x8xf32>
    %c0_448 = arith.constant 0 : index
    %c2_449 = arith.constant 2 : index
    %c0_450 = arith.constant 0 : index
    %c0_451 = arith.constant 0 : index
    %305 = vector.load %arg21[%c0_448, %c2_449, %c0_450, %c0_451] : memref<2x10x10x8xf32, #tpu.memory_space<vmem>>, vector<2x8x8x8xf32>
    %306 = vector.shape_cast %305 : vector<2x8x8x8xf32> to vector<128x8xf32>
    %c2_452 = arith.constant 2 : index
    %c0_453 = arith.constant 0 : index
    %c0_454 = arith.constant 0 : index
    %c0_455 = arith.constant 0 : index
    %307 = vector.load %arg13[%c2_452, %c0_453, %c0_454, %c0_455] : memref<3x3x8x8xf32, #tpu.memory_space<vmem>>, vector<1x1x8x8xf32>
    %308 = vector.shape_cast %307 : vector<1x1x8x8xf32> to vector<8x8xf32>
    %cst_456 = arith.constant dense<0.000000e+00> : vector<128x8xf32>
    %309 = tpu.matmul %306, %308, %cst_456 {dimension_numbers = #tpu.dot_dimension_numbers<[1], [0], [0], [1], [0, 0, 1, 1], [], []>} : vector<128x8xf32>, vector<8x8xf32>, vector<128x8xf32> -> vector<128x8xf32>
    %310 = arith.addf %304, %309 : vector<128x8xf32>
    %c0_457 = arith.constant 0 : index
    %c2_458 = arith.constant 2 : index
    %c1_459 = arith.constant 1 : index
    %c0_460 = arith.constant 0 : index
    %311 = vector.load %arg21[%c0_457, %c2_458, %c1_459, %c0_460] : memref<2x10x10x8xf32, #tpu.memory_space<vmem>>, vector<2x8x8x8xf32>
    %312 = vector.shape_cast %311 : vector<2x8x8x8xf32> to vector<128x8xf32>
    %c2_461 = arith.constant 2 : index
    %c1_462 = arith.constant 1 : index
    %c0_463 = arith.constant 0 : index
    %c0_464 = arith.constant 0 : index
    %313 = vector.load %arg13[%c2_461, %c1_462, %c0_463, %c0_464] : memref<3x3x8x8xf32, #tpu.memory_space<vmem>>, vector<1x1x8x8xf32>
    %314 = vector.shape_cast %313 : vector<1x1x8x8xf32> to vector<8x8xf32>
    %cst_465 = arith.constant dense<0.000000e+00> : vector<128x8xf32>
    %315 = tpu.matmul %312, %314, %cst_465 {dimension_numbers = #tpu.dot_dimension_numbers<[1], [0], [0], [1], [0, 0, 1, 1], [], []>} : vector<128x8xf32>, vector<8x8xf32>, vector<128x8xf32> -> vector<128x8xf32>
    %316 = arith.addf %310, %315 : vector<128x8xf32>
    %c0_466 = arith.constant 0 : index
    %c2_467 = arith.constant 2 : index
    %c2_468 = arith.constant 2 : index
    %c0_469 = arith.constant 0 : index
    %317 = vector.load %arg21[%c0_466, %c2_467, %c2_468, %c0_469] : memref<2x10x10x8xf32, #tpu.memory_space<vmem>>, vector<2x8x8x8xf32>
    %318 = vector.shape_cast %317 : vector<2x8x8x8xf32> to vector<128x8xf32>
    %c2_470 = arith.constant 2 : index
    %c2_471 = arith.constant 2 : index
    %c0_472 = arith.constant 0 : index
    %c0_473 = arith.constant 0 : index
    %319 = vector.load %arg13[%c2_470, %c2_471, %c0_472, %c0_473] : memref<3x3x8x8xf32, #tpu.memory_space<vmem>>, vector<1x1x8x8xf32>
    %320 = vector.shape_cast %319 : vector<1x1x8x8xf32> to vector<8x8xf32>
    %cst_474 = arith.constant dense<0.000000e+00> : vector<128x8xf32>
    %321 = tpu.matmul %318, %320, %cst_474 {dimension_numbers = #tpu.dot_dimension_numbers<[1], [0], [0], [1], [0, 0, 1, 1], [], []>} : vector<128x8xf32>, vector<8x8xf32>, vector<128x8xf32> -> vector<128x8xf32>
    %322 = arith.addf %316, %321 : vector<128x8xf32>
    %c0_475 = arith.constant 0 : index
    %c0_476 = arith.constant 0 : index
    %323 = vector.load %arg14[%c0_475, %c0_476] : memref<1x8xf32, #tpu.memory_space<vmem>>, vector<1x8xf32>
    %324 = vector.broadcast %323 : vector<1x8xf32> to vector<128x8xf32>
    %325 = arith.mulf %322, %324 : vector<128x8xf32>
    %c0_477 = arith.constant 0 : index
    %c0_478 = arith.constant 0 : index
    %326 = vector.load %arg15[%c0_477, %c0_478] : memref<1x8xf32, #tpu.memory_space<vmem>>, vector<1x8xf32>
    %327 = vector.broadcast %326 : vector<1x8xf32> to vector<128x8xf32>
    %328 = arith.addf %325, %327 : vector<128x8xf32>
    %cst_479 = arith.constant 0.000000e+00 : f32
    %329 = vector.broadcast %cst_479 : f32 to vector<128x8xf32>
    %330 = arith.maximumf %328, %329 : vector<128x8xf32>
    %331 = vector.shape_cast %330 : vector<128x8xf32> to vector<2x8x8x8xf32>
    %cst_480 = arith.constant 0.000000e+00 : f32
    %332 = vector.broadcast %cst_480 : f32 to vector<2x10x10x8xf32>
    %c0_481 = arith.constant 0 : index
    %c0_482 = arith.constant 0 : index
    %c0_483 = arith.constant 0 : index
    %c0_484 = arith.constant 0 : index
    %333 = vector.load %arg21[%c0_481, %c0_482, %c0_483, %c0_484] : memref<2x10x10x8xf32, #tpu.memory_space<vmem>>, vector<2x10x10x8xf32>
    tpu.vector_store %arg21[%c0_481, %c0_482, %c0_483, %c0_484], %332 {strides = array<i32>} : memref<2x10x10x8xf32, #tpu.memory_space<vmem>>, vector<2x10x10x8xf32>,
    %c0_485 = arith.constant 0 : index
    %c1_486 = arith.constant 1 : index
    %c1_487 = arith.constant 1 : index
    %c0_488 = arith.constant 0 : index
    %334 = vector.load %arg21[%c0_485, %c1_486, %c1_487, %c0_488] : memref<2x10x10x8xf32, #tpu.memory_space<vmem>>, vector<2x8x8x8xf32>
    tpu.vector_store %arg21[%c0_485, %c1_486, %c1_487, %c0_488], %331 {strides = array<i32>} : memref<2x10x10x8xf32, #tpu.memory_space<vmem>>, vector<2x8x8x8xf32>,
    %cst_489 = arith.constant 0.000000e+00 : f32
    %335 = vector.broadcast %cst_489 : f32 to vector<128x8xf32>
    %c0_490 = arith.constant 0 : index
    %c0_491 = arith.constant 0 : index
    %c0_492 = arith.constant 0 : index
    %c0_493 = arith.constant 0 : index
    %336 = vector.load %arg21[%c0_490, %c0_491, %c0_492, %c0_493] : memref<2x10x10x8xf32, #tpu.memory_space<vmem>>, vector<2x8x8x8xf32>
    %337 = vector.shape_cast %336 : vector<2x8x8x8xf32> to vector<128x8xf32>
    %c0_494 = arith.constant 0 : index
    %c0_495 = arith.constant 0 : index
    %c0_496 = arith.constant 0 : index
    %c0_497 = arith.constant 0 : index
    %338 = vector.load %arg16[%c0_494, %c0_495, %c0_496, %c0_497] : memref<3x3x8x8xf32, #tpu.memory_space<vmem>>, vector<1x1x8x8xf32>
    %339 = vector.shape_cast %338 : vector<1x1x8x8xf32> to vector<8x8xf32>
    %cst_498 = arith.constant dense<0.000000e+00> : vector<128x8xf32>
    %340 = tpu.matmul %337, %339, %cst_498 {dimension_numbers = #tpu.dot_dimension_numbers<[1], [0], [0], [1], [0, 0, 1, 1], [], []>} : vector<128x8xf32>, vector<8x8xf32>, vector<128x8xf32> -> vector<128x8xf32>
    %341 = arith.addf %335, %340 : vector<128x8xf32>
    %c0_499 = arith.constant 0 : index
    %c0_500 = arith.constant 0 : index
    %c1_501 = arith.constant 1 : index
    %c0_502 = arith.constant 0 : index
    %342 = vector.load %arg21[%c0_499, %c0_500, %c1_501, %c0_502] : memref<2x10x10x8xf32, #tpu.memory_space<vmem>>, vector<2x8x8x8xf32>
    %343 = vector.shape_cast %342 : vector<2x8x8x8xf32> to vector<128x8xf32>
    %c0_503 = arith.constant 0 : index
    %c1_504 = arith.constant 1 : index
    %c0_505 = arith.constant 0 : index
    %c0_506 = arith.constant 0 : index
    %344 = vector.load %arg16[%c0_503, %c1_504, %c0_505, %c0_506] : memref<3x3x8x8xf32, #tpu.memory_space<vmem>>, vector<1x1x8x8xf32>
    %345 = vector.shape_cast %344 : vector<1x1x8x8xf32> to vector<8x8xf32>
    %cst_507 = arith.constant dense<0.000000e+00> : vector<128x8xf32>
    %346 = tpu.matmul %343, %345, %cst_507 {dimension_numbers = #tpu.dot_dimension_numbers<[1], [0], [0], [1], [0, 0, 1, 1], [], []>} : vector<128x8xf32>, vector<8x8xf32>, vector<128x8xf32> -> vector<128x8xf32>
    %347 = arith.addf %341, %346 : vector<128x8xf32>
    %c0_508 = arith.constant 0 : index
    %c0_509 = arith.constant 0 : index
    %c2_510 = arith.constant 2 : index
    %c0_511 = arith.constant 0 : index
    %348 = vector.load %arg21[%c0_508, %c0_509, %c2_510, %c0_511] : memref<2x10x10x8xf32, #tpu.memory_space<vmem>>, vector<2x8x8x8xf32>
    %349 = vector.shape_cast %348 : vector<2x8x8x8xf32> to vector<128x8xf32>
    %c0_512 = arith.constant 0 : index
    %c2_513 = arith.constant 2 : index
    %c0_514 = arith.constant 0 : index
    %c0_515 = arith.constant 0 : index
    %350 = vector.load %arg16[%c0_512, %c2_513, %c0_514, %c0_515] : memref<3x3x8x8xf32, #tpu.memory_space<vmem>>, vector<1x1x8x8xf32>
    %351 = vector.shape_cast %350 : vector<1x1x8x8xf32> to vector<8x8xf32>
    %cst_516 = arith.constant dense<0.000000e+00> : vector<128x8xf32>
    %352 = tpu.matmul %349, %351, %cst_516 {dimension_numbers = #tpu.dot_dimension_numbers<[1], [0], [0], [1], [0, 0, 1, 1], [], []>} : vector<128x8xf32>, vector<8x8xf32>, vector<128x8xf32> -> vector<128x8xf32>
    %353 = arith.addf %347, %352 : vector<128x8xf32>
    %c0_517 = arith.constant 0 : index
    %c1_518 = arith.constant 1 : index
    %c0_519 = arith.constant 0 : index
    %c0_520 = arith.constant 0 : index
    %354 = vector.load %arg21[%c0_517, %c1_518, %c0_519, %c0_520] : memref<2x10x10x8xf32, #tpu.memory_space<vmem>>, vector<2x8x8x8xf32>
    %355 = vector.shape_cast %354 : vector<2x8x8x8xf32> to vector<128x8xf32>
    %c1_521 = arith.constant 1 : index
    %c0_522 = arith.constant 0 : index
    %c0_523 = arith.constant 0 : index
    %c0_524 = arith.constant 0 : index
    %356 = vector.load %arg16[%c1_521, %c0_522, %c0_523, %c0_524] : memref<3x3x8x8xf32, #tpu.memory_space<vmem>>, vector<1x1x8x8xf32>
    %357 = vector.shape_cast %356 : vector<1x1x8x8xf32> to vector<8x8xf32>
    %cst_525 = arith.constant dense<0.000000e+00> : vector<128x8xf32>
    %358 = tpu.matmul %355, %357, %cst_525 {dimension_numbers = #tpu.dot_dimension_numbers<[1], [0], [0], [1], [0, 0, 1, 1], [], []>} : vector<128x8xf32>, vector<8x8xf32>, vector<128x8xf32> -> vector<128x8xf32>
    %359 = arith.addf %353, %358 : vector<128x8xf32>
    %c0_526 = arith.constant 0 : index
    %c1_527 = arith.constant 1 : index
    %c1_528 = arith.constant 1 : index
    %c0_529 = arith.constant 0 : index
    %360 = vector.load %arg21[%c0_526, %c1_527, %c1_528, %c0_529] : memref<2x10x10x8xf32, #tpu.memory_space<vmem>>, vector<2x8x8x8xf32>
    %361 = vector.shape_cast %360 : vector<2x8x8x8xf32> to vector<128x8xf32>
    %c1_530 = arith.constant 1 : index
    %c1_531 = arith.constant 1 : index
    %c0_532 = arith.constant 0 : index
    %c0_533 = arith.constant 0 : index
    %362 = vector.load %arg16[%c1_530, %c1_531, %c0_532, %c0_533] : memref<3x3x8x8xf32, #tpu.memory_space<vmem>>, vector<1x1x8x8xf32>
    %363 = vector.shape_cast %362 : vector<1x1x8x8xf32> to vector<8x8xf32>
    %cst_534 = arith.constant dense<0.000000e+00> : vector<128x8xf32>
    %364 = tpu.matmul %361, %363, %cst_534 {dimension_numbers = #tpu.dot_dimension_numbers<[1], [0], [0], [1], [0, 0, 1, 1], [], []>} : vector<128x8xf32>, vector<8x8xf32>, vector<128x8xf32> -> vector<128x8xf32>
    %365 = arith.addf %359, %364 : vector<128x8xf32>
    %c0_535 = arith.constant 0 : index
    %c1_536 = arith.constant 1 : index
    %c2_537 = arith.constant 2 : index
    %c0_538 = arith.constant 0 : index
    %366 = vector.load %arg21[%c0_535, %c1_536, %c2_537, %c0_538] : memref<2x10x10x8xf32, #tpu.memory_space<vmem>>, vector<2x8x8x8xf32>
    %367 = vector.shape_cast %366 : vector<2x8x8x8xf32> to vector<128x8xf32>
    %c1_539 = arith.constant 1 : index
    %c2_540 = arith.constant 2 : index
    %c0_541 = arith.constant 0 : index
    %c0_542 = arith.constant 0 : index
    %368 = vector.load %arg16[%c1_539, %c2_540, %c0_541, %c0_542] : memref<3x3x8x8xf32, #tpu.memory_space<vmem>>, vector<1x1x8x8xf32>
    %369 = vector.shape_cast %368 : vector<1x1x8x8xf32> to vector<8x8xf32>
    %cst_543 = arith.constant dense<0.000000e+00> : vector<128x8xf32>
    %370 = tpu.matmul %367, %369, %cst_543 {dimension_numbers = #tpu.dot_dimension_numbers<[1], [0], [0], [1], [0, 0, 1, 1], [], []>} : vector<128x8xf32>, vector<8x8xf32>, vector<128x8xf32> -> vector<128x8xf32>
    %371 = arith.addf %365, %370 : vector<128x8xf32>
    %c0_544 = arith.constant 0 : index
    %c2_545 = arith.constant 2 : index
    %c0_546 = arith.constant 0 : index
    %c0_547 = arith.constant 0 : index
    %372 = vector.load %arg21[%c0_544, %c2_545, %c0_546, %c0_547] : memref<2x10x10x8xf32, #tpu.memory_space<vmem>>, vector<2x8x8x8xf32>
    %373 = vector.shape_cast %372 : vector<2x8x8x8xf32> to vector<128x8xf32>
    %c2_548 = arith.constant 2 : index
    %c0_549 = arith.constant 0 : index
    %c0_550 = arith.constant 0 : index
    %c0_551 = arith.constant 0 : index
    %374 = vector.load %arg16[%c2_548, %c0_549, %c0_550, %c0_551] : memref<3x3x8x8xf32, #tpu.memory_space<vmem>>, vector<1x1x8x8xf32>
    %375 = vector.shape_cast %374 : vector<1x1x8x8xf32> to vector<8x8xf32>
    %cst_552 = arith.constant dense<0.000000e+00> : vector<128x8xf32>
    %376 = tpu.matmul %373, %375, %cst_552 {dimension_numbers = #tpu.dot_dimension_numbers<[1], [0], [0], [1], [0, 0, 1, 1], [], []>} : vector<128x8xf32>, vector<8x8xf32>, vector<128x8xf32> -> vector<128x8xf32>
    %377 = arith.addf %371, %376 : vector<128x8xf32>
    %c0_553 = arith.constant 0 : index
    %c2_554 = arith.constant 2 : index
    %c1_555 = arith.constant 1 : index
    %c0_556 = arith.constant 0 : index
    %378 = vector.load %arg21[%c0_553, %c2_554, %c1_555, %c0_556] : memref<2x10x10x8xf32, #tpu.memory_space<vmem>>, vector<2x8x8x8xf32>
    %379 = vector.shape_cast %378 : vector<2x8x8x8xf32> to vector<128x8xf32>
    %c2_557 = arith.constant 2 : index
    %c1_558 = arith.constant 1 : index
    %c0_559 = arith.constant 0 : index
    %c0_560 = arith.constant 0 : index
    %380 = vector.load %arg16[%c2_557, %c1_558, %c0_559, %c0_560] : memref<3x3x8x8xf32, #tpu.memory_space<vmem>>, vector<1x1x8x8xf32>
    %381 = vector.shape_cast %380 : vector<1x1x8x8xf32> to vector<8x8xf32>
    %cst_561 = arith.constant dense<0.000000e+00> : vector<128x8xf32>
    %382 = tpu.matmul %379, %381, %cst_561 {dimension_numbers = #tpu.dot_dimension_numbers<[1], [0], [0], [1], [0, 0, 1, 1], [], []>} : vector<128x8xf32>, vector<8x8xf32>, vector<128x8xf32> -> vector<128x8xf32>
    %383 = arith.addf %377, %382 : vector<128x8xf32>
    %c0_562 = arith.constant 0 : index
    %c2_563 = arith.constant 2 : index
    %c2_564 = arith.constant 2 : index
    %c0_565 = arith.constant 0 : index
    %384 = vector.load %arg21[%c0_562, %c2_563, %c2_564, %c0_565] : memref<2x10x10x8xf32, #tpu.memory_space<vmem>>, vector<2x8x8x8xf32>
    %385 = vector.shape_cast %384 : vector<2x8x8x8xf32> to vector<128x8xf32>
    %c2_566 = arith.constant 2 : index
    %c2_567 = arith.constant 2 : index
    %c0_568 = arith.constant 0 : index
    %c0_569 = arith.constant 0 : index
    %386 = vector.load %arg16[%c2_566, %c2_567, %c0_568, %c0_569] : memref<3x3x8x8xf32, #tpu.memory_space<vmem>>, vector<1x1x8x8xf32>
    %387 = vector.shape_cast %386 : vector<1x1x8x8xf32> to vector<8x8xf32>
    %cst_570 = arith.constant dense<0.000000e+00> : vector<128x8xf32>
    %388 = tpu.matmul %385, %387, %cst_570 {dimension_numbers = #tpu.dot_dimension_numbers<[1], [0], [0], [1], [0, 0, 1, 1], [], []>} : vector<128x8xf32>, vector<8x8xf32>, vector<128x8xf32> -> vector<128x8xf32>
    %389 = arith.addf %383, %388 : vector<128x8xf32>
    %c0_571 = arith.constant 0 : index
    %c0_572 = arith.constant 0 : index
    %390 = vector.load %arg17[%c0_571, %c0_572] : memref<1x8xf32, #tpu.memory_space<vmem>>, vector<1x8xf32>
    %391 = vector.broadcast %390 : vector<1x8xf32> to vector<128x8xf32>
    %392 = arith.addf %389, %391 : vector<128x8xf32>
    %393 = arith.addf %261, %392 : vector<128x8xf32>
    %cst_573 = arith.constant 0.000000e+00 : f32
    %394 = vector.broadcast %cst_573 : f32 to vector<128x8xf32>
    %395 = arith.maximumf %393, %394 : vector<128x8xf32>
    %396 = vector.extract_strided_slice %395 {offsets = [0, 0], sizes = [64, 8], strides = [1, 1]} : vector<128x8xf32> to vector<64x8xf32>
    %cst_574 = arith.constant dense<0.000000e+00> : vector<256x8xf32>
    %397 = tpu.matmul %199, %396, %cst_574 {dimension_numbers = #tpu.dot_dimension_numbers<[1], [0], [0], [1], [0, 0, 1, 1], [], []>} : vector<256x64xf32>, vector<64x8xf32>, vector<256x8xf32> -> vector<256x8xf32>
    %398 = vector.shape_cast %397 : vector<256x8xf32> to vector<16x16x8xf32>
    %c0_575 = arith.constant 0 : index
    %c0_576 = arith.constant 0 : index
    %c0_577 = arith.constant 0 : index
    %c0_578 = arith.constant 0 : index
    %399 = vector.load %arg18[%c0_575, %c0_576, %c0_577, %c0_578] : memref<2x16x16x8xf32, #tpu.memory_space<vmem>>, vector<1x16x16x8xf32>
    %400 = vector.shape_cast %399 : vector<1x16x16x8xf32> to vector<16x16x8xf32>
    %401 = vector.shape_cast %398 : vector<16x16x8xf32> to vector<1x16x16x8xf32>
    tpu.vector_store %arg18[%c0_575, %c0_576, %c0_577, %c0_578], %401 {strides = array<i32>} : memref<2x16x16x8xf32, #tpu.memory_space<vmem>>, vector<1x16x16x8xf32>,
    %402 = vector.extract_strided_slice %395 {offsets = [64, 0], sizes = [64, 8], strides = [1, 1]} : vector<128x8xf32> to vector<64x8xf32>
    %cst_579 = arith.constant dense<0.000000e+00> : vector<256x8xf32>
    %403 = tpu.matmul %199, %402, %cst_579 {dimension_numbers = #tpu.dot_dimension_numbers<[1], [0], [0], [1], [0, 0, 1, 1], [], []>} : vector<256x64xf32>, vector<64x8xf32>, vector<256x8xf32> -> vector<256x8xf32>
    %404 = vector.shape_cast %403 : vector<256x8xf32> to vector<16x16x8xf32>
    %c1_580 = arith.constant 1 : index
    %c0_581 = arith.constant 0 : index
    %c0_582 = arith.constant 0 : index
    %c0_583 = arith.constant 0 : index
    %405 = vector.load %arg18[%c1_580, %c0_581, %c0_582, %c0_583] : memref<2x16x16x8xf32, #tpu.memory_space<vmem>>, vector<1x16x16x8xf32>
    %406 = vector.shape_cast %405 : vector<1x16x16x8xf32> to vector<16x16x8xf32>
    %407 = vector.shape_cast %404 : vector<16x16x8xf32> to vector<1x16x16x8xf32>
    tpu.vector_store %arg18[%c1_580, %c0_581, %c0_582, %c0_583], %407 {strides = array<i32>} : memref<2x16x16x8xf32, #tpu.memory_space<vmem>>, vector<1x16x16x8xf32>,
    return
  }
  func.func @transform_0(%arg0: i32) -> (i32, i32, i32, i32) {
    %c0_i32 = arith.constant 0 : i32
    %c0_i32_0 = arith.constant 0 : i32
    %c0_i32_1 = arith.constant 0 : i32
    %c0_i32_2 = arith.constant 0 : i32
    %c0_i32_3 = arith.constant 0 : i32
    return %c0_i32, %c0_i32_0, %c0_i32_1, %c0_i32_2 : i32, i32, i32, i32
  }
  func.func @transform_1(%arg0: i32) -> (i32, i32, i32, i32) {
    %c0_i32 = arith.constant 0 : i32
    %c0_i32_0 = arith.constant 0 : i32
    %c0_i32_1 = arith.constant 0 : i32
    %c0_i32_2 = arith.constant 0 : i32
    %c0_i32_3 = arith.constant 0 : i32
    return %c0_i32, %c0_i32_0, %c0_i32_1, %c0_i32_2 : i32, i32, i32, i32
  }
  func.func @transform_2(%arg0: i32) -> (i32, i32) {
    %c0_i32 = arith.constant 0 : i32
    %c0_i32_0 = arith.constant 0 : i32
    %c0_i32_1 = arith.constant 0 : i32
    return %c0_i32, %c0_i32_0 : i32, i32
  }
  func.func @transform_3(%arg0: i32) -> (i32, i32, i32, i32) {
    %c0_i32 = arith.constant 0 : i32
    %c0_i32_0 = arith.constant 0 : i32
    %c0_i32_1 = arith.constant 0 : i32
    %c0_i32_2 = arith.constant 0 : i32
    %c0_i32_3 = arith.constant 0 : i32
    return %c0_i32, %c0_i32_0, %c0_i32_1, %c0_i32_2 : i32, i32, i32, i32
  }
  func.func @transform_4(%arg0: i32) -> (i32, i32) {
    %c0_i32 = arith.constant 0 : i32
    %c0_i32_0 = arith.constant 0 : i32
    %c0_i32_1 = arith.constant 0 : i32
    return %c0_i32, %c0_i32_0 : i32, i32
  }
  func.func @transform_5(%arg0: i32) -> (i32, i32, i32, i32) {
    %c0_i32 = arith.constant 0 : i32
    %c0_i32_0 = arith.constant 0 : i32
    %c0_i32_1 = arith.constant 0 : i32
    %c0_i32_2 = arith.constant 0 : i32
    %c0_i32_3 = arith.constant 0 : i32
    return %c0_i32, %c0_i32_0, %c0_i32_1, %c0_i32_2 : i32, i32, i32, i32
  }
  func.func @transform_6(%arg0: i32) -> (i32, i32) {
    %c0_i32 = arith.constant 0 : i32
    %c0_i32_0 = arith.constant 0 : i32
    %c0_i32_1 = arith.constant 0 : i32
    return %c0_i32, %c0_i32_0 : i32, i32
  }
  func.func @transform_7(%arg0: i32) -> (i32, i32) {
    %c0_i32 = arith.constant 0 : i32
    %c0_i32_0 = arith.constant 0 : i32
    %c0_i32_1 = arith.constant 0 : i32
    return %c0_i32, %c0_i32_0 : i32, i32
  }
  func.func @transform_8(%arg0: i32) -> (i32, i32, i32, i32) {
    %c0_i32 = arith.constant 0 : i32
    %c0_i32_0 = arith.constant 0 : i32
    %c0_i32_1 = arith.constant 0 : i32
    %c0_i32_2 = arith.constant 0 : i32
    %c0_i32_3 = arith.constant 0 : i32
    return %c0_i32, %c0_i32_0, %c0_i32_1, %c0_i32_2 : i32, i32, i32, i32
  }
  func.func @transform_9(%arg0: i32) -> (i32, i32) {
    %c0_i32 = arith.constant 0 : i32
    %c0_i32_0 = arith.constant 0 : i32
    %c0_i32_1 = arith.constant 0 : i32
    return %c0_i32, %c0_i32_0 : i32, i32
  }
  func.func @transform_10(%arg0: i32) -> (i32, i32, i32, i32) {
    %c0_i32 = arith.constant 0 : i32
    %c0_i32_0 = arith.constant 0 : i32
    %c0_i32_1 = arith.constant 0 : i32
    %c0_i32_2 = arith.constant 0 : i32
    %c0_i32_3 = arith.constant 0 : i32
    return %c0_i32, %c0_i32_0, %c0_i32_1, %c0_i32_2 : i32, i32, i32, i32
  }
  func.func @transform_11(%arg0: i32) -> (i32, i32) {
    %c0_i32 = arith.constant 0 : i32
    %c0_i32_0 = arith.constant 0 : i32
    %c0_i32_1 = arith.constant 0 : i32
    return %c0_i32, %c0_i32_0 : i32, i32
  }
  func.func @transform_12(%arg0: i32) -> (i32, i32, i32, i32) {
    %c0_i32 = arith.constant 0 : i32
    %c0_i32_0 = arith.constant 0 : i32
    %c0_i32_1 = arith.constant 0 : i32
    %c0_i32_2 = arith.constant 0 : i32
    %c0_i32_3 = arith.constant 0 : i32
    return %c0_i32, %c0_i32_0, %c0_i32_1, %c0_i32_2 : i32, i32, i32, i32
  }
  func.func @transform_13(%arg0: i32) -> (i32, i32) {
    %c0_i32 = arith.constant 0 : i32
    %c0_i32_0 = arith.constant 0 : i32
    %c0_i32_1 = arith.constant 0 : i32
    return %c0_i32, %c0_i32_0 : i32, i32
  }
  func.func @transform_14(%arg0: i32) -> (i32, i32) {
    %c0_i32 = arith.constant 0 : i32
    %c0_i32_0 = arith.constant 0 : i32
    %c0_i32_1 = arith.constant 0 : i32
    return %c0_i32, %c0_i32_0 : i32, i32
  }
  func.func @transform_15(%arg0: i32) -> (i32, i32, i32, i32) {
    %c0_i32 = arith.constant 0 : i32
    %c0_i32_0 = arith.constant 0 : i32
    %c0_i32_1 = arith.constant 0 : i32
    %c0_i32_2 = arith.constant 0 : i32
    %c0_i32_3 = arith.constant 0 : i32
    return %c0_i32, %c0_i32_0, %c0_i32_1, %c0_i32_2 : i32, i32, i32, i32
  }
  func.func @transform_16(%arg0: i32) -> (i32, i32) {
    %c0_i32 = arith.constant 0 : i32
    %c0_i32_0 = arith.constant 0 : i32
    %c0_i32_1 = arith.constant 0 : i32
    return %c0_i32, %c0_i32_0 : i32, i32
  }
  func.func @transform_17(%arg0: i32) -> (i32, i32, i32, i32) {
    %c0_i32 = arith.constant 0 : i32
    %c0_i32_0 = arith.constant 0 : i32
    %c0_i32_1 = arith.constant 0 : i32
    %c0_i32_2 = arith.constant 0 : i32
    %c0_i32_3 = arith.constant 0 : i32
    return %c0_i32, %c0_i32_0, %c0_i32_1, %c0_i32_2 : i32, i32, i32, i32
  }
}

</mosaic_0001>

<bundles_post_ra>
// kernel: tpu_custom_call.1
= control target key start
LH: loop header
LB: loop body
LE: loop exit
PB: predicated region body
PF: predicated region fallthrough
CT: control target
= control target key end

     0   :  { %s22774_s0 = inlined_call_operand.vmem [shape: f32[2,8,8,4], index: 0, kind: input, shape index: {}]   ;;  %s22775_s1 = inlined_call_operand.vmem [shape: f32[2,8,8,8], index: 1, kind: input, shape index: {}]   ;;  %s22776_s2 = inlined_call_operand.vmem [shape: f32[256,64], index: 2, kind: input, shape index: {}]   ;;  %s22777_s3 = inlined_call_operand.hbm [shape: f32[3,3,4,8], index: 3, kind: input, shape index: {}]   ;;  %s22778_s4 = inlined_call_operand.vmem [shape: f32[1,8], index: 4, kind: input, shape index: {}]   ;;  %s22779_s5 = inlined_call_operand.vmem [shape: f32[3,3,8,8], index: 5, kind: input, shape index: {}]   ;;  %s22780_s6 = inlined_call_operand.vmem [shape: f32[1,8], index: 6, kind: input, shape index: {}]   ;;  %s22781_s7 = inlined_call_operand.vmem [shape: f32[1,8], index: 7, kind: input, shape index: {}]   ;;  %s22782_s8 = inlined_call_operand.vmem [shape: f32[3,3,8,8], index: 8, kind: input, shape index: {}]   ;;  %s22783_s9 = inlined_call_operand.vmem [shape: f32[1,8], index: 9, kind: input, shape index: {}]   ;;  %s22784_s10 = inlined_call_operand.vmem [shape: f32[3,3,8,8], index: 10, kind: input, shape index: {}]   ;;  %s22785_s11 = inlined_call_operand.vmem [shape: f32[1,8], index: 11, kind: input, shape index: {}]   ;;  %s22786_s12 = inlined_call_operand.vmem [shape: f32[3,3,8,8], index: 12, kind: input, shape index: {}]   ;;  %s22787_s13 = inlined_call_operand.vmem [shape: f32[1,8], index: 13, kind: input, shape index: {}]   ;;  %s22788_s14 = inlined_call_operand.vmem [shape: f32[1,8], index: 14, kind: input, shape index: {}]   ;;  %s22789_s15 = inlined_call_operand.hbm [shape: f32[3,3,8,8], index: 15, kind: input, shape index: {}]   ;;  %s22790_s16 = inlined_call_operand.vmem [shape: f32[1,8], index: 16, kind: input, shape index: {}]   ;;  %s22791_s17 = inlined_call_operand.vmem [shape: f32[2,16,16,8], index: 17, kind: output, shape index: {}]  }
   0x1   :  { %22841 = sst [smem:[#allocation71_spill]] %s22774_s0 }
   0x2   :  { %22842 = sst [smem:[#allocation72_spill]] %s22775_s1 }
   0x3   :  { %22 = vsyncpa [#allocation6], 0 }
   0x4   :  { %23 = vsyncpa [#allocation8], 0  ;;  %s17118_s24 = smov [#allocation5]  }
   0x5   :  { %s35_s25 = sshll.u32 %s17118_s24, 4  ;;  %s36_s25 = int_to_ptr.vmem [resolvable:$true] %s35_s25 }
   0x6   :  { %s17082_s26 = scalar_lea.vmem %s36_s25, 576  ;;  %p17087_p1 = scmp.lt.s32.totalorder %s36_s25, %s36_s25 }
   0x7   :  { %p17083_p0 = scmp.ne.s32.totalorder %s36_s25, %s17082_s26  ;;  %p17088_p2 = scmp.lt.s32.totalorder %s17082_s26, %s17082_s26 }
   0x9   :  { %p17089_p3 = por %p17088_p2, %p17087_p1 }
   0xb   :  { %p17090_p4 = pnand %p17089_p3, %p17083_p0 }
   0xd   :  { %17093 = shalt.err (!%p17090_p4)
}
   0xe   :  { %s17119_s27 = smov 64   ;;  %s17120_s28 = smov 4  }
   0xf   :  { %41 = dma.hbm_to_vmem [thread:$0]  %s22777_s3, 576, %s36_s25, [#allocation6], %s17119_s27, %s17119_s27, %s17120_s28  }
  0x10   :  { %s17121_s30 = smov [#allocation7]  }
  0x11   :  { %s69_s18 = sshll.u32 %s17121_s30, 4  ;;  %s70_s18 = int_to_ptr.vmem [resolvable:$true] %s69_s18 }
  0x12   :  { %s17102_s19 = scalar_lea.vmem %s70_s18, 1152  ;;  %p17107_p6 = scmp.lt.s32.totalorder %s70_s18, %s70_s18 }
  0x13   :  { %p17103_p5 = scmp.ne.s32.totalorder %s70_s18, %s17102_s19  ;;  %p17108_p7 = scmp.lt.s32.totalorder %s17102_s19, %s17102_s19 }
  0x15   :  { %p17109_p8 = por %p17108_p7, %p17107_p6 }
  0x17   :  { %p17110_p9 = pnand %p17109_p8, %p17103_p5 }
  0x19   :  { %17113 = shalt.err (!%p17110_p9)
}
  0x1a   :  { %s17122_s1 = smov 128   ;;  %s17123_s20 = smov 8  }
  0x1b   :  { %75 = dma.hbm_to_vmem [thread:$0]  %s22789_s15, 1152, %s70_s18, [#allocation8], %s17122_s1, %s17122_s1, %s17123_s20  }
  0x1c   :  { %17114 = dma.done.wait [#allocation6], 576  }
  0x1d   :  { %17115 = vsyncadd [#allocation6], 4294966720 }
  0x1e   :  { %17116 = dma.done.wait [#allocation8], 1152  }
  0x1f   :  { %17117 = vsyncadd [#allocation8], 4294966144  ;;  %vm100_vm0 = vcmask 31744   ;;  %vm102_vm1 = vcmask 25600   ;;  %v22794_v0 = vmov 0.0   ;;  %vm242_vm2 = vcmask 1043456  }
  0x20   :  { %101 = vst.msk [vmem:[#allocation2] sm:$0xff] %vm100_vm0, %v22794_v0  ;;  %104 = vst.msk [vmem:[#allocation2 + $0x10] sm:$0xff] %vm100_vm0, %v22794_v0  ;;  %v193_v1 = vld [vmem:[#allocation5 + $0x4] sm:$0xf]  ;;  %v175_v2 = vld [vmem:[#allocation5] sm:$0xf] }
  0x21   :  { %103 = vst.msk [vmem:[#allocation2 + $0x8] sm:$0x3] %vm102_vm1, %v22794_v0  ;;  %105 = vst.msk [vmem:[#allocation2 + $0x18] sm:$0x3] %vm102_vm1, %v22794_v0  ;;  %s22843_s23 = sld [smem:[#allocation71_spill]]  ;;  %15535 = vmatprep.subr.msk.mxu0 %vm242_vm2, %v193_v1  ;;  %15561 = vmatprep.subr.msk.mxu1 %vm242_vm2, %v175_v2  ;;  %vm2237_vm3 = vcmask 64512  }
  0x22   :  { %106 = vst.msk [vmem:[#allocation2 + $0x20] sm:$0xff] %vm100_vm0, %v22794_v0  ;;  %108 = vst.msk [vmem:[#allocation2 + $0x30] sm:$0xff] %vm100_vm0, %v22794_v0  ;;  %15536 = vmatpush3.msk.msra.mxu0 %vm242_vm2, %v193_v1  ;;  %15562 = vmatpush3.msk.msra.mxu1 %vm242_vm2, %v175_v2  ;;  %v604_v13 = vld [vmem:[#allocation5 + $0x8] sm:$0xf]  ;;  %v834_v20 = vld [vmem:[#allocation5 + $0xc] sm:$0xf] }
  0x23   :  { %107 = vst.msk [vmem:[#allocation2 + $0x28] sm:$0x3] %vm102_vm1, %v22794_v0  ;;  %109 = vst.msk [vmem:[#allocation2 + $0x38] sm:$0x3] %vm102_vm1, %v22794_v0  ;;  %15587 = vmatprep.subr.msk.mxu0 %vm242_vm2, %v604_v13  ;;  %15613 = vmatprep.subr.msk.mxu1 %vm242_vm2, %v834_v20  ;;  %v1064_v38 = vld [vmem:[#allocation5 + $0x10] sm:$0xf] }
  0x24   :  { %110 = vst.msk [vmem:[#allocation2 + $0x40] sm:$0xff] %vm100_vm0, %v22794_v0  ;;  %112 = vst.msk [vmem:[#allocation2 + $0x50] sm:$0xff] %vm100_vm0, %v22794_v0  ;;  %v1294_v44 = vld [vmem:[#allocation5 + $0x14] sm:$0xf]  ;;  %v1525_v58 = vld [vmem:[#allocation5 + $0x18] sm:$0xf] }
  0x25   :  { %111 = vst.msk [vmem:[#allocation2 + $0x48] sm:$0x3] %vm102_vm1, %v22794_v0  ;;  %113 = vst.msk [vmem:[#allocation2 + $0x58] sm:$0x3] %vm102_vm1, %v22794_v0  ;;  %v1755_v59 = vld [vmem:[#allocation5 + $0x1c] sm:$0xf] }
  0x26   :  { %114 = vst.msk [vmem:[#allocation2 + $0x60] sm:$0xff] %vm100_vm0, %v22794_v0  ;;  %116 = vst.msk [vmem:[#allocation2 + $0x70] sm:$0xff] %vm100_vm0, %v22794_v0  ;;  %vm2239_vm4 = vcmask 58368   ;;  %s23110_s18 = sld [smem:[#allocation72_spill]]  ;;  %vm12910_vm5 = vcmask 523264  }
  0x27   :  { %115 = vst.msk [vmem:[#allocation2 + $0x68] sm:$0x3] %vm102_vm1, %v22794_v0  ;;  %117 = vst.msk [vmem:[#allocation2 + $0x78] sm:$0x3] %vm102_vm1, %v22794_v0  ;;  %v84_v3 = vld [vmem:[%s22843_s23] sm:$0xff]  ;;  %v85_v6 = vld [vmem:[%s22843_s23 + $0x8] sm:$0xff] }
  0x28   :  { %118 = vst.msk [vmem:[#allocation2 + $0x80] sm:$0xff] %vm100_vm0, %v22794_v0  ;;  %120 = vst.msk [vmem:[#allocation2 + $0x90] sm:$0xff] %vm100_vm0, %v22794_v0  ;;  %v176_v4 = vld [vmem:[#allocation2 + $0x1] sm:$0xff]  ;;  %v86_v7 = vld [vmem:[%s22843_s23 + $0x10] sm:$0xff] }
  0x29   :  { %119 = vst.msk [vmem:[#allocation2 + $0x88] sm:$0x3] %vm102_vm1, %v22794_v0  ;;  %121 = vst.msk [vmem:[#allocation2 + $0x98] sm:$0x3] %vm102_vm1, %v22794_v0  ;;  %v159_v5 = vld [vmem:[#allocation2] sm:$0xff]  ;;  %15537 = vmatprep.mubr.msk.f32.mxu0 %vm100_vm0, %v176_v4  ;;  %v87_v8 = vld [vmem:[%s22843_s23 + $0x18] sm:$0xff] }
  0x2a   :  { %122 = vst.msk [vmem:[#allocation2 + $0xa0] sm:$0xff] %vm100_vm0, %v22794_v0  ;;  %124 = vst.msk [vmem:[#allocation2 + $0xb0] sm:$0xff] %vm100_vm0, %v22794_v0  ;;  %v88_v9 = vld [vmem:[%s22843_s23 + $0x20] sm:$0xff]  ;;  %15563 = vmatprep.mubr.msk.f32.mxu1 %vm100_vm0, %v159_v5  ;;  %v89_v10 = vld [vmem:[%s22843_s23 + $0x28] sm:$0xff] }
  0x2b   :  { %123 = vst.msk [vmem:[#allocation2 + $0xa8] sm:$0x3] %vm102_vm1, %v22794_v0  ;;  %125 = vst.msk [vmem:[#allocation2 + $0xb8] sm:$0x3] %vm102_vm1, %v22794_v0  ;;  %v90_v11 = vld [vmem:[%s22843_s23 + $0x30] sm:$0xff]  ;;  %v92_v12 = vld [vmem:[%s22843_s23 + $0x40] sm:$0xff] }
  0x2c   :  { %126 = vst.msk [vmem:[#allocation2 + $0xc0] sm:$0xff] %vm100_vm0, %v22794_v0  ;;  %128 = vst.msk [vmem:[#allocation2 + $0xd0] sm:$0xff] %vm100_vm0, %v22794_v0  ;;  %v93_v14 = vld [vmem:[%s22843_s23 + $0x48] sm:$0xff]  ;;  %v94_v15 = vld [vmem:[%s22843_s23 + $0x50] sm:$0xff] }
  0x2d   :  { %127 = vst.msk [vmem:[#allocation2 + $0xc8] sm:$0x3] %vm102_vm1, %v22794_v0  ;;  %129 = vst.msk [vmem:[#allocation2 + $0xd8] sm:$0x3] %vm102_vm1, %v22794_v0  ;;  %v95_v16 = vld [vmem:[%s22843_s23 + $0x58] sm:$0xff]  ;;  %v96_v17 = vld [vmem:[%s22843_s23 + $0x60] sm:$0xff] }
  0x2e   :  { %130 = vst.msk [vmem:[#allocation2 + $0xe0] sm:$0xff] %vm100_vm0, %v22794_v0  ;;  %132 = vst.msk [vmem:[#allocation2 + $0xf0] sm:$0xff] %vm100_vm0, %v22794_v0  ;;  %v97_v18 = vld [vmem:[%s22843_s23 + $0x68] sm:$0xff]  ;;  %v98_v19 = vld [vmem:[%s22843_s23 + $0x70] sm:$0xff] }
  0x2f   :  { %131 = vst.msk [vmem:[#allocation2 + $0xe8] sm:$0x3] %vm102_vm1, %v22794_v0  ;;  %133 = vst.msk [vmem:[#allocation2 + $0xf8] sm:$0x3] %vm102_vm1, %v22794_v0  ;;  %v91_v21 = vld [vmem:[%s22843_s23 + $0x38] sm:$0xff]  ;;  %v587_v55 = vld [vmem:[#allocation2 + $0x2] sm:$0xff] }
  0x30   :  { %134 = vst.msk [vmem:[#allocation2 + $0x100] sm:$0xff] %vm100_vm0, %v22794_v0  ;;  %136 = vst.msk [vmem:[#allocation2 + $0x110] sm:$0xff] %vm100_vm0, %v22794_v0  ;;  %v99_v43 = vld [vmem:[%s22843_s23 + $0x78] sm:$0xff] }
  0x31   :  { %135 = vst.msk [vmem:[#allocation2 + $0x108] sm:$0x3] %vm102_vm1, %v22794_v0  ;;  %137 = vst.msk [vmem:[#allocation2 + $0x118] sm:$0x3] %vm102_vm1, %v22794_v0  ;;  %v167_v37 = vld [vmem:[#allocation2 + $0xa0] sm:$0xff] }
  0x32   :  { %138 = vst.msk [vmem:[#allocation2 + $0x120] sm:$0xff] %vm100_vm0, %v22794_v0  ;;  %140 = vst.msk [vmem:[#allocation2 + $0x130] sm:$0xff] %vm100_vm0, %v22794_v0  ;;  %v184_v36 = vld [vmem:[#allocation2 + $0xa1] sm:$0xff] }
  0x33   :  { %139 = vst.msk [vmem:[#allocation2 + $0x128] sm:$0x3] %vm102_vm1, %v22794_v0  ;;  %141 = vst.msk [vmem:[#allocation2 + $0x138] sm:$0x3] %vm102_vm1, %v22794_v0 }
  0x34   :  { %143 = vst.msk [vmem:[#allocation2 + $0x11] sm:$0xff] %vm100_vm0, %v84_v3  ;;  %144 = vst.msk [vmem:[#allocation2 + $0x21] sm:$0xff] %vm100_vm0, %v85_v6  ;;  %v595_v3 = vld [vmem:[#allocation2 + $0xa2] sm:$0xff] }
  0x35   :  { %145 = vst.msk [vmem:[#allocation2 + $0x31] sm:$0xff] %vm100_vm0, %v86_v7  ;;  %146 = vst.msk [vmem:[#allocation2 + $0x41] sm:$0xff] %vm100_vm0, %v87_v8 }
  0x36   :  { %147 = vst.msk [vmem:[#allocation2 + $0x51] sm:$0xff] %vm100_vm0, %v88_v9  ;;  %148 = vst.msk [vmem:[#allocation2 + $0x61] sm:$0xff] %vm100_vm0, %v89_v10 }
  0x37   :  { %149 = vst.msk [vmem:[#allocation2 + $0x71] sm:$0xff] %vm100_vm0, %v90_v11  ;;  %151 = vst.msk [vmem:[#allocation2 + $0xb1] sm:$0xff] %vm100_vm0, %v92_v12  ;;  %v1985_v12 = vld [vmem:[#allocation5 + $0x20] sm:$0xf] }
  0x38   :  { %152 = vst.msk [vmem:[#allocation2 + $0xc1] sm:$0xff] %vm100_vm0, %v93_v14  ;;  %153 = vst.msk [vmem:[#allocation2 + $0xd1] sm:$0xff] %vm100_vm0, %v94_v15 }
  0x39   :  { %154 = vst.msk [vmem:[#allocation2 + $0xe1] sm:$0xff] %vm100_vm0, %v95_v16  ;;  %155 = vst.msk [vmem:[#allocation2 + $0xf1] sm:$0xff] %vm100_vm0, %v96_v17  ;;  %v1515_v17 = vld [vmem:[#allocation2 + $0x90] sm:$0xff] }
  0x3a   :  { %156 = vst.msk [vmem:[#allocation2 + $0x101] sm:$0xff] %vm100_vm0, %v97_v18  ;;  %157 = vst.msk [vmem:[#allocation2 + $0x111] sm:$0xff] %vm100_vm0, %v98_v19  ;;  %v1745_v18 = vld [vmem:[#allocation2 + $0x91] sm:$0xff] }
  0x3b   :  { %v17367_v22 = vld [vmem:[#allocation2 + $0x11] sm:$0xff]  ;;  %150 = vst.msk [vmem:[#allocation2 + $0x81] sm:$0xff] %vm100_vm0, %v91_v21  ;;  %v17377_v24 = vld [vmem:[#allocation2 + $0x21] sm:$0xff]  ;;  %158 = vst.msk [vmem:[#allocation2 + $0x121] sm:$0xff] %vm100_vm0, %v99_v43 }
  0x3c   :  { %v17369_v23 = vld [vmem:[#allocation2 + $0x10] sm:$0xff]  ;;  %15538 = vmatmul.mubr.msk.f32.vlgmr.msra.gmra.mxu0 %vm100_vm0, %v17367_v22  ;;  %v17379_v25 = vld [vmem:[#allocation2 + $0x20] sm:$0xff]  ;;  %2243 = vst.msk [vmem:[#allocation3 + $0x20] sm:$0xff] %vm2237_vm3, %v22794_v0  ;;  %2238 = vst.msk [vmem:[#allocation3] sm:$0xff] %vm2237_vm3, %v22794_v0 }
  0x3d   :  { %15564 = vmatmul.mubr.msk.f32.vlgmr.msra.gmra.mxu1 %vm100_vm0, %v17369_v23  ;;  %15540 = vmatprep.mubr.msk.f32.mxu0 %vm100_vm0, %v17377_v24  ;;  %v17385_v26 = vld [vmem:[#allocation2 + $0x31] sm:$0xff]  ;;  %v17389_v28 = vld [vmem:[#allocation2 + $0x41] sm:$0xff]  ;;  %2244 = vst.msk [vmem:[#allocation3 + $0x28] sm:$0x3] %vm2239_vm4, %v22794_v0  ;;  %2240 = vst.msk [vmem:[#allocation3 + $0x8] sm:$0x3] %vm2239_vm4, %v22794_v0 }
  0x3e   :  { %15566 = vmatprep.mubr.msk.f32.mxu1 %vm100_vm0, %v17379_v25  ;;  %v17387_v27 = vld [vmem:[#allocation2 + $0x30] sm:$0xff]  ;;  %v17391_v29 = vld [vmem:[#allocation2 + $0x40] sm:$0xff]  ;;  %15588 = vmatpush3.msk.msra.mxu0 %vm242_vm2, %v604_v13  ;;  %2241 = vst.msk [vmem:[#allocation3 + $0x10] sm:$0xff] %vm2237_vm3, %v22794_v0  ;;  %2245 = vst.msk [vmem:[#allocation3 + $0x30] sm:$0xff] %vm2237_vm3, %v22794_v0 }
  0x3f   :  { %15614 = vmatpush3.msk.msra.mxu1 %vm242_vm2, %v834_v20  ;;  %v17403_v30 = vld [vmem:[#allocation2 + $0x51] sm:$0xff]  ;;  %v17407_v32 = vld [vmem:[#allocation2 + $0x61] sm:$0xff]  ;;  %15639 = vmatprep.subr.msk.mxu0 %vm242_vm2, %v1064_v38  ;;  %2242 = vst.msk [vmem:[#allocation3 + $0x18] sm:$0x3] %vm2239_vm4, %v22794_v0  ;;  %2246 = vst.msk [vmem:[#allocation3 + $0x38] sm:$0x3] %vm2239_vm4, %v22794_v0 }
  0x40   :  { %15541 = vmatmul.mubr.msk.f32.gmra.mxu0 %vm100_vm0, %v17385_v26  ;;  %v17405_v31 = vld [vmem:[#allocation2 + $0x50] sm:$0xff]  ;;  %v17409_v33 = vld [vmem:[#allocation2 + $0x60] sm:$0xff]  ;;  %15665 = vmatprep.subr.msk.mxu1 %vm242_vm2, %v1294_v44  ;;  %2247 = vst.msk [vmem:[#allocation3 + $0x40] sm:$0xff] %vm2237_vm3, %v22794_v0  ;;  %2249 = vst.msk [vmem:[#allocation3 + $0x50] sm:$0xff] %vm2237_vm3, %v22794_v0 }
  0x41   :  { %15567 = vmatmul.mubr.msk.f32.gmra.mxu1 %vm100_vm0, %v17387_v27  ;;  %15543 = vmatprep.mubr.msk.f32.mxu0 %vm100_vm0, %v17389_v28  ;;  %v17419_v34 = vld [vmem:[#allocation2 + $0x71] sm:$0xff]  ;;  %v17433_v41 = vld [vmem:[#allocation2 + $0xc1] sm:$0xff]  ;;  %2248 = vst.msk [vmem:[#allocation3 + $0x48] sm:$0x3] %vm2239_vm4, %v22794_v0  ;;  %2250 = vst.msk [vmem:[#allocation3 + $0x58] sm:$0x3] %vm2239_vm4, %v22794_v0 }
  0x42   :  { %15569 = vmatprep.mubr.msk.f32.mxu1 %vm100_vm0, %v17391_v29  ;;  %v17421_v35 = vld [vmem:[#allocation2 + $0x70] sm:$0xff]  ;;  %v17435_v42 = vld [vmem:[#allocation2 + $0xc0] sm:$0xff]  ;;  %2251 = vst.msk [vmem:[#allocation3 + $0x60] sm:$0xff] %vm2237_vm3, %v22794_v0  ;;  %2253 = vst.msk [vmem:[#allocation3 + $0x70] sm:$0xff] %vm2237_vm3, %v22794_v0 }
  0x43   :  { %v17429_v39 = vld [vmem:[#allocation2 + $0xb1] sm:$0xff]  ;;  %v17455_v47 = vld [vmem:[#allocation2 + $0xe1] sm:$0xff]  ;;  %2252 = vst.msk [vmem:[#allocation3 + $0x68] sm:$0x3] %vm2239_vm4, %v22794_v0  ;;  %2254 = vst.msk [vmem:[#allocation3 + $0x78] sm:$0x3] %vm2239_vm4, %v22794_v0 }
  0x44   :  { %15544 = vmatmul.mubr.msk.f32.gmra.mxu0 %vm100_vm0, %v17403_v30  ;;  %v17431_v40 = vld [vmem:[#allocation2 + $0xb0] sm:$0xff]  ;;  %v17457_v48 = vld [vmem:[#allocation2 + $0xe0] sm:$0xff]  ;;  %2255 = vst.msk [vmem:[#allocation3 + $0x80] sm:$0xff] %vm2237_vm3, %v22794_v0  ;;  %2257 = vst.msk [vmem:[#allocation3 + $0x90] sm:$0xff] %vm2237_vm3, %v22794_v0 }
  0x45   :  { %15570 = vmatmul.mubr.msk.f32.gmra.mxu1 %vm100_vm0, %v17405_v31  ;;  %15546 = vmatprep.mubr.msk.f32.mxu0 %vm100_vm0, %v17407_v32  ;;  %v17451_v45 = vld [vmem:[#allocation2 + $0xd1] sm:$0xff]  ;;  %v17471_v51 = vld [vmem:[#allocation2 + $0x101] sm:$0xff]  ;;  %2256 = vst.msk [vmem:[#allocation3 + $0x88] sm:$0x3] %vm2239_vm4, %v22794_v0  ;;  %2258 = vst.msk [vmem:[#allocation3 + $0x98] sm:$0x3] %vm2239_vm4, %v22794_v0 }
  0x46   :  { %15572 = vmatprep.mubr.msk.f32.mxu1 %vm100_vm0, %v17409_v33  ;;  %v17453_v46 = vld [vmem:[#allocation2 + $0xd0] sm:$0xff]  ;;  %v17473_v52 = vld [vmem:[#allocation2 + $0x100] sm:$0xff]  ;;  %2259 = vst.msk [vmem:[#allocation3 + $0xa0] sm:$0xff] %vm2237_vm3, %v22794_v0  ;;  %2261 = vst.msk [vmem:[#allocation3 + $0xb0] sm:$0xff] %vm2237_vm3, %v22794_v0 }
  0x47   :  { %v17467_v49 = vld [vmem:[#allocation2 + $0xf1] sm:$0xff]  ;;  %v17494_v57 = vld [vmem:[#allocation2 + $0x22] sm:$0xff]  ;;  %2260 = vst.msk [vmem:[#allocation3 + $0xa8] sm:$0x3] %vm2239_vm4, %v22794_v0  ;;  %2262 = vst.msk [vmem:[#allocation3 + $0xb8] sm:$0x3] %vm2239_vm4, %v22794_v0 }
  0x48   :  { %15547 = vmatmul.mubr.msk.f32.gmra.mxu0 %vm100_vm0, %v17419_v34  ;;  %v17469_v50 = vld [vmem:[#allocation2 + $0xf0] sm:$0xff]  ;;  %v17505_v61 = vld [vmem:[#allocation2 + $0x42] sm:$0xff]  ;;  %2263 = vst.msk [vmem:[#allocation3 + $0xc0] sm:$0xff] %vm2237_vm3, %v22794_v0  ;;  %2265 = vst.msk [vmem:[#allocation3 + $0xd0] sm:$0xff] %vm2237_vm3, %v22794_v0 }
  0x49   :  { %15573 = vmatmul.mubr.msk.f32.gmra.mxu1 %vm100_vm0, %v17421_v35  ;;  %15549 = vmatprep.mubr.msk.f32.mxu0 %vm100_vm0, %v184_v36  ;;  %v17483_v53 = vld [vmem:[#allocation2 + $0x111] sm:$0xff]  ;;  %v17521_v63 = vld [vmem:[#allocation2 + $0x62] sm:$0xff]  ;;  %2264 = vst.msk [vmem:[#allocation3 + $0xc8] sm:$0x3] %vm2239_vm4, %v22794_v0  ;;  %2266 = vst.msk [vmem:[#allocation3 + $0xd8] sm:$0x3] %vm2239_vm4, %v22794_v0 }
  0x4a   :  { %15575 = vmatprep.mubr.msk.f32.mxu1 %vm100_vm0, %v167_v37  ;;  %v17485_v54 = vld [vmem:[#allocation2 + $0x110] sm:$0xff]  ;;  %v17533_v2 = vld [vmem:[#allocation2 + $0x80] sm:$0xff]  ;;  %2267 = vst.msk [vmem:[#allocation3 + $0xe0] sm:$0xff] %vm2237_vm3, %v22794_v0  ;;  %2269 = vst.msk [vmem:[#allocation3 + $0xf0] sm:$0xff] %vm2237_vm3, %v22794_v0 }
  0x4b   :  { %v588_v56 = vld [vmem:[#allocation2 + $0x12] sm:$0xff]  ;;  %v17542_v5 = vld [vmem:[#allocation2 + $0xc2] sm:$0xff]  ;;  %2268 = vst.msk [vmem:[#allocation3 + $0xe8] sm:$0x3] %vm2239_vm4, %v22794_v0  ;;  %2270 = vst.msk [vmem:[#allocation3 + $0xf8] sm:$0x3] %vm2239_vm4, %v22794_v0 }
  0x4c   :  { %15550 = vmatmul.mubr.msk.f32.gmra.mxu0 %vm100_vm0, %v17429_v39  ;;  %v17501_v60 = vld [vmem:[#allocation2 + $0x32] sm:$0xff]  ;;  %v17553_v7 = vld [vmem:[#allocation2 + $0xe2] sm:$0xff]  ;;  %2271 = vst.msk [vmem:[#allocation3 + $0x100] sm:$0xff] %vm2237_vm3, %v22794_v0  ;;  %2273 = vst.msk [vmem:[#allocation3 + $0x110] sm:$0xff] %vm2237_vm3, %v22794_v0 }
  0x4d   :  { %15576 = vmatmul.mubr.msk.f32.gmra.mxu1 %vm100_vm0, %v17431_v40  ;;  %15552 = vmatprep.mubr.msk.f32.mxu0 %vm100_vm0, %v17433_v41  ;;  %v17517_v62 = vld [vmem:[#allocation2 + $0x52] sm:$0xff]  ;;  %v17565_v9 = vld [vmem:[#allocation2 + $0x102] sm:$0xff]  ;;  %2272 = vst.msk [vmem:[#allocation3 + $0x108] sm:$0x3] %vm2239_vm4, %v22794_v0  ;;  %2274 = vst.msk [vmem:[#allocation3 + $0x118] sm:$0x3] %vm2239_vm4, %v22794_v0 }
  0x4e   :  { %15578 = vmatprep.mubr.msk.f32.mxu1 %vm100_vm0, %v17435_v42  ;;  %v17529_v1 = vld [vmem:[#allocation2 + $0x72] sm:$0xff]  ;;  %v17577_v11 = vld [vmem:[#allocation2 + $0x120] sm:$0xff]  ;;  %2275 = vst.msk [vmem:[#allocation3 + $0x120] sm:$0xff] %vm2237_vm3, %v22794_v0  ;;  %2277 = vst.msk [vmem:[#allocation3 + $0x130] sm:$0xff] %vm2237_vm3, %v22794_v0 }
  0x4f   :  { %v596_v4 = vld [vmem:[#allocation2 + $0xb2] sm:$0xff]  ;;  %v1054_v13 = vld [vmem:[#allocation2 + $0x81] sm:$0xff]  ;;  %2276 = vst.msk [vmem:[#allocation3 + $0x128] sm:$0x3] %vm2239_vm4, %v22794_v0  ;;  %2278 = vst.msk [vmem:[#allocation3 + $0x138] sm:$0x3] %vm2239_vm4, %v22794_v0 }
  0x50   :  { %15553 = vmatmul.mubr.msk.f32.gmra.mxu0 %vm100_vm0, %v17451_v45  ;;  %v17549_v6 = vld [vmem:[#allocation2 + $0xd2] sm:$0xff]  ;;  %v17613_v14 = vld [vmem:[#allocation2 + $0x82] sm:$0xff]  ;;  %8659 = vst.msk [vmem:[#allocation4] sm:$0xff] %vm2237_vm3, %v22794_v0  ;;  %8661 = vst.msk [vmem:[#allocation4 + $0x10] sm:$0xff] %vm2237_vm3, %v22794_v0 }
  0x51   :  { %15579 = vmatmul.mubr.msk.f32.gmra.mxu1 %vm100_vm0, %v17453_v46  ;;  %15555 = vmatprep.mubr.msk.f32.mxu0 %vm100_vm0, %v17455_v47  ;;  %v17561_v8 = vld [vmem:[#allocation2 + $0xf2] sm:$0xff]  ;;  %v1062_v15 = vld [vmem:[#allocation2 + $0x121] sm:$0xff]  ;;  %8660 = vst.msk [vmem:[#allocation4 + $0x8] sm:$0x3] %vm2239_vm4, %v22794_v0  ;;  %8662 = vst.msk [vmem:[#allocation4 + $0x18] sm:$0x3] %vm2239_vm4, %v22794_v0 }
  0x52   :  { %15581 = vmatprep.mubr.msk.f32.mxu1 %vm100_vm0, %v17457_v48  ;;  %v17573_v10 = vld [vmem:[#allocation2 + $0x112] sm:$0xff]  ;;  %v1292_v16 = vld [vmem:[#allocation2 + $0x122] sm:$0xff]  ;;  %8663 = vst.msk [vmem:[#allocation4 + $0x20] sm:$0xff] %vm2237_vm3, %v22794_v0  ;;  %8665 = vst.msk [vmem:[#allocation4 + $0x30] sm:$0xff] %vm2237_vm3, %v22794_v0 }
  0x53   :  { %v1523_v19 = vld [vmem:[#allocation2 + $0x130] sm:$0xff]  ;;  %8664 = vst.msk [vmem:[#allocation4 + $0x28] sm:$0x3] %vm2239_vm4, %v22794_v0  ;;  %8666 = vst.msk [vmem:[#allocation4 + $0x38] sm:$0x3] %vm2239_vm4, %v22794_v0 }
  0x54   :  { %15556 = vmatmul.mubr.msk.f32.gmra.mxu0 %vm100_vm0, %v17467_v49  ;;  %v1753_v20 = vld [vmem:[#allocation2 + $0x131] sm:$0xff]  ;;  %8667 = vst.msk [vmem:[#allocation4 + $0x40] sm:$0xff] %vm2237_vm3, %v22794_v0  ;;  %8669 = vst.msk [vmem:[#allocation4 + $0x50] sm:$0xff] %vm2237_vm3, %v22794_v0 }
  0x55   :  { %15582 = vmatmul.mubr.msk.f32.gmra.mxu1 %vm100_vm0, %v17469_v50  ;;  %15558 = vmatprep.mubr.msk.f32.mxu0 %vm100_vm0, %v17471_v51  ;;  %v1975_v21 = vld [vmem:[#allocation2 + $0x92] sm:$0xff]  ;;  %8668 = vst.msk [vmem:[#allocation4 + $0x48] sm:$0x3] %vm2239_vm4, %v22794_v0  ;;  %8670 = vst.msk [vmem:[#allocation4 + $0x58] sm:$0x3] %vm2239_vm4, %v22794_v0 }
  0x56   :  { %15584 = vmatprep.mubr.msk.f32.mxu1 %vm100_vm0, %v17473_v52  ;;  %8671 = vst.msk [vmem:[#allocation4 + $0x60] sm:$0xff] %vm2237_vm3, %v22794_v0  ;;  %8673 = vst.msk [vmem:[#allocation4 + $0x70] sm:$0xff] %vm2237_vm3, %v22794_v0 }
  0x57   :  { %8672 = vst.msk [vmem:[#allocation4 + $0x68] sm:$0x3] %vm2239_vm4, %v22794_v0  ;;  %8674 = vst.msk [vmem:[#allocation4 + $0x78] sm:$0x3] %vm2239_vm4, %v22794_v0 }
  0x58   :  { %15559 = vmatmul.mubr.msk.f32.gmra.mxu0 %vm100_vm0, %v17483_v53  ;;  %8675 = vst.msk [vmem:[#allocation4 + $0x80] sm:$0xff] %vm2237_vm3, %v22794_v0  ;;  %8677 = vst.msk [vmem:[#allocation4 + $0x90] sm:$0xff] %vm2237_vm3, %v22794_v0 }
  0x59   :  { %15585 = vmatmul.mubr.msk.f32.gmra.mxu1 %vm100_vm0, %v17485_v54  ;;  %15589 = vmatprep.mubr.msk.f32.mxu0 %vm100_vm0, %v587_v55  ;;  %8676 = vst.msk [vmem:[#allocation4 + $0x88] sm:$0x3] %vm2239_vm4, %v22794_v0  ;;  %8678 = vst.msk [vmem:[#allocation4 + $0x98] sm:$0x3] %vm2239_vm4, %v22794_v0 }
  0x5a   :  { %15615 = vmatprep.mubr.msk.f32.mxu1 %vm100_vm0, %v17369_v23  ;;  %8679 = vst.msk [vmem:[#allocation4 + $0xa0] sm:$0xff] %vm2237_vm3, %v22794_v0  ;;  %8681 = vst.msk [vmem:[#allocation4 + $0xb0] sm:$0xff] %vm2237_vm3, %v22794_v0 }
  0x5b   :  { %8680 = vst.msk [vmem:[#allocation4 + $0xa8] sm:$0x3] %vm2239_vm4, %v22794_v0  ;;  %8682 = vst.msk [vmem:[#allocation4 + $0xb8] sm:$0x3] %vm2239_vm4, %v22794_v0 }
  0x5c   :  { %15590 = vmatmul.mubr.msk.f32.vlgmr.msra.gmra.mxu0 %vm100_vm0, %v588_v56  ;;  %8683 = vst.msk [vmem:[#allocation4 + $0xc0] sm:$0xff] %vm2237_vm3, %v22794_v0  ;;  %8685 = vst.msk [vmem:[#allocation4 + $0xd0] sm:$0xff] %vm2237_vm3, %v22794_v0 }
  0x5d   :  { %15616 = vmatmul.mubr.msk.f32.vlgmr.msra.gmra.mxu1 %vm100_vm0, %v17379_v25  ;;  %15592 = vmatprep.mubr.msk.f32.mxu0 %vm100_vm0, %v17494_v57  ;;  %8684 = vst.msk [vmem:[#allocation4 + $0xc8] sm:$0x3] %vm2239_vm4, %v22794_v0  ;;  %8686 = vst.msk [vmem:[#allocation4 + $0xd8] sm:$0x3] %vm2239_vm4, %v22794_v0 }
  0x5e   :  { %15618 = vmatprep.mubr.msk.f32.mxu1 %vm100_vm0, %v17387_v27  ;;  %15640 = vmatpush3.msk.msra.mxu0 %vm242_vm2, %v1064_v38  ;;  %8687 = vst.msk [vmem:[#allocation4 + $0xe0] sm:$0xff] %vm2237_vm3, %v22794_v0  ;;  %8689 = vst.msk [vmem:[#allocation4 + $0xf0] sm:$0xff] %vm2237_vm3, %v22794_v0 }
  0x5f   :  { %15666 = vmatpush3.msk.msra.mxu1 %vm242_vm2, %v1294_v44  ;;  %15691 = vmatprep.subr.msk.mxu0 %vm242_vm2, %v1525_v58  ;;  %8688 = vst.msk [vmem:[#allocation4 + $0xe8] sm:$0x3] %vm2239_vm4, %v22794_v0  ;;  %8690 = vst.msk [vmem:[#allocation4 + $0xf8] sm:$0x3] %vm2239_vm4, %v22794_v0  ;;  %v2312_v44 = vld [vmem:[%s22779_s5] sm:$0xff] }
  0x60   :  { %15717 = vmatprep.subr.msk.mxu1 %vm242_vm2, %v1755_v59  ;;  %15593 = vmatmul.mubr.msk.f32.gmra.mxu0 %vm100_vm0, %v17501_v60  ;;  %8691 = vst.msk [vmem:[#allocation4 + $0x100] sm:$0xff] %vm2237_vm3, %v22794_v0  ;;  %8693 = vst.msk [vmem:[#allocation4 + $0x110] sm:$0xff] %vm2237_vm3, %v22794_v0 }
  0x61   :  { %15619 = vmatmul.mubr.msk.f32.gmra.mxu1 %vm100_vm0, %v17391_v29  ;;  %15595 = vmatprep.mubr.msk.f32.mxu0 %vm100_vm0, %v17505_v61  ;;  %8692 = vst.msk [vmem:[#allocation4 + $0x108] sm:$0x3] %vm2239_vm4, %v22794_v0  ;;  %8694 = vst.msk [vmem:[#allocation4 + $0x118] sm:$0x3] %vm2239_vm4, %v22794_v0 }
  0x62   :  { %15621 = vmatprep.mubr.msk.f32.mxu1 %vm100_vm0, %v17405_v31  ;;  %8695 = vst.msk [vmem:[#allocation4 + $0x120] sm:$0xff] %vm2237_vm3, %v22794_v0  ;;  %8697 = vst.msk [vmem:[#allocation4 + $0x130] sm:$0xff] %vm2237_vm3, %v22794_v0 }
  0x63   :  { %8696 = vst.msk [vmem:[#allocation4 + $0x128] sm:$0x3] %vm2239_vm4, %v22794_v0  ;;  %8698 = vst.msk [vmem:[#allocation4 + $0x138] sm:$0x3] %vm2239_vm4, %v22794_v0 }
  0x64   :  { %15596 = vmatmul.mubr.msk.f32.gmra.mxu0 %vm100_vm0, %v17517_v62 }
  0x65   :  { %15622 = vmatmul.mubr.msk.f32.gmra.mxu1 %vm100_vm0, %v17409_v33  ;;  %15598 = vmatprep.mubr.msk.f32.mxu0 %vm100_vm0, %v17521_v63 }
  0x66   :  { %15624 = vmatprep.mubr.msk.f32.mxu1 %vm100_vm0, %v17421_v35 }
  0x68   :  { %15599 = vmatmul.mubr.msk.f32.gmra.mxu0 %vm100_vm0, %v17529_v1 }
  0x69   :  { %15625 = vmatmul.mubr.msk.f32.gmra.mxu1 %vm100_vm0, %v17533_v2  ;;  %15601 = vmatprep.mubr.msk.f32.mxu0 %vm100_vm0, %v595_v3 }
  0x6a   :  { %15627 = vmatprep.mubr.msk.f32.mxu1 %vm100_vm0, %v17431_v40 }
  0x6c   :  { %15602 = vmatmul.mubr.msk.f32.gmra.mxu0 %vm100_vm0, %v596_v4 }
  0x6d   :  { %15628 = vmatmul.mubr.msk.f32.gmra.mxu1 %vm100_vm0, %v17435_v42  ;;  %15604 = vmatprep.mubr.msk.f32.mxu0 %vm100_vm0, %v17542_v5 }
  0x6e   :  { %15630 = vmatprep.mubr.msk.f32.mxu1 %vm100_vm0, %v17453_v46 }
  0x70   :  { %15605 = vmatmul.mubr.msk.f32.gmra.mxu0 %vm100_vm0, %v17549_v6 }
  0x71   :  { %15631 = vmatmul.mubr.msk.f32.gmra.mxu1 %vm100_vm0, %v17457_v48  ;;  %15607 = vmatprep.mubr.msk.f32.mxu0 %vm100_vm0, %v17553_v7 }
  0x72   :  { %15633 = vmatprep.mubr.msk.f32.mxu1 %vm100_vm0, %v17469_v50 }
  0x74   :  { %15608 = vmatmul.mubr.msk.f32.gmra.mxu0 %vm100_vm0, %v17561_v8 }
  0x75   :  { %15634 = vmatmul.mubr.msk.f32.gmra.mxu1 %vm100_vm0, %v17473_v52  ;;  %15610 = vmatprep.mubr.msk.f32.mxu0 %vm100_vm0, %v17565_v9 }
  0x76   :  { %15636 = vmatprep.mubr.msk.f32.mxu1 %vm100_vm0, %v17485_v54 }
  0x78   :  { %15611 = vmatmul.mubr.msk.f32.gmra.mxu0 %vm100_vm0, %v17573_v10 }
  0x79   :  { %15637 = vmatmul.mubr.msk.f32.gmra.mxu1 %vm100_vm0, %v17577_v11  ;;  %15641 = vmatprep.mubr.msk.f32.mxu0 %vm100_vm0, %v17367_v22  ;;  %v1983_v22 = vld [vmem:[#allocation2 + $0x132] sm:$0xff] }
  0x7a   :  { %15667 = vmatprep.mubr.msk.f32.mxu1 %vm100_vm0, %v588_v56 }
  0x7c   :  { %15642 = vmatmul.mubr.msk.f32.vlgmr.msra.gmra.mxu0 %vm100_vm0, %v17377_v24 }
  0x7d   :  { %15668 = vmatmul.mubr.msk.f32.vlgmr.msra.gmra.mxu1 %vm100_vm0, %v17494_v57  ;;  %15644 = vmatprep.mubr.msk.f32.mxu0 %vm100_vm0, %v17385_v26 }
  0x7e   :  { %15670 = vmatprep.mubr.msk.f32.mxu1 %vm100_vm0, %v17501_v60  ;;  %15692 = vmatpush3.msk.msra.mxu0 %vm242_vm2, %v1525_v58 }
  0x7f   :  { %15718 = vmatpush3.msk.msra.mxu1 %vm242_vm2, %v1755_v59  ;;  %15743 = vmatprep.subr.msk.mxu0 %vm242_vm2, %v1985_v12 }
  0x80   :  { %15645 = vmatmul.mubr.msk.f32.gmra.mxu0 %vm100_vm0, %v17389_v28 }
  0x81   :  { %15671 = vmatmul.mubr.msk.f32.gmra.mxu1 %vm100_vm0, %v17505_v61  ;;  %15647 = vmatprep.mubr.msk.f32.mxu0 %vm100_vm0, %v17403_v30 }
  0x82   :  { %15673 = vmatprep.mubr.msk.f32.mxu1 %vm100_vm0, %v17517_v62 }
  0x84   :  { %15648 = vmatmul.mubr.msk.f32.gmra.mxu0 %vm100_vm0, %v17407_v32 }
  0x85   :  { %15674 = vmatmul.mubr.msk.f32.gmra.mxu1 %vm100_vm0, %v17521_v63  ;;  %15650 = vmatprep.mubr.msk.f32.mxu0 %vm100_vm0, %v17419_v34 }
  0x86   :  { %15676 = vmatprep.mubr.msk.f32.mxu1 %vm100_vm0, %v17529_v1 }
  0x88   :  { %15651 = vmatmul.mubr.msk.f32.gmra.mxu0 %vm100_vm0, %v1054_v13 }
  0x89   :  { %15677 = vmatmul.mubr.msk.f32.gmra.mxu1 %vm100_vm0, %v17613_v14  ;;  %15653 = vmatprep.mubr.msk.f32.mxu0 %vm100_vm0, %v17429_v39 }
  0x8a   :  { %15679 = vmatprep.mubr.msk.f32.mxu1 %vm100_vm0, %v596_v4 }
  0x8c   :  { %15654 = vmatmul.mubr.msk.f32.gmra.mxu0 %vm100_vm0, %v17433_v41 }
  0x8d   :  { %15680 = vmatmul.mubr.msk.f32.gmra.mxu1 %vm100_vm0, %v17542_v5  ;;  %15656 = vmatprep.mubr.msk.f32.mxu0 %vm100_vm0, %v17451_v45 }
  0x8e   :  { %15682 = vmatprep.mubr.msk.f32.mxu1 %vm100_vm0, %v17549_v6 }
  0x90   :  { %15657 = vmatmul.mubr.msk.f32.gmra.mxu0 %vm100_vm0, %v17455_v47 }
  0x91   :  { %15683 = vmatmul.mubr.msk.f32.gmra.mxu1 %vm100_vm0, %v17553_v7  ;;  %15659 = vmatprep.mubr.msk.f32.mxu0 %vm100_vm0, %v17467_v49 }
  0x92   :  { %15685 = vmatprep.mubr.msk.f32.mxu1 %vm100_vm0, %v17561_v8 }
  0x94   :  { %15660 = vmatmul.mubr.msk.f32.gmra.mxu0 %vm100_vm0, %v17471_v51 }
  0x95   :  { %15686 = vmatmul.mubr.msk.f32.gmra.mxu1 %vm100_vm0, %v17565_v9  ;;  %15662 = vmatprep.mubr.msk.f32.mxu0 %vm100_vm0, %v17483_v53 }
  0x96   :  { %15688 = vmatprep.mubr.msk.f32.mxu1 %vm100_vm0, %v17573_v10 }
  0x98   :  { %15663 = vmatmul.mubr.msk.f32.gmra.mxu0 %vm100_vm0, %v1062_v15 }
  0x99   :  { %15689 = vmatmul.mubr.msk.f32.gmra.mxu1 %vm100_vm0, %v1292_v16  ;;  %15693 = vmatprep.mubr.msk.f32.mxu0 %vm100_vm0, %v17379_v25 }
  0x9a   :  { %15719 = vmatprep.mubr.msk.f32.mxu1 %vm100_vm0, %v17377_v24 }
  0x9c   :  { %15694 = vmatmul.mubr.msk.f32.vlgmr.msra.gmra.mxu0 %vm100_vm0, %v17387_v27 }
  0x9d   :  { %15720 = vmatmul.mubr.msk.f32.vlgmr.msra.gmra.mxu1 %vm100_vm0, %v17385_v26  ;;  %15696 = vmatprep.mubr.msk.f32.mxu0 %vm100_vm0, %v17391_v29 }
  0x9e   :  { %15722 = vmatprep.mubr.msk.f32.mxu1 %vm100_vm0, %v17389_v28  ;;  %15744 = vmatpush3.msk.msra.mxu0 %vm242_vm2, %v1985_v12  ;;  %v17956_v12 = vld [vmem:[%s22779_s5 + $0x10] sm:$0xff] }
  0x9f   :  { %15795 = vmatprep.subr.mxu0 %v2312_v44  ;;  %22844 = vst [vmem:[#allocation11_spill] sm:$0xff] %v17956_v12 }
  0xa0   :  { %15697 = vmatmul.mubr.msk.f32.gmra.mxu0 %vm100_vm0, %v17405_v31 }
  0xa1   :  { %15723 = vmatmul.mubr.msk.f32.gmra.mxu1 %vm100_vm0, %v17403_v30  ;;  %15699 = vmatprep.mubr.msk.f32.mxu0 %vm100_vm0, %v17409_v33  ;;  %v13682_v33 = vld [vmem:[%s22779_s5 + $0x8] sm:$0xff] }
  0xa2   :  { %15725 = vmatprep.mubr.msk.f32.mxu1 %vm100_vm0, %v17407_v32  ;;  %15769 = vmatprep.subr.mxu1 %v13682_v33 }
  0xa3   :  { %15770 = vmatpush3.msra.mxu1 %v13682_v33 }
  0xa4   :  { %15700 = vmatmul.mubr.msk.f32.gmra.mxu0 %vm100_vm0, %v17421_v35  ;;  %15821 = vmatprep.subr.mxu1 %v17956_v12 }
  0xa5   :  { %15726 = vmatmul.mubr.msk.f32.gmra.mxu1 %vm100_vm0, %v17419_v34  ;;  %15702 = vmatprep.mubr.msk.f32.mxu0 %vm100_vm0, %v17533_v2 }
  0xa6   :  { %15728 = vmatprep.mubr.msk.f32.mxu1 %vm100_vm0, %v1054_v13 }
  0xa8   :  { %15703 = vmatmul.mubr.msk.f32.gmra.mxu0 %vm100_vm0, %v1515_v17 }
  0xa9   :  { %15729 = vmatmul.mubr.msk.f32.gmra.mxu1 %vm100_vm0, %v1745_v18  ;;  %15705 = vmatprep.mubr.msk.f32.mxu0 %vm100_vm0, %v17435_v42 }
  0xaa   :  { %15731 = vmatprep.mubr.msk.f32.mxu1 %vm100_vm0, %v17433_v41 }
  0xac   :  { %15706 = vmatmul.mubr.msk.f32.gmra.mxu0 %vm100_vm0, %v17453_v46  ;;  %v2296_v46 = vld [vmem:[#allocation3] sm:$0xff] }
  0xad   :  { %15732 = vmatmul.mubr.msk.f32.gmra.mxu1 %vm100_vm0, %v17451_v45  ;;  %15708 = vmatprep.mubr.msk.f32.mxu0 %vm100_vm0, %v17457_v48  ;;  %v2313_v45 = vld [vmem:[#allocation3 + $0x1] sm:$0xff] }
  0xae   :  { %15734 = vmatprep.mubr.msk.f32.mxu1 %vm100_vm0, %v17455_v47 }
  0xb0   :  { %15709 = vmatmul.mubr.msk.f32.gmra.mxu0 %vm100_vm0, %v17469_v50 }
  0xb1   :  { %15735 = vmatmul.mubr.msk.f32.gmra.mxu1 %vm100_vm0, %v17467_v49  ;;  %15711 = vmatprep.mubr.msk.f32.mxu0 %vm100_vm0, %v17473_v52 }
  0xb2   :  { %15737 = vmatprep.mubr.msk.f32.mxu1 %vm100_vm0, %v17471_v51 }
  0xb4   :  { %15712 = vmatmul.mubr.msk.f32.gmra.mxu0 %vm100_vm0, %v17485_v54 }
  0xb5   :  { %15738 = vmatmul.mubr.msk.f32.gmra.mxu1 %vm100_vm0, %v17483_v53  ;;  %15714 = vmatprep.mubr.msk.f32.mxu0 %vm100_vm0, %v17577_v11 }
  0xb6   :  { %15740 = vmatprep.mubr.msk.f32.mxu1 %vm100_vm0, %v1062_v15 }
  0xb8   :  { %15715 = vmatmul.mubr.msk.f32.gmra.mxu0 %vm100_vm0, %v1523_v19 }
  0xb9   :  { %15741 = vmatmul.mubr.msk.f32.gmra.mxu1 %vm100_vm0, %v1753_v20  ;;  %15745 = vmatprep.mubr.msk.f32.mxu0 %vm100_vm0, %v17494_v57 }
  0xba   :  { %15771 = vmatprep.mubr.msk.f32.mxu1 %vm2237_vm3, %v2313_v45 }
  0xbc   :  { %15746 = vmatmul.mubr.msk.f32.vlgmr.msra.gmra.mxu0 %vm100_vm0, %v17501_v60 }
  0xbd   :  { %15748 = vmatprep.mubr.msk.f32.mxu0 %vm100_vm0, %v17505_v61  ;;  %15796 = vmatpush3.msra.mxu0 %v2312_v44 }
  0xc0   :  { %15749 = vmatmul.mubr.msk.f32.gmra.mxu0 %vm100_vm0, %v17517_v62 }
  0xc1   :  { %15751 = vmatprep.mubr.msk.f32.mxu0 %vm100_vm0, %v17521_v63 }
  0xc4   :  { %15752 = vmatmul.mubr.msk.f32.gmra.mxu0 %vm100_vm0, %v17529_v1 }
  0xc5   :  { %15754 = vmatprep.mubr.msk.f32.mxu0 %vm100_vm0, %v17613_v14 }
  0xc8   :  { %15755 = vmatmul.mubr.msk.f32.gmra.mxu0 %vm100_vm0, %v1975_v21 }
  0xc9   :  { %15757 = vmatprep.mubr.msk.f32.mxu0 %vm100_vm0, %v17542_v5 }
  0xcc   :  { %15758 = vmatmul.mubr.msk.f32.gmra.mxu0 %vm100_vm0, %v17549_v6 }
  0xcd   :  { %15760 = vmatprep.mubr.msk.f32.mxu0 %vm100_vm0, %v17553_v7 }
  0xd0   :  { %15761 = vmatmul.mubr.msk.f32.gmra.mxu0 %vm100_vm0, %v17561_v8 }
  0xd1   :  { %15763 = vmatprep.mubr.msk.f32.mxu0 %vm100_vm0, %v17565_v9 }
  0xd4   :  { %15764 = vmatmul.mubr.msk.f32.gmra.mxu0 %vm100_vm0, %v17573_v10 }
  0xd5   :  { %15766 = vmatprep.mubr.msk.f32.mxu0 %vm100_vm0, %v1292_v16 }
  0xd8   :  { %15767 = vmatmul.mubr.msk.f32.gmra.mxu0 %vm100_vm0, %v1983_v22 }
  0xd9   :  { %15797 = vmatprep.mubr.msk.f32.mxu0 %vm2237_vm3, %v2296_v46 }
  0xfc   :  { %v15539_v23 = vpop.f32.mrf.mxu0 }
  0xfd   :  { %v15565_v24 = vpop.f32.mrf.mxu1 }
  0xfe   :  { %v17735_v25 = vadd.f32 %v15565_v24, %v15539_v23  ;;  %v17737_v26 = vpop.f32.mrf.mxu0 }
  0xff   :  { %v17739_v27 = vpop.f32.mrf.mxu1 }
 0x100   :  { %v15542_v28 = vpop.f32.mrf.mxu0 }
 0x101   :  { %v15568_v29 = vpop.f32.mrf.mxu1 }
 0x102   :  { %v17741_v30 = vadd.f32 %v15568_v29, %v15542_v28  ;;  %v17743_v31 = vpop.f32.mrf.mxu0  ;;  %v17984_v28 = vld [vmem:[#allocation3 + $0x2] sm:$0xff] }
 0x103   :  { %v17745_v32 = vpop.f32.mrf.mxu1  ;;  %22846 = vst [vmem:[#allocation13_spill] sm:$0xff] %v17984_v28  ;;  %4369 = vst.msk [vmem:[#allocation3] sm:$0xff] %vm2237_vm3, %v22794_v0 }
 0x104   :  { %v15545_v34 = vpop.f32.mrf.mxu0  ;;  %4370 = vst.msk [vmem:[#allocation3 + $0x8] sm:$0x3] %vm2239_vm4, %v22794_v0 }
 0x105   :  { %v15571_v35 = vpop.f32.mrf.mxu1 }
 0x106   :  { %v534_v36 = vadd.f32 %v15571_v35, %v15545_v34  ;;  %v17910_v37 = vpop.f32.mrf.mxu0 }
 0x107   :  { %v17912_v38 = vpop.f32.mrf.mxu1 }
 0x108   :  { %v15548_v39 = vpop.f32.mrf.mxu0 }
 0x109   :  { %v15574_v40 = vpop.f32.mrf.mxu1 }
 0x10a   :  { %v544_v41 = vadd.f32 %v15574_v40, %v15548_v39  ;;  %v17914_v42 = vpop.f32.mrf.mxu0 }
 0x10b   :  { %v17916_v43 = vpop.f32.mrf.mxu1 }
 0x10c   :  { %v15551_v47 = vpop.f32.mrf.mxu0 }
 0x10d   :  { %v15577_v48 = vpop.f32.mrf.mxu1 }
 0x10e   :  { %v554_v49 = vadd.f32 %v15577_v48, %v15551_v47  ;;  %v17923_v50 = vpop.f32.mrf.mxu0 }
 0x10f   :  { %v17925_v51 = vpop.f32.mrf.mxu1 }
 0x110   :  { %v15554_v52 = vpop.f32.mrf.mxu0 }
 0x111   :  { %v15580_v53 = vpop.f32.mrf.mxu1 }
 0x112   :  { %v564_v54 = vadd.f32 %v15580_v53, %v15554_v52  ;;  %v17927_v55 = vpop.f32.mrf.mxu0 }
 0x113   :  { %v17929_v56 = vpop.f32.mrf.mxu1 }
 0x114   :  { %v15557_v57 = vpop.f32.mrf.mxu0 }
 0x115   :  { %v15583_v58 = vpop.f32.mrf.mxu1 }
 0x116   :  { %v574_v59 = vadd.f32 %v15583_v58, %v15557_v57  ;;  %v17931_v60 = vpop.f32.mrf.mxu0 }
 0x117   :  { %v17933_v61 = vpop.f32.mrf.mxu1 }
 0x118   :  { %v15560_v62 = vpop.f32.mrf.mxu0 }
 0x119   :  { %v15586_v63 = vpop.f32.mrf.mxu1 }
 0x11a   :  { %v584_v1 = vadd.f32 %v15586_v63, %v15560_v62  ;;  %v17935_v2 = vpop.f32.mrf.mxu0  ;;  %v18023_v62 = vld [vmem:[#allocation3 + $0xa1] sm:$0xff] }
 0x11b   :  { %v17937_v3 = vpop.f32.mrf.mxu1  ;;  %22859 = vst [vmem:[#allocation26_spill] sm:$0xff] %v18023_v62  ;;  %v18025_v63 = vld [vmem:[#allocation3 + $0xa0] sm:$0xff] }
 0x11c   :  { %v15591_v4 = vpop.f32.mrf.mxu0  ;;  %22860 = vst [vmem:[#allocation27_spill] sm:$0xff] %v18025_v63 }
 0x11d   :  { %v17939_v5 = vpop.f32.mrf.mxu1  ;;  %v17942_v6 = vadd.f32 %v15591_v4, %v17735_v25  ;;  %v17982_v25 = vld [vmem:[%s22779_s5 + $0x18] sm:$0xff]  ;;  %v18027_v4 = vld [vmem:[#allocation3 + $0xa2] sm:$0xff] }
 0x11e   :  { %v17944_v7 = vpop.f32.mrf.mxu0  ;;  %22845 = vst [vmem:[#allocation12_spill] sm:$0xff] %v17982_v25  ;;  %15847 = vmatprep.subr.mxu0 %v17982_v25  ;;  %22861 = vst [vmem:[#allocation28_spill] sm:$0xff] %v18027_v4 }
 0x11f   :  { %v17946_v8 = vpop.f32.mrf.mxu1  ;;  %4389 = vst.msk [vmem:[#allocation3 + $0xa0] sm:$0xff] %vm2237_vm3, %v22794_v0 }
 0x120   :  { %v15594_v9 = vpop.f32.mrf.mxu0  ;;  %4390 = vst.msk [vmem:[#allocation3 + $0xa8] sm:$0x3] %vm2239_vm4, %v22794_v0 }
 0x121   :  { %v17948_v10 = vpop.f32.mrf.mxu1  ;;  %v17951_v11 = vadd.f32 %v15594_v9, %v17741_v30 }
 0x122   :  { %v17958_v13 = vpop.f32.mrf.mxu0 }
 0x123   :  { %v17960_v14 = vpop.f32.mrf.mxu1 }
 0x124   :  { %v15597_v15 = vpop.f32.mrf.mxu0 }
 0x125   :  { %v17963_v16 = vpop.f32.mrf.mxu1  ;;  %v17965_v17 = vadd.f32 %v15597_v15, %v534_v36 }
 0x126   :  { %v17967_v18 = vpop.f32.mrf.mxu0 }
 0x127   :  { %v17969_v19 = vpop.f32.mrf.mxu1 }
 0x128   :  { %v15600_v20 = vpop.f32.mrf.mxu0 }
 0x129   :  { %v17971_v21 = vpop.f32.mrf.mxu1  ;;  %v17973_v22 = vadd.f32 %v15600_v20, %v544_v41 }
 0x12a   :  { %v17975_v23 = vpop.f32.mrf.mxu0 }
 0x12b   :  { %v17977_v24 = vpop.f32.mrf.mxu1 }
 0x12c   :  { %v15603_v29 = vpop.f32.mrf.mxu0 }
 0x12d   :  { %v17991_v30 = vpop.f32.mrf.mxu1  ;;  %v17993_v33 = vadd.f32 %v15603_v29, %v554_v49 }
 0x12e   :  { %v17995_v34 = vpop.f32.mrf.mxu0 }
 0x12f   :  { %v17997_v35 = vpop.f32.mrf.mxu1 }
 0x130   :  { %22847 = vst [vmem:[#allocation14_spill] sm:$0xff] %v17997_v35  ;;  %v15606_v36 = vpop.f32.mrf.mxu0 }
 0x131   :  { %v17999_v39 = vpop.f32.mrf.mxu1  ;;  %v18001_v40 = vadd.f32 %v15606_v36, %v564_v54 }
 0x132   :  { %22848 = vst [vmem:[#allocation15_spill] sm:$0xff] %v17999_v39  ;;  %v18003_v41 = vpop.f32.mrf.mxu0 }
 0x133   :  { %22849 = vst [vmem:[#allocation16_spill] sm:$0xff] %v18001_v40  ;;  %v18005_v44 = vpop.f32.mrf.mxu1 }
 0x134   :  { %22850 = vst [vmem:[#allocation17_spill] sm:$0xff] %v18005_v44  ;;  %v15609_v45 = vpop.f32.mrf.mxu0 }
 0x135   :  { %v18007_v46 = vpop.f32.mrf.mxu1  ;;  %v18009_v47 = vadd.f32 %v15609_v45, %v574_v59 }
 0x136   :  { %22851 = vst [vmem:[#allocation18_spill] sm:$0xff] %v18007_v46  ;;  %v18011_v48 = vpop.f32.mrf.mxu0 }
 0x137   :  { %22852 = vst [vmem:[#allocation19_spill] sm:$0xff] %v18009_v47  ;;  %22853 = vst [vmem:[#allocation20_spill] sm:$0xff] %v18011_v48  ;;  %v18013_v49 = vpop.f32.mrf.mxu1 }
 0x138   :  { %22854 = vst [vmem:[#allocation21_spill] sm:$0xff] %v18013_v49  ;;  %v15612_v52 = vpop.f32.mrf.mxu0 }
 0x139   :  { %v18015_v53 = vpop.f32.mrf.mxu1  ;;  %v18017_v57 = vadd.f32 %v15612_v52, %v584_v1 }
 0x13a   :  { %22855 = vst [vmem:[#allocation22_spill] sm:$0xff] %v18015_v53  ;;  %v18019_v54 = vpop.f32.mrf.mxu0 }
 0x13b   :  { %22856 = vst [vmem:[#allocation23_spill] sm:$0xff] %v18017_v57  ;;  %22857 = vst [vmem:[#allocation24_spill] sm:$0xff] %v18019_v54  ;;  %v18021_v58 = vpop.f32.mrf.mxu1 }
 0x13c   :  { %22858 = vst [vmem:[#allocation25_spill] sm:$0xff] %v18021_v58  ;;  %v15643_v59 = vpop.f32.mrf.mxu0 }
 0x13d   :  { %v18033_v9 = vpop.f32.mrf.mxu1 }
 0x13e   :  { %v1182_v1 = vpop.f32.mrf.mxu0 }
 0x13f   :  { %v18035_v15 = vpop.f32.mrf.mxu1 }
 0x140   :  { %v15646_v20 = vpop.f32.mrf.mxu0 }
 0x141   :  { %v18037_v29 = vpop.f32.mrf.mxu1 }
 0x142   :  { %v18039_v36 = vpop.f32.mrf.mxu0 }
 0x143   :  { %v18041_v45 = vpop.f32.mrf.mxu1 }
 0x144   :  { %v18043_v52 = vpop.f32.mrf.mxu0 }
 0x145   :  { %v18045_v4 = vpop.f32.mrf.mxu1 }
 0x146   :  { %v18047_v28 = vpop.f32.mrf.mxu0 }
 0x147   :  { %v18049_v0 = vpop.f32.mrf.mxu1 }
 0x148   :  { %22862 = vst [vmem:[#allocation29_spill] sm:$0xff] %v18049_v0  ;;  %v18051_v63 = vpop.f32.mrf.mxu0 }
 0x149   :  { %v18053_v62 = vpop.f32.mrf.mxu1 }
 0x14a   :  { %22863 = vst [vmem:[#allocation30_spill] sm:$0xff] %v18053_v62  ;;  %v18055_v25 = vpop.f32.mrf.mxu0 }
 0x14b   :  { %22864 = vst [vmem:[#allocation31_spill] sm:$0xff] %v18055_v25  ;;  %v18057_v12 = vpop.f32.mrf.mxu1  ;;  %v509_v25 = vadd.f32 %v17739_v27, %v17737_v26 }
 0x14c   :  { %22865 = vst [vmem:[#allocation32_spill] sm:$0xff] %v18057_v12  ;;  %v18059_v58 = vpop.f32.mrf.mxu0 }
 0x14d   :  { %22866 = vst [vmem:[#allocation33_spill] sm:$0xff] %v18059_v58  ;;  %v18061_v53 = vpop.f32.mrf.mxu1  ;;  %v801_v35 = vadd.f32 %v17944_v7, %v509_v25  ;;  %v529_v7 = vadd.f32 %v17912_v38, %v17910_v37  ;;  %v539_v37 = vadd.f32 %v17916_v43, %v17914_v42  ;;  %v1036_v38 = vadd.f32 %v17963_v16, %v17965_v17 }
 0x14e   :  { %22867 = vst [vmem:[#allocation34_spill] sm:$0xff] %v18061_v53  ;;  %v18063_v57 = vpop.f32.mrf.mxu0  ;;  %v559_v16 = vadd.f32 %v17929_v56, %v17927_v55  ;;  %v18169_v55 = vadd.f32 %v17937_v3, %v17935_v2  ;;  %v1040_v2 = vadd.f32 %v17991_v30, %v17993_v33 }
 0x14f   :  { %22868 = vst [vmem:[#allocation35_spill] sm:$0xff] %v18063_v57  ;;  %v18065_v54 = vpop.f32.mrf.mxu1  ;;  %v1266_v42 = vadd.f32 %v18043_v52, %v1036_v38 }
 0x150   :  { %22869 = vst [vmem:[#allocation36_spill] sm:$0xff] %v18065_v54  ;;  %v18067_v49 = vpop.f32.mrf.mxu0 }
 0x151   :  { %22870 = vst [vmem:[#allocation37_spill] sm:$0xff] %v18067_v49  ;;  %v18069_v46 = vpop.f32.mrf.mxu1 }
 0x152   :  { %22871 = vst [vmem:[#allocation38_spill] sm:$0xff] %v18069_v46  ;;  %v18071_v47 = vpop.f32.mrf.mxu0 }
 0x153   :  { %22872 = vst [vmem:[#allocation39_spill] sm:$0xff] %v18071_v47  ;;  %v18073_v48 = vpop.f32.mrf.mxu1 }
 0x154   :  { %22873 = vst [vmem:[#allocation40_spill] sm:$0xff] %v18073_v48  ;;  %v18075_v62 = vpop.f32.mrf.mxu0 }
 0x155   :  { %22874 = vst [vmem:[#allocation41_spill] sm:$0xff] %v18075_v62  ;;  %v18077_v44 = vpop.f32.mrf.mxu1 }
 0x156   :  { %22875 = vst [vmem:[#allocation42_spill] sm:$0xff] %v18077_v44  ;;  %v18079_v12 = vpop.f32.mrf.mxu0 }
 0x157   :  { %22876 = vst [vmem:[#allocation43_spill] sm:$0xff] %v18079_v12  ;;  %v18081_v58 = vpop.f32.mrf.mxu1 }
 0x158   :  { %22877 = vst [vmem:[#allocation44_spill] sm:$0xff] %v18081_v58  ;;  %v18083_v53 = vpop.f32.mrf.mxu0 }
 0x159   :  { %22878 = vst [vmem:[#allocation45_spill] sm:$0xff] %v18083_v53  ;;  %v18085_v57 = vpop.f32.mrf.mxu1 }
 0x15a   :  { %22879 = vst [vmem:[#allocation46_spill] sm:$0xff] %v18085_v57  ;;  %v18087_v54 = vpop.f32.mrf.mxu0 }
 0x15b   :  { %22880 = vst [vmem:[#allocation47_spill] sm:$0xff] %v18087_v54  ;;  %v18089_v49 = vpop.f32.mrf.mxu1 }
 0x15c   :  { %22881 = vst [vmem:[#allocation48_spill] sm:$0xff] %v18089_v49  ;;  %v15695_v46 = vpop.f32.mrf.mxu0 }
 0x15d   :  { %v15721_v47 = vpop.f32.mrf.mxu1 }
 0x15e   :  { %v1643_v39 = vpop.f32.mrf.mxu0 }
 0x15f   :  { %v18091_v48 = vpop.f32.mrf.mxu1 }
 0x160   :  { %v15698_v62 = vpop.f32.mrf.mxu0 }
 0x161   :  { %v18093_v44 = vpop.f32.mrf.mxu1 }
 0x162   :  { %v1653_v40 = vpop.f32.mrf.mxu0  ;;  %22882 = vst [vmem:[#allocation49_spill] sm:$0xff] %v18093_v44 }
 0x163   :  { %v18097_v58 = vpop.f32.mrf.mxu1 }
 0x164   :  { %v18095_v12 = vpop.f32.mrf.mxu0  ;;  %22884 = vst [vmem:[#allocation51_spill] sm:$0xff] %v18097_v58  ;;  %v519_v58 = vadd.f32 %v17745_v32, %v17743_v31  ;;  %v1034_v31 = vadd.f32 %v17948_v10, %v17951_v11 }
 0x165   :  { %22883 = vst [vmem:[#allocation50_spill] sm:$0xff] %v18095_v12  ;;  %v18103_v54 = vpop.f32.mrf.mxu1 }
 0x166   :  { %v18099_v53 = vpop.f32.mrf.mxu0  ;;  %22886 = vst [vmem:[#allocation53_spill] sm:$0xff] %v18103_v54  ;;  %v803_v26 = vadd.f32 %v17958_v13, %v519_v58 }
 0x167   :  { %v18112_v44 = vpop.f32.mrf.mxu1 }
 0x168   :  { %v18101_v57 = vpop.f32.mrf.mxu0 }
 0x169   :  { %22885 = vst [vmem:[#allocation52_spill] sm:$0xff] %v18101_v57  ;;  %v1032_v57 = vadd.f32 %v17939_v5, %v17942_v6  ;;  %v18126_v25 = vpop.f32.mrf.mxu1  ;;  %v805_v5 = vadd.f32 %v17967_v18, %v529_v7  ;;  %v22894_v7 = vld [vmem:[#allocation15_spill] sm:$0xff] }
 0x16a   :  { %v18105_v49 = vpop.f32.mrf.mxu0 }
 0x16b   :  { %22887 = vst [vmem:[#allocation54_spill] sm:$0xff] %v18105_v49  ;;  %v1031_v49 = vadd.f32 %v17946_v8, %v801_v35  ;;  %v1262_v27 = vadd.f32 %v15643_v59, %v1032_v57  ;;  %v1033_v8 = vadd.f32 %v17960_v14, %v803_v26  ;;  %v1264_v35 = vadd.f32 %v15646_v20, %v1034_v31  ;;  %v18141_v57 = vpop.f32.mrf.mxu1 }
 0x16c   :  { %v18109_v0 = vpop.f32.mrf.mxu0  ;;  %v549_v14 = vadd.f32 %v17925_v51, %v17923_v50  ;;  %v807_v59 = vadd.f32 %v17975_v23, %v539_v37  ;;  %v1038_v50 = vadd.f32 %v17971_v21, %v17973_v22  ;;  %v1496_v21 = vadd.f32 %v18045_v4, %v1266_v42  ;;  %v22891_v4 = vld [vmem:[#allocation31_spill] sm:$0xff]  ;;  %v22902_v42 = vld [vmem:[#allocation20_spill] sm:$0xff] }
 0x16d   :  { %22888 = vst [vmem:[#allocation55_spill] sm:$0xff] %v18109_v0  ;;  %v1261_v32 = vadd.f32 %v1182_v1, %v1031_v49  ;;  %v1492_v13 = vadd.f32 %v18033_v9, %v1262_v27  ;;  %v1263_v11 = vadd.f32 %v18039_v36, %v1033_v8  ;;  %v1035_v49 = vadd.f32 %v17969_v19, %v805_v5  ;;  %v18163_v23 = vpop.f32.mrf.mxu1  ;;  %v22893_v27 = vld [vmem:[#allocation16_spill] sm:$0xff]  ;;  %v22898_v8 = vld [vmem:[#allocation30_spill] sm:$0xff] }
 0x16e   :  { %v18114_v12 = vpop.f32.mrf.mxu0  ;;  %v1494_v17 = vadd.f32 %v18037_v29, %v1264_v35  ;;  %v809_v51 = vadd.f32 %v17995_v34, %v549_v14  ;;  %v1268_v22 = vadd.f32 %v18051_v63, %v1038_v50  ;;  %v18179_v34 = vld [vmem:[%s22778_s4] ss:$0 sm:$0xff]  ;;  %v22892_v63 = vld [vmem:[#allocation50_spill] sm:$0xff]  ;;  %v1042_v31 = vadd.f32 %v22894_v7, %v22893_v27  ;;  %v22904_v50 = vld [vmem:[#allocation35_spill] sm:$0xff] }
 0x16f   :  { %v1491_v10 = vadd.f32 %v18035_v15, %v1261_v32  ;;  %v1723_v18 = vadd.f32 %v15695_v46, %v1492_v13  ;;  %v569_v46 = vadd.f32 %v17933_v61, %v17931_v60  ;;  %v1265_v19 = vadd.f32 %v18047_v28, %v1035_v49  ;;  %v18188_v52 = vpop.f32.mrf.mxu1  ;;  %v22895_v32 = vld [vmem:[#allocation49_spill] sm:$0xff]  ;;  %v22915_v7 = vld [vmem:[#allocation36_spill] sm:$0xff] }
 0x170   :  { %v18120_v54 = vpop.f32.mrf.mxu0  ;;  %v1493_v56 = vadd.f32 %v18041_v45, %v1263_v11  ;;  %v1725_v15 = vadd.f32 %v15698_v62, %v1494_v17  ;;  %v1037_v60 = vadd.f32 %v17977_v24, %v807_v59  ;;  %v811_v61 = vadd.f32 %v18003_v41, %v559_v16  ;;  %v22889_v24 = vld [vmem:[#allocation14_spill] sm:$0xff]  ;;  %v22890_v41 = vld [vmem:[#allocation29_spill] sm:$0xff]  ;;  %v22900_v11 = vld [vmem:[#allocation51_spill] sm:$0xff] }
 0x171   :  { %v1722_v9 = vadd.f32 %v1643_v39, %v1491_v10  ;;  %v1953_v39 = vadd.f32 %v15721_v47, %v1723_v18  ;;  %v1039_v20 = vadd.f32 %v22889_v24, %v809_v51  ;;  %v1495_v29 = vadd.f32 %v22890_v41, %v1265_v19  ;;  %v22899_v35 = vld [vmem:[#allocation33_spill] sm:$0xff]  ;;  %v22903_v17 = vld [vmem:[#allocation32_spill] sm:$0xff] }
 0x172   :  { %v18128_v0 = vpop.f32.mrf.mxu0  ;;  %v1724_v47 = vadd.f32 %v1653_v40, %v1493_v56  ;;  %v1267_v36 = vadd.f32 %v22891_v4, %v1037_v60  ;;  %v1727_v45 = vadd.f32 %v22892_v63, %v1496_v21  ;;  %v1955_v30 = vadd.f32 %v22895_v32, %v1725_v15  ;;  %v22905_v19 = vld [vmem:[#allocation53_spill] sm:$0xff]  ;;  %v22906_v15 = vld [vmem:[#allocation52_spill] sm:$0xff] }
 0x173   :  { %v1952_v3 = vadd.f32 %v18091_v48, %v1722_v9  ;;  %v22897_v48 = vld [vmem:[#allocation17_spill] sm:$0xff]  ;;  %v1498_v13 = vadd.f32 %v22898_v8, %v1268_v22  ;;  %v1270_v37 = vadd.f32 %v22899_v35, %v1040_v2  ;;  %v1726_v38 = vadd.f32 %v18099_v53, %v1495_v29  ;;  %v22912_v29 = vld [vmem:[#allocation54_spill] sm:$0xff] }
 0x174   :  { %v18133_v6 = vpop.f32.mrf.mxu0  ;;  %v1041_v5 = vadd.f32 %v22897_v48, %v811_v61  ;;  %v1954_v18 = vadd.f32 %v22900_v11, %v1724_v47  ;;  %v813_v16 = vadd.f32 %v22902_v42, %v569_v46  ;;  %v1497_v9 = vadd.f32 %v22903_v17, %v1267_v36  ;;  %v22908_v46 = vld [vmem:[#allocation19_spill] sm:$0xff] }
 0x175   :  { %v1269_v51 = vadd.f32 %v22904_v50, %v1039_v20  ;;  %v1957_v56 = vadd.f32 %v22905_v19, %v1727_v45  ;;  %v1729_v60 = vadd.f32 %v22906_v15, %v1498_v13  ;;  %v1956_v20 = vadd.f32 %v18112_v44, %v1726_v38  ;;  %v22924_v19 = vld [vmem:[#allocation22_spill] sm:$0xff]  ;;  %v22926_v15 = vld [vmem:[#allocation43_spill] sm:$0xff] }
 0x176   :  { %v18143_v58 = vpop.f32.mrf.mxu0  ;;  %v1728_v4 = vadd.f32 %v22912_v29, %v1497_v9 }
 0x177   :  { %v1499_v32 = vadd.f32 %v22915_v7, %v1269_v51  ;;  %v1959_v13 = vadd.f32 %v18126_v25, %v1729_v60  ;;  %v22923_v51 = vld [vmem:[#allocation23_spill] sm:$0xff] }
 0x178   :  { %v18152_v43 = vpop.f32.mrf.mxu0  ;;  %v1958_v25 = vadd.f32 %v18141_v57, %v1728_v4  ;;  %v22931_v4 = vld [vmem:[#allocation45_spill] sm:$0xff] }
 0x179   :  { %v1730_v42 = vadd.f32 %v18114_v12, %v1499_v32 }
 0x17a   :  { %v18165_v1 = vpop.f32.mrf.mxu0 }
 0x17c   :  { %v15747_v28 = vpop.f32.mrf.mxu0 }
 0x17d   :  { %v2183_v62 = vadd.f32 %v15747_v28, %v1953_v39  ;;  %v18209_v39 = vpop.f32.mrf.mxu1  ;;  %v22909_v28 = vld [vmem:[#allocation18_spill] sm:$0xff] }
 0x17e   :  { %v2103_v26 = vpop.f32.mrf.mxu0  ;;  %v1044_v2 = vadd.f32 %v22909_v28, %v22908_v46 }
 0x17f   :  { %v18194_v33 = vadd.f32 %v18179_v34, %v2183_v62  ;;  %v2182_v40 = vadd.f32 %v2103_v26, %v1952_v3  ;;  %v22910_v3 = vld [vmem:[#allocation34_spill] sm:$0xff]  ;;  %v22911_v62 = vld [vmem:[#allocation37_spill] sm:$0xff]  ;;  %v18232_v44 = vpop.f32.mrf.mxu1 }
 0x180   :  { %v15750_v10 = vpop.f32.mrf.mxu0  ;;  %v1500_v47 = vadd.f32 %v22910_v3, %v1270_v37  ;;  %v1272_v24 = vadd.f32 %v22911_v62, %v1042_v31  ;;  %v22914_v26 = vld [vmem:[#allocation21_spill] sm:$0xff]  ;;  %v22917_v31 = vld [vmem:[#allocation55_spill] sm:$0xff] }
 0x181   :  { %22896 = vst [vmem:[#allocation14_spill] sm:$0xff] %v18194_v33  ;;  %v2222_v14 = vmax.f32 %v18194_v33, 0.0  ;;  %v18203_v49 = vadd.f32 %v18179_v34, %v2182_v40  ;;  %v2185_v59 = vadd.f32 %v15750_v10, %v1955_v30  ;;  %v1043_v27 = vadd.f32 %v22914_v26, %v813_v16  ;;  %v22916_v30 = vld [vmem:[#allocation39_spill] sm:$0xff]  ;;  %v22919_v10 = vld [vmem:[#allocation24_spill] sm:$0xff] }
 0x182   :  { %v2113_v53 = vpop.f32.mrf.mxu0  ;;  %v1271_v40 = vadd.f32 %v22916_v30, %v1041_v5  ;;  %v1731_v48 = vadd.f32 %v22917_v31, %v1500_v47  ;;  %v815_v11 = vadd.f32 %v22919_v10, %v18169_v55  ;;  %v1046_v55 = vadd.f32 %v22924_v19, %v22923_v51 }
 0x183   :  { %22901 = vst [vmem:[#allocation29_spill] sm:$0xff] %v18203_v49  ;;  %2281 = vst.msk [vmem:[#allocation3 + $0x21] sm:$0xff] %vm2237_vm3, %v2222_v14  ;;  %v2221_v61 = vmax.f32 %v18203_v49, 0.0  ;;  %v18215_v21 = vadd.f32 %v18179_v34, %v2185_v59  ;;  %v2184_v22 = vadd.f32 %v2113_v53, %v1954_v18  ;;  %v22920_v18 = vld [vmem:[#allocation38_spill] sm:$0xff]  ;;  %v22921_v14 = vld [vmem:[#allocation41_spill] sm:$0xff]  ;;  %v1273_v60 = vadd.f32 %v22926_v15, %v1043_v27 }
 0x184   :  { %v15753_v41 = vpop.f32.mrf.mxu0  ;;  %v1502_v5 = vadd.f32 %v22920_v18, %v1272_v24  ;;  %v1274_v59 = vadd.f32 %v22921_v14, %v1044_v2  ;;  %v1961_v12 = vadd.f32 %v18163_v23, %v1731_v48  ;;  %v22928_v23 = vmov 0.0   ;;  %v22929_v24 = vld [vmem:[#allocation25_spill] sm:$0xff]  ;;  %v22933_v48 = vld [vmem:[#allocation44_spill] sm:$0xff] }
 0x185   :  { %22907 = vst [vmem:[#allocation31_spill] sm:$0xff] %v18215_v21  ;;  %2280 = vst.msk [vmem:[#allocation3 + $0x11] sm:$0xff] %vm2237_vm3, %v2221_v61  ;;  %v2224_v36 = vmax.f32 %v18215_v21, 0.0  ;;  %v18226_v63 = vadd.f32 %v18179_v34, %v2184_v22  ;;  %v2187_v45 = vadd.f32 %v15753_v41, %v1957_v56  ;;  %v22925_v56 = vld [vmem:[#allocation40_spill] sm:$0xff]  ;;  %v18256_v61 = vpop.f32.mrf.mxu1  ;;  %v22930_v41 = vld [vmem:[#allocation42_spill] sm:$0xff] }
 0x186   :  { %v2123_v8 = vpop.f32.mrf.mxu0  ;;  %v1501_v53 = vadd.f32 %v22925_v56, %v1271_v40  ;;  %v1733_v2 = vadd.f32 %v18120_v54, %v1502_v5  ;;  %v1504_v29 = vadd.f32 %v22930_v41, %v1274_v59  ;;  %v1276_v54 = vadd.f32 %v22931_v4, %v1046_v55 }
 0x187   :  { %22913 = vst [vmem:[#allocation50_spill] sm:$0xff] %v18226_v63  ;;  %2283 = vst.msk [vmem:[#allocation3 + $0x41] sm:$0xff] %vm2237_vm3, %v2224_v36  ;;  %v2223_v35 = vmax.f32 %v18226_v63, 0.0  ;;  %v18238_v37 = vadd.f32 %v18179_v34, %v2187_v45  ;;  %v2186_v38 = vadd.f32 %v2123_v8, %v1956_v20  ;;  %v1045_v20 = vadd.f32 %v22929_v24, %v815_v11  ;;  %v1933_v10 = vpop.f32.mrf.mxu1 }
 0x188   :  { %v15756_v16 = vpop.f32.mrf.mxu0  ;;  %v1960_v36 = vadd.f32 %v18188_v52, %v1730_v42  ;;  %v1732_v32 = vadd.f32 %v18128_v0, %v1501_v53  ;;  %v18297_v52 = vld [vmem:[%s22779_s5 + $0x20] sm:$0xff]  ;;  %v18306_v0 = vld [vmem:[%s22779_s5 + $0x28] sm:$0xff]  ;;  %v1503_v8 = vadd.f32 %v22933_v48, %v1273_v60  ;;  %v1963_v59 = vadd.f32 %v18209_v39, %v1733_v2 }
 0x189   :  { %22918 = vst [vmem:[#allocation16_spill] sm:$0xff] %v18238_v37  ;;  %2282 = vst.msk [vmem:[#allocation3 + $0x31] sm:$0xff] %vm2237_vm3, %v2223_v35  ;;  %v2226_v17 = vmax.f32 %v18238_v37, 0.0  ;;  %v18249_v9 = vadd.f32 %v18179_v34, %v2186_v38  ;;  %v2189_v50 = vadd.f32 %v15756_v16, %v1959_v13  ;;  %v22934_v13 = vld [vmem:[#allocation47_spill] sm:$0xff]  ;;  %v1735_v38 = vadd.f32 %v18133_v6, %v1504_v29  ;;  %v13800_v37 = vld [vmem:[%s22779_s5 + $0x38] sm:$0xff] }
 0x18a   :  { %v2133_v57 = vpop.f32.mrf.mxu0  ;;  %v18258_v22 = vld [vmem:[#allocation3 + $0x21] sm:$0xff]  ;;  %v1275_v35 = vadd.f32 %v22934_v13, %v1045_v20  ;;  %v1734_v51 = vadd.f32 %v18143_v58, %v1503_v8  ;;  %v1962_v15 = vadd.f32 %v18232_v44, %v1732_v32  ;;  %v22940_v44 = vld [vmem:[#allocation48_spill] sm:$0xff] }
 0x18b   :  { %22922 = vst [vmem:[#allocation15_spill] sm:$0xff] %v18249_v9  ;;  %v18260_v46 = vld [vmem:[#allocation3 + $0x20] sm:$0xff]  ;;  %2285 = vst.msk [vmem:[#allocation3 + $0x61] sm:$0xff] %vm2237_vm3, %v2226_v17  ;;  %v2225_v3 = vmax.f32 %v18249_v9, 0.0  ;;  %v18268_v47 = vadd.f32 %v18179_v34, %v2189_v50  ;;  %v2188_v62 = vadd.f32 %v2133_v57, %v1958_v25  ;;  %v22936_v25 = vld [vmem:[#allocation11_spill] sm:$0xff]  ;;  %v1965_v2 = vadd.f32 %v18256_v61, %v1735_v38 }
 0x18c   :  { %v18262_v28 = vld [vmem:[#allocation3 + $0x22] sm:$0xff]  ;;  %v15759_v45 = vpop.f32.mrf.mxu0  ;;  %v18278_v26 = vld [vmem:[#allocation3 + $0x11] sm:$0xff]  ;;  %v1505_v57 = vadd.f32 %v22940_v44, %v1275_v35 }
 0x18d   :  { %22927 = vst [vmem:[#allocation49_spill] sm:$0xff] %v18268_v47  ;;  %4373 = vst.msk [vmem:[#allocation3 + $0x20] sm:$0xff] %vm2237_vm3, %v22928_v23  ;;  %v18280_v27 = vld [vmem:[#allocation3 + $0x10] sm:$0xff]  ;;  %v2228_v30 = vmax.f32 %v18268_v47, 0.0  ;;  %v18288_v40 = vadd.f32 %v18179_v34, %v2188_v62  ;;  %v2191_v31 = vadd.f32 %v15759_v45, %v1961_v12  ;;  %15772 = vmatmul.mubr.msk.f32.vlgmr.msra.gmra.mxu1 %vm2237_vm3, %v18278_v26  ;;  %v22938_v50 = vld [vmem:[#allocation46_spill] sm:$0xff] }
 0x18e   :  { %4374 = vst.msk [vmem:[#allocation3 + $0x28] sm:$0x3] %vm2239_vm4, %v22928_v23  ;;  %v18282_v7 = vld [vmem:[#allocation3 + $0x12] sm:$0xff]  ;;  %15798 = vmatmul.mubr.msk.f32.vlgmr.msra.gmra.mxu0 %vm2237_vm3, %v18280_v27  ;;  %v2143_v11 = vpop.f32.mrf.mxu0  ;;  %15774 = vmatprep.mubr.msk.f32.mxu1 %vm2237_vm3, %v18258_v22  ;;  %v18315_v18 = vld [vmem:[#allocation3 + $0x41] sm:$0xff]  ;;  %v1506_v39 = vadd.f32 %v22938_v50, %v1276_v54 }
 0x18f   :  { %2284 = vst.msk [vmem:[#allocation3 + $0x51] sm:$0xff] %vm2237_vm3, %v2225_v3  ;;  %22932 = vst [vmem:[#allocation17_spill] sm:$0xff] %v18288_v40  ;;  %15800 = vmatprep.mubr.msk.f32.mxu0 %vm2237_vm3, %v18260_v46  ;;  %v18317_v5 = vld [vmem:[#allocation3 + $0x40] sm:$0xff]  ;;  %v2227_v6 = vmax.f32 %v18288_v40, 0.0  ;;  %v18325_v42 = vadd.f32 %v18179_v34, %v2191_v31  ;;  %v2190_v16 = vadd.f32 %v2143_v11, %v1960_v36  ;;  %15822 = vmatpush3.msra.mxu1 %v22936_v25  ;;  %v22937_v17 = vld [vmem:[#allocation12_spill] sm:$0xff]  ;;  %v15742_v3 = vpop.f32.mrf.mxu1 }
 0x190   :  { %4371 = vst.msk [vmem:[#allocation3 + $0x10] sm:$0xff] %vm2237_vm3, %v22928_v23  ;;  %v18319_v14 = vld [vmem:[#allocation3 + $0x42] sm:$0xff]  ;;  %2287 = vst.msk [vmem:[#allocation3 + $0x81] sm:$0xff] %vm2237_vm3, %v2228_v30  ;;  %15848 = vmatpush3.msra.mxu0 %v22937_v17  ;;  %v15762_v19 = vpop.f32.mrf.mxu0  ;;  %v18335_v55 = vld [vmem:[#allocation3 + $0x31] sm:$0xff]  ;;  %15873 = vmatprep.subr.mxu1 %v18297_v52  ;;  %v1737_v29 = vadd.f32 %v18152_v43, %v1506_v39  ;;  %v1964_v36 = vadd.f32 %v1933_v10, %v1734_v51 }
 0x191   :  { %4372 = vst.msk [vmem:[#allocation3 + $0x18] sm:$0x3] %vm2239_vm4, %v22928_v23  ;;  %22935 = vst [vmem:[#allocation30_spill] sm:$0xff] %v18325_v42  ;;  %v18337_v56 = vld [vmem:[#allocation3 + $0x30] sm:$0xff]  ;;  %15899 = vmatprep.subr.mxu0 %v18306_v0  ;;  %v2230_v60 = vmax.f32 %v18325_v42, 0.0  ;;  %v18347_v12 = vadd.f32 %v18179_v34, %v2190_v16  ;;  %v2193_v58 = vadd.f32 %v15762_v19, %v1963_v59  ;;  %15775 = vmatmul.mubr.msk.f32.gmra.mxu1 %vm2237_vm3, %v18335_v55  ;;  %v22949_v47 = vld [vmem:[#allocation13_spill] sm:$0xff] }
 0x192   :  { %4377 = vst.msk [vmem:[#allocation3 + $0x40] sm:$0xff] %vm2237_vm3, %v22928_v23  ;;  %v18339_v53 = vld [vmem:[#allocation3 + $0x32] sm:$0xff]  ;;  %2286 = vst.msk [vmem:[#allocation3 + $0x71] sm:$0xff] %vm2237_vm3, %v2227_v6  ;;  %15801 = vmatmul.mubr.msk.f32.gmra.mxu0 %vm2237_vm3, %v18337_v56  ;;  %v2153_v62 = vpop.f32.mrf.mxu0  ;;  %15777 = vmatprep.mubr.msk.f32.mxu1 %vm2237_vm3, %v18315_v18  ;;  %v18363_v24 = vld [vmem:[#allocation3 + $0x61] sm:$0xff]  ;;  %v1736_v31 = vadd.f32 %v18165_v1, %v1505_v57  ;;  %v1943_v1 = vpop.f32.mrf.mxu1  ;;  %v1967_v59 = vadd.f32 %v15742_v3, %v1737_v29 }
 0x193   :  { %4378 = vst.msk [vmem:[#allocation3 + $0x48] sm:$0x3] %vm2239_vm4, %v22928_v23  ;;  %22939 = vst [vmem:[#allocation33_spill] sm:$0xff] %v18347_v12  ;;  %15803 = vmatprep.mubr.msk.f32.mxu0 %vm2237_vm3, %v18317_v5  ;;  %v18365_v20 = vld [vmem:[#allocation3 + $0x60] sm:$0xff]  ;;  %v2229_v61 = vmax.f32 %v18347_v12, 0.0  ;;  %v18373_v4 = vadd.f32 %v18179_v34, %v2193_v58  ;;  %v2192_v54 = vadd.f32 %v2153_v62, %v1962_v15  ;;  %v18414_v17 = vld [vmem:[#allocation3 + $0x90] sm:$0xff] }
 0x194   :  { %4375 = vst.msk [vmem:[#allocation3 + $0x30] sm:$0xff] %vm2237_vm3, %v22928_v23  ;;  %v18367_v41 = vld [vmem:[#allocation3 + $0x62] sm:$0xff]  ;;  %2289 = vst.msk [vmem:[#allocation3 + $0xc1] sm:$0xff] %vm2237_vm3, %v2230_v60  ;;  %v15765_v45 = vpop.f32.mrf.mxu0  ;;  %v18416_v50 = vld [vmem:[#allocation3 + $0x91] sm:$0xff]  ;;  %v1966_v58 = vadd.f32 %v1943_v1, %v1736_v31 }
 0x195   :  { %4376 = vst.msk [vmem:[#allocation3 + $0x38] sm:$0x3] %vm2239_vm4, %v22928_v23  ;;  %22941 = vst [vmem:[#allocation51_spill] sm:$0xff] %v18373_v4  ;;  %v2232_v48 = vmax.f32 %v18373_v4, 0.0  ;;  %v18389_v8 = vadd.f32 %v18179_v34, %v2192_v54  ;;  %v2195_v13 = vadd.f32 %v15765_v45, %v1965_v2  ;;  %v18422_v39 = vld [vmem:[#allocation3 + $0x92] sm:$0xff]  ;;  %v22945_v62 = vld [vmem:[#allocation26_spill] sm:$0xff] }
 0x196   :  { %4381 = vst.msk [vmem:[#allocation3 + $0x60] sm:$0xff] %vm2237_vm3, %v22928_v23  ;;  %v18379_v32 = vld [vmem:[#allocation3 + $0x51] sm:$0xff]  ;;  %2288 = vst.msk [vmem:[#allocation3 + $0xb1] sm:$0xff] %vm2237_vm3, %v2229_v61  ;;  %v2163_v35 = vpop.f32.mrf.mxu0 }
 0x197   :  { %4382 = vst.msk [vmem:[#allocation3 + $0x68] sm:$0x3] %vm2239_vm4, %v22928_v23  ;;  %v18381_v30 = vld [vmem:[#allocation3 + $0x50] sm:$0xff]  ;;  %22942 = vst [vmem:[#allocation20_spill] sm:$0xff] %v18389_v8  ;;  %15778 = vmatmul.mubr.msk.f32.gmra.mxu1 %vm2237_vm3, %v18379_v32  ;;  %v18403_v38 = vld [vmem:[#allocation3 + $0x80] sm:$0xff]  ;;  %v2231_v6 = vmax.f32 %v18389_v8, 0.0  ;;  %v18412_v16 = vadd.f32 %v18179_v34, %v2195_v13  ;;  %v2194_v25 = vadd.f32 %v2163_v35, %v1964_v36 }
 0x198   :  { %v18383_v43 = vld [vmem:[#allocation3 + $0x52] sm:$0xff]  ;;  %15804 = vmatmul.mubr.msk.f32.gmra.mxu0 %vm2237_vm3, %v18381_v30  ;;  %15780 = vmatprep.mubr.msk.f32.mxu1 %vm2237_vm3, %v18363_v24  ;;  %v18405_v10 = vld [vmem:[#allocation3 + $0x81] sm:$0xff]  ;;  %2291 = vst.msk [vmem:[#allocation3 + $0xe1] sm:$0xff] %vm2237_vm3, %v2232_v48  ;;  %v15768_v51 = vpop.f32.mrf.mxu0  ;;  %4387 = vst.msk [vmem:[#allocation3 + $0x90] sm:$0xff] %vm2237_vm3, %v22928_v23 }
 0x199   :  { %4379 = vst.msk [vmem:[#allocation3 + $0x50] sm:$0xff] %vm2237_vm3, %v22928_v23  ;;  %15806 = vmatprep.mubr.msk.f32.mxu0 %vm2237_vm3, %v18365_v20  ;;  %v18407_v11 = vld [vmem:[#allocation3 + $0x82] sm:$0xff]  ;;  %22943 = vst [vmem:[#allocation32_spill] sm:$0xff] %v18412_v16  ;;  %v18424_v19 = vld [vmem:[#allocation3 + $0x71] sm:$0xff]  ;;  %v2234_v44 = vmax.f32 %v18412_v16, 0.0  ;;  %v18437_v57 = vadd.f32 %v18179_v34, %v2194_v25  ;;  %v2197_v2 = vadd.f32 %v15768_v51, %v1967_v59 }
 0x19a   :  { %4380 = vst.msk [vmem:[#allocation3 + $0x58] sm:$0x3] %vm2239_vm4, %v22928_v23  ;;  %4386 = vst.msk [vmem:[#allocation3 + $0x88] sm:$0x3] %vm2239_vm4, %v22928_v23  ;;  %v18426_v15 = vld [vmem:[#allocation3 + $0x70] sm:$0xff]  ;;  %v2173_v3 = vpop.f32.mrf.mxu0 }
 0x19b   :  { %4385 = vst.msk [vmem:[#allocation3 + $0x80] sm:$0xff] %vm2237_vm3, %v22928_v23  ;;  %v18428_v60 = vld [vmem:[#allocation3 + $0x72] sm:$0xff]  ;;  %2290 = vst.msk [vmem:[#allocation3 + $0xd1] sm:$0xff] %vm2237_vm3, %v2231_v6  ;;  %15781 = vmatmul.mubr.msk.f32.gmra.mxu1 %vm2237_vm3, %v18424_v19  ;;  %v18451_v61 = vld [vmem:[#allocation3 + $0xc1] sm:$0xff]  ;;  %v2233_v45 = vmax.f32 %v18437_v57, 0.0  ;;  %v18460_v31 = vadd.f32 %v18179_v34, %v2197_v2  ;;  %v2196_v48 = vadd.f32 %v2173_v3, %v1966_v58 }
 0x19c   :  { %4388 = vst.msk [vmem:[#allocation3 + $0x98] sm:$0x3] %vm2239_vm4, %v22928_v23  ;;  %22944 = vst [vmem:[#allocation35_spill] sm:$0xff] %v18437_v57  ;;  %15807 = vmatmul.mubr.msk.f32.gmra.mxu0 %vm2237_vm3, %v18426_v15  ;;  %15783 = vmatprep.mubr.msk.f32.mxu1 %vm2237_vm3, %v22945_v62  ;;  %v22946_v29 = vld [vmem:[#allocation27_spill] sm:$0xff]  ;;  %v18453_v54 = vld [vmem:[#allocation3 + $0xc0] sm:$0xff] }
 0x19d   :  { %4383 = vst.msk [vmem:[#allocation3 + $0x70] sm:$0xff] %vm2237_vm3, %v22928_v23  ;;  %15809 = vmatprep.mubr.msk.f32.mxu0 %vm2237_vm3, %v22946_v29  ;;  %v18455_v36 = vld [vmem:[#allocation3 + $0xc2] sm:$0xff]  ;;  %2293 = vst.msk [vmem:[#allocation3 + $0x101] sm:$0xff] %vm2237_vm3, %v2234_v44  ;;  %v18466_v13 = vld [vmem:[#allocation3 + $0xb1] sm:$0xff]  ;;  %v2236_v59 = vmax.f32 %v18460_v31, 0.0  ;;  %v18475_v6 = vadd.f32 %v18179_v34, %v2196_v48 }
 0x19e   :  { %4384 = vst.msk [vmem:[#allocation3 + $0x78] sm:$0x3] %vm2239_vm4, %v22928_v23  ;;  %22947 = vst [vmem:[#allocation53_spill] sm:$0xff] %v18460_v31  ;;  %v18468_v1 = vld [vmem:[#allocation3 + $0xb0] sm:$0xff] }
 0x19f   :  { %4393 = vst.msk [vmem:[#allocation3 + $0xc0] sm:$0xff] %vm2237_vm3, %v22928_v23  ;;  %v18470_v35 = vld [vmem:[#allocation3 + $0xb2] sm:$0xff]  ;;  %2292 = vst.msk [vmem:[#allocation3 + $0xf1] sm:$0xff] %vm2237_vm3, %v2233_v45  ;;  %15784 = vmatmul.mubr.msk.f32.gmra.mxu1 %vm2237_vm3, %v18466_v13  ;;  %v18489_v34 = vld [vmem:[#allocation3 + $0xe1] sm:$0xff]  ;;  %v2235_v58 = vmax.f32 %v18475_v6, 0.0 }
 0x1a0   :  { %4394 = vst.msk [vmem:[#allocation3 + $0xc8] sm:$0x3] %vm2239_vm4, %v22928_v23  ;;  %22948 = vst [vmem:[#allocation52_spill] sm:$0xff] %v18475_v6  ;;  %15810 = vmatmul.mubr.msk.f32.gmra.mxu0 %vm2237_vm3, %v18468_v1  ;;  %15786 = vmatprep.mubr.msk.f32.mxu1 %vm2237_vm3, %v18451_v61  ;;  %v18491_v25 = vld [vmem:[#allocation3 + $0xe0] sm:$0xff]  ;;  %v18554_v16 = vld [vmem:[#allocation3 + $0x130] sm:$0xff] }
 0x1a1   :  { %4391 = vst.msk [vmem:[#allocation3 + $0xb0] sm:$0xff] %vm2237_vm3, %v22928_v23  ;;  %15812 = vmatprep.mubr.msk.f32.mxu0 %vm2237_vm3, %v18453_v54  ;;  %v18493_v51 = vld [vmem:[#allocation3 + $0xe2] sm:$0xff]  ;;  %2295 = vst.msk [vmem:[#allocation3 + $0x121] sm:$0xff] %vm2237_vm3, %v2236_v59  ;;  %v18556_v8 = vld [vmem:[#allocation3 + $0x131] sm:$0xff] }
 0x1a2   :  { %4392 = vst.msk [vmem:[#allocation3 + $0xb8] sm:$0x3] %vm2239_vm4, %v22928_v23  ;;  %4398 = vst.msk [vmem:[#allocation3 + $0xe8] sm:$0x3] %vm2239_vm4, %v22928_v23  ;;  %v18501_v44 = vld [vmem:[#allocation3 + $0xd1] sm:$0xff] }
 0x1a3   :  { %4397 = vst.msk [vmem:[#allocation3 + $0xe0] sm:$0xff] %vm2237_vm3, %v22928_v23  ;;  %v18503_v2 = vld [vmem:[#allocation3 + $0xd0] sm:$0xff]  ;;  %2294 = vst.msk [vmem:[#allocation3 + $0x111] sm:$0xff] %vm2237_vm3, %v2235_v58  ;;  %15787 = vmatmul.mubr.msk.f32.gmra.mxu1 %vm2237_vm3, %v18501_v44 }
 0x1a4   :  { %v18505_v3 = vld [vmem:[#allocation3 + $0xd2] sm:$0xff]  ;;  %15813 = vmatmul.mubr.msk.f32.gmra.mxu0 %vm2237_vm3, %v18503_v2  ;;  %15789 = vmatprep.mubr.msk.f32.mxu1 %vm2237_vm3, %v18489_v34  ;;  %v18520_v62 = vld [vmem:[#allocation3 + $0x101] sm:$0xff] }
 0x1a5   :  { %4395 = vst.msk [vmem:[#allocation3 + $0xd0] sm:$0xff] %vm2237_vm3, %v22928_v23  ;;  %15815 = vmatprep.mubr.msk.f32.mxu0 %vm2237_vm3, %v18491_v25  ;;  %v18522_v29 = vld [vmem:[#allocation3 + $0x100] sm:$0xff]  ;;  %v18562_v4 = vld [vmem:[#allocation3 + $0x132] sm:$0xff] }
 0x1a6   :  { %4396 = vst.msk [vmem:[#allocation3 + $0xd8] sm:$0x3] %vm2239_vm4, %v22928_v23  ;;  %v18524_v45 = vld [vmem:[#allocation3 + $0x102] sm:$0xff]  ;;  %v18530_v48 = vld [vmem:[#allocation3 + $0xf1] sm:$0xff]  ;;  %4408 = vst.msk [vmem:[#allocation3 + $0x138] sm:$0x3] %vm2239_vm4, %v22928_v23 }
 0x1a7   :  { %4401 = vst.msk [vmem:[#allocation3 + $0x100] sm:$0xff] %vm2237_vm3, %v22928_v23  ;;  %v18532_v59 = vld [vmem:[#allocation3 + $0xf0] sm:$0xff]  ;;  %15790 = vmatmul.mubr.msk.f32.gmra.mxu1 %vm2237_vm3, %v18530_v48  ;;  %4407 = vst.msk [vmem:[#allocation3 + $0x130] sm:$0xff] %vm2237_vm3, %v22928_v23 }
 0x1a8   :  { %4402 = vst.msk [vmem:[#allocation3 + $0x108] sm:$0x3] %vm2239_vm4, %v22928_v23  ;;  %v18534_v58 = vld [vmem:[#allocation3 + $0xf2] sm:$0xff]  ;;  %15816 = vmatmul.mubr.msk.f32.gmra.mxu0 %vm2237_vm3, %v18532_v59  ;;  %15792 = vmatprep.mubr.msk.f32.mxu1 %vm2237_vm3, %v18520_v62  ;;  %v18548_v6 = vld [vmem:[#allocation3 + $0x120] sm:$0xff] }
 0x1a9   :  { %4399 = vst.msk [vmem:[#allocation3 + $0xf0] sm:$0xff] %vm2237_vm3, %v22928_v23  ;;  %15818 = vmatprep.mubr.msk.f32.mxu0 %vm2237_vm3, %v18522_v29  ;;  %v18550_v31 = vld [vmem:[#allocation3 + $0x121] sm:$0xff]  ;;  %v13783_v9 = vld [vmem:[%s22779_s5 + $0x30] sm:$0xff] }
 0x1aa   :  { %4400 = vst.msk [vmem:[#allocation3 + $0xf8] sm:$0x3] %vm2239_vm4, %v22928_v23  ;;  %v18552_v57 = vld [vmem:[#allocation3 + $0x122] sm:$0xff]  ;;  %v18564_v12 = vld [vmem:[#allocation3 + $0x111] sm:$0xff] }
 0x1ab   :  { %4406 = vst.msk [vmem:[#allocation3 + $0x128] sm:$0x3] %vm2239_vm4, %v22928_v23  ;;  %v18566_v42 = vld [vmem:[#allocation3 + $0x110] sm:$0xff]  ;;  %15793 = vmatmul.mubr.msk.f32.gmra.mxu1 %vm2237_vm3, %v18564_v12 }
 0x1ac   :  { %4405 = vst.msk [vmem:[#allocation3 + $0x120] sm:$0xff] %vm2237_vm3, %v22928_v23  ;;  %v18568_v40 = vld [vmem:[#allocation3 + $0x112] sm:$0xff]  ;;  %15819 = vmatmul.mubr.msk.f32.gmra.mxu0 %vm2237_vm3, %v18566_v42  ;;  %15823 = vmatprep.mubr.msk.f32.mxu1 %vm2237_vm3, %v22949_v47 }
 0x1ad   :  { %4403 = vst.msk [vmem:[#allocation3 + $0x110] sm:$0xff] %vm2237_vm3, %v22928_v23  ;;  %15849 = vmatprep.mubr.msk.f32.mxu0 %vm2237_vm3, %v18280_v27  ;;  %v22950_v47 = vld [vmem:[#allocation28_spill] sm:$0xff]  ;;  %v13817_v27 = vld [vmem:[%s22779_s5 + $0x40] sm:$0xff] }
 0x1ae   :  { %4404 = vst.msk [vmem:[#allocation3 + $0x118] sm:$0x3] %vm2239_vm4, %v22928_v23 }
 0x1af   :  { %15824 = vmatmul.mubr.msk.f32.vlgmr.msra.gmra.mxu1 %vm2237_vm3, %v18282_v7 }
 0x1b0   :  { %15850 = vmatmul.mubr.msk.f32.vlgmr.msra.gmra.mxu0 %vm2237_vm3, %v18260_v46  ;;  %15826 = vmatprep.mubr.msk.f32.mxu1 %vm2237_vm3, %v18262_v28 }
 0x1b1   :  { %15852 = vmatprep.mubr.msk.f32.mxu0 %vm2237_vm3, %v18337_v56  ;;  %15874 = vmatpush3.msra.mxu1 %v18297_v52 }
 0x1b2   :  { %15900 = vmatpush3.msra.mxu0 %v18306_v0  ;;  %15925 = vmatprep.subr.mxu1 %v13783_v9 }
 0x1b3   :  { %15951 = vmatprep.subr.mxu0 %v13800_v37  ;;  %15827 = vmatmul.mubr.msk.f32.gmra.mxu1 %vm2237_vm3, %v18339_v53 }
 0x1b4   :  { %15853 = vmatmul.mubr.msk.f32.gmra.mxu0 %vm2237_vm3, %v18317_v5  ;;  %15829 = vmatprep.mubr.msk.f32.mxu1 %vm2237_vm3, %v18319_v14 }
 0x1b5   :  { %15855 = vmatprep.mubr.msk.f32.mxu0 %vm2237_vm3, %v18381_v30 }
 0x1b7   :  { %15830 = vmatmul.mubr.msk.f32.gmra.mxu1 %vm2237_vm3, %v18383_v43 }
 0x1b8   :  { %15856 = vmatmul.mubr.msk.f32.gmra.mxu0 %vm2237_vm3, %v18365_v20  ;;  %15832 = vmatprep.mubr.msk.f32.mxu1 %vm2237_vm3, %v18367_v41 }
 0x1b9   :  { %15858 = vmatprep.mubr.msk.f32.mxu0 %vm2237_vm3, %v18426_v15 }
 0x1bb   :  { %15833 = vmatmul.mubr.msk.f32.gmra.mxu1 %vm2237_vm3, %v18428_v60 }
 0x1bc   :  { %15859 = vmatmul.mubr.msk.f32.gmra.mxu0 %vm2237_vm3, %v18403_v38  ;;  %15835 = vmatprep.mubr.msk.f32.mxu1 %vm2237_vm3, %v22950_v47 }
 0x1bd   :  { %15861 = vmatprep.mubr.msk.f32.mxu0 %vm2237_vm3, %v18468_v1 }
 0x1bf   :  { %15836 = vmatmul.mubr.msk.f32.gmra.mxu1 %vm2237_vm3, %v18470_v35 }
 0x1c0   :  { %15862 = vmatmul.mubr.msk.f32.gmra.mxu0 %vm2237_vm3, %v18453_v54  ;;  %15838 = vmatprep.mubr.msk.f32.mxu1 %vm2237_vm3, %v18455_v36 }
 0x1c1   :  { %15864 = vmatprep.mubr.msk.f32.mxu0 %vm2237_vm3, %v18503_v2 }
 0x1c3   :  { %15839 = vmatmul.mubr.msk.f32.gmra.mxu1 %vm2237_vm3, %v18505_v3 }
 0x1c4   :  { %15865 = vmatmul.mubr.msk.f32.gmra.mxu0 %vm2237_vm3, %v18491_v25  ;;  %15841 = vmatprep.mubr.msk.f32.mxu1 %vm2237_vm3, %v18493_v51 }
 0x1c5   :  { %15867 = vmatprep.mubr.msk.f32.mxu0 %vm2237_vm3, %v18532_v59 }
 0x1c7   :  { %15842 = vmatmul.mubr.msk.f32.gmra.mxu1 %vm2237_vm3, %v18534_v58 }
 0x1c8   :  { %15868 = vmatmul.mubr.msk.f32.gmra.mxu0 %vm2237_vm3, %v18522_v29  ;;  %15844 = vmatprep.mubr.msk.f32.mxu1 %vm2237_vm3, %v18524_v45 }
 0x1c9   :  { %15870 = vmatprep.mubr.msk.f32.mxu0 %vm2237_vm3, %v18566_v42 }
 0x1cb   :  { %15845 = vmatmul.mubr.msk.f32.gmra.mxu1 %vm2237_vm3, %v18568_v40 }
 0x1cc   :  { %15871 = vmatmul.mubr.msk.f32.gmra.mxu0 %vm2237_vm3, %v18548_v6  ;;  %15875 = vmatprep.mubr.msk.f32.mxu1 %vm2237_vm3, %v18278_v26 }
 0x1cd   :  { %15901 = vmatprep.mubr.msk.f32.mxu0 %vm2237_vm3, %v18282_v7 }
 0x1cf   :  { %15876 = vmatmul.mubr.msk.f32.vlgmr.msra.gmra.mxu1 %vm2237_vm3, %v18258_v22 }
 0x1d0   :  { %15902 = vmatmul.mubr.msk.f32.vlgmr.msra.gmra.mxu0 %vm2237_vm3, %v18262_v28  ;;  %15878 = vmatprep.mubr.msk.f32.mxu1 %vm2237_vm3, %v18335_v55 }
 0x1d1   :  { %15904 = vmatprep.mubr.msk.f32.mxu0 %vm2237_vm3, %v18339_v53  ;;  %15926 = vmatpush3.msra.mxu1 %v13783_v9 }
 0x1d2   :  { %15952 = vmatpush3.msra.mxu0 %v13800_v37  ;;  %15977 = vmatprep.subr.mxu1 %v13817_v27 }
 0x1d3   :  { %15879 = vmatmul.mubr.msk.f32.gmra.mxu1 %vm2237_vm3, %v18315_v18 }
 0x1d4   :  { %15905 = vmatmul.mubr.msk.f32.gmra.mxu0 %vm2237_vm3, %v18319_v14  ;;  %15881 = vmatprep.mubr.msk.f32.mxu1 %vm2237_vm3, %v18379_v32 }
 0x1d5   :  { %15907 = vmatprep.mubr.msk.f32.mxu0 %vm2237_vm3, %v18383_v43 }
 0x1d7   :  { %15882 = vmatmul.mubr.msk.f32.gmra.mxu1 %vm2237_vm3, %v18363_v24 }
 0x1d8   :  { %15908 = vmatmul.mubr.msk.f32.gmra.mxu0 %vm2237_vm3, %v18367_v41  ;;  %15884 = vmatprep.mubr.msk.f32.mxu1 %vm2237_vm3, %v18424_v19 }
 0x1d9   :  { %15910 = vmatprep.mubr.msk.f32.mxu0 %vm2237_vm3, %v18428_v60 }
 0x1db   :  { %15885 = vmatmul.mubr.msk.f32.gmra.mxu1 %vm2237_vm3, %v18405_v10 }
 0x1dc   :  { %15911 = vmatmul.mubr.msk.f32.gmra.mxu0 %vm2237_vm3, %v18407_v11  ;;  %15887 = vmatprep.mubr.msk.f32.mxu1 %vm2237_vm3, %v18466_v13 }
 0x1dd   :  { %15913 = vmatprep.mubr.msk.f32.mxu0 %vm2237_vm3, %v18470_v35 }
 0x1df   :  { %15888 = vmatmul.mubr.msk.f32.gmra.mxu1 %vm2237_vm3, %v18451_v61 }
 0x1e0   :  { %15914 = vmatmul.mubr.msk.f32.gmra.mxu0 %vm2237_vm3, %v18455_v36  ;;  %15890 = vmatprep.mubr.msk.f32.mxu1 %vm2237_vm3, %v18501_v44 }
 0x1e1   :  { %15916 = vmatprep.mubr.msk.f32.mxu0 %vm2237_vm3, %v18505_v3 }
 0x1e3   :  { %15891 = vmatmul.mubr.msk.f32.gmra.mxu1 %vm2237_vm3, %v18489_v34 }
 0x1e4   :  { %15917 = vmatmul.mubr.msk.f32.gmra.mxu0 %vm2237_vm3, %v18493_v51  ;;  %15893 = vmatprep.mubr.msk.f32.mxu1 %vm2237_vm3, %v18530_v48 }
 0x1e5   :  { %15919 = vmatprep.mubr.msk.f32.mxu0 %vm2237_vm3, %v18534_v58 }
 0x1e7   :  { %15894 = vmatmul.mubr.msk.f32.gmra.mxu1 %vm2237_vm3, %v18520_v62 }
 0x1e8   :  { %15920 = vmatmul.mubr.msk.f32.gmra.mxu0 %vm2237_vm3, %v18524_v45  ;;  %15896 = vmatprep.mubr.msk.f32.mxu1 %vm2237_vm3, %v18564_v12 }
 0x1e9   :  { %15922 = vmatprep.mubr.msk.f32.mxu0 %vm2237_vm3, %v18568_v40 }
 0x1eb   :  { %15897 = vmatmul.mubr.msk.f32.gmra.mxu1 %vm2237_vm3, %v18550_v31 }
 0x1ec   :  { %15923 = vmatmul.mubr.msk.f32.gmra.mxu0 %vm2237_vm3, %v18552_v57  ;;  %15927 = vmatprep.mubr.msk.f32.mxu1 %vm2237_vm3, %v18260_v46 }
 0x1ed   :  { %15953 = vmatprep.mubr.msk.f32.mxu0 %vm2237_vm3, %v18258_v22 }
 0x1ef   :  { %15928 = vmatmul.mubr.msk.f32.vlgmr.msra.gmra.mxu1 %vm2237_vm3, %v18337_v56  ;;  %v13836_v56 = vld [vmem:[%s22782_s8 + $0x8] sm:$0xff] }
 0x1f0   :  { %15954 = vmatmul.mubr.msk.f32.vlgmr.msra.gmra.mxu0 %vm2237_vm3, %v18335_v55  ;;  %15930 = vmatprep.mubr.msk.f32.mxu1 %vm2237_vm3, %v18317_v5 }
 0x1f1   :  { %15956 = vmatprep.mubr.msk.f32.mxu0 %vm2237_vm3, %v18315_v18  ;;  %15978 = vmatpush3.msra.mxu1 %v13817_v27 }
 0x1f2   :  { %16003 = vmatprep.subr.mxu0 %v13836_v56 }
 0x1f3   :  { %15931 = vmatmul.mubr.msk.f32.gmra.mxu1 %vm2237_vm3, %v18381_v30  ;;  %16004 = vmatpush3.msra.mxu0 %v13836_v56  ;;  %v4441_v30 = vld [vmem:[%s22782_s8] sm:$0xff] }
 0x1f4   :  { %15957 = vmatmul.mubr.msk.f32.gmra.mxu0 %vm2237_vm3, %v18379_v32  ;;  %15933 = vmatprep.mubr.msk.f32.mxu1 %vm2237_vm3, %v18365_v20  ;;  %v18902_v56 = vld [vmem:[#allocation3 + $0x2] sm:$0xff] }
 0x1f5   :  { %15959 = vmatprep.mubr.msk.f32.mxu0 %vm2237_vm3, %v18363_v24  ;;  %16029 = vmatprep.subr.mxu1 %v4441_v30  ;;  %22953 = vst [vmem:[#allocation34_spill] sm:$0xff] %v18902_v56 }
 0x1f7   :  { %15934 = vmatmul.mubr.msk.f32.gmra.mxu1 %vm2237_vm3, %v18426_v15 }
 0x1f8   :  { %15960 = vmatmul.mubr.msk.f32.gmra.mxu0 %vm2237_vm3, %v18424_v19  ;;  %15936 = vmatprep.mubr.msk.f32.mxu1 %vm2237_vm3, %v18403_v38  ;;  %v4425_v38 = vld [vmem:[#allocation3] sm:$0xff] }
 0x1f9   :  { %15962 = vmatprep.mubr.msk.f32.mxu0 %vm2237_vm3, %v18405_v10 }
 0x1fb   :  { %15937 = vmatmul.mubr.msk.f32.gmra.mxu1 %vm2237_vm3, %v18414_v17 }
 0x1fc   :  { %15963 = vmatmul.mubr.msk.f32.gmra.mxu0 %vm2237_vm3, %v18416_v50  ;;  %15939 = vmatprep.mubr.msk.f32.mxu1 %vm2237_vm3, %v18453_v54 }
 0x1fd   :  { %15965 = vmatprep.mubr.msk.f32.mxu0 %vm2237_vm3, %v18451_v61 }
 0x1ff   :  { %15940 = vmatmul.mubr.msk.f32.gmra.mxu1 %vm2237_vm3, %v18503_v2 }
 0x200   :  { %15966 = vmatmul.mubr.msk.f32.gmra.mxu0 %vm2237_vm3, %v18501_v44  ;;  %15942 = vmatprep.mubr.msk.f32.mxu1 %vm2237_vm3, %v18491_v25 }
 0x201   :  { %15968 = vmatprep.mubr.msk.f32.mxu0 %vm2237_vm3, %v18489_v34 }
 0x203   :  { %15943 = vmatmul.mubr.msk.f32.gmra.mxu1 %vm2237_vm3, %v18532_v59 }
 0x204   :  { %15969 = vmatmul.mubr.msk.f32.gmra.mxu0 %vm2237_vm3, %v18530_v48  ;;  %15945 = vmatprep.mubr.msk.f32.mxu1 %vm2237_vm3, %v18522_v29  ;;  %v18876_v48 = vld [vmem:[%s22782_s8 + $0x10] sm:$0xff] }
 0x205   :  { %15971 = vmatprep.mubr.msk.f32.mxu0 %vm2237_vm3, %v18520_v62  ;;  %22951 = vst [vmem:[#allocation19_spill] sm:$0xff] %v18876_v48  ;;  %16055 = vmatprep.subr.mxu0 %v18876_v48 }
 0x207   :  { %15946 = vmatmul.mubr.msk.f32.gmra.mxu1 %vm2237_vm3, %v18566_v42 }
 0x208   :  { %15972 = vmatmul.mubr.msk.f32.gmra.mxu0 %vm2237_vm3, %v18564_v12  ;;  %15948 = vmatprep.mubr.msk.f32.mxu1 %vm2237_vm3, %v18548_v6 }
 0x209   :  { %15974 = vmatprep.mubr.msk.f32.mxu0 %vm2237_vm3, %v18550_v31 }
 0x20b   :  { %15949 = vmatmul.mubr.msk.f32.gmra.mxu1 %vm2237_vm3, %v18554_v16 }
 0x20c   :  { %15975 = vmatmul.mubr.msk.f32.gmra.mxu0 %vm2237_vm3, %v18556_v8  ;;  %15979 = vmatprep.mubr.msk.f32.mxu1 %vm2237_vm3, %v18262_v28  ;;  %v4442_v8 = vld [vmem:[#allocation3 + $0x1] sm:$0xff] }
 0x20d   :  { %16005 = vmatprep.mubr.msk.f32.mxu0 %vm2237_vm3, %v4442_v8  ;;  %6554 = vst.msk [vmem:[#allocation3] sm:$0xff] %vm2237_vm3, %v22928_v23 }
 0x20e   :  { %6555 = vst.msk [vmem:[#allocation3 + $0x8] sm:$0x3] %vm2239_vm4, %v22928_v23 }
 0x20f   :  { %15980 = vmatmul.mubr.msk.f32.vlgmr.msra.gmra.mxu1 %vm2237_vm3, %v18339_v53 }
 0x210   :  { %15982 = vmatprep.mubr.msk.f32.mxu1 %vm2237_vm3, %v18319_v14  ;;  %16030 = vmatpush3.msra.mxu1 %v4441_v30 }
 0x213   :  { %15983 = vmatmul.mubr.msk.f32.gmra.mxu1 %vm2237_vm3, %v18383_v43 }
 0x214   :  { %15985 = vmatprep.mubr.msk.f32.mxu1 %vm2237_vm3, %v18367_v41 }
 0x217   :  { %15986 = vmatmul.mubr.msk.f32.gmra.mxu1 %vm2237_vm3, %v18428_v60 }
 0x218   :  { %15988 = vmatprep.mubr.msk.f32.mxu1 %vm2237_vm3, %v18407_v11 }
 0x21b   :  { %15989 = vmatmul.mubr.msk.f32.gmra.mxu1 %vm2237_vm3, %v18422_v39 }
 0x21c   :  { %15991 = vmatprep.mubr.msk.f32.mxu1 %vm2237_vm3, %v18455_v36 }
 0x21f   :  { %15992 = vmatmul.mubr.msk.f32.gmra.mxu1 %vm2237_vm3, %v18505_v3 }
 0x220   :  { %15994 = vmatprep.mubr.msk.f32.mxu1 %vm2237_vm3, %v18493_v51 }
 0x223   :  { %15995 = vmatmul.mubr.msk.f32.gmra.mxu1 %vm2237_vm3, %v18534_v58 }
 0x224   :  { %15997 = vmatprep.mubr.msk.f32.mxu1 %vm2237_vm3, %v18524_v45 }
 0x227   :  { %15998 = vmatmul.mubr.msk.f32.gmra.mxu1 %vm2237_vm3, %v18568_v40 }
 0x228   :  { %16000 = vmatprep.mubr.msk.f32.mxu1 %vm2237_vm3, %v18552_v57 }
 0x22b   :  { %16001 = vmatmul.mubr.msk.f32.gmra.mxu1 %vm2237_vm3, %v18562_v4 }
 0x22c   :  { %16031 = vmatprep.mubr.msk.f32.mxu1 %vm2237_vm3, %v4425_v38 }
 0x24d   :  { %v15773_v37 = vpop.f32.mrf.mxu1 }
 0x24e   :  { %v15799_v9 = vpop.f32.mrf.mxu0 }
 0x24f   :  { %v2644_v22 = vadd.f32 %v15799_v9, %v15773_v37  ;;  %v18817_v46 = vpop.f32.mrf.mxu1 }
 0x250   :  { %v18819_v28 = vpop.f32.mrf.mxu0 }
 0x251   :  { %v15776_v26 = vpop.f32.mrf.mxu1 }
 0x252   :  { %v15802_v7 = vpop.f32.mrf.mxu0 }
 0x253   :  { %v2654_v52 = vadd.f32 %v15802_v7, %v15776_v26  ;;  %v18821_v0 = vpop.f32.mrf.mxu1 }
 0x254   :  { %v18823_v18 = vpop.f32.mrf.mxu0 }
 0x257   :  { %v15779_v40 = vpop.f32.mrf.mxu1 }
 0x258   :  { %v15805_v5 = vpop.f32.mrf.mxu0 }
 0x259   :  { %v2664_v14 = vadd.f32 %v15805_v5, %v15779_v40  ;;  %v18825_v42 = vpop.f32.mrf.mxu1 }
 0x25a   :  { %v18827_v55 = vpop.f32.mrf.mxu0 }
 0x25b   :  { %v15782_v53 = vpop.f32.mrf.mxu1 }
 0x25c   :  { %v15808_v12 = vpop.f32.mrf.mxu0 }
 0x25d   :  { %v2674_v24 = vadd.f32 %v15808_v12, %v15782_v53  ;;  %v18832_v20 = vpop.f32.mrf.mxu1 }
 0x25e   :  { %v18834_v41 = vpop.f32.mrf.mxu0 }
 0x25f   :  { %v15785_v4 = vpop.f32.mrf.mxu1 }
 0x260   :  { %v15811_v32 = vpop.f32.mrf.mxu0 }
 0x261   :  { %v2684_v43 = vadd.f32 %v15811_v32, %v15785_v4  ;;  %v18839_v10 = vpop.f32.mrf.mxu1 }
 0x262   :  { %v18841_v11 = vpop.f32.mrf.mxu0 }
 0x263   :  { %v15788_v16 = vpop.f32.mrf.mxu1 }
 0x264   :  { %v15814_v17 = vpop.f32.mrf.mxu0 }
 0x265   :  { %v2694_v50 = vadd.f32 %v15814_v17, %v15788_v16  ;;  %v18845_v39 = vpop.f32.mrf.mxu1 }
 0x266   :  { %v18847_v19 = vpop.f32.mrf.mxu0 }
 0x267   :  { %v15791_v15 = vpop.f32.mrf.mxu1 }
 0x268   :  { %v15817_v60 = vpop.f32.mrf.mxu0 }
 0x269   :  { %v2704_v57 = vadd.f32 %v15817_v60, %v15791_v15  ;;  %v18849_v61 = vpop.f32.mrf.mxu1 }
 0x26a   :  { %v18851_v54 = vpop.f32.mrf.mxu0 }
 0x26b   :  { %v15794_v36 = vpop.f32.mrf.mxu1 }
 0x26c   :  { %v15820_v31 = vpop.f32.mrf.mxu0 }
 0x26d   :  { %v2714_v13 = vadd.f32 %v15820_v31, %v15794_v36  ;;  %v18853_v1 = vpop.f32.mrf.mxu1 }
 0x26e   :  { %v18855_v35 = vpop.f32.mrf.mxu0 }
 0x26f   :  { %v15825_v6 = vpop.f32.mrf.mxu1 }
 0x270   :  { %v18857_v34 = vpop.f32.mrf.mxu0  ;;  %v18859_v25 = vadd.f32 %v15825_v6, %v2644_v22 }
 0x271   :  { %v18861_v51 = vpop.f32.mrf.mxu1 }
 0x272   :  { %v18863_v44 = vpop.f32.mrf.mxu0 }
 0x273   :  { %v15828_v2 = vpop.f32.mrf.mxu1 }
 0x274   :  { %v18865_v3 = vpop.f32.mrf.mxu0  ;;  %v18867_v62 = vadd.f32 %v15828_v2, %v2654_v52 }
 0x275   :  { %v18869_v29 = vpop.f32.mrf.mxu1 }
 0x276   :  { %v18871_v45 = vpop.f32.mrf.mxu0 }
 0x277   :  { %v15831_v59 = vpop.f32.mrf.mxu1 }
 0x278   :  { %v18878_v58 = vpop.f32.mrf.mxu0  ;;  %v18881_v47 = vadd.f32 %v15831_v59, %v2664_v14  ;;  %v18900_v14 = vld [vmem:[%s22782_s8 + $0x18] sm:$0xff] }
 0x279   :  { %v18883_v27 = vpop.f32.mrf.mxu1  ;;  %22952 = vst [vmem:[#allocation18_spill] sm:$0xff] %v18900_v14  ;;  %16081 = vmatprep.subr.mxu1 %v18900_v14 }
 0x27a   :  { %v18885_v37 = vpop.f32.mrf.mxu0 }
 0x27b   :  { %v15834_v9 = vpop.f32.mrf.mxu1 }
 0x27c   :  { %v18887_v22 = vpop.f32.mrf.mxu0  ;;  %v18889_v26 = vadd.f32 %v15834_v9, %v2674_v24 }
 0x27d   :  { %v18891_v7 = vpop.f32.mrf.mxu1 }
 0x27e   :  { %v18893_v52 = vpop.f32.mrf.mxu0 }
 0x27f   :  { %v15837_v40 = vpop.f32.mrf.mxu1 }
 0x280   :  { %v18895_v5 = vpop.f32.mrf.mxu0  ;;  %v18904_v53 = vadd.f32 %v15837_v40, %v2684_v43  ;;  %v18941_v40 = vld [vmem:[#allocation3 + $0xa1] sm:$0xff] }
 0x281   :  { %v18911_v12 = vpop.f32.mrf.mxu1  ;;  %22962 = vst [vmem:[#allocation41_spill] sm:$0xff] %v18941_v40 }
 0x282   :  { %v18913_v24 = vpop.f32.mrf.mxu0 }
 0x283   :  { %v15840_v4 = vpop.f32.mrf.mxu1 }
 0x284   :  { %v18915_v32 = vpop.f32.mrf.mxu0  ;;  %v18917_v30 = vadd.f32 %v15840_v4, %v2694_v50  ;;  %v18945_v4 = vld [vmem:[#allocation3 + $0xa2] sm:$0xff] }
 0x285   :  { %v18919_v8 = vpop.f32.mrf.mxu1  ;;  %22964 = vst [vmem:[#allocation22_spill] sm:$0xff] %v18945_v4  ;;  %6575 = vst.msk [vmem:[#allocation3 + $0xa8] sm:$0x3] %vm2239_vm4, %v22928_v23 }
 0x286   :  { %v18921_v43 = vpop.f32.mrf.mxu0 }
 0x287   :  { %22954 = vst [vmem:[#allocation37_spill] sm:$0xff] %v18921_v43  ;;  %v15843_v38 = vpop.f32.mrf.mxu1 }
 0x288   :  { %v18923_v16 = vpop.f32.mrf.mxu0  ;;  %v18925_v17 = vadd.f32 %v15843_v38, %v2704_v57  ;;  %v18943_v57 = vld [vmem:[#allocation3 + $0xa0] sm:$0xff] }
 0x289   :  { %22955 = vst [vmem:[#allocation54_spill] sm:$0xff] %v18923_v16  ;;  %v18927_v15 = vpop.f32.mrf.mxu1  ;;  %22963 = vst [vmem:[#allocation23_spill] sm:$0xff] %v18943_v57 }
 0x28a   :  { %22956 = vst [vmem:[#allocation21_spill] sm:$0xff] %v18925_v17  ;;  %v18929_v60 = vpop.f32.mrf.mxu0  ;;  %6574 = vst.msk [vmem:[#allocation3 + $0xa0] sm:$0xff] %vm2237_vm3, %v22928_v23 }
 0x28b   :  { %22957 = vst [vmem:[#allocation36_spill] sm:$0xff] %v18929_v60  ;;  %v15846_v36 = vpop.f32.mrf.mxu1 }
 0x28c   :  { %v18931_v31 = vpop.f32.mrf.mxu0  ;;  %v18933_v6 = vadd.f32 %v15846_v36, %v2714_v13 }
 0x28d   :  { %22958 = vst [vmem:[#allocation39_spill] sm:$0xff] %v18931_v31  ;;  %v18935_v50 = vpop.f32.mrf.mxu1 }
 0x28e   :  { %22959 = vst [vmem:[#allocation55_spill] sm:$0xff] %v18933_v6  ;;  %22960 = vst [vmem:[#allocation24_spill] sm:$0xff] %v18935_v50  ;;  %v18937_v2 = vpop.f32.mrf.mxu0 }
 0x28f   :  { %22961 = vst [vmem:[#allocation38_spill] sm:$0xff] %v18937_v2  ;;  %v15877_v59 = vpop.f32.mrf.mxu1 }
 0x290   :  { %v18939_v9 = vpop.f32.mrf.mxu0 }
 0x291   :  { %v3303_v13 = vpop.f32.mrf.mxu1 }
 0x292   :  { %v18951_v38 = vpop.f32.mrf.mxu0 }
 0x293   :  { %v18953_v36 = vpop.f32.mrf.mxu1 }
 0x294   :  { %v18955_v63 = vpop.f32.mrf.mxu0 }
 0x295   :  { %v18957_v21 = vpop.f32.mrf.mxu1 }
 0x296   :  { %v18959_v49 = vpop.f32.mrf.mxu0 }
 0x297   :  { %v18961_v33 = vpop.f32.mrf.mxu1 }
 0x298   :  { %v18963_v4 = vpop.f32.mrf.mxu0 }
 0x299   :  { %22965 = vst [vmem:[#allocation40_spill] sm:$0xff] %v18963_v4  ;;  %v18965_v56 = vpop.f32.mrf.mxu1 }
 0x29a   :  { %v18967_v57 = vpop.f32.mrf.mxu0 }
 0x29b   :  { %22966 = vst [vmem:[#allocation43_spill] sm:$0xff] %v18967_v57  ;;  %v18969_v40 = vpop.f32.mrf.mxu1 }
 0x29c   :  { %22967 = vst [vmem:[#allocation25_spill] sm:$0xff] %v18969_v40  ;;  %v18971_v14 = vpop.f32.mrf.mxu0 }
 0x29d   :  { %22968 = vst [vmem:[#allocation42_spill] sm:$0xff] %v18971_v14  ;;  %v18973_v48 = vpop.f32.mrf.mxu1 }
 0x29e   :  { %22969 = vst [vmem:[#allocation45_spill] sm:$0xff] %v18973_v48  ;;  %v18975_v23 = vpop.f32.mrf.mxu0 }
 0x29f   :  { %22970 = vst [vmem:[#allocation44_spill] sm:$0xff] %v18975_v23  ;;  %v18977_v2 = vpop.f32.mrf.mxu1 }
 0x2a0   :  { %22971 = vst [vmem:[#allocation47_spill] sm:$0xff] %v18977_v2  ;;  %v18979_v31 = vpop.f32.mrf.mxu0 }
 0x2a1   :  { %22972 = vst [vmem:[#allocation11_spill] sm:$0xff] %v18979_v31  ;;  %v18981_v6 = vpop.f32.mrf.mxu1 }
 0x2a2   :  { %22973 = vst [vmem:[#allocation12_spill] sm:$0xff] %v18981_v6  ;;  %v18983_v60 = vpop.f32.mrf.mxu0 }
 0x2a3   :  { %22974 = vst [vmem:[#allocation46_spill] sm:$0xff] %v18983_v60  ;;  %v18985_v16 = vpop.f32.mrf.mxu1 }
 0x2a4   :  { %22975 = vst [vmem:[#allocation48_spill] sm:$0xff] %v18985_v16  ;;  %v18987_v17 = vpop.f32.mrf.mxu0 }
 0x2a5   :  { %22976 = vst [vmem:[#allocation26_spill] sm:$0xff] %v18987_v17  ;;  %v18989_v57 = vpop.f32.mrf.mxu1 }
 0x2a6   :  { %22977 = vst [vmem:[#allocation27_spill] sm:$0xff] %v18989_v57  ;;  %v18991_v40 = vpop.f32.mrf.mxu0 }
 0x2a7   :  { %22978 = vst [vmem:[#allocation13_spill] sm:$0xff] %v18991_v40  ;;  %v18993_v14 = vpop.f32.mrf.mxu1 }
 0x2a8   :  { %22979 = vst [vmem:[#allocation28_spill] sm:$0xff] %v18993_v14  ;;  %v18995_v48 = vpop.f32.mrf.mxu0 }
 0x2a9   :  { %22980 = vst [vmem:[#allocation56_spill] sm:$0xff] %v18995_v48  ;;  %v18997_v23 = vpop.f32.mrf.mxu1 }
 0x2aa   :  { %22981 = vst [vmem:[#allocation57_spill] sm:$0xff] %v18997_v23  ;;  %v18999_v2 = vpop.f32.mrf.mxu0 }
 0x2ab   :  { %22982 = vst [vmem:[#allocation58_spill] sm:$0xff] %v18999_v2  ;;  %v19001_v31 = vpop.f32.mrf.mxu1 }
 0x2ac   :  { %22983 = vst [vmem:[#allocation59_spill] sm:$0xff] %v19001_v31  ;;  %v19003_v6 = vpop.f32.mrf.mxu0 }
 0x2ad   :  { %22984 = vst [vmem:[#allocation60_spill] sm:$0xff] %v19003_v6  ;;  %v19005_v60 = vpop.f32.mrf.mxu1 }
 0x2ae   :  { %22985 = vst [vmem:[#allocation61_spill] sm:$0xff] %v19005_v60  ;;  %v19007_v16 = vpop.f32.mrf.mxu0 }
 0x2af   :  { %22986 = vst [vmem:[#allocation62_spill] sm:$0xff] %v19007_v16  ;;  %v15929_v17 = vpop.f32.mrf.mxu1  ;;  %v2639_v16 = vadd.f32 %v18819_v28, %v18817_v46 }
 0x2b0   :  { %v15955_v57 = vpop.f32.mrf.mxu0 }
 0x2b1   :  { %v3758_v4 = vpop.f32.mrf.mxu1 }
 0x2b2   :  { %v19009_v40 = vpop.f32.mrf.mxu0 }
 0x2b3   :  { %22987 = vst [vmem:[#allocation63_spill] sm:$0xff] %v19009_v40  ;;  %v15932_v14 = vpop.f32.mrf.mxu1 }
 0x2b4   :  { %v19013_v48 = vpop.f32.mrf.mxu0 }
 0x2b5   :  { %v19011_v50 = vpop.f32.mrf.mxu1  ;;  %22989 = vst [vmem:[#allocation65_spill] sm:$0xff] %v19013_v48 }
 0x2b6   :  { %22988 = vst [vmem:[#allocation64_spill] sm:$0xff] %v19011_v50  ;;  %v19019_v31 = vpop.f32.mrf.mxu0  ;;  %v2928_v50 = vadd.f32 %v18861_v51, %v2639_v16  ;;  %v2659_v51 = vadd.f32 %v18827_v55, %v18825_v42 }
 0x2b7   :  { %v19015_v23 = vpop.f32.mrf.mxu1  ;;  %22991 = vst [vmem:[#allocation67_spill] sm:$0xff] %v19019_v31  ;;  %v3156_v31 = vadd.f32 %v18857_v34, %v18859_v25 }
 0x2b8   :  { %v19027_v43 = vpop.f32.mrf.mxu0  ;;  %v3155_v46 = vadd.f32 %v18863_v44, %v2928_v50  ;;  %v2679_v44 = vadd.f32 %v18841_v11, %v18839_v10 }
 0x2b9   :  { %v19017_v2 = vpop.f32.mrf.mxu1  ;;  %22994 = vst [vmem:[#allocation70_spill] sm:$0xff] %v19027_v43  ;;  %v3383_v43 = vadd.f32 %v15877_v59, %v3156_v31  ;;  %v22995_v59 = vld [vmem:[#allocation37_spill] sm:$0xff] }
 0x2ba   :  { %22990 = vst [vmem:[#allocation66_spill] sm:$0xff] %v19017_v2  ;;  %v2649_v2 = vadd.f32 %v18823_v18, %v18821_v0  ;;  %v2669_v0 = vadd.f32 %v18834_v41, %v18832_v20  ;;  %v3158_v18 = vadd.f32 %v18865_v3, %v18867_v62  ;;  %v3382_v34 = vadd.f32 %v3303_v13, %v3155_v46 }
 0x2bb   :  { %v19021_v6 = vpop.f32.mrf.mxu1  ;;  %v3610_v50 = vadd.f32 %v18939_v9, %v3383_v43  ;;  %v2689_v41 = vadd.f32 %v18847_v19, %v18845_v39  ;;  %v3160_v3 = vadd.f32 %v18878_v58, %v18881_v47  ;;  %v2936_v10 = vadd.f32 %v18911_v12, %v2679_v44  ;;  %v23005_v44 = vld [vmem:[#allocation45_spill] sm:$0xff] }
 0x2bc   :  { %22992 = vst [vmem:[#allocation68_spill] sm:$0xff] %v19021_v6  ;;  %v19038_v6 = vpop.f32.mrf.mxu0  ;;  %v2930_v28 = vadd.f32 %v18869_v29, %v2649_v2  ;;  %v2932_v29 = vadd.f32 %v18883_v27, %v2659_v51  ;;  %v2934_v55 = vadd.f32 %v18891_v7, %v2669_v0  ;;  %v3385_v20 = vadd.f32 %v18953_v36, %v3158_v18  ;;  %v23003_v51 = vld [vmem:[#allocation36_spill] sm:$0xff]  ;;  %v23004_v18 = vld [vmem:[#allocation43_spill] sm:$0xff] }
 0x2bd   :  { %v19023_v60 = vpop.f32.mrf.mxu1  ;;  %v2699_v62 = vadd.f32 %v18851_v54, %v18849_v61  ;;  %v3838_v7 = vadd.f32 %v15929_v17, %v3610_v50  ;;  %v2709_v39 = vadd.f32 %v18855_v35, %v18853_v1  ;;  %v2938_v58 = vadd.f32 %v18919_v8, %v2689_v41  ;;  %v23002_v36 = vld [vmem:[#allocation64_spill] sm:$0xff]  ;;  %v23007_v41 = vld [vmem:[#allocation39_spill] sm:$0xff] }
 0x2be   :  { %22993 = vst [vmem:[#allocation69_spill] sm:$0xff] %v19023_v60  ;;  %v19052_v25 = vpop.f32.mrf.mxu0  ;;  %v3157_v42 = vadd.f32 %v18871_v45, %v2930_v28  ;;  %v3609_v45 = vadd.f32 %v18951_v38, %v3382_v34  ;;  %v3159_v19 = vadd.f32 %v18885_v37, %v2932_v29  ;;  %v3387_v47 = vadd.f32 %v18961_v33, %v3160_v3  ;;  %v19106_v38 = vld [vmem:[%s22780_s6] ss:$0 sm:$0xff] }
 0x2bf   :  { %v19029_v40 = vpop.f32.mrf.mxu1  ;;  %v3162_v61 = vadd.f32 %v18887_v22, %v18889_v26  ;;  %v3161_v54 = vadd.f32 %v18893_v52, %v2934_v55  ;;  %v3164_v2 = vadd.f32 %v18895_v5, %v18904_v53  ;;  %v3163_v1 = vadd.f32 %v18913_v24, %v2936_v10  ;;  %v22996_v5 = vld [vmem:[#allocation24_spill] sm:$0xff]  ;;  %v19119_v55 = vld [vmem:[%s22781_s7] ss:$0 sm:$0xff] }
 0x2c0   :  { %v3384_v27 = vadd.f32 %v18957_v21, %v3157_v42  ;;  %v19074_v43 = vpop.f32.mrf.mxu0  ;;  %v3612_v21 = vadd.f32 %v18955_v63, %v3385_v20  ;;  %v3837_v17 = vadd.f32 %v3758_v4, %v3609_v45  ;;  %v2940_v35 = vadd.f32 %v18927_v15, %v2699_v62  ;;  %v22997_v24 = vld [vmem:[#allocation40_spill] sm:$0xff]  ;;  %v22998_v15 = vld [vmem:[#allocation25_spill] sm:$0xff]  ;;  %v23006_v20 = vld [vmem:[#allocation55_spill] sm:$0xff] }
 0x2c1   :  { %v19032_v48 = vpop.f32.mrf.mxu1  ;;  %v3386_v37 = vadd.f32 %v18965_v56, %v3159_v19  ;;  %v3166_v8 = vadd.f32 %v18915_v32, %v18917_v30  ;;  %v4065_v26 = vadd.f32 %v15955_v57, %v3838_v7  ;;  %v3165_v9 = vadd.f32 %v22995_v59, %v2938_v58  ;;  %v22999_v32 = vld [vmem:[#allocation21_spill] sm:$0xff]  ;;  %v23014_v59 = vld [vmem:[#allocation44_spill] sm:$0xff] }
 0x2c2   :  { %v3611_v22 = vadd.f32 %v18959_v49, %v3384_v27  ;;  %v3840_v52 = vadd.f32 %v15932_v14, %v3612_v21  ;;  %v19097_v63 = vpop.f32.mrf.mxu0  ;;  %v2942_v53 = vadd.f32 %v22996_v5, %v2709_v39  ;;  %v3614_v4 = vadd.f32 %v22997_v24, %v3387_v47  ;;  %v23000_v49 = vld [vmem:[#allocation54_spill] sm:$0xff]  ;;  %v23001_v14 = vld [vmem:[#allocation63_spill] sm:$0xff]  ;;  %v23008_v10 = vld [vmem:[#allocation65_spill] sm:$0xff] }
 0x2c3   :  { %v19040_v60 = vpop.f32.mrf.mxu1  ;;  %v3389_v13 = vadd.f32 %v22998_v15, %v3162_v61  ;;  %v3168_v30 = vadd.f32 %v23000_v49, %v22999_v32  ;;  %v4064_v57 = vadd.f32 %v23001_v14, %v3837_v17  ;;  %v3167_v0 = vadd.f32 %v23003_v51, %v2940_v35  ;;  %v23009_v39 = vld [vmem:[#allocation38_spill] sm:$0xff]  ;;  %v23011_v47 = vld [vmem:[#allocation47_spill] sm:$0xff]  ;;  %v23015_v24 = vld [vmem:[#allocation12_spill] sm:$0xff] }
 0x2c4   :  { %v3839_v46 = vadd.f32 %v23002_v36, %v3611_v22  ;;  %v3613_v34 = vadd.f32 %v23004_v18, %v3386_v37  ;;  %v3388_v29 = vadd.f32 %v23005_v44, %v3161_v54  ;;  %v3842_v42 = vadd.f32 %v19015_v23, %v3614_v4  ;;  %v19126_v45 = vpop.f32.mrf.mxu0  ;;  %v23010_v23 = vld [vmem:[#allocation42_spill] sm:$0xff]  ;;  %v23013_v35 = vld [vmem:[#allocation67_spill] sm:$0xff]  ;;  %v23019_v51 = vld [vmem:[#allocation48_spill] sm:$0xff] }
 0x2c5   :  { %v19046_v16 = vpop.f32.mrf.mxu1  ;;  %v19123_v3 = vadd.f32 %v23007_v41, %v23006_v20  ;;  %v4067_v62 = vadd.f32 %v23008_v10, %v3840_v52  ;;  %v19130_v19 = vadd.f32 %v23009_v39, %v2942_v53  ;;  %v3616_v58 = vadd.f32 %v23010_v23, %v3389_v13  ;;  %v23012_v54 = vld [vmem:[#allocation66_spill] sm:$0xff] }
 0x2c6   :  { %v3391_v61 = vadd.f32 %v23011_v47, %v3164_v2  ;;  %v3841_v21 = vadd.f32 %v23012_v54, %v3613_v34  ;;  %v4066_v37 = vadd.f32 %v23013_v35, %v3839_v46  ;;  %v3615_v5 = vadd.f32 %v23014_v59, %v3388_v29  ;;  %v23016_v53 = vld [vmem:[#allocation70_spill] sm:$0xff]  ;;  %v19142_v2 = vpop.f32.mrf.mxu0  ;;  %v23018_v46 = vld [vmem:[#allocation11_spill] sm:$0xff]  ;;  %v23024_v35 = vld [vmem:[#allocation28_spill] sm:$0xff] }
 0x2c7   :  { %v19057_v31 = vpop.f32.mrf.mxu1  ;;  %v3390_v4 = vadd.f32 %v23015_v24, %v3163_v1  ;;  %v4069_v15 = vadd.f32 %v23016_v53, %v3842_v42  ;;  %v3393_v18 = vadd.f32 %v23019_v51, %v3166_v8  ;;  %v23020_v1 = vld [vmem:[#allocation69_spill] sm:$0xff]  ;;  %v23021_v10 = vld [vmem:[#allocation46_spill] sm:$0xff] }
 0x2c8   :  { %v4068_v34 = vadd.f32 %v19038_v6, %v3841_v21  ;;  %v3843_v44 = vadd.f32 %v23020_v1, %v3615_v5  ;;  %v19157_v23 = vpop.f32.mrf.mxu0  ;;  %v23023_v21 = vld [vmem:[#allocation26_spill] sm:$0xff]  ;;  %v23025_v5 = vld [vmem:[#allocation13_spill] sm:$0xff] }
 0x2c9   :  { %v19068_v11 = vpop.f32.mrf.mxu1 }
 0x2cb   :  { %v19081_v12 = vpop.f32.mrf.mxu1 }
 0x2cd   :  { %v19092_v33 = vpop.f32.mrf.mxu1 }
 0x2cf   :  { %v15981_v56 = vpop.f32.mrf.mxu1 }
 0x2d0   :  { %v4292_v28 = vadd.f32 %v15981_v56, %v4065_v26  ;;  %v23017_v56 = vld [vmem:[#allocation68_spill] sm:$0xff] }
 0x2d1   :  { %v4212_v50 = vpop.f32.mrf.mxu1  ;;  %v3844_v13 = vadd.f32 %v23017_v56, %v3616_v58  ;;  %v15973_v56 = vpop.f32.mrf.mxu0 }
 0x2d2   :  { %v4315_v27 = vmul.f32 %v19106_v38, %v4292_v28  ;;  %v4291_v7 = vadd.f32 %v4212_v50, %v4064_v57  ;;  %v3618_v28 = vadd.f32 %v23018_v46, %v3391_v61 }
 0x2d3   :  { %v15984_v17 = vpop.f32.mrf.mxu1  ;;  %v4071_v39 = vadd.f32 %v19052_v25, %v3844_v13 }
 0x2d4   :  { %v4338_v22 = vadd.f32 %v19119_v55, %v4315_v27  ;;  %v4314_v26 = vmul.f32 %v19106_v38, %v4291_v7  ;;  %v4294_v52 = vadd.f32 %v15984_v17, %v4067_v62  ;;  %v3617_v62 = vadd.f32 %v23021_v10, %v3390_v4  ;;  %v23022_v27 = vld [vmem:[#allocation27_spill] sm:$0xff]  ;;  %v23026_v4 = vld [vmem:[#allocation57_spill] sm:$0xff] }
 0x2d5   :  { %v4222_v32 = vpop.f32.mrf.mxu1  ;;  %v3392_v7 = vadd.f32 %v23022_v27, %v3165_v9  ;;  %v3846_v8 = vadd.f32 %v19029_v40, %v3618_v28  ;;  %v3620_v17 = vadd.f32 %v23023_v21, %v3393_v18  ;;  %v4070_v9 = vadd.f32 %v19074_v43, %v3843_v44 }
 0x2d6   :  { %v4354_v49 = vmax.f32 %v4338_v22, 0.0  ;;  %v4337_v14 = vadd.f32 %v19119_v55, %v4314_v26  ;;  %v4317_v57 = vmul.f32 %v19106_v38, %v4294_v52  ;;  %v4293_v36 = vadd.f32 %v4222_v32, %v4066_v37 }
 0x2d7   :  { %v15987_v29 = vpop.f32.mrf.mxu1  ;;  %v3395_v37 = vadd.f32 %v23024_v35, %v3168_v30  ;;  %v3845_v25 = vadd.f32 %v19032_v48, %v3617_v62  ;;  %v3619_v24 = vadd.f32 %v23025_v5, %v3392_v7  ;;  %v3394_v53 = vadd.f32 %v23026_v4, %v3167_v0 }
 0x2d8   :  { %4410 = vst.msk [vmem:[#allocation3 + $0x21] sm:$0xff] %vm2237_vm3, %v4354_v49  ;;  %v4353_v42 = vmax.f32 %v4337_v14, 0.0  ;;  %v4340_v50 = vadd.f32 %v19119_v55, %v4317_v57  ;;  %v4316_v20 = vmul.f32 %v19106_v38, %v4293_v36  ;;  %v4296_v41 = vadd.f32 %v15987_v29, %v4069_v15  ;;  %v23027_v14 = vld [vmem:[#allocation56_spill] sm:$0xff]  ;;  %v23028_v36 = vld [vmem:[#allocation59_spill] sm:$0xff] }
 0x2d9   :  { %v4232_v6 = vpop.f32.mrf.mxu1  ;;  %v4073_v15 = vadd.f32 %v19097_v63, %v3846_v8  ;;  %v3848_v30 = vadd.f32 %v19040_v60, %v3620_v17  ;;  %v3622_v57 = vadd.f32 %v23027_v14, %v3395_v37  ;;  %v3397_v46 = vadd.f32 %v23028_v36, %v19123_v3 }
 0x2da   :  { %4409 = vst.msk [vmem:[#allocation3 + $0x11] sm:$0xff] %vm2237_vm3, %v4353_v42  ;;  %v4356_v58 = vmax.f32 %v4340_v50, 0.0  ;;  %v4339_v47 = vadd.f32 %v19119_v55, %v4316_v20  ;;  %v4319_v61 = vmul.f32 %v19106_v38, %v4296_v41  ;;  %v4295_v54 = vadd.f32 %v4232_v6, %v4068_v34  ;;  %v23031_v42 = vld [vmem:[#allocation61_spill] sm:$0xff] }
 0x2db   :  { %v15990_v40 = vpop.f32.mrf.mxu1  ;;  %v4072_v0 = vadd.f32 %v19126_v45, %v3845_v25  ;;  %v3847_v63 = vadd.f32 %v19046_v16, %v3619_v24  ;;  %v23029_v3 = vmov 0.0   ;;  %v23030_v16 = vld [vmem:[#allocation58_spill] sm:$0xff]  ;;  %v3396_v50 = vadd.f32 %v23031_v42, %v19130_v19 }
 0x2dc   :  { %4412 = vst.msk [vmem:[#allocation3 + $0x41] sm:$0xff] %vm2237_vm3, %v4356_v58  ;;  %v4355_v22 = vmax.f32 %v4339_v47, 0.0  ;;  %v4342_v26 = vadd.f32 %v19119_v55, %v4319_v61  ;;  %v4318_v52 = vmul.f32 %v19106_v38, %v4295_v54  ;;  %v4298_v59 = vadd.f32 %v15990_v40, %v4071_v39  ;;  %v4045_v39 = vpop.f32.mrf.mxu0  ;;  %v23032_v47 = vld [vmem:[#allocation60_spill] sm:$0xff] }
 0x2dd   :  { %v4242_v43 = vpop.f32.mrf.mxu1  ;;  %v3621_v45 = vadd.f32 %v23030_v16, %v3394_v53  ;;  %v4075_v20 = vadd.f32 %v19142_v2, %v3848_v30  ;;  %v3850_v41 = vadd.f32 %v19057_v31, %v3622_v57  ;;  %v19215_v31 = vld [vmem:[%s22782_s8 + $0x20] sm:$0xff]  ;;  %v19224_v2 = vld [vmem:[%s22782_s8 + $0x28] sm:$0xff]  ;;  %v3624_v61 = vadd.f32 %v23032_v47, %v3397_v46 }
 0x2de   :  { %4411 = vst.msk [vmem:[#allocation3 + $0x31] sm:$0xff] %vm2237_vm3, %v4355_v22  ;;  %v4358_v48 = vmax.f32 %v4342_v26, 0.0  ;;  %v4341_v13 = vadd.f32 %v19119_v55, %v4318_v52  ;;  %v4321_v32 = vmul.f32 %v19106_v38, %v4298_v59  ;;  %v4297_v49 = vadd.f32 %v4242_v43, %v4070_v9  ;;  %v15976_v25 = vpop.f32.mrf.mxu0  ;;  %v23033_v26 = vld [vmem:[#allocation19_spill] sm:$0xff]  ;;  %v23034_v52 = vld [vmem:[#allocation18_spill] sm:$0xff] }
 0x2df   :  { %v15993_v60 = vpop.f32.mrf.mxu1  ;;  %v19181_v28 = vld [vmem:[#allocation3 + $0x21] sm:$0xff]  ;;  %v4074_v54 = vadd.f32 %v19157_v23, %v3847_v63  ;;  %v3849_v21 = vadd.f32 %v19068_v11, %v3621_v45  ;;  %v4077_v24 = vadd.f32 %v15973_v56, %v3850_v41  ;;  %v3852_v4 = vadd.f32 %v19081_v12, %v3624_v61 }
 0x2e0   :  { %v19183_v51 = vld [vmem:[#allocation3 + $0x20] sm:$0xff]  ;;  %4414 = vst.msk [vmem:[#allocation3 + $0x61] sm:$0xff] %vm2237_vm3, %v4358_v48  ;;  %v4357_v34 = vmax.f32 %v4341_v13, 0.0  ;;  %v4344_v1 = vadd.f32 %v19119_v55, %v4321_v32  ;;  %v4320_v44 = vmul.f32 %v19106_v38, %v4297_v49  ;;  %v4300_v29 = vadd.f32 %v15993_v60, %v4073_v15 }
 0x2e1   :  { %v19185_v18 = vld [vmem:[#allocation3 + $0x22] sm:$0xff]  ;;  %v4252_v10 = vpop.f32.mrf.mxu1  ;;  %v19199_v62 = vld [vmem:[#allocation3 + $0x11] sm:$0xff]  ;;  %v4076_v12 = vadd.f32 %v4045_v39, %v3849_v21 }
 0x2e2   :  { %6558 = vst.msk [vmem:[#allocation3 + $0x20] sm:$0xff] %vm2237_vm3, %v23029_v3  ;;  %v19201_v27 = vld [vmem:[#allocation3 + $0x10] sm:$0xff]  ;;  %4413 = vst.msk [vmem:[#allocation3 + $0x51] sm:$0xff] %vm2237_vm3, %v4357_v34  ;;  %v4360_v8 = vmax.f32 %v4344_v1, 0.0  ;;  %v4343_v6 = vadd.f32 %v19119_v55, %v4320_v44  ;;  %v4323_v58 = vmul.f32 %v19106_v38, %v4300_v29  ;;  %v4299_v19 = vadd.f32 %v4252_v10, %v4072_v0  ;;  %v23035_v59 = vld [vmem:[#allocation62_spill] sm:$0xff]  ;;  %v4055_v0 = vpop.f32.mrf.mxu0 }
 0x2e3   :  { %6559 = vst.msk [vmem:[#allocation3 + $0x28] sm:$0x3] %vm2239_vm4, %v23029_v3  ;;  %v19203_v7 = vld [vmem:[#allocation3 + $0x12] sm:$0xff]  ;;  %16006 = vmatmul.mubr.msk.f32.vlgmr.msra.gmra.mxu0 %vm2237_vm3, %v19199_v62  ;;  %16032 = vmatmul.mubr.msk.f32.vlgmr.msra.gmra.mxu1 %vm2237_vm3, %v19201_v27  ;;  %v15996_v17 = vpop.f32.mrf.mxu1  ;;  %v19233_v35 = vld [vmem:[#allocation3 + $0x41] sm:$0xff]  ;;  %v3623_v5 = vadd.f32 %v23035_v59, %v3396_v50  ;;  %v4079_v1 = vadd.f32 %v15976_v25, %v3852_v4 }
 0x2e4   :  { %6556 = vst.msk [vmem:[#allocation3 + $0x10] sm:$0xff] %vm2237_vm3, %v23029_v3  ;;  %16008 = vmatprep.mubr.msk.f32.mxu0 %vm2237_vm3, %v19181_v28  ;;  %16034 = vmatprep.mubr.msk.f32.mxu1 %vm2237_vm3, %v19183_v51  ;;  %v19235_v37 = vld [vmem:[#allocation3 + $0x40] sm:$0xff]  ;;  %4416 = vst.msk [vmem:[#allocation3 + $0x81] sm:$0xff] %vm2237_vm3, %v4360_v8  ;;  %v4359_v40 = vmax.f32 %v4343_v6, 0.0  ;;  %v4346_v23 = vadd.f32 %v19119_v55, %v4323_v58  ;;  %v4322_v11 = vmul.f32 %v19106_v38, %v4299_v19  ;;  %v19317_v21 = vld [vmem:[#allocation3 + $0x90] sm:$0xff] }
 0x2e5   :  { %6557 = vst.msk [vmem:[#allocation3 + $0x18] sm:$0x3] %vm2239_vm4, %v23029_v3  ;;  %v19237_v9 = vld [vmem:[#allocation3 + $0x42] sm:$0xff]  ;;  %v4302_v22 = vadd.f32 %v15996_v17, %v4075_v20  ;;  %16056 = vmatpush3.msra.mxu0 %v23033_v26  ;;  %16082 = vmatpush3.msra.mxu1 %v23034_v52  ;;  %v4262_v53 = vpop.f32.mrf.mxu1  ;;  %v19250_v15 = vld [vmem:[#allocation3 + $0x31] sm:$0xff]  ;;  %v3851_v49 = vadd.f32 %v19092_v33, %v3623_v5 }
 0x2e6   :  { %6562 = vst.msk [vmem:[#allocation3 + $0x40] sm:$0xff] %vm2237_vm3, %v23029_v3  ;;  %v19252_v30 = vld [vmem:[#allocation3 + $0x30] sm:$0xff]  ;;  %16107 = vmatprep.subr.mxu0 %v19215_v31  ;;  %16133 = vmatprep.subr.mxu1 %v19224_v2  ;;  %4415 = vst.msk [vmem:[#allocation3 + $0x71] sm:$0xff] %vm2237_vm3, %v4359_v40  ;;  %v4362_v48 = vmax.f32 %v4346_v23, 0.0  ;;  %v4345_v13 = vadd.f32 %v19119_v55, %v4322_v11  ;;  %v4301_v32 = vadd.f32 %v4262_v53, %v4074_v54 }
 0x2e7   :  { %6563 = vst.msk [vmem:[#allocation3 + $0x48] sm:$0x3] %vm2239_vm4, %v23029_v3  ;;  %v19254_v43 = vld [vmem:[#allocation3 + $0x32] sm:$0xff]  ;;  %v4325_v56 = vmul.f32 %v19106_v38, %v4302_v22  ;;  %16009 = vmatmul.mubr.msk.f32.gmra.mxu0 %vm2237_vm3, %v19250_v15  ;;  %16035 = vmatmul.mubr.msk.f32.gmra.mxu1 %vm2237_vm3, %v19252_v30  ;;  %v15999_v14 = vpop.f32.mrf.mxu1  ;;  %v19274_v57 = vld [vmem:[#allocation3 + $0x61] sm:$0xff]  ;;  %v4078_v10 = vadd.f32 %v4055_v0, %v3851_v49 }
 0x2e8   :  { %6560 = vst.msk [vmem:[#allocation3 + $0x30] sm:$0xff] %vm2237_vm3, %v23029_v3  ;;  %16011 = vmatprep.mubr.msk.f32.mxu0 %vm2237_vm3, %v19233_v35  ;;  %16037 = vmatprep.mubr.msk.f32.mxu1 %vm2237_vm3, %v19235_v37  ;;  %v19276_v36 = vld [vmem:[#allocation3 + $0x60] sm:$0xff]  ;;  %4418 = vst.msk [vmem:[#allocation3 + $0xc1] sm:$0xff] %vm2237_vm3, %v4362_v48  ;;  %v4361_v63 = vmax.f32 %v4345_v13, 0.0  ;;  %v4324_v33 = vmul.f32 %v19106_v38, %v4301_v32  ;;  %v4304_v34 = vadd.f32 %v15999_v14, %v4077_v24  ;;  %v19319_v17 = vld [vmem:[#allocation3 + $0x91] sm:$0xff] }
 0x2e9   :  { %6561 = vst.msk [vmem:[#allocation3 + $0x38] sm:$0x3] %vm2239_vm4, %v23029_v3  ;;  %v19278_v46 = vld [vmem:[#allocation3 + $0x62] sm:$0xff]  ;;  %v4348_v60 = vadd.f32 %v19119_v55, %v4325_v56  ;;  %v4272_v44 = vpop.f32.mrf.mxu1  ;;  %v19287_v29 = vld [vmem:[#allocation3 + $0x51] sm:$0xff] }
 0x2ea   :  { %6566 = vst.msk [vmem:[#allocation3 + $0x60] sm:$0xff] %vm2237_vm3, %v23029_v3  ;;  %v19289_v16 = vld [vmem:[#allocation3 + $0x50] sm:$0xff]  ;;  %4417 = vst.msk [vmem:[#allocation3 + $0xb1] sm:$0xff] %vm2237_vm3, %v4361_v63  ;;  %v4347_v50 = vadd.f32 %v19119_v55, %v4324_v33  ;;  %v4327_v20 = vmul.f32 %v19106_v38, %v4304_v34  ;;  %v4303_v41 = vadd.f32 %v4272_v44, %v4076_v12  ;;  %v23036_v24 = vld [vmem:[#allocation41_spill] sm:$0xff] }
 0x2eb   :  { %6567 = vst.msk [vmem:[#allocation3 + $0x68] sm:$0x3] %vm2239_vm4, %v23029_v3  ;;  %v19291_v45 = vld [vmem:[#allocation3 + $0x52] sm:$0xff]  ;;  %v4364_v42 = vmax.f32 %v4348_v60, 0.0  ;;  %16012 = vmatmul.mubr.msk.f32.gmra.mxu0 %vm2237_vm3, %v19287_v29  ;;  %16038 = vmatmul.mubr.msk.f32.gmra.mxu1 %vm2237_vm3, %v19289_v16  ;;  %v16002_v39 = vpop.f32.mrf.mxu1  ;;  %v19308_v8 = vld [vmem:[#allocation3 + $0x80] sm:$0xff] }
 0x2ec   :  { %6564 = vst.msk [vmem:[#allocation3 + $0x50] sm:$0xff] %vm2237_vm3, %v23029_v3  ;;  %16014 = vmatprep.mubr.msk.f32.mxu0 %vm2237_vm3, %v19274_v57  ;;  %16040 = vmatprep.mubr.msk.f32.mxu1 %vm2237_vm3, %v19276_v36  ;;  %v19310_v6 = vld [vmem:[#allocation3 + $0x81] sm:$0xff]  ;;  %v4363_v19 = vmax.f32 %v4347_v50, 0.0  ;;  %v4350_v47 = vadd.f32 %v19119_v55, %v4327_v20  ;;  %v4326_v61 = vmul.f32 %v19106_v38, %v4303_v41  ;;  %v19325_v25 = vld [vmem:[#allocation3 + $0x92] sm:$0xff] }
 0x2ed   :  { %6565 = vst.msk [vmem:[#allocation3 + $0x58] sm:$0x3] %vm2239_vm4, %v23029_v3  ;;  %v19312_v58 = vld [vmem:[#allocation3 + $0x82] sm:$0xff]  ;;  %v4306_v54 = vadd.f32 %v16002_v39, %v4079_v1  ;;  %v4282_v40 = vpop.f32.mrf.mxu1  ;;  %v19327_v23 = vld [vmem:[#allocation3 + $0x71] sm:$0xff]  ;;  %6573 = vst.msk [vmem:[#allocation3 + $0x98] sm:$0x3] %vm2239_vm4, %v23029_v3 }
 0x2ee   :  { %4420 = vst.msk [vmem:[#allocation3 + $0xe1] sm:$0xff] %vm2237_vm3, %v4364_v42  ;;  %6570 = vst.msk [vmem:[#allocation3 + $0x80] sm:$0xff] %vm2237_vm3, %v23029_v3  ;;  %v19329_v11 = vld [vmem:[#allocation3 + $0x70] sm:$0xff]  ;;  %v4366_v26 = vmax.f32 %v4350_v47, 0.0  ;;  %v4349_v52 = vadd.f32 %v19119_v55, %v4326_v61  ;;  %v4305_v5 = vadd.f32 %v4282_v40, %v4078_v10 }
 0x2ef   :  { %6571 = vst.msk [vmem:[#allocation3 + $0x88] sm:$0x3] %vm2239_vm4, %v23029_v3  ;;  %v19331_v22 = vld [vmem:[#allocation3 + $0x72] sm:$0xff]  ;;  %v4329_v59 = vmul.f32 %v19106_v38, %v4306_v54  ;;  %16015 = vmatmul.mubr.msk.f32.gmra.mxu0 %vm2237_vm3, %v19327_v23  ;;  %16041 = vmatmul.mubr.msk.f32.gmra.mxu1 %vm2237_vm3, %v19329_v11  ;;  %v19352_v53 = vld [vmem:[#allocation3 + $0xc1] sm:$0xff] }
 0x2f0   :  { %6572 = vst.msk [vmem:[#allocation3 + $0x90] sm:$0xff] %vm2237_vm3, %v23029_v3  ;;  %4419 = vst.msk [vmem:[#allocation3 + $0xd1] sm:$0xff] %vm2237_vm3, %v4363_v19  ;;  %16017 = vmatprep.mubr.msk.f32.mxu0 %vm2237_vm3, %v23036_v24  ;;  %v23037_v4 = vld [vmem:[#allocation23_spill] sm:$0xff]  ;;  %v19354_v48 = vld [vmem:[#allocation3 + $0xc0] sm:$0xff]  ;;  %v4365_v56 = vmax.f32 %v4349_v52, 0.0  ;;  %v4328_v12 = vmul.f32 %v19106_v38, %v4305_v5 }
 0x2f1   :  { %6568 = vst.msk [vmem:[#allocation3 + $0x70] sm:$0xff] %vm2237_vm3, %v23029_v3  ;;  %16043 = vmatprep.mubr.msk.f32.mxu1 %vm2237_vm3, %v23037_v4  ;;  %v19356_v13 = vld [vmem:[#allocation3 + $0xc2] sm:$0xff]  ;;  %4422 = vst.msk [vmem:[#allocation3 + $0x101] sm:$0xff] %vm2237_vm3, %v4366_v26  ;;  %v4352_v32 = vadd.f32 %v19119_v55, %v4329_v59  ;;  %v19365_v49 = vld [vmem:[#allocation3 + $0xb1] sm:$0xff] }
 0x2f2   :  { %6569 = vst.msk [vmem:[#allocation3 + $0x78] sm:$0x3] %vm2239_vm4, %v23029_v3  ;;  %6579 = vst.msk [vmem:[#allocation3 + $0xc8] sm:$0x3] %vm2239_vm4, %v23029_v3  ;;  %v19367_v14 = vld [vmem:[#allocation3 + $0xb0] sm:$0xff]  ;;  %v4351_v60 = vadd.f32 %v19119_v55, %v4328_v12  ;;  %v23038_v4 = vld [vmem:[#allocation34_spill] sm:$0xff] }
 0x2f3   :  { %6578 = vst.msk [vmem:[#allocation3 + $0xc0] sm:$0xff] %vm2237_vm3, %v23029_v3  ;;  %v19369_v0 = vld [vmem:[#allocation3 + $0xb2] sm:$0xff]  ;;  %4421 = vst.msk [vmem:[#allocation3 + $0xf1] sm:$0xff] %vm2237_vm3, %v4365_v56  ;;  %v4368_v63 = vmax.f32 %v4352_v32, 0.0  ;;  %16018 = vmatmul.mubr.msk.f32.gmra.mxu0 %vm2237_vm3, %v19365_v49  ;;  %16044 = vmatmul.mubr.msk.f32.gmra.mxu1 %vm2237_vm3, %v19367_v14  ;;  %v6610_v12 = vld [vmem:[#allocation3] sm:$0xff] }
 0x2f4   :  { %6576 = vst.msk [vmem:[#allocation3 + $0xb0] sm:$0xff] %vm2237_vm3, %v23029_v3  ;;  %16020 = vmatprep.mubr.msk.f32.mxu0 %vm2237_vm3, %v19352_v53  ;;  %16046 = vmatprep.mubr.msk.f32.mxu1 %vm2237_vm3, %v19354_v48  ;;  %v4367_v34 = vmax.f32 %v4351_v60, 0.0  ;;  %v19449_v40 = vld [vmem:[#allocation3 + $0x130] sm:$0xff]  ;;  %v13954_v32 = vld [vmem:[%s22782_s8 + $0x38] sm:$0xff] }
 0x2f5   :  { %6577 = vst.msk [vmem:[#allocation3 + $0xb8] sm:$0x3] %vm2239_vm4, %v23029_v3  ;;  %v19385_v38 = vld [vmem:[#allocation3 + $0xe1] sm:$0xff]  ;;  %v19451_v26 = vld [vmem:[#allocation3 + $0x131] sm:$0xff] }
 0x2f6   :  { %v19387_v55 = vld [vmem:[#allocation3 + $0xe0] sm:$0xff]  ;;  %4424 = vst.msk [vmem:[#allocation3 + $0x121] sm:$0xff] %vm2237_vm3, %v4368_v63  ;;  %4423 = vst.msk [vmem:[#allocation3 + $0x111] sm:$0xff] %vm2237_vm3, %v4367_v34  ;;  %v19457_v52 = vld [vmem:[#allocation3 + $0x132] sm:$0xff] }
 0x2f7   :  { %v19389_v33 = vld [vmem:[#allocation3 + $0xe2] sm:$0xff]  ;;  %v19396_v1 = vld [vmem:[#allocation3 + $0xd1] sm:$0xff]  ;;  %6592 = vst.msk [vmem:[#allocation3 + $0x130] sm:$0xff] %vm2237_vm3, %v23029_v3 }
 0x2f8   :  { %6582 = vst.msk [vmem:[#allocation3 + $0xe0] sm:$0xff] %vm2237_vm3, %v23029_v3  ;;  %v19398_v44 = vld [vmem:[#allocation3 + $0xd0] sm:$0xff]  ;;  %16021 = vmatmul.mubr.msk.f32.gmra.mxu0 %vm2237_vm3, %v19396_v1  ;;  %v19415_v50 = vld [vmem:[#allocation3 + $0x101] sm:$0xff] }
 0x2f9   :  { %6583 = vst.msk [vmem:[#allocation3 + $0xe8] sm:$0x3] %vm2239_vm4, %v23029_v3  ;;  %v19400_v42 = vld [vmem:[#allocation3 + $0xd2] sm:$0xff]  ;;  %16047 = vmatmul.mubr.msk.f32.gmra.mxu1 %vm2237_vm3, %v19398_v44  ;;  %16023 = vmatprep.mubr.msk.f32.mxu0 %vm2237_vm3, %v19385_v38  ;;  %v19417_v20 = vld [vmem:[#allocation3 + $0x100] sm:$0xff]  ;;  %6593 = vst.msk [vmem:[#allocation3 + $0x138] sm:$0x3] %vm2239_vm4, %v23029_v3 }
 0x2fa   :  { %6580 = vst.msk [vmem:[#allocation3 + $0xd0] sm:$0xff] %vm2237_vm3, %v23029_v3  ;;  %16049 = vmatprep.mubr.msk.f32.mxu1 %vm2237_vm3, %v19387_v55  ;;  %v19419_v41 = vld [vmem:[#allocation3 + $0x102] sm:$0xff]  ;;  %v19425_v10 = vld [vmem:[#allocation3 + $0xf1] sm:$0xff] }
 0x2fb   :  { %6581 = vst.msk [vmem:[#allocation3 + $0xd8] sm:$0x3] %vm2239_vm4, %v23029_v3  ;;  %6587 = vst.msk [vmem:[#allocation3 + $0x108] sm:$0x3] %vm2239_vm4, %v23029_v3  ;;  %v19427_v39 = vld [vmem:[#allocation3 + $0xf0] sm:$0xff] }
 0x2fc   :  { %6586 = vst.msk [vmem:[#allocation3 + $0x100] sm:$0xff] %vm2237_vm3, %v23029_v3  ;;  %v19429_v19 = vld [vmem:[#allocation3 + $0xf2] sm:$0xff]  ;;  %16024 = vmatmul.mubr.msk.f32.gmra.mxu0 %vm2237_vm3, %v19425_v10 }
 0x2fd   :  { %16050 = vmatmul.mubr.msk.f32.gmra.mxu1 %vm2237_vm3, %v19427_v39  ;;  %6584 = vst.msk [vmem:[#allocation3 + $0xf0] sm:$0xff] %vm2237_vm3, %v23029_v3  ;;  %16026 = vmatprep.mubr.msk.f32.mxu0 %vm2237_vm3, %v19415_v50  ;;  %v19443_v47 = vld [vmem:[#allocation3 + $0x120] sm:$0xff]  ;;  %v19459_v59 = vld [vmem:[#allocation3 + $0x111] sm:$0xff] }
 0x2fe   :  { %6585 = vst.msk [vmem:[#allocation3 + $0xf8] sm:$0x3] %vm2239_vm4, %v23029_v3  ;;  %16052 = vmatprep.mubr.msk.f32.mxu1 %vm2237_vm3, %v19417_v20  ;;  %v19445_v61 = vld [vmem:[#allocation3 + $0x121] sm:$0xff]  ;;  %v19461_v5 = vld [vmem:[#allocation3 + $0x110] sm:$0xff] }
 0x2ff   :  { %v19447_v54 = vld [vmem:[#allocation3 + $0x122] sm:$0xff]  ;;  %v19463_v24 = vld [vmem:[#allocation3 + $0x112] sm:$0xff] }
 0x300   :  { %6591 = vst.msk [vmem:[#allocation3 + $0x128] sm:$0x3] %vm2239_vm4, %v23029_v3  ;;  %16027 = vmatmul.mubr.msk.f32.gmra.mxu0 %vm2237_vm3, %v19459_v59  ;;  %6589 = vst.msk [vmem:[#allocation3 + $0x118] sm:$0x3] %vm2239_vm4, %v23029_v3  ;;  %v13937_v56 = vld [vmem:[%s22782_s8 + $0x30] sm:$0xff] }
 0x301   :  { %6590 = vst.msk [vmem:[#allocation3 + $0x120] sm:$0xff] %vm2237_vm3, %v23029_v3  ;;  %16053 = vmatmul.mubr.msk.f32.gmra.mxu1 %vm2237_vm3, %v19461_v5  ;;  %6588 = vst.msk [vmem:[#allocation3 + $0x110] sm:$0xff] %vm2237_vm3, %v23029_v3  ;;  %16057 = vmatprep.mubr.msk.f32.mxu0 %vm2237_vm3, %v23038_v4 }
 0x302   :  { %16083 = vmatprep.mubr.msk.f32.mxu1 %vm2237_vm3, %v19201_v27  ;;  %v23039_v27 = vld [vmem:[#allocation22_spill] sm:$0xff] }
 0x304   :  { %16058 = vmatmul.mubr.msk.f32.vlgmr.msra.gmra.mxu0 %vm2237_vm3, %v19203_v7 }
 0x305   :  { %16084 = vmatmul.mubr.msk.f32.vlgmr.msra.gmra.mxu1 %vm2237_vm3, %v19183_v51  ;;  %16060 = vmatprep.mubr.msk.f32.mxu0 %vm2237_vm3, %v19185_v18 }
 0x306   :  { %16086 = vmatprep.mubr.msk.f32.mxu1 %vm2237_vm3, %v19252_v30  ;;  %16108 = vmatpush3.msra.mxu0 %v19215_v31  ;;  %v13971_v31 = vld [vmem:[%s22782_s8 + $0x40] sm:$0xff] }
 0x307   :  { %16134 = vmatpush3.msra.mxu1 %v19224_v2  ;;  %16159 = vmatprep.subr.mxu0 %v13937_v56 }
 0x308   :  { %16185 = vmatprep.subr.mxu1 %v13954_v32  ;;  %16061 = vmatmul.mubr.msk.f32.gmra.mxu0 %vm2237_vm3, %v19254_v43 }
 0x309   :  { %16087 = vmatmul.mubr.msk.f32.gmra.mxu1 %vm2237_vm3, %v19235_v37  ;;  %16063 = vmatprep.mubr.msk.f32.mxu0 %vm2237_vm3, %v19237_v9 }
 0x30a   :  { %16089 = vmatprep.mubr.msk.f32.mxu1 %vm2237_vm3, %v19289_v16 }
 0x30c   :  { %16064 = vmatmul.mubr.msk.f32.gmra.mxu0 %vm2237_vm3, %v19291_v45 }
 0x30d   :  { %16090 = vmatmul.mubr.msk.f32.gmra.mxu1 %vm2237_vm3, %v19276_v36  ;;  %16066 = vmatprep.mubr.msk.f32.mxu0 %vm2237_vm3, %v19278_v46 }
 0x30e   :  { %16092 = vmatprep.mubr.msk.f32.mxu1 %vm2237_vm3, %v19329_v11 }
 0x310   :  { %16067 = vmatmul.mubr.msk.f32.gmra.mxu0 %vm2237_vm3, %v19331_v22 }
 0x311   :  { %16093 = vmatmul.mubr.msk.f32.gmra.mxu1 %vm2237_vm3, %v19308_v8  ;;  %16069 = vmatprep.mubr.msk.f32.mxu0 %vm2237_vm3, %v23039_v27 }
 0x312   :  { %16095 = vmatprep.mubr.msk.f32.mxu1 %vm2237_vm3, %v19367_v14 }
 0x314   :  { %16070 = vmatmul.mubr.msk.f32.gmra.mxu0 %vm2237_vm3, %v19369_v0 }
 0x315   :  { %16096 = vmatmul.mubr.msk.f32.gmra.mxu1 %vm2237_vm3, %v19354_v48  ;;  %16072 = vmatprep.mubr.msk.f32.mxu0 %vm2237_vm3, %v19356_v13 }
 0x316   :  { %16098 = vmatprep.mubr.msk.f32.mxu1 %vm2237_vm3, %v19398_v44 }
 0x318   :  { %16073 = vmatmul.mubr.msk.f32.gmra.mxu0 %vm2237_vm3, %v19400_v42 }
 0x319   :  { %16099 = vmatmul.mubr.msk.f32.gmra.mxu1 %vm2237_vm3, %v19387_v55  ;;  %16075 = vmatprep.mubr.msk.f32.mxu0 %vm2237_vm3, %v19389_v33 }
 0x31a   :  { %16101 = vmatprep.mubr.msk.f32.mxu1 %vm2237_vm3, %v19427_v39 }
 0x31c   :  { %16076 = vmatmul.mubr.msk.f32.gmra.mxu0 %vm2237_vm3, %v19429_v19 }
 0x31d   :  { %16102 = vmatmul.mubr.msk.f32.gmra.mxu1 %vm2237_vm3, %v19417_v20  ;;  %16078 = vmatprep.mubr.msk.f32.mxu0 %vm2237_vm3, %v19419_v41 }
 0x31e   :  { %16104 = vmatprep.mubr.msk.f32.mxu1 %vm2237_vm3, %v19461_v5 }
 0x320   :  { %16079 = vmatmul.mubr.msk.f32.gmra.mxu0 %vm2237_vm3, %v19463_v24 }
 0x321   :  { %16105 = vmatmul.mubr.msk.f32.gmra.mxu1 %vm2237_vm3, %v19443_v47  ;;  %16109 = vmatprep.mubr.msk.f32.mxu0 %vm2237_vm3, %v19199_v62 }
 0x322   :  { %16135 = vmatprep.mubr.msk.f32.mxu1 %vm2237_vm3, %v19203_v7 }
 0x324   :  { %16110 = vmatmul.mubr.msk.f32.vlgmr.msra.gmra.mxu0 %vm2237_vm3, %v19181_v28 }
 0x325   :  { %16136 = vmatmul.mubr.msk.f32.vlgmr.msra.gmra.mxu1 %vm2237_vm3, %v19185_v18  ;;  %16112 = vmatprep.mubr.msk.f32.mxu0 %vm2237_vm3, %v19250_v15 }
 0x326   :  { %16138 = vmatprep.mubr.msk.f32.mxu1 %vm2237_vm3, %v19254_v43  ;;  %16160 = vmatpush3.msra.mxu0 %v13937_v56 }
 0x327   :  { %16186 = vmatpush3.msra.mxu1 %v13954_v32  ;;  %16211 = vmatprep.subr.mxu0 %v13971_v31 }
 0x328   :  { %16113 = vmatmul.mubr.msk.f32.gmra.mxu0 %vm2237_vm3, %v19233_v35 }
 0x329   :  { %16139 = vmatmul.mubr.msk.f32.gmra.mxu1 %vm2237_vm3, %v19237_v9  ;;  %16115 = vmatprep.mubr.msk.f32.mxu0 %vm2237_vm3, %v19287_v29 }
 0x32a   :  { %16141 = vmatprep.mubr.msk.f32.mxu1 %vm2237_vm3, %v19291_v45 }
 0x32c   :  { %16116 = vmatmul.mubr.msk.f32.gmra.mxu0 %vm2237_vm3, %v19274_v57 }
 0x32d   :  { %16142 = vmatmul.mubr.msk.f32.gmra.mxu1 %vm2237_vm3, %v19278_v46  ;;  %16118 = vmatprep.mubr.msk.f32.mxu0 %vm2237_vm3, %v19327_v23 }
 0x32e   :  { %16144 = vmatprep.mubr.msk.f32.mxu1 %vm2237_vm3, %v19331_v22 }
 0x330   :  { %16119 = vmatmul.mubr.msk.f32.gmra.mxu0 %vm2237_vm3, %v19310_v6 }
 0x331   :  { %16145 = vmatmul.mubr.msk.f32.gmra.mxu1 %vm2237_vm3, %v19312_v58  ;;  %16121 = vmatprep.mubr.msk.f32.mxu0 %vm2237_vm3, %v19365_v49 }
 0x332   :  { %16147 = vmatprep.mubr.msk.f32.mxu1 %vm2237_vm3, %v19369_v0 }
 0x334   :  { %16122 = vmatmul.mubr.msk.f32.gmra.mxu0 %vm2237_vm3, %v19352_v53 }
 0x335   :  { %16148 = vmatmul.mubr.msk.f32.gmra.mxu1 %vm2237_vm3, %v19356_v13  ;;  %16124 = vmatprep.mubr.msk.f32.mxu0 %vm2237_vm3, %v19396_v1 }
 0x336   :  { %16150 = vmatprep.mubr.msk.f32.mxu1 %vm2237_vm3, %v19400_v42 }
 0x338   :  { %16125 = vmatmul.mubr.msk.f32.gmra.mxu0 %vm2237_vm3, %v19385_v38 }
 0x339   :  { %16151 = vmatmul.mubr.msk.f32.gmra.mxu1 %vm2237_vm3, %v19389_v33  ;;  %16127 = vmatprep.mubr.msk.f32.mxu0 %vm2237_vm3, %v19425_v10 }
 0x33a   :  { %16153 = vmatprep.mubr.msk.f32.mxu1 %vm2237_vm3, %v19429_v19 }
 0x33c   :  { %16128 = vmatmul.mubr.msk.f32.gmra.mxu0 %vm2237_vm3, %v19415_v50 }
 0x33d   :  { %16154 = vmatmul.mubr.msk.f32.gmra.mxu1 %vm2237_vm3, %v19419_v41  ;;  %16130 = vmatprep.mubr.msk.f32.mxu0 %vm2237_vm3, %v19459_v59 }
 0x33e   :  { %16156 = vmatprep.mubr.msk.f32.mxu1 %vm2237_vm3, %v19463_v24 }
 0x340   :  { %16131 = vmatmul.mubr.msk.f32.gmra.mxu0 %vm2237_vm3, %v19445_v61 }
 0x341   :  { %16157 = vmatmul.mubr.msk.f32.gmra.mxu1 %vm2237_vm3, %v19447_v54  ;;  %16161 = vmatprep.mubr.msk.f32.mxu0 %vm2237_vm3, %v19183_v51 }
 0x342   :  { %16187 = vmatprep.mubr.msk.f32.mxu1 %vm2237_vm3, %v19181_v28 }
 0x344   :  { %16162 = vmatmul.mubr.msk.f32.vlgmr.msra.gmra.mxu0 %vm2237_vm3, %v19252_v30 }
 0x345   :  { %16188 = vmatmul.mubr.msk.f32.vlgmr.msra.gmra.mxu1 %vm2237_vm3, %v19250_v15  ;;  %16164 = vmatprep.mubr.msk.f32.mxu0 %vm2237_vm3, %v19235_v37 }
 0x346   :  { %16190 = vmatprep.mubr.msk.f32.mxu1 %vm2237_vm3, %v19233_v35  ;;  %16212 = vmatpush3.msra.mxu0 %v13971_v31 }
 0x348   :  { %16165 = vmatmul.mubr.msk.f32.gmra.mxu0 %vm2237_vm3, %v19289_v16 }
 0x349   :  { %16191 = vmatmul.mubr.msk.f32.gmra.mxu1 %vm2237_vm3, %v19287_v29  ;;  %16167 = vmatprep.mubr.msk.f32.mxu0 %vm2237_vm3, %v19276_v36 }
 0x34a   :  { %16193 = vmatprep.mubr.msk.f32.mxu1 %vm2237_vm3, %v19274_v57 }
 0x34c   :  { %16168 = vmatmul.mubr.msk.f32.gmra.mxu0 %vm2237_vm3, %v19329_v11 }
 0x34d   :  { %16194 = vmatmul.mubr.msk.f32.gmra.mxu1 %vm2237_vm3, %v19327_v23  ;;  %16170 = vmatprep.mubr.msk.f32.mxu0 %vm2237_vm3, %v19308_v8 }
 0x34e   :  { %16196 = vmatprep.mubr.msk.f32.mxu1 %vm2237_vm3, %v19310_v6 }
 0x350   :  { %16171 = vmatmul.mubr.msk.f32.gmra.mxu0 %vm2237_vm3, %v19317_v21 }
 0x351   :  { %16197 = vmatmul.mubr.msk.f32.gmra.mxu1 %vm2237_vm3, %v19319_v17  ;;  %16173 = vmatprep.mubr.msk.f32.mxu0 %vm2237_vm3, %v19354_v48 }
 0x352   :  { %16199 = vmatprep.mubr.msk.f32.mxu1 %vm2237_vm3, %v19352_v53 }
 0x354   :  { %16174 = vmatmul.mubr.msk.f32.gmra.mxu0 %vm2237_vm3, %v19398_v44 }
 0x355   :  { %16200 = vmatmul.mubr.msk.f32.gmra.mxu1 %vm2237_vm3, %v19396_v1  ;;  %16176 = vmatprep.mubr.msk.f32.mxu0 %vm2237_vm3, %v19387_v55 }
 0x356   :  { %16202 = vmatprep.mubr.msk.f32.mxu1 %vm2237_vm3, %v19385_v38 }
 0x358   :  { %16177 = vmatmul.mubr.msk.f32.gmra.mxu0 %vm2237_vm3, %v19427_v39 }
 0x359   :  { %16203 = vmatmul.mubr.msk.f32.gmra.mxu1 %vm2237_vm3, %v19425_v10  ;;  %16179 = vmatprep.mubr.msk.f32.mxu0 %vm2237_vm3, %v19417_v20 }
 0x35a   :  { %16205 = vmatprep.mubr.msk.f32.mxu1 %vm2237_vm3, %v19415_v50 }
 0x35c   :  { %16180 = vmatmul.mubr.msk.f32.gmra.mxu0 %vm2237_vm3, %v19461_v5 }
 0x35d   :  { %16206 = vmatmul.mubr.msk.f32.gmra.mxu1 %vm2237_vm3, %v19459_v59  ;;  %16182 = vmatprep.mubr.msk.f32.mxu0 %vm2237_vm3, %v19443_v47 }
 0x35e   :  { %16208 = vmatprep.mubr.msk.f32.mxu1 %vm2237_vm3, %v19445_v61 }
 0x360   :  { %16183 = vmatmul.mubr.msk.f32.gmra.mxu0 %vm2237_vm3, %v19449_v40 }
 0x361   :  { %16209 = vmatmul.mubr.msk.f32.gmra.mxu1 %vm2237_vm3, %v19451_v26  ;;  %16213 = vmatprep.mubr.msk.f32.mxu0 %vm2237_vm3, %v19185_v18 }
 0x364   :  { %16214 = vmatmul.mubr.msk.f32.vlgmr.msra.gmra.mxu0 %vm2237_vm3, %v19254_v43 }
 0x365   :  { %16216 = vmatprep.mubr.msk.f32.mxu0 %vm2237_vm3, %v19237_v9 }
 0x368   :  { %16217 = vmatmul.mubr.msk.f32.gmra.mxu0 %vm2237_vm3, %v19291_v45 }
 0x369   :  { %16219 = vmatprep.mubr.msk.f32.mxu0 %vm2237_vm3, %v19278_v46 }
 0x36c   :  { %16220 = vmatmul.mubr.msk.f32.gmra.mxu0 %vm2237_vm3, %v19331_v22  ;;  %v6626_v22 = vld [vmem:[%s22784_s10] sm:$0xff] }
 0x36d   :  { %16222 = vmatprep.mubr.msk.f32.mxu0 %vm2237_vm3, %v19312_v58  ;;  %v13989_v58 = vld [vmem:[%s22784_s10 + $0x8] sm:$0xff]  ;;  %16263 = vmatprep.subr.mxu0 %v6626_v22 }
 0x36e   :  { %16237 = vmatprep.subr.mxu1 %v13989_v58  ;;  %16264 = vmatpush3.msra.mxu0 %v6626_v22 }
 0x36f   :  { %16238 = vmatpush3.msra.mxu1 %v13989_v58 }
 0x370   :  { %16223 = vmatmul.mubr.msk.f32.gmra.mxu0 %vm2237_vm3, %v19325_v25 }
 0x371   :  { %16225 = vmatprep.mubr.msk.f32.mxu0 %vm2237_vm3, %v19356_v13  ;;  %v6627_v13 = vld [vmem:[#allocation3 + $0x1] sm:$0xff] }
 0x372   :  { %16239 = vmatprep.mubr.msk.f32.mxu1 %vm2237_vm3, %v6627_v13 }
 0x374   :  { %16226 = vmatmul.mubr.msk.f32.gmra.mxu0 %vm2237_vm3, %v19400_v42 }
 0x375   :  { %16228 = vmatprep.mubr.msk.f32.mxu0 %vm2237_vm3, %v19389_v33 }
 0x378   :  { %16229 = vmatmul.mubr.msk.f32.gmra.mxu0 %vm2237_vm3, %v19429_v19 }
 0x379   :  { %16231 = vmatprep.mubr.msk.f32.mxu0 %vm2237_vm3, %v19419_v41 }
 0x37c   :  { %16232 = vmatmul.mubr.msk.f32.gmra.mxu0 %vm2237_vm3, %v19463_v24  ;;  %v19775_v24 = vld [vmem:[%s22784_s10 + $0x10] sm:$0xff] }
 0x37d   :  { %16234 = vmatprep.mubr.msk.f32.mxu0 %vm2237_vm3, %v19447_v54  ;;  %23040 = vst [vmem:[#allocation37_spill] sm:$0xff] %v19775_v24  ;;  %16289 = vmatprep.subr.mxu1 %v19775_v24 }
 0x380   :  { %16235 = vmatmul.mubr.msk.f32.gmra.mxu0 %vm2237_vm3, %v19457_v52 }
 0x381   :  { %16265 = vmatprep.mubr.msk.f32.mxu0 %vm2237_vm3, %v6610_v12 }
 0x3a3   :  { %v16007_v28 = vpop.f32.mrf.mxu0  ;;  %v16033_v51 = vpop.f32.mrf.mxu1 }
 0x3a4   :  { %v4773_v18 = vadd.f32 %v16033_v51, %v16007_v28 }
 0x3a5   :  { %v19712_v62 = vpop.f32.mrf.mxu0  ;;  %v19714_v7 = vpop.f32.mrf.mxu1 }
 0x3a7   :  { %v16010_v2 = vpop.f32.mrf.mxu0  ;;  %v16036_v35 = vpop.f32.mrf.mxu1 }
 0x3a8   :  { %v4783_v37 = vadd.f32 %v16036_v35, %v16010_v2 }
 0x3a9   :  { %v19716_v9 = vpop.f32.mrf.mxu0  ;;  %v19718_v15 = vpop.f32.mrf.mxu1 }
 0x3ab   :  { %v16013_v30 = vpop.f32.mrf.mxu0  ;;  %v16039_v43 = vpop.f32.mrf.mxu1 }
 0x3ac   :  { %v4793_v57 = vadd.f32 %v16039_v43, %v16013_v30  ;;  %v19801_v43 = vld [vmem:[%s22784_s10 + $0x18] sm:$0xff] }
 0x3ad   :  { %v19720_v36 = vpop.f32.mrf.mxu0  ;;  %v19722_v46 = vpop.f32.mrf.mxu1  ;;  %23041 = vst [vmem:[#allocation24_spill] sm:$0xff] %v19801_v43  ;;  %16315 = vmatprep.subr.mxu0 %v19801_v43 }
 0x3af   :  { %v16016_v29 = vpop.f32.mrf.mxu0  ;;  %v16042_v16 = vpop.f32.mrf.mxu1 }
 0x3b0   :  { %v4803_v45 = vadd.f32 %v16042_v16, %v16016_v29 }
 0x3b1   :  { %v19724_v8 = vpop.f32.mrf.mxu0  ;;  %v19726_v6 = vpop.f32.mrf.mxu1 }
 0x3b3   :  { %v16019_v21 = vpop.f32.mrf.mxu0  ;;  %v16045_v17 = vpop.f32.mrf.mxu1 }
 0x3b4   :  { %v4813_v25 = vadd.f32 %v16045_v17, %v16019_v21 }
 0x3b5   :  { %v19731_v23 = vpop.f32.mrf.mxu0  ;;  %v19733_v11 = vpop.f32.mrf.mxu1 }
 0x3b8   :  { %v16022_v53 = vpop.f32.mrf.mxu0 }
 0x3b9   :  { %v16048_v48 = vpop.f32.mrf.mxu1 }
 0x3ba   :  { %v4823_v49 = vadd.f32 %v16048_v48, %v16022_v53  ;;  %v19739_v14 = vpop.f32.mrf.mxu0 }
 0x3bb   :  { %v19741_v0 = vpop.f32.mrf.mxu1 }
 0x3bc   :  { %v16025_v63 = vpop.f32.mrf.mxu0 }
 0x3bd   :  { %v16051_v60 = vpop.f32.mrf.mxu1 }
 0x3be   :  { %v4833_v38 = vadd.f32 %v16051_v60, %v16025_v63  ;;  %v19744_v55 = vpop.f32.mrf.mxu0 }
 0x3bf   :  { %v19746_v33 = vpop.f32.mrf.mxu1 }
 0x3c0   :  { %v16028_v34 = vpop.f32.mrf.mxu0 }
 0x3c1   :  { %v16054_v1 = vpop.f32.mrf.mxu1 }
 0x3c2   :  { %v4843_v44 = vadd.f32 %v16054_v1, %v16028_v34  ;;  %v19748_v42 = vpop.f32.mrf.mxu0 }
 0x3c3   :  { %v19750_v50 = vpop.f32.mrf.mxu1 }
 0x3c4   :  { %v16059_v20 = vpop.f32.mrf.mxu0 }
 0x3c5   :  { %v19752_v41 = vpop.f32.mrf.mxu1  ;;  %v19754_v10 = vadd.f32 %v16059_v20, %v4773_v18 }
 0x3c6   :  { %v19756_v39 = vpop.f32.mrf.mxu0 }
 0x3c7   :  { %v19758_v19 = vpop.f32.mrf.mxu1 }
 0x3c8   :  { %v16062_v47 = vpop.f32.mrf.mxu0 }
 0x3c9   :  { %v19760_v61 = vpop.f32.mrf.mxu1  ;;  %v19762_v54 = vadd.f32 %v16062_v47, %v4783_v37 }
 0x3ca   :  { %v19764_v40 = vpop.f32.mrf.mxu0 }
 0x3cb   :  { %v19766_v26 = vpop.f32.mrf.mxu1 }
 0x3cc   :  { %v16065_v52 = vpop.f32.mrf.mxu0 }
 0x3cd   :  { %v19768_v59 = vpop.f32.mrf.mxu1  ;;  %v19770_v5 = vadd.f32 %v16065_v52, %v4793_v57 }
 0x3ce   :  { %v19777_v4 = vpop.f32.mrf.mxu0 }
 0x3cf   :  { %v19779_v56 = vpop.f32.mrf.mxu1 }
 0x3d0   :  { %v16068_v32 = vpop.f32.mrf.mxu0 }
 0x3d1   :  { %v19782_v27 = vpop.f32.mrf.mxu1  ;;  %v19784_v31 = vadd.f32 %v16068_v32, %v4803_v45 }
 0x3d2   :  { %v19786_v28 = vpop.f32.mrf.mxu0 }
 0x3d3   :  { %v19788_v51 = vpop.f32.mrf.mxu1 }
 0x3d4   :  { %v16071_v18 = vpop.f32.mrf.mxu0 }
 0x3d5   :  { %v19790_v2 = vpop.f32.mrf.mxu1  ;;  %v19792_v35 = vadd.f32 %v16071_v18, %v4813_v25 }
 0x3d6   :  { %v19794_v37 = vpop.f32.mrf.mxu0 }
 0x3d7   :  { %v19796_v30 = vpop.f32.mrf.mxu1 }
 0x3d8   :  { %v16074_v57 = vpop.f32.mrf.mxu0 }
 0x3d9   :  { %v19803_v29 = vpop.f32.mrf.mxu1  ;;  %v19806_v16 = vadd.f32 %v16074_v57, %v4823_v49 }
 0x3da   :  { %v19808_v45 = vpop.f32.mrf.mxu0 }
 0x3db   :  { %v19810_v58 = vpop.f32.mrf.mxu1 }
 0x3dc   :  { %v16077_v21 = vpop.f32.mrf.mxu0 }
 0x3dd   :  { %v19812_v17 = vpop.f32.mrf.mxu1  ;;  %v19814_v25 = vadd.f32 %v16077_v21, %v4833_v38 }
 0x3de   :  { %v19816_v22 = vpop.f32.mrf.mxu0 }
 0x3df   :  { %v19818_v53 = vpop.f32.mrf.mxu1 }
 0x3e0   :  { %23042 = vst [vmem:[#allocation40_spill] sm:$0xff] %v19818_v53  ;;  %v16080_v48 = vpop.f32.mrf.mxu0 }
 0x3e1   :  { %v19820_v13 = vpop.f32.mrf.mxu1  ;;  %v19822_v12 = vadd.f32 %v16080_v48, %v4843_v44 }
 0x3e2   :  { %23043 = vst [vmem:[#allocation25_spill] sm:$0xff] %v19820_v13  ;;  %v19824_v49 = vpop.f32.mrf.mxu0 }
 0x3e3   :  { %23044 = vst [vmem:[#allocation21_spill] sm:$0xff] %v19822_v12  ;;  %v19826_v63 = vpop.f32.mrf.mxu1 }
 0x3e4   :  { %23045 = vst [vmem:[#allocation54_spill] sm:$0xff] %v19826_v63  ;;  %v16111_v60 = vpop.f32.mrf.mxu0 }
 0x3e5   :  { %v19828_v34 = vpop.f32.mrf.mxu1 }
 0x3e6   :  { %v5432_v1 = vpop.f32.mrf.mxu0 }
 0x3e7   :  { %v19830_v20 = vpop.f32.mrf.mxu1 }
 0x3e8   :  { %v19832_v38 = vpop.f32.mrf.mxu0 }
 0x3e9   :  { %v19834_v47 = vpop.f32.mrf.mxu1 }
 0x3ea   :  { %v19836_v52 = vpop.f32.mrf.mxu0 }
 0x3eb   :  { %v19838_v32 = vpop.f32.mrf.mxu1 }
 0x3ec   :  { %23046 = vst [vmem:[#allocation63_spill] sm:$0xff] %v19838_v32  ;;  %v19840_v44 = vpop.f32.mrf.mxu0 }
 0x3ed   :  { %v19842_v18 = vpop.f32.mrf.mxu1 }
 0x3ee   :  { %23047 = vst [vmem:[#allocation64_spill] sm:$0xff] %v19842_v18  ;;  %v19844_v57 = vpop.f32.mrf.mxu0 }
 0x3ef   :  { %23048 = vst [vmem:[#allocation36_spill] sm:$0xff] %v19844_v57  ;;  %v19846_v21 = vpop.f32.mrf.mxu1 }
 0x3f0   :  { %23049 = vst [vmem:[#allocation43_spill] sm:$0xff] %v19846_v21  ;;  %v19848_v48 = vpop.f32.mrf.mxu0 }
 0x3f1   :  { %23050 = vst [vmem:[#allocation45_spill] sm:$0xff] %v19848_v48  ;;  %v19850_v3 = vpop.f32.mrf.mxu1 }
 0x3f2   :  { %23051 = vst [vmem:[#allocation55_spill] sm:$0xff] %v19850_v3  ;;  %v19852_v43 = vpop.f32.mrf.mxu0 }
 0x3f3   :  { %23052 = vst [vmem:[#allocation39_spill] sm:$0xff] %v19852_v43  ;;  %v19854_v24 = vpop.f32.mrf.mxu1 }
 0x3f4   :  { %23053 = vst [vmem:[#allocation65_spill] sm:$0xff] %v19854_v24  ;;  %v19856_v63 = vpop.f32.mrf.mxu0 }
 0x3f5   :  { %23054 = vst [vmem:[#allocation38_spill] sm:$0xff] %v19856_v63  ;;  %v19858_v13 = vpop.f32.mrf.mxu1 }
 0x3f6   :  { %23055 = vst [vmem:[#allocation42_spill] sm:$0xff] %v19858_v13  ;;  %v19860_v12 = vpop.f32.mrf.mxu0 }
 0x3f7   :  { %23056 = vst [vmem:[#allocation47_spill] sm:$0xff] %v19860_v12  ;;  %v19862_v32 = vpop.f32.mrf.mxu1 }
 0x3f8   :  { %23057 = vst [vmem:[#allocation66_spill] sm:$0xff] %v19862_v32  ;;  %v19864_v18 = vpop.f32.mrf.mxu0 }
 0x3f9   :  { %23058 = vst [vmem:[#allocation67_spill] sm:$0xff] %v19864_v18  ;;  %v19866_v57 = vpop.f32.mrf.mxu1 }
 0x3fa   :  { %23059 = vst [vmem:[#allocation44_spill] sm:$0xff] %v19866_v57  ;;  %v19868_v21 = vpop.f32.mrf.mxu0 }
 0x3fb   :  { %23060 = vst [vmem:[#allocation12_spill] sm:$0xff] %v19868_v21  ;;  %v19870_v48 = vpop.f32.mrf.mxu1 }
 0x3fc   :  { %23061 = vst [vmem:[#allocation70_spill] sm:$0xff] %v19870_v48  ;;  %v19872_v3 = vpop.f32.mrf.mxu0 }
 0x3fd   :  { %23062 = vst [vmem:[#allocation68_spill] sm:$0xff] %v19872_v3  ;;  %v19874_v43 = vpop.f32.mrf.mxu1 }
 0x3fe   :  { %23063 = vst [vmem:[#allocation11_spill] sm:$0xff] %v19874_v43  ;;  %v19876_v24 = vpop.f32.mrf.mxu0 }
 0x3ff   :  { %23064 = vst [vmem:[#allocation48_spill] sm:$0xff] %v19876_v24  ;;  %v19878_v63 = vpop.f32.mrf.mxu1 }
 0x400   :  { %23065 = vst [vmem:[#allocation69_spill] sm:$0xff] %v19878_v63  ;;  %v19880_v13 = vpop.f32.mrf.mxu0 }
 0x401   :  { %23066 = vst [vmem:[#allocation46_spill] sm:$0xff] %v19880_v13  ;;  %v19882_v12 = vpop.f32.mrf.mxu1 }
 0x402   :  { %23067 = vst [vmem:[#allocation27_spill] sm:$0xff] %v19882_v12  ;;  %v19884_v32 = vpop.f32.mrf.mxu0 }
 0x403   :  { %23068 = vst [vmem:[#allocation26_spill] sm:$0xff] %v19884_v32  ;;  %v19886_v18 = vpop.f32.mrf.mxu1 }
 0x404   :  { %23069 = vst [vmem:[#allocation28_spill] sm:$0xff] %v19886_v18  ;;  %v16163_v57 = vpop.f32.mrf.mxu0 }
 0x405   :  { %v19888_v21 = vpop.f32.mrf.mxu1 }
 0x406   :  { %23070 = vst [vmem:[#allocation13_spill] sm:$0xff] %v19888_v21  ;;  %v5886_v48 = vpop.f32.mrf.mxu0  ;;  %v4768_v21 = vadd.f32 %v19714_v7, %v19712_v62  ;;  %v4798_v7 = vadd.f32 %v19726_v6, %v19724_v8 }
 0x407   :  { %v19890_v53 = vpop.f32.mrf.mxu1 }
 0x408   :  { %23071 = vst [vmem:[#allocation57_spill] sm:$0xff] %v19890_v53  ;;  %v19892_v3 = vpop.f32.mrf.mxu0  ;;  %v5063_v8 = vadd.f32 %v19786_v28, %v4798_v7 }
 0x409   :  { %23072 = vst [vmem:[#allocation56_spill] sm:$0xff] %v19892_v3  ;;  %v19896_v24 = vpop.f32.mrf.mxu1 }
 0x40a   :  { %v19894_v43 = vpop.f32.mrf.mxu0  ;;  %23074 = vst [vmem:[#allocation58_spill] sm:$0xff] %v19896_v24 }
 0x40b   :  { %23073 = vst [vmem:[#allocation59_spill] sm:$0xff] %v19894_v43  ;;  %v19902_v12 = vpop.f32.mrf.mxu1  ;;  %v5057_v43 = vadd.f32 %v19756_v39, %v4768_v21 }
 0x40c   :  { %v19898_v63 = vpop.f32.mrf.mxu0  ;;  %23076 = vst [vmem:[#allocation60_spill] sm:$0xff] %v19902_v12  ;;  %v5285_v12 = vadd.f32 %v19752_v41, %v19754_v10 }
 0x40d   :  { %v19910_v53 = vpop.f32.mrf.mxu1  ;;  %v5284_v39 = vadd.f32 %v19758_v19, %v5057_v43  ;;  %v4828_v19 = vadd.f32 %v19746_v33, %v19744_v55  ;;  %v5291_v33 = vadd.f32 %v19782_v27, %v19784_v31 }
 0x40e   :  { %v19900_v13 = vpop.f32.mrf.mxu0 }
 0x40f   :  { %23075 = vst [vmem:[#allocation61_spill] sm:$0xff] %v19900_v13  ;;  %v4778_v13 = vadd.f32 %v19718_v15, %v19716_v9  ;;  %v4808_v9 = vadd.f32 %v19733_v11, %v19731_v23  ;;  %v5511_v6 = vadd.f32 %v5432_v1, %v5284_v39  ;;  %v4838_v23 = vadd.f32 %v19750_v50, %v19748_v42  ;;  %v23090_v39 = vld [vmem:[#allocation38_spill] sm:$0xff] }
 0x410   :  { %v19904_v32 = vpop.f32.mrf.mxu0  ;;  %v5069_v42 = vadd.f32 %v19816_v22, %v4828_v19  ;;  %v23093_v19 = vld [vmem:[#allocation57_spill] sm:$0xff] }
 0x411   :  { %23077 = vst [vmem:[#allocation19_spill] sm:$0xff] %v19904_v32  ;;  %v19921_v32 = vpop.f32.mrf.mxu1  ;;  %v5059_v21 = vadd.f32 %v19764_v40, %v4778_v13  ;;  %v5065_v11 = vadd.f32 %v19794_v37, %v4808_v9  ;;  %v5738_v28 = vadd.f32 %v19830_v20, %v5511_v6  ;;  %v5071_v27 = vadd.f32 %v19824_v49, %v4838_v23  ;;  %v23083_v49 = vld [vmem:[#allocation63_spill] sm:$0xff] }
 0x412   :  { %v19906_v18 = vpop.f32.mrf.mxu0  ;;  %v23084_v20 = vld [vmem:[#allocation39_spill] sm:$0xff] }
 0x413   :  { %23078 = vst [vmem:[#allocation18_spill] sm:$0xff] %v19906_v18  ;;  %v4788_v18 = vadd.f32 %v19722_v46, %v19720_v36  ;;  %v4818_v36 = vadd.f32 %v19741_v0, %v19739_v14  ;;  %v5287_v46 = vadd.f32 %v19760_v61, %v19762_v54  ;;  %v19941_v10 = vpop.f32.mrf.mxu1  ;;  %v5286_v14 = vadd.f32 %v19766_v26, %v5059_v21  ;;  %v23091_v9 = vld [vmem:[#allocation47_spill] sm:$0xff] }
 0x414   :  { %v19912_v3 = vpop.f32.mrf.mxu0  ;;  %v5290_v26 = vadd.f32 %v19788_v51, %v5063_v8  ;;  %v5965_v13 = vadd.f32 %v5886_v48, %v5738_v28  ;;  %v23089_v48 = vld [vmem:[#allocation54_spill] sm:$0xff]  ;;  %v23092_v8 = vld [vmem:[#allocation64_spill] sm:$0xff] }
 0x415   :  { %v5061_v15 = vadd.f32 %v19777_v4, %v4788_v18  ;;  %v5067_v0 = vadd.f32 %v19808_v45, %v4818_v36  ;;  %v5514_v54 = vadd.f32 %v19832_v38, %v5287_v46  ;;  %v5289_v4 = vadd.f32 %v19768_v59, %v19770_v5  ;;  %v19965_v43 = vpop.f32.mrf.mxu1  ;;  %v23085_v38 = vld [vmem:[#allocation13_spill] sm:$0xff] }
 0x416   :  { %v19915_v24 = vpop.f32.mrf.mxu0  ;;  %v5293_v59 = vadd.f32 %v19790_v2, %v19792_v35  ;;  %v5292_v5 = vadd.f32 %v19796_v30, %v5065_v11  ;;  %v23080_v2 = vld [vmem:[#allocation40_spill] sm:$0xff]  ;;  %v19996_v7 = vadd.f32 %v23089_v48, %v5071_v27  ;;  %v20003_v46 = vld [vmem:[%s22783_s9] ss:$0 sm:$0xff]  ;;  %v6192_v23 = vadd.f32 %v23093_v19, %v5965_v13  ;;  %v23094_v11 = vld [vmem:[#allocation59_spill] sm:$0xff] }
 0x417   :  { %23079 = vst [vmem:[#allocation62_spill] sm:$0xff] %v19915_v24  ;;  %v5512_v24 = vadd.f32 %v16111_v60, %v5285_v12  ;;  %v5288_v55 = vadd.f32 %v19779_v56, %v5061_v15  ;;  %v5295_v56 = vadd.f32 %v19803_v29, %v19806_v16  ;;  %v5294_v51 = vadd.f32 %v19810_v58, %v5067_v0  ;;  %v23081_v30 = vld [vmem:[#allocation36_spill] sm:$0xff]  ;;  %v19989_v18 = vpop.f32.mrf.mxu1  ;;  %v23111_v19 = vld [vmem:[#allocation29_spill] sm:$0xff] }
 0x418   :  { %v19925_v62 = vpop.f32.mrf.mxu0  ;;  %v5741_v45 = vadd.f32 %v19834_v47, %v5514_v54  ;;  %v5516_v22 = vadd.f32 %v19840_v44, %v5289_v4  ;;  %v5297_v12 = vadd.f32 %v19812_v17, %v19814_v25  ;;  %v5296_v35 = vadd.f32 %v23080_v2, %v5069_v42  ;;  %v23088_v17 = vld [vmem:[#allocation25_spill] sm:$0xff]  ;;  %v23096_v4 = vld [vmem:[#allocation55_spill] sm:$0xff]  ;;  %v23101_v2 = vld [vmem:[#allocation42_spill] sm:$0xff] }
 0x419   :  { %v5739_v61 = vadd.f32 %v19828_v34, %v5512_v24  ;;  %v5513_v24 = vadd.f32 %v19836_v52, %v5286_v14  ;;  %v5515_v60 = vadd.f32 %v23081_v30, %v5288_v55  ;;  %v23082_v34 = vld [vmem:[#allocation45_spill] sm:$0xff]  ;;  %v5517_v58 = vadd.f32 %v23084_v20, %v5290_v26  ;;  %v23086_v52 = vld [vmem:[#allocation56_spill] sm:$0xff] }
 0x41a   :  { %v19934_v41 = vpop.f32.mrf.mxu0  ;;  %v5518_v29 = vadd.f32 %v23082_v34, %v5291_v33  ;;  %v5968_v44 = vadd.f32 %v23086_v52, %v5741_v45  ;;  %v5520_v21 = vadd.f32 %v23090_v39, %v5293_v59  ;;  %v5519_v15 = vadd.f32 %v23091_v9, %v5292_v5  ;;  %v23097_v33 = vld [vmem:[#allocation67_spill] sm:$0xff]  ;;  %v23098_v26 = vld [vmem:[#allocation12_spill] sm:$0xff]  ;;  %v23100_v5 = vld [vmem:[#allocation58_spill] sm:$0xff]  ;;  %v20014_v45 = vpop.f32.mrf.mxu1 }
 0x41b   :  { %v5966_v37 = vadd.f32 %v16163_v57, %v5739_v61  ;;  %v5740_v1 = vadd.f32 %v23083_v49, %v5513_v24  ;;  %v23087_v57 = vld [vmem:[#allocation21_spill] sm:$0xff]  ;;  %v5743_v6 = vadd.f32 %v23092_v8, %v5516_v22  ;;  %v23095_v61 = vld [vmem:[#allocation43_spill] sm:$0xff]  ;;  %v5522_v42 = vadd.f32 %v23097_v33, %v5295_v56  ;;  %v23102_v34 = vld [vmem:[#allocation66_spill] sm:$0xff] }
 0x41c   :  { %v19948_v40 = vpop.f32.mrf.mxu0  ;;  %v19993_v25 = vadd.f32 %v23088_v17, %v23087_v57  ;;  %v5742_v54 = vadd.f32 %v23095_v61, %v5515_v60  ;;  %v5745_v55 = vadd.f32 %v23096_v4, %v5518_v29  ;;  %v5521_v28 = vadd.f32 %v23098_v26, %v5294_v51  ;;  %v23103_v49 = vld [vmem:[#allocation61_spill] sm:$0xff]  ;;  %v23104_v51 = vld [vmem:[#allocation60_spill] sm:$0xff]  ;;  %v23107_v17 = vld [vmem:[#allocation70_spill] sm:$0xff]  ;;  %v16204_v8 = vpop.f32.mrf.mxu1 }
 0x41d   :  { %v6193_v47 = vadd.f32 %v23085_v38, %v5966_v37  ;;  %v5967_v14 = vadd.f32 %v23094_v11, %v5740_v1  ;;  %v23099_v37 = vld [vmem:[#allocation65_spill] sm:$0xff]  ;;  %v6195_v27 = vadd.f32 %v23100_v5, %v5968_v44  ;;  %v5747_v30 = vadd.f32 %v23101_v2, %v5520_v21  ;;  %v23105_v38 = vld [vmem:[#allocation14_spill] sm:$0xff]  ;;  %v23106_v44 = vld [vmem:[#allocation44_spill] sm:$0xff] }
 0x41e   :  { %v19960_v50 = vpop.f32.mrf.mxu0  ;;  %v5744_v59 = vadd.f32 %v23099_v37, %v5517_v58  ;;  %v5746_v60 = vadd.f32 %v23102_v34, %v5519_v15  ;;  %v5970_v29 = vadd.f32 %v19898_v63, %v5743_v6  ;;  %v5969_v56 = vadd.f32 %v23103_v49, %v5742_v54  ;;  %v23108_v39 = vld [vmem:[#allocation68_spill] sm:$0xff]  ;;  %v23109_v9 = vld [vmem:[#allocation19_spill] sm:$0xff]  ;;  %v23113_v4 = vld [vmem:[#allocation18_spill] sm:$0xff]  ;;  %v6163_v2 = vpop.f32.mrf.mxu1 }
 0x41f   :  { %v6194_v20 = vadd.f32 %v23104_v51, %v5967_v14  ;;  %v5749_v57 = vadd.f32 %v23106_v44, %v5522_v42  ;;  %v5748_v48 = vadd.f32 %v23107_v17, %v5521_v28  ;;  %v5524_v21 = vadd.f32 %v23108_v39, %v5297_v12  ;;  %v6491_v63 = vld [vmem:[%s23110_s18 + $0x8] sm:$0xff]  ;;  %v6490_v33 = vld [vmem:[%s23110_s18] sm:$0xff] }
 0x420   :  { %v19973_v31 = vpop.f32.mrf.mxu0  ;;  %v5972_v15 = vadd.f32 %v23109_v9, %v5745_v55  ;;  %v6197_v54 = vadd.f32 %v19910_v53, %v5970_v29  ;;  %v6196_v12 = vadd.f32 %v19921_v32, %v5969_v56  ;;  %v5971_v55 = vadd.f32 %v23113_v4, %v5744_v59  ;;  %v6493_v32 = vld [vmem:[%s23110_s18 + $0x18] sm:$0xff]  ;;  %v23116_v49 = vld [vmem:[#allocation50_spill] sm:$0xff] }
 0x421   :  { %v5974_v53 = vadd.f32 %v19912_v3, %v5747_v30  ;;  %v23117_v51 = vld [vmem:[#allocation69_spill] sm:$0xff]  ;;  %v6492_v30 = vld [vmem:[%s23110_s18 + $0x10] sm:$0xff] }
 0x422   :  { %v19983_v16 = vpop.f32.mrf.mxu0 }
 0x424   :  { %v16215_v36 = vpop.f32.mrf.mxu0 }
 0x425   :  { %v6420_v0 = vadd.f32 %v16215_v36, %v6193_v47 }
 0x426   :  { %v6340_v24 = vpop.f32.mrf.mxu0 }
 0x427   :  { %v6443_v22 = vadd.f32 %v20003_v46, %v6420_v0  ;;  %v6419_v13 = vadd.f32 %v6340_v24, %v6192_v23  ;;  %v23112_v0 = vld [vmem:[#allocation48_spill] sm:$0xff]  ;;  %v23114_v24 = vld [vmem:[#allocation31_spill] sm:$0xff] }
 0x428   :  { %v16218_v1 = vpop.f32.mrf.mxu0  ;;  %v5523_v61 = vadd.f32 %v23112_v0, %v5296_v35  ;;  %v6199_v35 = vadd.f32 %v19941_v10, %v5972_v15  ;;  %v6198_v10 = vadd.f32 %v19965_v43, %v5971_v55  ;;  %v6201_v43 = vadd.f32 %v19989_v18, %v5974_v53  ;;  %v23120_v15 = vld [vmem:[#allocation16_spill] sm:$0xff]  ;;  %v23122_v18 = vld [vmem:[#allocation26_spill] sm:$0xff]  ;;  %v23124_v53 = vld [vmem:[#allocation17_spill] sm:$0xff] }
 0x429   :  { %v6459_v58 = vadd.f32 %v6443_v22, %v23105_v38  ;;  %v6442_v47 = vadd.f32 %v20003_v46, %v6419_v13  ;;  %v6422_v52 = vadd.f32 %v16218_v1, %v6195_v27  ;;  %v23115_v27 = vld [vmem:[#allocation11_spill] sm:$0xff]  ;;  %v23118_v38 = vld [vmem:[#allocation62_spill] sm:$0xff] }
 0x42a   :  { %v6350_v36 = vpop.f32.mrf.mxu0  ;;  %v5751_v22 = vadd.f32 %v23115_v27, %v5524_v21  ;;  %v5973_v3 = vadd.f32 %v23118_v38, %v5746_v60  ;;  %v23119_v21 = vld [vmem:[#allocation46_spill] sm:$0xff]  ;;  %v5976_v60 = vadd.f32 %v19925_v62, %v5749_v57  ;;  %v5975_v57 = vadd.f32 %v19934_v41, %v5748_v48  ;;  %v6497_v48 = vld [vmem:[%s23110_s18 + $0x38] sm:$0xff] }
 0x42b   :  { %v6475_v6 = vmax.f32 %v6459_v58, 0.0  ;;  %v6458_v23 = vadd.f32 %v6442_v47, %v23111_v19  ;;  %v6445_v11 = vadd.f32 %v20003_v46, %v6422_v52  ;;  %v6421_v14 = vadd.f32 %v6350_v36, %v6194_v20 }
 0x42c   :  { %v16221_v42 = vpop.f32.mrf.mxu0  ;;  %v5750_v20 = vadd.f32 %v23117_v51, %v5523_v61  ;;  %v5526_v9 = vadd.f32 %v23119_v21, %v19993_v25  ;;  %v5525_v61 = vadd.f32 %v23122_v18, %v19996_v7  ;;  %v6200_v62 = vadd.f32 %v20014_v45, %v5973_v3  ;;  %v20100_v51 = vld [vmem:[%s22784_s10 + $0x20] sm:$0xff] }
 0x42d   :  { %v6507_v26 = vadd.f32 %v6491_v63, %v6475_v6  ;;  %v6474_v28 = vmax.f32 %v6458_v23, 0.0  ;;  %v6461_v37 = vadd.f32 %v6445_v11, %v23114_v24  ;;  %v6444_v5 = vadd.f32 %v20003_v46, %v6421_v14  ;;  %v16207_v6 = vpop.f32.mrf.mxu1  ;;  %v6495_v23 = vld [vmem:[%s23110_s18 + $0x28] sm:$0xff] }
 0x42e   :  { %v6424_v59 = vadd.f32 %v16221_v42, %v6197_v54  ;;  %v6360_v13 = vpop.f32.mrf.mxu0  ;;  %v23121_v11 = vld [vmem:[#allocation15_spill] sm:$0xff]  ;;  %v6203_v24 = vadd.f32 %v16204_v8, %v5976_v60  ;;  %v5978_v7 = vadd.f32 %v19948_v40, %v5751_v22  ;;  %v5977_v45 = vadd.f32 %v19960_v50, %v5750_v20  ;;  %v23126_v50 = vld [vmem:[#allocation28_spill] sm:$0xff]  ;;  %v23127_v3 = vld [vmem:[#allocation30_spill] sm:$0xff] }
 0x42f   :  { %6595 = vst.msk [vmem:[#allocation3 + $0x21] sm:$0xff] %vm2237_vm3, %v6507_v26  ;;  %v6506_v34 = vadd.f32 %v6490_v33, %v6474_v28  ;;  %v6477_v29 = vmax.f32 %v6461_v37, 0.0  ;;  %v6460_v56 = vadd.f32 %v6444_v5, %v23116_v49  ;;  %v6423_v1 = vadd.f32 %v6360_v13, %v6196_v12  ;;  %v6494_v12 = vld [vmem:[%s23110_s18 + $0x20] sm:$0xff]  ;;  %v6173_v5 = vpop.f32.mrf.mxu1  ;;  %v23125_v40 = vld [vmem:[#allocation27_spill] sm:$0xff] }
 0x430   :  { %v6447_v58 = vadd.f32 %v20003_v46, %v6424_v59  ;;  %v16224_v47 = vpop.f32.mrf.mxu0  ;;  %v23123_v33 = vld [vmem:[#allocation49_spill] sm:$0xff]  ;;  %v6496_v59 = vld [vmem:[%s23110_s18 + $0x30] sm:$0xff]  ;;  %v5753_v22 = vadd.f32 %v23125_v40, %v5526_v9  ;;  %v5752_v13 = vadd.f32 %v23126_v50, %v5525_v61 }
 0x431   :  { %6594 = vst.msk [vmem:[#allocation3 + $0x11] sm:$0xff] %vm2237_vm3, %v6506_v34  ;;  %v6509_v52 = vadd.f32 %v6493_v32, %v6477_v29  ;;  %v6476_v44 = vmax.f32 %v6460_v56, 0.0  ;;  %v6446_v17 = vadd.f32 %v20003_v46, %v6423_v1  ;;  %v6426_v39 = vadd.f32 %v16224_v47, %v6199_v35  ;;  %v16210_v20 = vpop.f32.mrf.mxu1  ;;  %v23133_v40 = vld [vmem:[#allocation32_spill] sm:$0xff] }
 0x432   :  { %v6463_v63 = vadd.f32 %v6447_v58, %v23120_v15  ;;  %v6370_v36 = vpop.f32.mrf.mxu0  ;;  %v6202_v34 = vadd.f32 %v6163_v2, %v5975_v57 }
 0x433   :  { %6597 = vst.msk [vmem:[#allocation3 + $0x41] sm:$0xff] %vm2237_vm3, %v6509_v52  ;;  %v6508_v19 = vadd.f32 %v6492_v30, %v6476_v44  ;;  %v6462_v14 = vadd.f32 %v6446_v17, %v23121_v11  ;;  %v6449_v0 = vadd.f32 %v20003_v46, %v6426_v39  ;;  %v6425_v25 = vadd.f32 %v6370_v36, %v6198_v10  ;;  %v20115_v52 = vld [vmem:[%s22784_s10 + $0x28] sm:$0xff]  ;;  %v23128_v36 = vld [vmem:[#allocation37_spill] sm:$0xff]  ;;  %v6183_v61 = vpop.f32.mrf.mxu1 }
 0x434   :  { %v6479_v54 = vmax.f32 %v6463_v63, 0.0  ;;  %v16227_v4 = vpop.f32.mrf.mxu0  ;;  %v6205_v44 = vadd.f32 %v16207_v6, %v5978_v7  ;;  %v6204_v17 = vadd.f32 %v6173_v5, %v5977_v45  ;;  %v6499_v39 = vld [vmem:[%s23110_s18 + $0x48] sm:$0xff]  ;;  %v23129_v6 = vld [vmem:[#allocation24_spill] sm:$0xff]  ;;  %v23130_v11 = vld [vmem:[#allocation33_spill] sm:$0xff] }
 0x435   :  { %6596 = vst.msk [vmem:[#allocation3 + $0x31] sm:$0xff] %vm2237_vm3, %v6508_v19  ;;  %v6478_v55 = vmax.f32 %v6462_v14, 0.0  ;;  %v6465_v42 = vadd.f32 %v6449_v0, %v23123_v33  ;;  %v6448_v26 = vadd.f32 %v20003_v46, %v6425_v25  ;;  %v6428_v28 = vadd.f32 %v16227_v4, %v6201_v43  ;;  %v6501_v33 = vld [vmem:[%s23110_s18 + $0x58] sm:$0xff] }
 0x436   :  { %v6511_v41 = vadd.f32 %v6495_v23, %v6479_v54  ;;  %v6380_v37 = vpop.f32.mrf.mxu0  ;;  %v20108_v58 = vld [vmem:[#allocation3 + $0x21] sm:$0xff]  ;;  %v5980_v19 = vadd.f32 %v19973_v31, %v5753_v22  ;;  %v5979_v23 = vadd.f32 %v19983_v16, %v5752_v13  ;;  %v23131_v16 = vld [vmem:[#allocation51_spill] sm:$0xff] }
 0x437   :  { %v6510_v27 = vadd.f32 %v6494_v12, %v6478_v55  ;;  %v6481_v35 = vmax.f32 %v6465_v42, 0.0  ;;  %v6464_v32 = vadd.f32 %v6448_v26, %v23124_v53  ;;  %v6451_v8 = vadd.f32 %v20003_v46, %v6428_v28  ;;  %v20110_v47 = vld [vmem:[#allocation3 + $0x20] sm:$0xff] }
 0x438   :  { %6599 = vst.msk [vmem:[#allocation3 + $0x61] sm:$0xff] %vm2237_vm3, %v6511_v41  ;;  %v6427_v29 = vadd.f32 %v6380_v37, %v6200_v62  ;;  %v16230_v49 = vpop.f32.mrf.mxu0  ;;  %v20093_v56 = vld [vmem:[#allocation3 + $0x11] sm:$0xff]  ;;  %v6498_v31 = vld [vmem:[%s23110_s18 + $0x40] sm:$0xff]  ;;  %v6206_v37 = vadd.f32 %v6183_v61, %v5979_v23 }
 0x439   :  { %v20095_v1 = vld [vmem:[#allocation3 + $0x10] sm:$0xff]  ;;  %6598 = vst.msk [vmem:[#allocation3 + $0x51] sm:$0xff] %vm2237_vm3, %v6510_v27  ;;  %v6513_v10 = vadd.f32 %v6497_v48, %v6481_v35  ;;  %v6480_v38 = vmax.f32 %v6464_v32, 0.0  ;;  %v6467_v2 = vadd.f32 %v6451_v8, %v23127_v3  ;;  %v6430_v30 = vadd.f32 %v16230_v49, %v6203_v24  ;;  %16240 = vmatmul.mubr.msk.f32.vlgmr.msra.gmra.mxu1 %vm2237_vm3, %v20093_v56  ;;  %v6505_v23 = vld [vmem:[%s23110_s18 + $0x78] sm:$0xff] }
 0x43a   :  { %16266 = vmatmul.mubr.msk.f32.vlgmr.msra.gmra.mxu0 %vm2237_vm3, %v20095_v1  ;;  %v6450_v21 = vadd.f32 %v20003_v46, %v6427_v29  ;;  %v6390_v9 = vpop.f32.mrf.mxu0  ;;  %16242 = vmatprep.mubr.msk.f32.mxu1 %vm2237_vm3, %v20108_v58  ;;  %v20146_v4 = vld [vmem:[#allocation3 + $0x41] sm:$0xff]  ;;  %v23132_v24 = vld [vmem:[#allocation20_spill] sm:$0xff]  ;;  %v6207_v48 = vadd.f32 %v16210_v20, %v5980_v19  ;;  %v23134_v3 = vld [vmem:[#allocation35_spill] sm:$0xff] }
 0x43b   :  { %16268 = vmatprep.mubr.msk.f32.mxu0 %vm2237_vm3, %v20110_v47  ;;  %6601 = vst.msk [vmem:[#allocation3 + $0x81] sm:$0xff] %vm2237_vm3, %v6513_v10  ;;  %v6512_v43 = vadd.f32 %v6496_v59, %v6480_v38  ;;  %v6483_v60 = vmax.f32 %v6467_v2, 0.0  ;;  %v6453_v15 = vadd.f32 %v20003_v46, %v6430_v30  ;;  %v6429_v63 = vadd.f32 %v6390_v9, %v6202_v34  ;;  %v20155_v26 = vld [vmem:[#allocation3 + $0x40] sm:$0xff]  ;;  %v6500_v27 = vld [vmem:[%s23110_s18 + $0x50] sm:$0xff]  ;;  %v6503_v34 = vld [vmem:[%s23110_s18 + $0x68] sm:$0xff] }
 0x43c   :  { %16290 = vmatpush3.msra.mxu1 %v23128_v36  ;;  %16316 = vmatpush3.msra.mxu0 %v23129_v6  ;;  %v6466_v14 = vadd.f32 %v6450_v21, %v23130_v11  ;;  %v16233_v0 = vpop.f32.mrf.mxu0  ;;  %v20132_v25 = vld [vmem:[#allocation3 + $0x31] sm:$0xff]  ;;  %v6502_v30 = vld [vmem:[%s23110_s18 + $0x60] sm:$0xff] }
 0x43d   :  { %v20134_v18 = vld [vmem:[#allocation3 + $0x30] sm:$0xff]  ;;  %16341 = vmatprep.subr.mxu1 %v20100_v51  ;;  %16367 = vmatprep.subr.mxu0 %v20115_v52  ;;  %6600 = vst.msk [vmem:[#allocation3 + $0x71] sm:$0xff] %vm2237_vm3, %v6512_v43  ;;  %v6515_v62 = vadd.f32 %v6499_v39, %v6483_v60  ;;  %v6469_v57 = vadd.f32 %v6453_v15, %v23131_v16  ;;  %v6618_v43 = vld [vmem:[#allocation3 + $0xa0] sm:$0xff] }
 0x43e   :  { %v6452_v54 = vadd.f32 %v20003_v46, %v6429_v63  ;;  %v6432_v12 = vadd.f32 %v16233_v0, %v6205_v44  ;;  %16243 = vmatmul.mubr.msk.f32.gmra.mxu1 %vm2237_vm3, %v20132_v25  ;;  %v6482_v55 = vmax.f32 %v6466_v14, 0.0  ;;  %16269 = vmatmul.mubr.msk.f32.gmra.mxu0 %vm2237_vm3, %v20134_v18  ;;  %v6400_v42 = vpop.f32.mrf.mxu0  ;;  %v23135_v36 = vld [vmem:[#allocation53_spill] sm:$0xff]  ;;  %v23136_v11 = vld [vmem:[#allocation52_spill] sm:$0xff] }
 0x43f   :  { %16245 = vmatprep.mubr.msk.f32.mxu1 %vm2237_vm3, %v20146_v4  ;;  %6603 = vst.msk [vmem:[#allocation3 + $0xc1] sm:$0xff] %vm2237_vm3, %v6515_v62  ;;  %v6485_v28 = vmax.f32 %v6469_v57, 0.0  ;;  %v6431_v41 = vadd.f32 %v6400_v42, %v6204_v17  ;;  %16271 = vmatprep.mubr.msk.f32.mxu0 %vm2237_vm3, %v20155_v26  ;;  %v20173_v13 = vld [vmem:[#allocation3 + $0x61] sm:$0xff]  ;;  %v6504_v0 = vld [vmem:[%s23110_s18 + $0x70] sm:$0xff] }
 0x440   :  { %v6468_v7 = vadd.f32 %v6452_v54, %v23132_v24  ;;  %v6455_v45 = vadd.f32 %v20003_v46, %v6432_v12  ;;  %v6514_v5 = vadd.f32 %v6498_v31, %v6482_v55  ;;  %v16236_v35 = vpop.f32.mrf.mxu0  ;;  %v20165_v53 = vld [vmem:[#allocation3 + $0x51] sm:$0xff]  ;;  %v20183_v20 = vld [vmem:[#allocation3 + $0x60] sm:$0xff] }
 0x441   :  { %v20167_v32 = vld [vmem:[#allocation3 + $0x50] sm:$0xff]  ;;  %v6517_v59 = vadd.f32 %v6501_v33, %v6485_v28  ;;  %v6454_v50 = vadd.f32 %v20003_v46, %v6431_v41  ;;  %v6434_v29 = vadd.f32 %v16236_v35, %v6207_v48  ;;  %v6635_v17 = vld [vmem:[#allocation3 + $0xa1] sm:$0xff] }
 0x442   :  { %v6484_v8 = vmax.f32 %v6468_v7, 0.0  ;;  %v6471_v22 = vadd.f32 %v6455_v45, %v23133_v40  ;;  %16246 = vmatmul.mubr.msk.f32.gmra.mxu1 %vm2237_vm3, %v20165_v53  ;;  %6602 = vst.msk [vmem:[#allocation3 + $0xb1] sm:$0xff] %vm2237_vm3, %v6514_v5  ;;  %16272 = vmatmul.mubr.msk.f32.gmra.mxu0 %vm2237_vm3, %v20167_v32  ;;  %v6410_v49 = vpop.f32.mrf.mxu0  ;;  %v7031_v5 = vld [vmem:[#allocation3 + $0x2] sm:$0xff] }
 0x443   :  { %16248 = vmatprep.mubr.msk.f32.mxu1 %vm2237_vm3, %v20173_v13  ;;  %6605 = vst.msk [vmem:[#allocation3 + $0xe1] sm:$0xff] %vm2237_vm3, %v6517_v59  ;;  %v6470_v2 = vadd.f32 %v6454_v50, %v23134_v3  ;;  %v6433_v44 = vadd.f32 %v6410_v49, %v6206_v37  ;;  %16274 = vmatprep.mubr.msk.f32.mxu0 %vm2237_vm3, %v20183_v20  ;;  %v20279_v35 = vld [vmem:[#allocation3 + $0x22] sm:$0xff]  ;;  %v14090_v59 = vld [vmem:[%s22784_s10 + $0x30] sm:$0xff] }
 0x444   :  { %v6516_v10 = vadd.f32 %v6500_v27, %v6484_v8  ;;  %v6487_v38 = vmax.f32 %v6471_v22, 0.0  ;;  %v6457_v39 = vadd.f32 %v20003_v46, %v6434_v29  ;;  %v20193_v21 = vld [vmem:[#allocation3 + $0x71] sm:$0xff]  ;;  %v20299_v40 = vld [vmem:[#allocation3 + $0x42] sm:$0xff] }
 0x445   :  { %v20195_v9 = vld [vmem:[#allocation3 + $0x70] sm:$0xff]  ;;  %v6486_v15 = vmax.f32 %v6470_v2, 0.0  ;;  %v6456_v63 = vadd.f32 %v20003_v46, %v6433_v44  ;;  %v14107_v8 = vld [vmem:[%s22784_s10 + $0x38] sm:$0xff]  ;;  %v7039_v22 = vld [vmem:[#allocation3 + $0xa2] sm:$0xff] }
 0x446   :  { %6604 = vst.msk [vmem:[#allocation3 + $0xd1] sm:$0xff] %vm2237_vm3, %v6516_v10  ;;  %v6519_v60 = vadd.f32 %v6503_v34, %v6487_v38  ;;  %16249 = vmatmul.mubr.msk.f32.gmra.mxu1 %vm2237_vm3, %v20193_v21  ;;  %v6473_v6 = vadd.f32 %v6457_v39, %v23135_v36  ;;  %16275 = vmatmul.mubr.msk.f32.gmra.mxu0 %vm2237_vm3, %v20195_v9  ;;  %v20223_v57 = vld [vmem:[#allocation3 + $0xc1] sm:$0xff]  ;;  %v7032_v27 = vld [vmem:[#allocation3 + $0x12] sm:$0xff] }
 0x447   :  { %16251 = vmatprep.mubr.msk.f32.mxu1 %vm2237_vm3, %v6635_v17  ;;  %v6518_v19 = vadd.f32 %v6502_v30, %v6486_v15  ;;  %v6472_v14 = vadd.f32 %v6456_v63, %v23136_v11  ;;  %16277 = vmatprep.mubr.msk.f32.mxu0 %vm2237_vm3, %v6618_v43  ;;  %v20225_v54 = vld [vmem:[#allocation3 + $0xc0] sm:$0xff]  ;;  %v20317_v50 = vld [vmem:[#allocation3 + $0x72] sm:$0xff] }
 0x448   :  { %6607 = vst.msk [vmem:[#allocation3 + $0x101] sm:$0xff] %vm2237_vm3, %v6519_v60  ;;  %v6489_v46 = vmax.f32 %v6473_v6, 0.0  ;;  %v20319_v34 = vld [vmem:[#allocation3 + $0x80] sm:$0xff] }
 0x449   :  { %6606 = vst.msk [vmem:[#allocation3 + $0xf1] sm:$0xff] %vm2237_vm3, %v6518_v19  ;;  %v6488_v61 = vmax.f32 %v6472_v14, 0.0  ;;  %v20215_v62 = vld [vmem:[#allocation3 + $0xb1] sm:$0xff]  ;;  %v20331_v49 = vld [vmem:[#allocation3 + $0xc2] sm:$0xff] }
 0x44a   :  { %v20217_v31 = vld [vmem:[#allocation3 + $0xb0] sm:$0xff]  ;;  %v6521_v16 = vadd.f32 %v6505_v23, %v6489_v46  ;;  %16252 = vmatmul.mubr.msk.f32.gmra.mxu1 %vm2237_vm3, %v20215_v62  ;;  %v20241_v42 = vld [vmem:[#allocation3 + $0xe1] sm:$0xff] }
 0x44b   :  { %16278 = vmatmul.mubr.msk.f32.gmra.mxu0 %vm2237_vm3, %v20217_v31  ;;  %v6520_v12 = vadd.f32 %v6504_v0, %v6488_v61  ;;  %16254 = vmatprep.mubr.msk.f32.mxu1 %vm2237_vm3, %v20223_v57  ;;  %v20243_v28 = vld [vmem:[#allocation3 + $0xe0] sm:$0xff]  ;;  %v7040_v29 = vld [vmem:[#allocation3 + $0xb2] sm:$0xff]  ;;  %v14142_v23 = vld [vmem:[%s22786_s12 + $0x8] sm:$0xff] }
 0x44c   :  { %16280 = vmatprep.mubr.msk.f32.mxu0 %vm2237_vm3, %v20225_v54  ;;  %6609 = vst.msk [vmem:[#allocation3 + $0x121] sm:$0xff] %vm2237_vm3, %v6521_v16  ;;  %v20343_v38 = vld [vmem:[#allocation3 + $0xe2] sm:$0xff] }
 0x44d   :  { %v20232_v55 = vld [vmem:[#allocation3 + $0xd1] sm:$0xff]  ;;  %6608 = vst.msk [vmem:[#allocation3 + $0x111] sm:$0xff] %vm2237_vm3, %v6520_v12  ;;  %v14124_v17 = vld [vmem:[%s22784_s10 + $0x40] sm:$0xff] }
 0x44e   :  { %v20234_v33 = vld [vmem:[#allocation3 + $0xd0] sm:$0xff]  ;;  %16255 = vmatmul.mubr.msk.f32.gmra.mxu1 %vm2237_vm3, %v20232_v55  ;;  %v20399_v39 = vld [vmem:[#allocation3 + $0x82] sm:$0xff] }
 0x44f   :  { %16281 = vmatmul.mubr.msk.f32.gmra.mxu0 %vm2237_vm3, %v20234_v33  ;;  %16257 = vmatprep.mubr.msk.f32.mxu1 %vm2237_vm3, %v20241_v42  ;;  %v20257_v45 = vld [vmem:[#allocation3 + $0x101] sm:$0xff]  ;;  %v20337_v10 = vld [vmem:[#allocation3 + $0xd2] sm:$0xff] }
 0x450   :  { %16283 = vmatprep.mubr.msk.f32.mxu0 %vm2237_vm3, %v20243_v28  ;;  %v20249_v24 = vld [vmem:[#allocation3 + $0xf1] sm:$0xff]  ;;  %v20259_v41 = vld [vmem:[#allocation3 + $0x100] sm:$0xff] }
 0x451   :  { %v20251_v7 = vld [vmem:[#allocation3 + $0xf0] sm:$0xff]  ;;  %v20355_v2 = vld [vmem:[#allocation3 + $0x102] sm:$0xff] }
 0x452   :  { %16258 = vmatmul.mubr.msk.f32.gmra.mxu1 %vm2237_vm3, %v20249_v24  ;;  %v20349_v3 = vld [vmem:[#allocation3 + $0xf2] sm:$0xff]  ;;  %v8733_v12 = vld [vmem:[#allocation4 + $0x1] sm:$0xff] }
 0x453   :  { %16284 = vmatmul.mubr.msk.f32.gmra.mxu0 %vm2237_vm3, %v20251_v7  ;;  %16260 = vmatprep.mubr.msk.f32.mxu1 %vm2237_vm3, %v20257_v45  ;;  %v20363_v44 = vld [vmem:[#allocation3 + $0x120] sm:$0xff] }
 0x454   :  { %16286 = vmatprep.mubr.msk.f32.mxu0 %vm2237_vm3, %v20259_v41  ;;  %v20265_v48 = vld [vmem:[#allocation3 + $0x111] sm:$0xff]  ;;  %v7500_v43 = vld [vmem:[#allocation3 + $0x121] sm:$0xff] }
 0x455   :  { %v20267_v37 = vld [vmem:[#allocation3 + $0x110] sm:$0xff]  ;;  %v7727_v60 = vld [vmem:[#allocation3 + $0x122] sm:$0xff] }
 0x456   :  { %16261 = vmatmul.mubr.msk.f32.gmra.mxu1 %vm2237_vm3, %v20265_v48  ;;  %v20361_v30 = vld [vmem:[#allocation3 + $0x112] sm:$0xff] }
 0x457   :  { %16287 = vmatmul.mubr.msk.f32.gmra.mxu0 %vm2237_vm3, %v20267_v37  ;;  %16291 = vmatprep.mubr.msk.f32.mxu1 %vm2237_vm3, %v7031_v5 }
 0x458   :  { %16317 = vmatprep.mubr.msk.f32.mxu0 %vm2237_vm3, %v20095_v1  ;;  %v20293_v1 = vld [vmem:[#allocation3 + $0x32] sm:$0xff] }
 0x45a   :  { %16292 = vmatmul.mubr.msk.f32.vlgmr.msra.gmra.mxu1 %vm2237_vm3, %v7032_v27 }
 0x45b   :  { %16318 = vmatmul.mubr.msk.f32.vlgmr.msra.gmra.mxu0 %vm2237_vm3, %v20110_v47  ;;  %16294 = vmatprep.mubr.msk.f32.mxu1 %vm2237_vm3, %v20279_v35 }
 0x45c   :  { %16320 = vmatprep.mubr.msk.f32.mxu0 %vm2237_vm3, %v20134_v18  ;;  %16342 = vmatpush3.msra.mxu1 %v20100_v51  ;;  %v20305_v51 = vld [vmem:[#allocation3 + $0x52] sm:$0xff] }
 0x45d   :  { %16368 = vmatpush3.msra.mxu0 %v20115_v52  ;;  %16393 = vmatprep.subr.mxu1 %v14090_v59  ;;  %v20311_v52 = vld [vmem:[#allocation3 + $0x62] sm:$0xff] }
 0x45e   :  { %16419 = vmatprep.subr.mxu0 %v14107_v8  ;;  %16295 = vmatmul.mubr.msk.f32.gmra.mxu1 %vm2237_vm3, %v20293_v1 }
 0x45f   :  { %16321 = vmatmul.mubr.msk.f32.gmra.mxu0 %vm2237_vm3, %v20155_v26  ;;  %16297 = vmatprep.mubr.msk.f32.mxu1 %vm2237_vm3, %v20299_v40 }
 0x460   :  { %16323 = vmatprep.mubr.msk.f32.mxu0 %vm2237_vm3, %v20167_v32 }
 0x462   :  { %16298 = vmatmul.mubr.msk.f32.gmra.mxu1 %vm2237_vm3, %v20305_v51 }
 0x463   :  { %16324 = vmatmul.mubr.msk.f32.gmra.mxu0 %vm2237_vm3, %v20183_v20  ;;  %16300 = vmatprep.mubr.msk.f32.mxu1 %vm2237_vm3, %v20311_v52 }
 0x464   :  { %16326 = vmatprep.mubr.msk.f32.mxu0 %vm2237_vm3, %v20195_v9 }
 0x466   :  { %16301 = vmatmul.mubr.msk.f32.gmra.mxu1 %vm2237_vm3, %v20317_v50 }
 0x467   :  { %16327 = vmatmul.mubr.msk.f32.gmra.mxu0 %vm2237_vm3, %v20319_v34  ;;  %16303 = vmatprep.mubr.msk.f32.mxu1 %vm2237_vm3, %v7039_v22 }
 0x468   :  { %16329 = vmatprep.mubr.msk.f32.mxu0 %vm2237_vm3, %v20217_v31 }
 0x46a   :  { %16304 = vmatmul.mubr.msk.f32.gmra.mxu1 %vm2237_vm3, %v7040_v29 }
 0x46b   :  { %16330 = vmatmul.mubr.msk.f32.gmra.mxu0 %vm2237_vm3, %v20225_v54  ;;  %16306 = vmatprep.mubr.msk.f32.mxu1 %vm2237_vm3, %v20331_v49 }
 0x46c   :  { %16332 = vmatprep.mubr.msk.f32.mxu0 %vm2237_vm3, %v20234_v33 }
 0x46e   :  { %16307 = vmatmul.mubr.msk.f32.gmra.mxu1 %vm2237_vm3, %v20337_v10 }
 0x46f   :  { %16333 = vmatmul.mubr.msk.f32.gmra.mxu0 %vm2237_vm3, %v20243_v28  ;;  %16309 = vmatprep.mubr.msk.f32.mxu1 %vm2237_vm3, %v20343_v38 }
 0x470   :  { %16335 = vmatprep.mubr.msk.f32.mxu0 %vm2237_vm3, %v20251_v7 }
 0x472   :  { %16310 = vmatmul.mubr.msk.f32.gmra.mxu1 %vm2237_vm3, %v20349_v3 }
 0x473   :  { %16336 = vmatmul.mubr.msk.f32.gmra.mxu0 %vm2237_vm3, %v20259_v41  ;;  %16312 = vmatprep.mubr.msk.f32.mxu1 %vm2237_vm3, %v20355_v2 }
 0x474   :  { %16338 = vmatprep.mubr.msk.f32.mxu0 %vm2237_vm3, %v20267_v37 }
 0x476   :  { %16313 = vmatmul.mubr.msk.f32.gmra.mxu1 %vm2237_vm3, %v20361_v30 }
 0x477   :  { %16339 = vmatmul.mubr.msk.f32.gmra.mxu0 %vm2237_vm3, %v20363_v44  ;;  %16343 = vmatprep.mubr.msk.f32.mxu1 %vm2237_vm3, %v20093_v56  ;;  %v7492_v56 = vld [vmem:[#allocation3 + $0x81] sm:$0xff] }
 0x478   :  { %16369 = vmatprep.mubr.msk.f32.mxu0 %vm2237_vm3, %v7032_v27 }
 0x47a   :  { %16344 = vmatmul.mubr.msk.f32.vlgmr.msra.gmra.mxu1 %vm2237_vm3, %v20108_v58 }
 0x47b   :  { %16370 = vmatmul.mubr.msk.f32.vlgmr.msra.gmra.mxu0 %vm2237_vm3, %v20279_v35  ;;  %16346 = vmatprep.mubr.msk.f32.mxu1 %vm2237_vm3, %v20132_v25 }
 0x47c   :  { %16372 = vmatprep.mubr.msk.f32.mxu0 %vm2237_vm3, %v20293_v1  ;;  %16394 = vmatpush3.msra.mxu1 %v14090_v59 }
 0x47d   :  { %16420 = vmatpush3.msra.mxu0 %v14107_v8  ;;  %16445 = vmatprep.subr.mxu1 %v14124_v17 }
 0x47e   :  { %16347 = vmatmul.mubr.msk.f32.gmra.mxu1 %vm2237_vm3, %v20146_v4  ;;  %16471 = vmatprep.subr.mxu0 %v14142_v23 }
 0x47f   :  { %16373 = vmatmul.mubr.msk.f32.gmra.mxu0 %vm2237_vm3, %v20299_v40  ;;  %16349 = vmatprep.mubr.msk.f32.mxu1 %vm2237_vm3, %v20165_v53 }
 0x480   :  { %16375 = vmatprep.mubr.msk.f32.mxu0 %vm2237_vm3, %v20305_v51 }
 0x482   :  { %16350 = vmatmul.mubr.msk.f32.gmra.mxu1 %vm2237_vm3, %v20173_v13 }
 0x483   :  { %16376 = vmatmul.mubr.msk.f32.gmra.mxu0 %vm2237_vm3, %v20311_v52  ;;  %16352 = vmatprep.mubr.msk.f32.mxu1 %vm2237_vm3, %v20193_v21 }
 0x484   :  { %16378 = vmatprep.mubr.msk.f32.mxu0 %vm2237_vm3, %v20317_v50 }
 0x486   :  { %16353 = vmatmul.mubr.msk.f32.gmra.mxu1 %vm2237_vm3, %v7492_v56 }
 0x487   :  { %16379 = vmatmul.mubr.msk.f32.gmra.mxu0 %vm2237_vm3, %v20399_v39  ;;  %16355 = vmatprep.mubr.msk.f32.mxu1 %vm2237_vm3, %v20215_v62 }
 0x488   :  { %16381 = vmatprep.mubr.msk.f32.mxu0 %vm2237_vm3, %v7040_v29 }
 0x48a   :  { %16356 = vmatmul.mubr.msk.f32.gmra.mxu1 %vm2237_vm3, %v20223_v57 }
 0x48b   :  { %16382 = vmatmul.mubr.msk.f32.gmra.mxu0 %vm2237_vm3, %v20331_v49  ;;  %16358 = vmatprep.mubr.msk.f32.mxu1 %vm2237_vm3, %v20232_v55 }
 0x48c   :  { %16384 = vmatprep.mubr.msk.f32.mxu0 %vm2237_vm3, %v20337_v10 }
 0x48e   :  { %16359 = vmatmul.mubr.msk.f32.gmra.mxu1 %vm2237_vm3, %v20241_v42 }
 0x48f   :  { %16385 = vmatmul.mubr.msk.f32.gmra.mxu0 %vm2237_vm3, %v20343_v38  ;;  %16361 = vmatprep.mubr.msk.f32.mxu1 %vm2237_vm3, %v20249_v24 }
 0x490   :  { %16387 = vmatprep.mubr.msk.f32.mxu0 %vm2237_vm3, %v20349_v3 }
 0x492   :  { %16362 = vmatmul.mubr.msk.f32.gmra.mxu1 %vm2237_vm3, %v20257_v45 }
 0x493   :  { %16388 = vmatmul.mubr.msk.f32.gmra.mxu0 %vm2237_vm3, %v20355_v2  ;;  %16364 = vmatprep.mubr.msk.f32.mxu1 %vm2237_vm3, %v20265_v48 }
 0x494   :  { %16390 = vmatprep.mubr.msk.f32.mxu0 %vm2237_vm3, %v20361_v30 }
 0x496   :  { %16365 = vmatmul.mubr.msk.f32.gmra.mxu1 %vm2237_vm3, %v7500_v43 }
 0x497   :  { %16391 = vmatmul.mubr.msk.f32.gmra.mxu0 %vm2237_vm3, %v7727_v60  ;;  %16395 = vmatprep.mubr.msk.f32.mxu1 %vm2237_vm3, %v20110_v47  ;;  %v8173_v47 = vld [vmem:[#allocation3 + $0x91] sm:$0xff] }
 0x498   :  { %16421 = vmatprep.mubr.msk.f32.mxu0 %vm2237_vm3, %v20108_v58  ;;  %v7946_v58 = vld [vmem:[#allocation3 + $0x90] sm:$0xff] }
 0x49a   :  { %16396 = vmatmul.mubr.msk.f32.vlgmr.msra.gmra.mxu1 %vm2237_vm3, %v20134_v18  ;;  %v8181_v18 = vld [vmem:[#allocation3 + $0x131] sm:$0xff] }
 0x49b   :  { %16422 = vmatmul.mubr.msk.f32.vlgmr.msra.gmra.mxu0 %vm2237_vm3, %v20132_v25  ;;  %16398 = vmatprep.mubr.msk.f32.mxu1 %vm2237_vm3, %v20155_v26  ;;  %v7954_v25 = vld [vmem:[#allocation3 + $0x130] sm:$0xff] }
 0x49c   :  { %16424 = vmatprep.mubr.msk.f32.mxu0 %vm2237_vm3, %v20146_v4  ;;  %16446 = vmatpush3.msra.mxu1 %v14124_v17  ;;  %v8400_v4 = vld [vmem:[#allocation3 + $0x92] sm:$0xff] }
 0x49d   :  { %v8408_v26 = vld [vmem:[#allocation3 + $0x132] sm:$0xff]  ;;  %16472 = vmatpush3.msra.mxu0 %v14142_v23 }
 0x49e   :  { %16399 = vmatmul.mubr.msk.f32.gmra.mxu1 %vm2237_vm3, %v20167_v32 }
 0x49f   :  { %16425 = vmatmul.mubr.msk.f32.gmra.mxu0 %vm2237_vm3, %v20165_v53  ;;  %16401 = vmatprep.mubr.msk.f32.mxu1 %vm2237_vm3, %v20183_v20 }
 0x4a0   :  { %16427 = vmatprep.mubr.msk.f32.mxu0 %vm2237_vm3, %v20173_v13 }
 0x4a2   :  { %16402 = vmatmul.mubr.msk.f32.gmra.mxu1 %vm2237_vm3, %v20195_v9 }
 0x4a3   :  { %16428 = vmatmul.mubr.msk.f32.gmra.mxu0 %vm2237_vm3, %v20193_v21  ;;  %16404 = vmatprep.mubr.msk.f32.mxu1 %vm2237_vm3, %v20319_v34 }
 0x4a4   :  { %16430 = vmatprep.mubr.msk.f32.mxu0 %vm2237_vm3, %v7492_v56 }
 0x4a6   :  { %16405 = vmatmul.mubr.msk.f32.gmra.mxu1 %vm2237_vm3, %v7946_v58 }
 0x4a7   :  { %16431 = vmatmul.mubr.msk.f32.gmra.mxu0 %vm2237_vm3, %v8173_v47  ;;  %16407 = vmatprep.mubr.msk.f32.mxu1 %vm2237_vm3, %v20225_v54  ;;  %v8732_v54 = vld [vmem:[%s22786_s12] sm:$0xff] }
 0x4a8   :  { %16433 = vmatprep.mubr.msk.f32.mxu0 %vm2237_vm3, %v20223_v57  ;;  %16497 = vmatprep.subr.mxu1 %v8732_v54 }
 0x4aa   :  { %16408 = vmatmul.mubr.msk.f32.gmra.mxu1 %vm2237_vm3, %v20234_v33 }
 0x4ab   :  { %16434 = vmatmul.mubr.msk.f32.gmra.mxu0 %vm2237_vm3, %v20232_v55  ;;  %16410 = vmatprep.mubr.msk.f32.mxu1 %vm2237_vm3, %v20243_v28  ;;  %v8716_v55 = vld [vmem:[#allocation4] sm:$0xff] }
 0x4ac   :  { %16436 = vmatprep.mubr.msk.f32.mxu0 %vm2237_vm3, %v20241_v42 }
 0x4ae   :  { %16411 = vmatmul.mubr.msk.f32.gmra.mxu1 %vm2237_vm3, %v20251_v7 }
 0x4af   :  { %16437 = vmatmul.mubr.msk.f32.gmra.mxu0 %vm2237_vm3, %v20249_v24  ;;  %16413 = vmatprep.mubr.msk.f32.mxu1 %vm2237_vm3, %v20259_v41 }
 0x4b0   :  { %16439 = vmatprep.mubr.msk.f32.mxu0 %vm2237_vm3, %v20257_v45 }
 0x4b2   :  { %16414 = vmatmul.mubr.msk.f32.gmra.mxu1 %vm2237_vm3, %v20267_v37 }
 0x4b3   :  { %16440 = vmatmul.mubr.msk.f32.gmra.mxu0 %vm2237_vm3, %v20265_v48  ;;  %16416 = vmatprep.mubr.msk.f32.mxu1 %vm2237_vm3, %v20363_v44  ;;  %v20575_v44 = vld [vmem:[%s22786_s12 + $0x10] sm:$0xff] }
 0x4b4   :  { %16442 = vmatprep.mubr.msk.f32.mxu0 %vm2237_vm3, %v7500_v43  ;;  %23137 = vst [vmem:[#allocation41_spill] sm:$0xff] %v20575_v44  ;;  %16523 = vmatprep.subr.mxu0 %v20575_v44 }
 0x4b6   :  { %16417 = vmatmul.mubr.msk.f32.gmra.mxu1 %vm2237_vm3, %v7954_v25 }
 0x4b7   :  { %16443 = vmatmul.mubr.msk.f32.gmra.mxu0 %vm2237_vm3, %v8181_v18  ;;  %16447 = vmatprep.mubr.msk.f32.mxu1 %vm2237_vm3, %v20279_v35 }
 0x4b8   :  { %16473 = vmatprep.mubr.msk.f32.mxu0 %vm2237_vm3, %v8733_v12 }
 0x4ba   :  { %16448 = vmatmul.mubr.msk.f32.vlgmr.msra.gmra.mxu1 %vm2237_vm3, %v20293_v1 }
 0x4bb   :  { %16450 = vmatprep.mubr.msk.f32.mxu1 %vm2237_vm3, %v20299_v40  ;;  %16498 = vmatpush3.msra.mxu1 %v8732_v54 }
 0x4be   :  { %16451 = vmatmul.mubr.msk.f32.gmra.mxu1 %vm2237_vm3, %v20305_v51 }
 0x4bf   :  { %16453 = vmatprep.mubr.msk.f32.mxu1 %vm2237_vm3, %v20311_v52 }
 0x4c2   :  { %16454 = vmatmul.mubr.msk.f32.gmra.mxu1 %vm2237_vm3, %v20317_v50 }
 0x4c3   :  { %16456 = vmatprep.mubr.msk.f32.mxu1 %vm2237_vm3, %v20399_v39 }
 0x4c6   :  { %16457 = vmatmul.mubr.msk.f32.gmra.mxu1 %vm2237_vm3, %v8400_v4 }
 0x4c7   :  { %16459 = vmatprep.mubr.msk.f32.mxu1 %vm2237_vm3, %v20331_v49 }
 0x4ca   :  { %16460 = vmatmul.mubr.msk.f32.gmra.mxu1 %vm2237_vm3, %v20337_v10 }
 0x4cb   :  { %16462 = vmatprep.mubr.msk.f32.mxu1 %vm2237_vm3, %v20343_v38 }
 0x4ce   :  { %16463 = vmatmul.mubr.msk.f32.gmra.mxu1 %vm2237_vm3, %v20349_v3 }
 0x4cf   :  { %16465 = vmatprep.mubr.msk.f32.mxu1 %vm2237_vm3, %v20355_v2 }
 0x4d2   :  { %16466 = vmatmul.mubr.msk.f32.gmra.mxu1 %vm2237_vm3, %v20361_v30 }
 0x4d3   :  { %16468 = vmatprep.mubr.msk.f32.mxu1 %vm2237_vm3, %v7727_v60 }
 0x4d6   :  { %16469 = vmatmul.mubr.msk.f32.gmra.mxu1 %vm2237_vm3, %v8408_v26 }
 0x4d7   :  { %16499 = vmatprep.mubr.msk.f32.mxu1 %vm2237_vm3, %v8716_v55 }
 0x4f9   :  { %v16241_v53 = vpop.f32.mrf.mxu1 }
 0x4fa   :  { %v16267_v32 = vpop.f32.mrf.mxu0 }
 0x4fb   :  { %v6958_v13 = vadd.f32 %v16267_v32, %v16241_v53  ;;  %v20520_v20 = vpop.f32.mrf.mxu1  ;;  %v20601_v32 = vld [vmem:[%s22786_s12 + $0x18] sm:$0xff] }
 0x4fc   :  { %v20522_v21 = vpop.f32.mrf.mxu0  ;;  %23138 = vst [vmem:[#allocation23_spill] sm:$0xff] %v20601_v32  ;;  %16549 = vmatprep.subr.mxu1 %v20601_v32 }
 0x4fe   :  { %v16244_v9 = vpop.f32.mrf.mxu1  ;;  %v16270_v15 = vpop.f32.mrf.mxu0 }
 0x4ff   :  { %v6968_v63 = vadd.f32 %v16270_v15, %v16244_v9  ;;  %v23140_v9 = vmov 0.0  }
 0x500   :  { %v20524_v36 = vpop.f32.mrf.mxu1  ;;  %v20526_v6 = vpop.f32.mrf.mxu0 }
 0x502   :  { %v16247_v19 = vpop.f32.mrf.mxu1  ;;  %v16273_v11 = vpop.f32.mrf.mxu0 }
 0x503   :  { %v6978_v14 = vadd.f32 %v16273_v11, %v16247_v19 }
 0x504   :  { %v20531_v46 = vpop.f32.mrf.mxu1  ;;  %v20533_v0 = vpop.f32.mrf.mxu0 }
 0x506   :  { %v16250_v61 = vpop.f32.mrf.mxu1  ;;  %v16276_v62 = vpop.f32.mrf.mxu0 }
 0x507   :  { %v6988_v31 = vadd.f32 %v16276_v62, %v16250_v61 }
 0x508   :  { %v20535_v16 = vpop.f32.mrf.mxu1  ;;  %v20537_v57 = vpop.f32.mrf.mxu0 }
 0x50a   :  { %v16253_v33 = vpop.f32.mrf.mxu1 }
 0x50b   :  { %v16279_v42 = vpop.f32.mrf.mxu0 }
 0x50c   :  { %v6998_v28 = vadd.f32 %v16279_v42, %v16253_v33  ;;  %v20544_v24 = vpop.f32.mrf.mxu1 }
 0x50d   :  { %v20546_v7 = vpop.f32.mrf.mxu0 }
 0x50e   :  { %v16256_v45 = vpop.f32.mrf.mxu1 }
 0x50f   :  { %v16282_v41 = vpop.f32.mrf.mxu0 }
 0x510   :  { %v7008_v48 = vadd.f32 %v16282_v41, %v16256_v45  ;;  %v20548_v37 = vpop.f32.mrf.mxu1 }
 0x511   :  { %v20550_v5 = vpop.f32.mrf.mxu0 }
 0x512   :  { %v16259_v27 = vpop.f32.mrf.mxu1 }
 0x513   :  { %v16285_v35 = vpop.f32.mrf.mxu0 }
 0x514   :  { %v7018_v59 = vadd.f32 %v16285_v35, %v16259_v27  ;;  %v20552_v8 = vpop.f32.mrf.mxu1 }
 0x515   :  { %v20554_v1 = vpop.f32.mrf.mxu0 }
 0x516   :  { %v16262_v40 = vpop.f32.mrf.mxu1 }
 0x517   :  { %v16288_v51 = vpop.f32.mrf.mxu0 }
 0x518   :  { %v7028_v52 = vadd.f32 %v16288_v51, %v16262_v40  ;;  %v20556_v22 = vpop.f32.mrf.mxu1  ;;  %v20642_v40 = vld [vmem:[#allocation4 + $0xa1] sm:$0xff] }
 0x519   :  { %v20558_v50 = vpop.f32.mrf.mxu0  ;;  %23153 = vst [vmem:[#allocation47_spill] sm:$0xff] %v20642_v40  ;;  %v20644_v51 = vld [vmem:[#allocation4 + $0xa0] sm:$0xff] }
 0x51a   :  { %v16293_v34 = vpop.f32.mrf.mxu1  ;;  %23154 = vst [vmem:[#allocation64_spill] sm:$0xff] %v20644_v51 }
 0x51b   :  { %v20560_v29 = vpop.f32.mrf.mxu0  ;;  %v20562_v49 = vadd.f32 %v16293_v34, %v6958_v13  ;;  %v20603_v13 = vld [vmem:[#allocation4 + $0x2] sm:$0xff] }
 0x51c   :  { %v20564_v10 = vpop.f32.mrf.mxu1  ;;  %23139 = vst [vmem:[#allocation34_spill] sm:$0xff] %v20603_v13  ;;  %10789 = vst.msk [vmem:[#allocation4] sm:$0xff] %vm2237_vm3, %v23140_v9  ;;  %v20646_v34 = vld [vmem:[#allocation4 + $0xa2] sm:$0xff] }
 0x51d   :  { %v20566_v38 = vpop.f32.mrf.mxu0  ;;  %10790 = vst.msk [vmem:[#allocation4 + $0x8] sm:$0x3] %vm2239_vm4, %v23140_v9  ;;  %23155 = vst [vmem:[#allocation57_spill] sm:$0xff] %v20646_v34 }
 0x51e   :  { %v16296_v3 = vpop.f32.mrf.mxu1  ;;  %10809 = vst.msk [vmem:[#allocation4 + $0xa0] sm:$0xff] %vm2237_vm3, %v23140_v9 }
 0x51f   :  { %v20568_v2 = vpop.f32.mrf.mxu0  ;;  %v20570_v30 = vadd.f32 %v16296_v3, %v6968_v63  ;;  %10810 = vst.msk [vmem:[#allocation4 + $0xa8] sm:$0x3] %vm2239_vm4, %v23140_v9 }
 0x520   :  { %v20577_v17 = vpop.f32.mrf.mxu1 }
 0x521   :  { %v20579_v56 = vpop.f32.mrf.mxu0 }
 0x522   :  { %v16299_v39 = vpop.f32.mrf.mxu1 }
 0x523   :  { %v20582_v43 = vpop.f32.mrf.mxu0  ;;  %v20584_v60 = vadd.f32 %v16299_v39, %v6978_v14 }
 0x524   :  { %v20586_v58 = vpop.f32.mrf.mxu1 }
 0x525   :  { %v20588_v47 = vpop.f32.mrf.mxu0 }
 0x526   :  { %v16302_v25 = vpop.f32.mrf.mxu1 }
 0x527   :  { %v20590_v18 = vpop.f32.mrf.mxu0  ;;  %v20592_v4 = vadd.f32 %v16302_v25, %v6988_v31 }
 0x528   :  { %v20594_v26 = vpop.f32.mrf.mxu1 }
 0x529   :  { %v20596_v53 = vpop.f32.mrf.mxu0 }
 0x52a   :  { %v16305_v15 = vpop.f32.mrf.mxu1 }
 0x52b   :  { %v20610_v63 = vpop.f32.mrf.mxu0  ;;  %v20612_v19 = vadd.f32 %v16305_v15, %v6998_v28 }
 0x52c   :  { %v20614_v23 = vpop.f32.mrf.mxu1 }
 0x52d   :  { %v20616_v11 = vpop.f32.mrf.mxu0 }
 0x52e   :  { %23141 = vst [vmem:[#allocation22_spill] sm:$0xff] %v20616_v11  ;;  %v16308_v14 = vpop.f32.mrf.mxu1 }
 0x52f   :  { %v20618_v61 = vpop.f32.mrf.mxu0  ;;  %v20620_v62 = vadd.f32 %v16308_v14, %v7008_v48 }
 0x530   :  { %23142 = vst [vmem:[#allocation40_spill] sm:$0xff] %v20618_v61  ;;  %v20622_v31 = vpop.f32.mrf.mxu1 }
 0x531   :  { %23143 = vst [vmem:[#allocation36_spill] sm:$0xff] %v20620_v62  ;;  %v20624_v54 = vpop.f32.mrf.mxu0 }
 0x532   :  { %23144 = vst [vmem:[#allocation45_spill] sm:$0xff] %v20624_v54  ;;  %v16311_v12 = vpop.f32.mrf.mxu1 }
 0x533   :  { %v20626_v55 = vpop.f32.mrf.mxu0  ;;  %v20628_v33 = vadd.f32 %v16311_v12, %v7018_v59 }
 0x534   :  { %23145 = vst [vmem:[#allocation63_spill] sm:$0xff] %v20626_v55  ;;  %v20630_v42 = vpop.f32.mrf.mxu1 }
 0x535   :  { %23146 = vst [vmem:[#allocation39_spill] sm:$0xff] %v20628_v33  ;;  %23147 = vst [vmem:[#allocation13_spill] sm:$0xff] %v20630_v42  ;;  %v20632_v28 = vpop.f32.mrf.mxu0 }
 0x536   :  { %23148 = vst [vmem:[#allocation56_spill] sm:$0xff] %v20632_v28  ;;  %v16314_v45 = vpop.f32.mrf.mxu1 }
 0x537   :  { %v20634_v41 = vpop.f32.mrf.mxu0  ;;  %v20636_v27 = vadd.f32 %v16314_v45, %v7028_v52 }
 0x538   :  { %23149 = vst [vmem:[#allocation21_spill] sm:$0xff] %v20634_v41  ;;  %v20638_v48 = vpop.f32.mrf.mxu1 }
 0x539   :  { %23150 = vst [vmem:[#allocation25_spill] sm:$0xff] %v20636_v27  ;;  %23151 = vst [vmem:[#allocation54_spill] sm:$0xff] %v20638_v48  ;;  %v20640_v35 = vpop.f32.mrf.mxu0 }
 0x53a   :  { %23152 = vst [vmem:[#allocation38_spill] sm:$0xff] %v20640_v35  ;;  %v16345_v59 = vpop.f32.mrf.mxu1 }
 0x53b   :  { %v20652_v3 = vpop.f32.mrf.mxu0 }
 0x53c   :  { %v7617_v52 = vpop.f32.mrf.mxu1 }
 0x53d   :  { %v20654_v39 = vpop.f32.mrf.mxu0 }
 0x53e   :  { %v16348_v25 = vpop.f32.mrf.mxu1 }
 0x53f   :  { %v20656_v15 = vpop.f32.mrf.mxu0 }
 0x540   :  { %v20658_v14 = vpop.f32.mrf.mxu1 }
 0x541   :  { %v20660_v12 = vpop.f32.mrf.mxu0 }
 0x542   :  { %v20662_v45 = vpop.f32.mrf.mxu1 }
 0x543   :  { %v20664_v34 = vpop.f32.mrf.mxu0 }
 0x544   :  { %v20666_v13 = vpop.f32.mrf.mxu1 }
 0x545   :  { %v20668_v51 = vpop.f32.mrf.mxu0 }
 0x546   :  { %23156 = vst [vmem:[#allocation59_spill] sm:$0xff] %v20668_v51  ;;  %v20670_v40 = vpop.f32.mrf.mxu1 }
 0x547   :  { %v20672_v32 = vpop.f32.mrf.mxu0 }
 0x548   :  { %23157 = vst [vmem:[#allocation43_spill] sm:$0xff] %v20672_v32  ;;  %v20674_v44 = vpop.f32.mrf.mxu1 }
 0x549   :  { %23158 = vst [vmem:[#allocation55_spill] sm:$0xff] %v20674_v44  ;;  %v20676_v35 = vpop.f32.mrf.mxu0 }
 0x54a   :  { %23159 = vst [vmem:[#allocation67_spill] sm:$0xff] %v20676_v35  ;;  %v20678_v9 = vpop.f32.mrf.mxu1 }
 0x54b   :  { %23160 = vst [vmem:[#allocation12_spill] sm:$0xff] %v20678_v9  ;;  %v20680_v41 = vpop.f32.mrf.mxu0 }
 0x54c   :  { %23161 = vst [vmem:[#allocation65_spill] sm:$0xff] %v20680_v41  ;;  %v20682_v27 = vpop.f32.mrf.mxu1 }
 0x54d   :  { %23162 = vst [vmem:[#allocation58_spill] sm:$0xff] %v20682_v27  ;;  %v20684_v48 = vpop.f32.mrf.mxu0 }
 0x54e   :  { %23163 = vst [vmem:[#allocation42_spill] sm:$0xff] %v20684_v48  ;;  %v20686_v28 = vpop.f32.mrf.mxu1 }
 0x54f   :  { %23164 = vst [vmem:[#allocation66_spill] sm:$0xff] %v20686_v28  ;;  %v20688_v55 = vpop.f32.mrf.mxu0 }
 0x550   :  { %23165 = vst [vmem:[#allocation61_spill] sm:$0xff] %v20688_v55  ;;  %v20690_v33 = vpop.f32.mrf.mxu1 }
 0x551   :  { %23166 = vst [vmem:[#allocation60_spill] sm:$0xff] %v20690_v33  ;;  %v20692_v42 = vpop.f32.mrf.mxu0 }
 0x552   :  { %23167 = vst [vmem:[#allocation14_spill] sm:$0xff] %v20692_v42  ;;  %v20694_v32 = vpop.f32.mrf.mxu1 }
 0x553   :  { %23168 = vst [vmem:[#allocation44_spill] sm:$0xff] %v20694_v32  ;;  %v20696_v54 = vpop.f32.mrf.mxu0 }
 0x554   :  { %23169 = vst [vmem:[#allocation70_spill] sm:$0xff] %v20696_v54  ;;  %v20698_v35 = vpop.f32.mrf.mxu1 }
 0x555   :  { %23170 = vst [vmem:[#allocation68_spill] sm:$0xff] %v20698_v35  ;;  %v20700_v9 = vpop.f32.mrf.mxu0 }
 0x556   :  { %23171 = vst [vmem:[#allocation19_spill] sm:$0xff] %v20700_v9  ;;  %v20702_v41 = vpop.f32.mrf.mxu1 }
 0x557   :  { %23172 = vst [vmem:[#allocation29_spill] sm:$0xff] %v20702_v41  ;;  %v20704_v27 = vpop.f32.mrf.mxu0 }
 0x558   :  { %23173 = vst [vmem:[#allocation48_spill] sm:$0xff] %v20704_v27  ;;  %v20706_v48 = vpop.f32.mrf.mxu1 }
 0x559   :  { %23174 = vst [vmem:[#allocation18_spill] sm:$0xff] %v20706_v48  ;;  %v20708_v28 = vpop.f32.mrf.mxu0 }
 0x55a   :  { %23175 = vst [vmem:[#allocation31_spill] sm:$0xff] %v20708_v28  ;;  %v16397_v55 = vpop.f32.mrf.mxu1  ;;  %v6953_v28 = vadd.f32 %v20522_v21, %v20520_v20 }
 0x55b   :  { %v16423_v33 = vpop.f32.mrf.mxu0 }
 0x55c   :  { %v8071_v61 = vpop.f32.mrf.mxu1  ;;  %v7242_v11 = vadd.f32 %v20564_v10, %v6953_v28  ;;  %v6973_v10 = vadd.f32 %v20533_v0, %v20531_v46  ;;  %v6983_v46 = vadd.f32 %v20537_v57, %v20535_v16  ;;  %v7474_v0 = vadd.f32 %v20582_v43, %v20584_v60 }
 0x55d   :  { %v20710_v42 = vpop.f32.mrf.mxu0  ;;  %v7003_v43 = vadd.f32 %v20550_v5, %v20548_v37 }
 0x55e   :  { %v16400_v32 = vpop.f32.mrf.mxu1  ;;  %v7469_v20 = vadd.f32 %v20566_v38, %v7242_v11 }
 0x55f   :  { %v20712_v54 = vpop.f32.mrf.mxu0 }
 0x560   :  { %v8081_v62 = vpop.f32.mrf.mxu1  ;;  %23176 = vst [vmem:[#allocation11_spill] sm:$0xff] %v20712_v54 }
 0x561   :  { %v20718_v41 = vpop.f32.mrf.mxu0 }
 0x562   :  { %v20714_v35 = vpop.f32.mrf.mxu1  ;;  %23178 = vst [vmem:[#allocation69_spill] sm:$0xff] %v20718_v41  ;;  %v7470_v41 = vadd.f32 %v20560_v29, %v20562_v49  ;;  %v7246_v29 = vadd.f32 %v20586_v58, %v6973_v10 }
 0x563   :  { %v20726_v44 = vpop.f32.mrf.mxu0 }
 0x564   :  { %v20716_v9 = vpop.f32.mrf.mxu1  ;;  %23181 = vst [vmem:[#allocation16_spill] sm:$0xff] %v20726_v44  ;;  %v7697_v44 = vadd.f32 %v16345_v59, %v7470_v41  ;;  %v6993_v41 = vadd.f32 %v20546_v7, %v20544_v24  ;;  %v7701_v59 = vadd.f32 %v20662_v45, %v7474_v0  ;;  %v7476_v24 = vadd.f32 %v20590_v18, %v20592_v4  ;;  %v23186_v45 = vld [vmem:[#allocation36_spill] sm:$0xff] }
 0x565   :  { %23177 = vst [vmem:[#allocation50_spill] sm:$0xff] %v20716_v9  ;;  %v6963_v9 = vadd.f32 %v20526_v6, %v20524_v36  ;;  %v7472_v36 = vadd.f32 %v20568_v2, %v20570_v30  ;;  %v7696_v6 = vadd.f32 %v7617_v52, %v7469_v20  ;;  %v20786_v52 = vadd.f32 %v20558_v50, %v20556_v22  ;;  %v20798_v22 = vld [vmem:[%s22785_s11] ss:$0 sm:$0xff]  ;;  %v23187_v20 = vld [vmem:[#allocation40_spill] sm:$0xff] }
 0x566   :  { %v20720_v27 = vpop.f32.mrf.mxu1  ;;  %v7250_v7 = vadd.f32 %v20614_v23, %v6993_v41  ;;  %v7703_v18 = vadd.f32 %v20670_v40, %v7476_v24  ;;  %v7478_v50 = vadd.f32 %v20610_v63, %v20612_v19  ;;  %v23185_v40 = vld [vmem:[#allocation55_spill] sm:$0xff] }
 0x567   :  { %23179 = vst [vmem:[#allocation62_spill] sm:$0xff] %v20720_v27  ;;  %v20737_v27 = vpop.f32.mrf.mxu0  ;;  %v7244_v21 = vadd.f32 %v20577_v17, %v6963_v9  ;;  %v7924_v17 = vadd.f32 %v20652_v3, %v7697_v44  ;;  %v7699_v9 = vadd.f32 %v16348_v25, %v7472_v36  ;;  %v7923_v2 = vadd.f32 %v20654_v39, %v7696_v6  ;;  %v23188_v10 = vld [vmem:[#allocation11_spill] sm:$0xff] }
 0x568   :  { %v20722_v48 = vpop.f32.mrf.mxu1  ;;  %v7248_v44 = vadd.f32 %v20594_v26, %v6983_v46  ;;  %v23191_v6 = vld [vmem:[#allocation43_spill] sm:$0xff] }
 0x569   :  { %23180 = vst [vmem:[#allocation46_spill] sm:$0xff] %v20722_v48  ;;  %v20750_v49 = vpop.f32.mrf.mxu0  ;;  %v7471_v38 = vadd.f32 %v20579_v56, %v7244_v21  ;;  %v8151_v58 = vadd.f32 %v16397_v55, %v7924_v17  ;;  %v7473_v56 = vadd.f32 %v20588_v47, %v7246_v29  ;;  %v7926_v60 = vadd.f32 %v20656_v15, %v7699_v9 }
 0x56a   :  { %v20728_v51 = vpop.f32.mrf.mxu1  ;;  %v8150_v3 = vadd.f32 %v8071_v61, %v7923_v2  ;;  %v7013_v55 = vadd.f32 %v20554_v1, %v20552_v8  ;;  %v7475_v39 = vadd.f32 %v20596_v53, %v7248_v44  ;;  %v7252_v8 = vadd.f32 %v20622_v31, %v7003_v43  ;;  %v23183_v31 = vld [vmem:[#allocation22_spill] sm:$0xff]  ;;  %v23194_v2 = vld [vmem:[#allocation69_spill] sm:$0xff]  ;;  %v23197_v43 = vld [vmem:[#allocation67_spill] sm:$0xff] }
 0x56b   :  { %v7698_v30 = vadd.f32 %v20658_v14, %v7471_v38  ;;  %v20769_v16 = vpop.f32.mrf.mxu0  ;;  %v7700_v47 = vadd.f32 %v20666_v13, %v7473_v56  ;;  %v8378_v5 = vadd.f32 %v16423_v33, %v8151_v58  ;;  %v8153_v61 = vadd.f32 %v16400_v32, %v7926_v60  ;;  %v23192_v38 = vld [vmem:[#allocation12_spill] sm:$0xff]  ;;  %v23196_v44 = vld [vmem:[#allocation13_spill] sm:$0xff] }
 0x56c   :  { %v20731_v54 = vpop.f32.mrf.mxu1  ;;  %v7928_v1 = vadd.f32 %v20664_v34, %v7701_v59  ;;  %v8377_v32 = vadd.f32 %v20710_v42, %v8150_v3  ;;  %v7477_v33 = vadd.f32 %v23183_v31, %v7250_v7  ;;  %v23184_v34 = vld [vmem:[#allocation59_spill] sm:$0xff]  ;;  %v7702_v15 = vadd.f32 %v23185_v40, %v7475_v39  ;;  %v23193_v9 = vld [vmem:[#allocation50_spill] sm:$0xff]  ;;  %v23199_v7 = vld [vmem:[#allocation16_spill] sm:$0xff] }
 0x56d   :  { %23182 = vst [vmem:[#allocation15_spill] sm:$0xff] %v20731_v54  ;;  %v7925_v37 = vadd.f32 %v20660_v12, %v7698_v30  ;;  %v20793_v4 = vpop.f32.mrf.mxu0  ;;  %v7927_v25 = vadd.f32 %v23184_v34, %v7700_v47  ;;  %v7480_v21 = vadd.f32 %v23187_v20, %v23186_v45  ;;  %v8380_v36 = vadd.f32 %v23188_v10, %v8153_v61  ;;  %v23198_v3 = vld [vmem:[#allocation58_spill] sm:$0xff]  ;;  %v23208_v45 = vld [vmem:[#allocation56_spill] sm:$0xff] }
 0x56e   :  { %v20739_v48 = vpop.f32.mrf.mxu1  ;;  %v8155_v14 = vadd.f32 %v20714_v35, %v7928_v1  ;;  %v7930_v29 = vadd.f32 %v23191_v6, %v7703_v18  ;;  %v7705_v17 = vadd.f32 %v23192_v38, %v7478_v50  ;;  %v7254_v59 = vadd.f32 %v23196_v44, %v7013_v55  ;;  %v23202_v18 = vld [vmem:[#allocation39_spill] sm:$0xff]  ;;  %v23204_v50 = vld [vmem:[#allocation65_spill] sm:$0xff]  ;;  %v23209_v10 = vld [vmem:[#allocation42_spill] sm:$0xff] }
 0x56f   :  { %v8152_v53 = vadd.f32 %v8081_v62, %v7925_v37  ;;  %v23190_v62 = vld [vmem:[#allocation45_spill] sm:$0xff]  ;;  %v8154_v46 = vadd.f32 %v23193_v9, %v7927_v25  ;;  %v20817_v0 = vpop.f32.mrf.mxu0  ;;  %v7929_v60 = vadd.f32 %v23197_v43, %v7702_v15  ;;  %v7704_v24 = vadd.f32 %v23198_v3, %v7477_v33  ;;  %v23212_v9 = vld [vmem:[#allocation54_spill] sm:$0xff] }
 0x570   :  { %v20745_v28 = vpop.f32.mrf.mxu1  ;;  %v7479_v42 = vadd.f32 %v23190_v62, %v7252_v8  ;;  %v8382_v47 = vadd.f32 %v23199_v7, %v8155_v14  ;;  %v23206_v25 = vld [vmem:[#allocation46_spill] sm:$0xff]  ;;  %v7481_v20 = vadd.f32 %v23208_v45, %v7254_v59  ;;  %v23218_v3 = vld [vmem:[#allocation21_spill] sm:$0xff] }
 0x571   :  { %v8379_v30 = vadd.f32 %v23194_v2, %v8152_v53  ;;  %v23205_v53 = vld [vmem:[#allocation66_spill] sm:$0xff]  ;;  %v8381_v31 = vadd.f32 %v20737_v27, %v8154_v46  ;;  %v20839_v33 = vpop.f32.mrf.mxu0  ;;  %v8156_v40 = vadd.f32 %v23206_v25, %v7929_v60  ;;  %v7256_v46 = vadd.f32 %v23212_v9, %v20786_v52  ;;  %v23217_v52 = vld [vmem:[#allocation25_spill] sm:$0xff] }
 0x572   :  { %v20752_v54 = vpop.f32.mrf.mxu1  ;;  %v23219_v7 = vld [vmem:[#allocation14_spill] sm:$0xff]  ;;  %v23225_v25 = vld [vmem:[#allocation29_spill] sm:$0xff] }
 0x573   :  { %v8383_v44 = vadd.f32 %v20769_v16, %v8156_v40 }
 0x574   :  { %v20760_v11 = vpop.f32.mrf.mxu1 }
 0x576   :  { %v20771_v57 = vpop.f32.mrf.mxu1 }
 0x578   :  { %v20782_v26 = vpop.f32.mrf.mxu1 }
 0x57a   :  { %v16449_v13 = vpop.f32.mrf.mxu1 }
 0x57b   :  { %v8605_v23 = vadd.f32 %v16449_v13, %v8378_v5  ;;  %v23200_v5 = vld [vmem:[#allocation62_spill] sm:$0xff]  ;;  %v23203_v13 = vld [vmem:[#allocation63_spill] sm:$0xff] }
 0x57c   :  { %v8525_v12 = vpop.f32.mrf.mxu1  ;;  %v8157_v61 = vadd.f32 %v23200_v5, %v7930_v29  ;;  %v7482_v55 = vadd.f32 %v23203_v13, %v23202_v18 }
 0x57d   :  { %v20811_v63 = vadd.f32 %v20798_v22, %v8605_v23  ;;  %v8604_v19 = vadd.f32 %v8525_v12, %v8377_v32  ;;  %v7932_v32 = vadd.f32 %v23204_v50, %v7705_v17  ;;  %v7707_v23 = vadd.f32 %v23205_v53, %v7480_v21  ;;  %v23210_v21 = vld [vmem:[#allocation60_spill] sm:$0xff] }
 0x57e   :  { %v16452_v35 = vpop.f32.mrf.mxu1  ;;  %v8384_v6 = vadd.f32 %v20750_v49, %v8157_v61  ;;  %v23222_v53 = vmov 0.0  }
 0x57f   :  { %23189 = vst [vmem:[#allocation26_spill] sm:$0xff] %v20811_v63  ;;  %v8644_v58 = vmax.f32 %v20811_v63, 0.0  ;;  %v20822_v41 = vadd.f32 %v20798_v22, %v8604_v19  ;;  %v8607_v56 = vadd.f32 %v16452_v35, %v8380_v36  ;;  %v7931_v36 = vadd.f32 %v23209_v10, %v7704_v24  ;;  %v23213_v35 = vld [vmem:[#allocation61_spill] sm:$0xff]  ;;  %v23243_v63 = vld [vmem:[#allocation34_spill] sm:$0xff] }
 0x580   :  { %v8535_v37 = vpop.f32.mrf.mxu1  ;;  %v7706_v19 = vadd.f32 %v23210_v21, %v7479_v42  ;;  %v8159_v27 = vadd.f32 %v20728_v51, %v7932_v32  ;;  %v7934_v2 = vadd.f32 %v23213_v35, %v7707_v23  ;;  %v7484_v24 = vadd.f32 %v23218_v3, %v23217_v52 }
 0x581   :  { %23195 = vst [vmem:[#allocation49_spill] sm:$0xff] %v20822_v41  ;;  %8701 = vst.msk [vmem:[#allocation4 + $0x21] sm:$0xff] %vm2237_vm3, %v8644_v58  ;;  %v8643_v39 = vmax.f32 %v20822_v41, 0.0  ;;  %v20832_v8 = vadd.f32 %v20798_v22, %v8607_v56  ;;  %v8606_v1 = vadd.f32 %v8535_v37, %v8379_v30  ;;  %v23214_v30 = vld [vmem:[#allocation44_spill] sm:$0xff]  ;;  %v23215_v58 = vld [vmem:[#allocation15_spill] sm:$0xff]  ;;  %v20862_v56 = vpop.f32.mrf.mxu0 }
 0x582   :  { %v16455_v34 = vpop.f32.mrf.mxu1  ;;  %v7709_v42 = vadd.f32 %v23214_v30, %v7482_v55  ;;  %v8158_v51 = vadd.f32 %v23215_v58, %v7931_v36  ;;  %v23220_v37 = vld [vmem:[#allocation68_spill] sm:$0xff]  ;;  %v8386_v61 = vadd.f32 %v20793_v4, %v8159_v27  ;;  %v8161_v13 = vadd.f32 %v20739_v48, %v7934_v2  ;;  %v23223_v4 = vld [vmem:[#allocation38_spill] sm:$0xff] }
 0x583   :  { %23201 = vst [vmem:[#allocation17_spill] sm:$0xff] %v20832_v8  ;;  %8700 = vst.msk [vmem:[#allocation4 + $0x11] sm:$0xff] %vm2237_vm3, %v8643_v39  ;;  %v8646_v15 = vmax.f32 %v20832_v8, 0.0  ;;  %v20845_v14 = vadd.f32 %v20798_v22, %v8606_v1  ;;  %v8609_v12 = vadd.f32 %v16455_v34, %v8382_v47  ;;  %v7933_v47 = vadd.f32 %v23219_v7, %v7706_v19 }
 0x584   :  { %v8545_v62 = vpop.f32.mrf.mxu1  ;;  %v7708_v5 = vadd.f32 %v23220_v37, %v7481_v20  ;;  %v7483_v23 = vadd.f32 %v23223_v4, %v7256_v46  ;;  %v7711_v48 = vadd.f32 %v23225_v25, %v7484_v24  ;;  %v8385_v40 = vadd.f32 %v20817_v0, %v8158_v51  ;;  %v20914_v0 = vld [vmem:[%s22786_s12 + $0x20] sm:$0xff] }
 0x585   :  { %23207 = vst [vmem:[#allocation27_spill] sm:$0xff] %v20845_v14  ;;  %8703 = vst.msk [vmem:[#allocation4 + $0x41] sm:$0xff] %vm2237_vm3, %v8646_v15  ;;  %v8645_v29 = vmax.f32 %v20845_v14, 0.0  ;;  %v20855_v38 = vadd.f32 %v20798_v22, %v8609_v12  ;;  %v8608_v17 = vadd.f32 %v8545_v62, %v8381_v31  ;;  %v23224_v31 = vld [vmem:[#allocation70_spill] sm:$0xff]  ;;  %v16441_v15 = vpop.f32.mrf.mxu0  ;;  %v8160_v36 = vadd.f32 %v20745_v28, %v7933_v47  ;;  %v23227_v62 = vld [vmem:[#allocation19_spill] sm:$0xff] }
 0x586   :  { %v16458_v49 = vpop.f32.mrf.mxu1  ;;  %v7936_v34 = vadd.f32 %v23224_v31, %v7709_v42  ;;  %v20923_v28 = vld [vmem:[%s22786_s12 + $0x28] sm:$0xff]  ;;  %v8388_v42 = vadd.f32 %v20839_v33, %v8161_v13  ;;  %v14243_v14 = vld [vmem:[%s22786_s12 + $0x30] sm:$0xff] }
 0x587   :  { %23211 = vst [vmem:[#allocation28_spill] sm:$0xff] %v20855_v38  ;;  %8702 = vst.msk [vmem:[#allocation4 + $0x31] sm:$0xff] %vm2237_vm3, %v8645_v29  ;;  %v8648_v59 = vmax.f32 %v20855_v38, 0.0  ;;  %v20868_v43 = vadd.f32 %v20798_v22, %v8608_v17  ;;  %v8611_v60 = vadd.f32 %v16458_v49, %v8384_v6  ;;  %v7935_v6 = vadd.f32 %v23227_v62, %v7708_v5  ;;  %v23228_v29 = vld [vmem:[#allocation18_spill] sm:$0xff]  ;;  %v23230_v49 = vld [vmem:[#allocation41_spill] sm:$0xff]  ;;  %v8358_v52 = vpop.f32.mrf.mxu0 }
 0x588   :  { %v8555_v39 = vpop.f32.mrf.mxu1  ;;  %v20875_v1 = vld [vmem:[#allocation4 + $0x21] sm:$0xff]  ;;  %v7710_v17 = vadd.f32 %v23228_v29, %v7483_v23  ;;  %v8163_v9 = vadd.f32 %v20752_v54, %v7936_v34  ;;  %v8387_v37 = vadd.f32 %v20862_v56, %v8160_v36  ;;  %v23234_v56 = vld [vmem:[#allocation31_spill] sm:$0xff] }
 0x589   :  { %23216 = vst [vmem:[#allocation30_spill] sm:$0xff] %v20868_v43  ;;  %v20877_v16 = vld [vmem:[#allocation4 + $0x20] sm:$0xff]  ;;  %8705 = vst.msk [vmem:[#allocation4 + $0x61] sm:$0xff] %vm2237_vm3, %v8648_v59  ;;  %v8647_v55 = vmax.f32 %v20868_v43, 0.0  ;;  %v20885_v50 = vadd.f32 %v20798_v22, %v8611_v60  ;;  %v8610_v32 = vadd.f32 %v8555_v39, %v8383_v44  ;;  %v23231_v44 = vld [vmem:[#allocation23_spill] sm:$0xff]  ;;  %v8162_v60 = vadd.f32 %v20760_v11, %v7935_v6 }
 0x58a   :  { %v20879_v18 = vld [vmem:[#allocation4 + $0x22] sm:$0xff]  ;;  %v16461_v12 = vpop.f32.mrf.mxu1  ;;  %v20895_v45 = vld [vmem:[#allocation4 + $0x11] sm:$0xff]  ;;  %v7937_v39 = vadd.f32 %v23234_v56, %v7710_v17  ;;  %v8390_v13 = vadd.f32 %v16441_v15, %v8163_v9 }
 0x58b   :  { %23221 = vst [vmem:[#allocation37_spill] sm:$0xff] %v20885_v50  ;;  %10793 = vst.msk [vmem:[#allocation4 + $0x20] sm:$0xff] %vm2237_vm3, %v23222_v53  ;;  %v20897_v20 = vld [vmem:[#allocation4 + $0x10] sm:$0xff]  ;;  %v8650_v21 = vmax.f32 %v20885_v50, 0.0  ;;  %v20905_v19 = vadd.f32 %v20798_v22, %v8610_v32  ;;  %v8613_v27 = vadd.f32 %v16461_v12, %v8386_v61  ;;  %16474 = vmatmul.mubr.msk.f32.vlgmr.msra.gmra.mxu0 %vm2237_vm3, %v20895_v45 }
 0x58c   :  { %10794 = vst.msk [vmem:[#allocation4 + $0x28] sm:$0x3] %vm2239_vm4, %v23222_v53  ;;  %v20899_v10 = vld [vmem:[#allocation4 + $0x12] sm:$0xff]  ;;  %16500 = vmatmul.mubr.msk.f32.vlgmr.msra.gmra.mxu1 %vm2237_vm3, %v20897_v20  ;;  %v8565_v46 = vpop.f32.mrf.mxu1  ;;  %16476 = vmatprep.mubr.msk.f32.mxu0 %vm2237_vm3, %v20875_v1  ;;  %v20932_v35 = vld [vmem:[#allocation4 + $0x41] sm:$0xff]  ;;  %v8389_v15 = vadd.f32 %v8358_v52, %v8162_v60 }
 0x58d   :  { %8704 = vst.msk [vmem:[#allocation4 + $0x51] sm:$0xff] %vm2237_vm3, %v8647_v55  ;;  %23226 = vst [vmem:[#allocation24_spill] sm:$0xff] %v20905_v19  ;;  %16502 = vmatprep.mubr.msk.f32.mxu1 %vm2237_vm3, %v20877_v16  ;;  %v20934_v2 = vld [vmem:[#allocation4 + $0x40] sm:$0xff]  ;;  %v8649_v58 = vmax.f32 %v20905_v19, 0.0  ;;  %v20942_v54 = vadd.f32 %v20798_v22, %v8613_v27  ;;  %v8612_v51 = vadd.f32 %v8565_v46, %v8385_v40  ;;  %16524 = vmatpush3.msra.mxu0 %v23230_v49  ;;  %v23232_v59 = vld [vmem:[#allocation48_spill] sm:$0xff]  ;;  %v16444_v55 = vpop.f32.mrf.mxu0 }
 0x58e   :  { %10791 = vst.msk [vmem:[#allocation4 + $0x10] sm:$0xff] %vm2237_vm3, %v23222_v53  ;;  %v20936_v30 = vld [vmem:[#allocation4 + $0x42] sm:$0xff]  ;;  %8707 = vst.msk [vmem:[#allocation4 + $0x81] sm:$0xff] %vm2237_vm3, %v8650_v21  ;;  %16550 = vmatpush3.msra.mxu1 %v23231_v44  ;;  %v7938_v33 = vadd.f32 %v23232_v59, %v7711_v48  ;;  %v16464_v3 = vpop.f32.mrf.mxu1  ;;  %v20952_v24 = vld [vmem:[#allocation4 + $0x31] sm:$0xff]  ;;  %16575 = vmatprep.subr.mxu0 %v20914_v0  ;;  %v8164_v27 = vadd.f32 %v20782_v26, %v7937_v39 }
 0x58f   :  { %10792 = vst.msk [vmem:[#allocation4 + $0x18] sm:$0x3] %vm2239_vm4, %v23222_v53  ;;  %23229 = vst [vmem:[#allocation33_spill] sm:$0xff] %v20942_v54  ;;  %v20954_v7 = vld [vmem:[#allocation4 + $0x30] sm:$0xff]  ;;  %16601 = vmatprep.subr.mxu1 %v20923_v28  ;;  %v8652_v5 = vmax.f32 %v20942_v54, 0.0  ;;  %v20964_v11 = vadd.f32 %v20798_v22, %v8612_v51  ;;  %v8615_v61 = vadd.f32 %v16464_v3, %v8388_v42  ;;  %16477 = vmatmul.mubr.msk.f32.gmra.mxu0 %vm2237_vm3, %v20952_v24  ;;  %v8368_v26 = vpop.f32.mrf.mxu0 }
 0x590   :  { %10797 = vst.msk [vmem:[#allocation4 + $0x40] sm:$0xff] %vm2237_vm3, %v23222_v53  ;;  %v20956_v47 = vld [vmem:[#allocation4 + $0x32] sm:$0xff]  ;;  %8706 = vst.msk [vmem:[#allocation4 + $0x71] sm:$0xff] %vm2237_vm3, %v8649_v58  ;;  %16503 = vmatmul.mubr.msk.f32.gmra.mxu1 %vm2237_vm3, %v20954_v7  ;;  %v8575_v32 = vpop.f32.mrf.mxu1  ;;  %16479 = vmatprep.mubr.msk.f32.mxu0 %vm2237_vm3, %v20932_v35  ;;  %v20979_v4 = vld [vmem:[#allocation4 + $0x61] sm:$0xff]  ;;  %v8165_v34 = vadd.f32 %v20771_v57, %v7938_v33 }
 0x591   :  { %10798 = vst.msk [vmem:[#allocation4 + $0x48] sm:$0x3] %vm2239_vm4, %v23222_v53  ;;  %23233 = vst [vmem:[#allocation51_spill] sm:$0xff] %v20964_v11  ;;  %16505 = vmatprep.mubr.msk.f32.mxu1 %vm2237_vm3, %v20934_v2  ;;  %v20981_v23 = vld [vmem:[#allocation4 + $0x60] sm:$0xff]  ;;  %v8651_v25 = vmax.f32 %v20964_v11, 0.0  ;;  %v20989_v48 = vadd.f32 %v20798_v22, %v8615_v61  ;;  %v8614_v40 = vadd.f32 %v8575_v32, %v8387_v37  ;;  %v21030_v59 = vld [vmem:[#allocation4 + $0x90] sm:$0xff] }
 0x592   :  { %10795 = vst.msk [vmem:[#allocation4 + $0x30] sm:$0xff] %vm2237_vm3, %v23222_v53  ;;  %v20983_v31 = vld [vmem:[#allocation4 + $0x62] sm:$0xff]  ;;  %8709 = vst.msk [vmem:[#allocation4 + $0xc1] sm:$0xff] %vm2237_vm3, %v8652_v5  ;;  %v16467_v12 = vpop.f32.mrf.mxu1  ;;  %v8392_v58 = vadd.f32 %v16444_v55, %v8165_v34  ;;  %v21032_v33 = vld [vmem:[#allocation4 + $0x91] sm:$0xff]  ;;  %v8391_v61 = vadd.f32 %v8368_v26, %v8164_v27 }
 0x593   :  { %10796 = vst.msk [vmem:[#allocation4 + $0x38] sm:$0x3] %vm2239_vm4, %v23222_v53  ;;  %23235 = vst [vmem:[#allocation20_spill] sm:$0xff] %v20989_v48  ;;  %v8654_v62 = vmax.f32 %v20989_v48, 0.0  ;;  %v21005_v6 = vadd.f32 %v20798_v22, %v8614_v40  ;;  %v8617_v29 = vadd.f32 %v16467_v12, %v8390_v13  ;;  %v21038_v60 = vld [vmem:[#allocation4 + $0x92] sm:$0xff] }
 0x594   :  { %10801 = vst.msk [vmem:[#allocation4 + $0x60] sm:$0xff] %vm2237_vm3, %v23222_v53  ;;  %v20995_v36 = vld [vmem:[#allocation4 + $0x51] sm:$0xff]  ;;  %8708 = vst.msk [vmem:[#allocation4 + $0xb1] sm:$0xff] %vm2237_vm3, %v8651_v25  ;;  %v8585_v17 = vpop.f32.mrf.mxu1 }
 0x595   :  { %10802 = vst.msk [vmem:[#allocation4 + $0x68] sm:$0x3] %vm2239_vm4, %v23222_v53  ;;  %v20997_v21 = vld [vmem:[#allocation4 + $0x50] sm:$0xff]  ;;  %23236 = vst [vmem:[#allocation32_spill] sm:$0xff] %v21005_v6  ;;  %16480 = vmatmul.mubr.msk.f32.gmra.mxu0 %vm2237_vm3, %v20995_v36  ;;  %v21019_v9 = vld [vmem:[#allocation4 + $0x80] sm:$0xff]  ;;  %v8653_v51 = vmax.f32 %v21005_v6, 0.0  ;;  %v21028_v49 = vadd.f32 %v20798_v22, %v8617_v29  ;;  %v8616_v44 = vadd.f32 %v8585_v17, %v8389_v15 }
 0x596   :  { %v20999_v57 = vld [vmem:[#allocation4 + $0x52] sm:$0xff]  ;;  %16506 = vmatmul.mubr.msk.f32.gmra.mxu1 %vm2237_vm3, %v20997_v21  ;;  %16482 = vmatprep.mubr.msk.f32.mxu0 %vm2237_vm3, %v20979_v4  ;;  %v21021_v46 = vld [vmem:[#allocation4 + $0x81] sm:$0xff]  ;;  %8711 = vst.msk [vmem:[#allocation4 + $0xe1] sm:$0xff] %vm2237_vm3, %v8654_v62  ;;  %v16470_v52 = vpop.f32.mrf.mxu1  ;;  %10807 = vst.msk [vmem:[#allocation4 + $0x90] sm:$0xff] %vm2237_vm3, %v23222_v53 }
 0x597   :  { %10799 = vst.msk [vmem:[#allocation4 + $0x50] sm:$0xff] %vm2237_vm3, %v23222_v53  ;;  %16508 = vmatprep.mubr.msk.f32.mxu1 %vm2237_vm3, %v20981_v23  ;;  %v21023_v42 = vld [vmem:[#allocation4 + $0x82] sm:$0xff]  ;;  %23237 = vst [vmem:[#allocation35_spill] sm:$0xff] %v21028_v49  ;;  %v21040_v3 = vld [vmem:[#allocation4 + $0x71] sm:$0xff]  ;;  %v8656_v56 = vmax.f32 %v21028_v49, 0.0  ;;  %v21053_v39 = vadd.f32 %v20798_v22, %v8616_v44  ;;  %v8619_v13 = vadd.f32 %v16470_v52, %v8392_v58 }
 0x598   :  { %10800 = vst.msk [vmem:[#allocation4 + $0x58] sm:$0x3] %vm2239_vm4, %v23222_v53  ;;  %10806 = vst.msk [vmem:[#allocation4 + $0x88] sm:$0x3] %vm2239_vm4, %v23222_v53  ;;  %v21042_v37 = vld [vmem:[#allocation4 + $0x70] sm:$0xff]  ;;  %v8595_v55 = vpop.f32.mrf.mxu1 }
 0x599   :  { %10805 = vst.msk [vmem:[#allocation4 + $0x80] sm:$0xff] %vm2237_vm3, %v23222_v53  ;;  %v21044_v5 = vld [vmem:[#allocation4 + $0x72] sm:$0xff]  ;;  %8710 = vst.msk [vmem:[#allocation4 + $0xd1] sm:$0xff] %vm2237_vm3, %v8653_v51  ;;  %16483 = vmatmul.mubr.msk.f32.gmra.mxu0 %vm2237_vm3, %v21040_v3  ;;  %v21067_v25 = vld [vmem:[#allocation4 + $0xc1] sm:$0xff]  ;;  %v8655_v12 = vmax.f32 %v21053_v39, 0.0  ;;  %v21076_v27 = vadd.f32 %v20798_v22, %v8619_v13  ;;  %v8618_v62 = vadd.f32 %v8595_v55, %v8391_v61 }
 0x59a   :  { %10808 = vst.msk [vmem:[#allocation4 + $0x98] sm:$0x3] %vm2239_vm4, %v23222_v53  ;;  %23238 = vst [vmem:[#allocation53_spill] sm:$0xff] %v21053_v39  ;;  %16509 = vmatmul.mubr.msk.f32.gmra.mxu1 %vm2237_vm3, %v21042_v37  ;;  %v23239_v32 = vld [vmem:[#allocation47_spill] sm:$0xff]  ;;  %v23240_v34 = vld [vmem:[#allocation64_spill] sm:$0xff] }
 0x59b   :  { %10803 = vst.msk [vmem:[#allocation4 + $0x70] sm:$0xff] %vm2237_vm3, %v23222_v53  ;;  %16485 = vmatprep.mubr.msk.f32.mxu0 %vm2237_vm3, %v23239_v32  ;;  %16511 = vmatprep.mubr.msk.f32.mxu1 %vm2237_vm3, %v23240_v34  ;;  %v21069_v40 = vld [vmem:[#allocation4 + $0xc0] sm:$0xff]  ;;  %8713 = vst.msk [vmem:[#allocation4 + $0x101] sm:$0xff] %vm2237_vm3, %v8656_v56  ;;  %v21082_v29 = vld [vmem:[#allocation4 + $0xb1] sm:$0xff]  ;;  %v8658_v58 = vmax.f32 %v21076_v27, 0.0  ;;  %v21091_v51 = vadd.f32 %v20798_v22, %v8618_v62 }
 0x59c   :  { %10804 = vst.msk [vmem:[#allocation4 + $0x78] sm:$0x3] %vm2239_vm4, %v23222_v53  ;;  %v21071_v15 = vld [vmem:[#allocation4 + $0xc2] sm:$0xff]  ;;  %23241 = vst [vmem:[#allocation52_spill] sm:$0xff] %v21076_v27  ;;  %v21084_v26 = vld [vmem:[#allocation4 + $0xb0] sm:$0xff] }
 0x59d   :  { %10813 = vst.msk [vmem:[#allocation4 + $0xc0] sm:$0xff] %vm2237_vm3, %v23222_v53  ;;  %v21086_v17 = vld [vmem:[#allocation4 + $0xb2] sm:$0xff]  ;;  %8712 = vst.msk [vmem:[#allocation4 + $0xf1] sm:$0xff] %vm2237_vm3, %v8655_v12  ;;  %16486 = vmatmul.mubr.msk.f32.gmra.mxu0 %vm2237_vm3, %v21082_v29  ;;  %v21105_v22 = vld [vmem:[#allocation4 + $0xe1] sm:$0xff]  ;;  %v8657_v61 = vmax.f32 %v21091_v51, 0.0 }
 0x59e   :  { %10814 = vst.msk [vmem:[#allocation4 + $0xc8] sm:$0x3] %vm2239_vm4, %v23222_v53  ;;  %23242 = vst [vmem:[#allocation22_spill] sm:$0xff] %v21091_v51  ;;  %16512 = vmatmul.mubr.msk.f32.gmra.mxu1 %vm2237_vm3, %v21084_v26  ;;  %16488 = vmatprep.mubr.msk.f32.mxu0 %vm2237_vm3, %v21067_v25  ;;  %v21107_v44 = vld [vmem:[#allocation4 + $0xe0] sm:$0xff]  ;;  %v21170_v48 = vld [vmem:[#allocation4 + $0x130] sm:$0xff] }
 0x59f   :  { %10811 = vst.msk [vmem:[#allocation4 + $0xb0] sm:$0xff] %vm2237_vm3, %v23222_v53  ;;  %16514 = vmatprep.mubr.msk.f32.mxu1 %vm2237_vm3, %v21069_v40  ;;  %v21109_v52 = vld [vmem:[#allocation4 + $0xe2] sm:$0xff]  ;;  %8715 = vst.msk [vmem:[#allocation4 + $0x121] sm:$0xff] %vm2237_vm3, %v8658_v58  ;;  %v21172_v39 = vld [vmem:[#allocation4 + $0x131] sm:$0xff] }
 0x5a0   :  { %10812 = vst.msk [vmem:[#allocation4 + $0xb8] sm:$0x3] %vm2239_vm4, %v23222_v53  ;;  %10818 = vst.msk [vmem:[#allocation4 + $0xe8] sm:$0x3] %vm2239_vm4, %v23222_v53  ;;  %v21117_v56 = vld [vmem:[#allocation4 + $0xd1] sm:$0xff] }
 0x5a1   :  { %10817 = vst.msk [vmem:[#allocation4 + $0xe0] sm:$0xff] %vm2237_vm3, %v23222_v53  ;;  %v21119_v13 = vld [vmem:[#allocation4 + $0xd0] sm:$0xff]  ;;  %8714 = vst.msk [vmem:[#allocation4 + $0x111] sm:$0xff] %vm2237_vm3, %v8657_v61  ;;  %16489 = vmatmul.mubr.msk.f32.gmra.mxu0 %vm2237_vm3, %v21117_v56 }
 0x5a2   :  { %v21121_v55 = vld [vmem:[#allocation4 + $0xd2] sm:$0xff]  ;;  %16515 = vmatmul.mubr.msk.f32.gmra.mxu1 %vm2237_vm3, %v21119_v13  ;;  %16491 = vmatprep.mubr.msk.f32.mxu0 %vm2237_vm3, %v21105_v22  ;;  %v21136_v32 = vld [vmem:[#allocation4 + $0x101] sm:$0xff] }
 0x5a3   :  { %10815 = vst.msk [vmem:[#allocation4 + $0xd0] sm:$0xff] %vm2237_vm3, %v23222_v53  ;;  %16517 = vmatprep.mubr.msk.f32.mxu1 %vm2237_vm3, %v21107_v44  ;;  %v21138_v34 = vld [vmem:[#allocation4 + $0x100] sm:$0xff]  ;;  %v21178_v49 = vld [vmem:[#allocation4 + $0x132] sm:$0xff] }
 0x5a4   :  { %10816 = vst.msk [vmem:[#allocation4 + $0xd8] sm:$0x3] %vm2239_vm4, %v23222_v53  ;;  %v21140_v12 = vld [vmem:[#allocation4 + $0x102] sm:$0xff]  ;;  %v21146_v62 = vld [vmem:[#allocation4 + $0xf1] sm:$0xff]  ;;  %10828 = vst.msk [vmem:[#allocation4 + $0x138] sm:$0x3] %vm2239_vm4, %v23222_v53 }
 0x5a5   :  { %10821 = vst.msk [vmem:[#allocation4 + $0x100] sm:$0xff] %vm2237_vm3, %v23222_v53  ;;  %v21148_v58 = vld [vmem:[#allocation4 + $0xf0] sm:$0xff]  ;;  %16492 = vmatmul.mubr.msk.f32.gmra.mxu0 %vm2237_vm3, %v21146_v62  ;;  %10827 = vst.msk [vmem:[#allocation4 + $0x130] sm:$0xff] %vm2237_vm3, %v23222_v53 }
 0x5a6   :  { %10822 = vst.msk [vmem:[#allocation4 + $0x108] sm:$0x3] %vm2239_vm4, %v23222_v53  ;;  %v21150_v61 = vld [vmem:[#allocation4 + $0xf2] sm:$0xff]  ;;  %16518 = vmatmul.mubr.msk.f32.gmra.mxu1 %vm2237_vm3, %v21148_v58  ;;  %16494 = vmatprep.mubr.msk.f32.mxu0 %vm2237_vm3, %v21136_v32  ;;  %v21164_v11 = vld [vmem:[#allocation4 + $0x120] sm:$0xff] }
 0x5a7   :  { %10819 = vst.msk [vmem:[#allocation4 + $0xf0] sm:$0xff] %vm2237_vm3, %v23222_v53  ;;  %16520 = vmatprep.mubr.msk.f32.mxu1 %vm2237_vm3, %v21138_v34  ;;  %v21166_v54 = vld [vmem:[#allocation4 + $0x121] sm:$0xff] }
 0x5a8   :  { %10820 = vst.msk [vmem:[#allocation4 + $0xf8] sm:$0x3] %vm2239_vm4, %v23222_v53  ;;  %v21168_v6 = vld [vmem:[#allocation4 + $0x122] sm:$0xff]  ;;  %v21180_v51 = vld [vmem:[#allocation4 + $0x111] sm:$0xff] }
 0x5a9   :  { %10825 = vst.msk [vmem:[#allocation4 + $0x120] sm:$0xff] %vm2237_vm3, %v23222_v53  ;;  %v21182_v27 = vld [vmem:[#allocation4 + $0x110] sm:$0xff]  ;;  %16495 = vmatmul.mubr.msk.f32.gmra.mxu0 %vm2237_vm3, %v21180_v51 }
 0x5aa   :  { %10826 = vst.msk [vmem:[#allocation4 + $0x128] sm:$0x3] %vm2239_vm4, %v23222_v53  ;;  %v21184_v41 = vld [vmem:[#allocation4 + $0x112] sm:$0xff]  ;;  %16521 = vmatmul.mubr.msk.f32.gmra.mxu1 %vm2237_vm3, %v21182_v27  ;;  %16525 = vmatprep.mubr.msk.f32.mxu0 %vm2237_vm3, %v23243_v63  ;;  %v23244_v63 = vld [vmem:[#allocation57_spill] sm:$0xff] }
 0x5ab   :  { %10823 = vst.msk [vmem:[#allocation4 + $0x110] sm:$0xff] %vm2237_vm3, %v23222_v53  ;;  %16551 = vmatprep.mubr.msk.f32.mxu1 %vm2237_vm3, %v20897_v20  ;;  %v14277_v20 = vld [vmem:[%s22786_s12 + $0x40] sm:$0xff] }
 0x5ac   :  { %10824 = vst.msk [vmem:[#allocation4 + $0x118] sm:$0x3] %vm2239_vm4, %v23222_v53  ;;  %v14260_v53 = vld [vmem:[%s22786_s12 + $0x38] sm:$0xff] }
 0x5ad   :  { %16526 = vmatmul.mubr.msk.f32.vlgmr.msra.gmra.mxu0 %vm2237_vm3, %v20899_v10 }
 0x5ae   :  { %16552 = vmatmul.mubr.msk.f32.vlgmr.msra.gmra.mxu1 %vm2237_vm3, %v20877_v16  ;;  %16528 = vmatprep.mubr.msk.f32.mxu0 %vm2237_vm3, %v20879_v18 }
 0x5af   :  { %16554 = vmatprep.mubr.msk.f32.mxu1 %vm2237_vm3, %v20954_v7  ;;  %16576 = vmatpush3.msra.mxu0 %v20914_v0 }
 0x5b0   :  { %16602 = vmatpush3.msra.mxu1 %v20923_v28  ;;  %16627 = vmatprep.subr.mxu0 %v14243_v14 }
 0x5b1   :  { %16653 = vmatprep.subr.mxu1 %v14260_v53  ;;  %16529 = vmatmul.mubr.msk.f32.gmra.mxu0 %vm2237_vm3, %v20956_v47 }
 0x5b2   :  { %16555 = vmatmul.mubr.msk.f32.gmra.mxu1 %vm2237_vm3, %v20934_v2  ;;  %16531 = vmatprep.mubr.msk.f32.mxu0 %vm2237_vm3, %v20936_v30 }
 0x5b3   :  { %16557 = vmatprep.mubr.msk.f32.mxu1 %vm2237_vm3, %v20997_v21 }
 0x5b5   :  { %16532 = vmatmul.mubr.msk.f32.gmra.mxu0 %vm2237_vm3, %v20999_v57 }
 0x5b6   :  { %16558 = vmatmul.mubr.msk.f32.gmra.mxu1 %vm2237_vm3, %v20981_v23  ;;  %16534 = vmatprep.mubr.msk.f32.mxu0 %vm2237_vm3, %v20983_v31 }
 0x5b7   :  { %16560 = vmatprep.mubr.msk.f32.mxu1 %vm2237_vm3, %v21042_v37 }
 0x5b9   :  { %16535 = vmatmul.mubr.msk.f32.gmra.mxu0 %vm2237_vm3, %v21044_v5 }
 0x5ba   :  { %16561 = vmatmul.mubr.msk.f32.gmra.mxu1 %vm2237_vm3, %v21019_v9  ;;  %16537 = vmatprep.mubr.msk.f32.mxu0 %vm2237_vm3, %v23244_v63 }
 0x5bb   :  { %16563 = vmatprep.mubr.msk.f32.mxu1 %vm2237_vm3, %v21084_v26 }
 0x5bd   :  { %16538 = vmatmul.mubr.msk.f32.gmra.mxu0 %vm2237_vm3, %v21086_v17 }
 0x5be   :  { %16564 = vmatmul.mubr.msk.f32.gmra.mxu1 %vm2237_vm3, %v21069_v40  ;;  %16540 = vmatprep.mubr.msk.f32.mxu0 %vm2237_vm3, %v21071_v15 }
 0x5bf   :  { %16566 = vmatprep.mubr.msk.f32.mxu1 %vm2237_vm3, %v21119_v13 }
 0x5c1   :  { %16541 = vmatmul.mubr.msk.f32.gmra.mxu0 %vm2237_vm3, %v21121_v55 }
 0x5c2   :  { %16567 = vmatmul.mubr.msk.f32.gmra.mxu1 %vm2237_vm3, %v21107_v44  ;;  %16543 = vmatprep.mubr.msk.f32.mxu0 %vm2237_vm3, %v21109_v52 }
 0x5c3   :  { %16569 = vmatprep.mubr.msk.f32.mxu1 %vm2237_vm3, %v21148_v58 }
 0x5c5   :  { %16544 = vmatmul.mubr.msk.f32.gmra.mxu0 %vm2237_vm3, %v21150_v61 }
 0x5c6   :  { %16570 = vmatmul.mubr.msk.f32.gmra.mxu1 %vm2237_vm3, %v21138_v34  ;;  %16546 = vmatprep.mubr.msk.f32.mxu0 %vm2237_vm3, %v21140_v12 }
 0x5c7   :  { %16572 = vmatprep.mubr.msk.f32.mxu1 %vm2237_vm3, %v21182_v27 }
 0x5c9   :  { %16547 = vmatmul.mubr.msk.f32.gmra.mxu0 %vm2237_vm3, %v21184_v41 }
 0x5ca   :  { %16573 = vmatmul.mubr.msk.f32.gmra.mxu1 %vm2237_vm3, %v21164_v11  ;;  %16577 = vmatprep.mubr.msk.f32.mxu0 %vm2237_vm3, %v20895_v45 }
 0x5cb   :  { %16603 = vmatprep.mubr.msk.f32.mxu1 %vm2237_vm3, %v20899_v10 }
 0x5cd   :  { %16578 = vmatmul.mubr.msk.f32.vlgmr.msra.gmra.mxu0 %vm2237_vm3, %v20875_v1 }
 0x5ce   :  { %16604 = vmatmul.mubr.msk.f32.vlgmr.msra.gmra.mxu1 %vm2237_vm3, %v20879_v18  ;;  %16580 = vmatprep.mubr.msk.f32.mxu0 %vm2237_vm3, %v20952_v24 }
 0x5cf   :  { %16606 = vmatprep.mubr.msk.f32.mxu1 %vm2237_vm3, %v20956_v47  ;;  %16628 = vmatpush3.msra.mxu0 %v14243_v14 }
 0x5d0   :  { %16654 = vmatpush3.msra.mxu1 %v14260_v53  ;;  %16679 = vmatprep.subr.mxu0 %v14277_v20 }
 0x5d1   :  { %16581 = vmatmul.mubr.msk.f32.gmra.mxu0 %vm2237_vm3, %v20932_v35 }
 0x5d2   :  { %16607 = vmatmul.mubr.msk.f32.gmra.mxu1 %vm2237_vm3, %v20936_v30  ;;  %16583 = vmatprep.mubr.msk.f32.mxu0 %vm2237_vm3, %v20995_v36 }
 0x5d3   :  { %16609 = vmatprep.mubr.msk.f32.mxu1 %vm2237_vm3, %v20999_v57 }
 0x5d5   :  { %16584 = vmatmul.mubr.msk.f32.gmra.mxu0 %vm2237_vm3, %v20979_v4 }
 0x5d6   :  { %16610 = vmatmul.mubr.msk.f32.gmra.mxu1 %vm2237_vm3, %v20983_v31  ;;  %16586 = vmatprep.mubr.msk.f32.mxu0 %vm2237_vm3, %v21040_v3 }
 0x5d7   :  { %16612 = vmatprep.mubr.msk.f32.mxu1 %vm2237_vm3, %v21044_v5 }
 0x5d9   :  { %16587 = vmatmul.mubr.msk.f32.gmra.mxu0 %vm2237_vm3, %v21021_v46 }
 0x5da   :  { %16613 = vmatmul.mubr.msk.f32.gmra.mxu1 %vm2237_vm3, %v21023_v42  ;;  %16589 = vmatprep.mubr.msk.f32.mxu0 %vm2237_vm3, %v21082_v29 }
 0x5db   :  { %16615 = vmatprep.mubr.msk.f32.mxu1 %vm2237_vm3, %v21086_v17 }
 0x5dd   :  { %16590 = vmatmul.mubr.msk.f32.gmra.mxu0 %vm2237_vm3, %v21067_v25 }
 0x5de   :  { %16616 = vmatmul.mubr.msk.f32.gmra.mxu1 %vm2237_vm3, %v21071_v15  ;;  %16592 = vmatprep.mubr.msk.f32.mxu0 %vm2237_vm3, %v21117_v56 }
 0x5df   :  { %16618 = vmatprep.mubr.msk.f32.mxu1 %vm2237_vm3, %v21121_v55 }
 0x5e1   :  { %16593 = vmatmul.mubr.msk.f32.gmra.mxu0 %vm2237_vm3, %v21105_v22 }
 0x5e2   :  { %16619 = vmatmul.mubr.msk.f32.gmra.mxu1 %vm2237_vm3, %v21109_v52  ;;  %16595 = vmatprep.mubr.msk.f32.mxu0 %vm2237_vm3, %v21146_v62 }
 0x5e3   :  { %16621 = vmatprep.mubr.msk.f32.mxu1 %vm2237_vm3, %v21150_v61 }
 0x5e5   :  { %16596 = vmatmul.mubr.msk.f32.gmra.mxu0 %vm2237_vm3, %v21136_v32 }
 0x5e6   :  { %16622 = vmatmul.mubr.msk.f32.gmra.mxu1 %vm2237_vm3, %v21140_v12  ;;  %16598 = vmatprep.mubr.msk.f32.mxu0 %vm2237_vm3, %v21180_v51 }
 0x5e7   :  { %16624 = vmatprep.mubr.msk.f32.mxu1 %vm2237_vm3, %v21184_v41 }
 0x5e9   :  { %16599 = vmatmul.mubr.msk.f32.gmra.mxu0 %vm2237_vm3, %v21166_v54 }
 0x5ea   :  { %16625 = vmatmul.mubr.msk.f32.gmra.mxu1 %vm2237_vm3, %v21168_v6  ;;  %16629 = vmatprep.mubr.msk.f32.mxu0 %vm2237_vm3, %v20877_v16 }
 0x5eb   :  { %16655 = vmatprep.mubr.msk.f32.mxu1 %vm2237_vm3, %v20875_v1 }
 0x5ed   :  { %16630 = vmatmul.mubr.msk.f32.vlgmr.msra.gmra.mxu0 %vm2237_vm3, %v20954_v7 }
 0x5ee   :  { %16656 = vmatmul.mubr.msk.f32.vlgmr.msra.gmra.mxu1 %vm2237_vm3, %v20952_v24  ;;  %16632 = vmatprep.mubr.msk.f32.mxu0 %vm2237_vm3, %v20934_v2 }
 0x5ef   :  { %16658 = vmatprep.mubr.msk.f32.mxu1 %vm2237_vm3, %v20932_v35  ;;  %16680 = vmatpush3.msra.mxu0 %v14277_v20 }
 0x5f1   :  { %16633 = vmatmul.mubr.msk.f32.gmra.mxu0 %vm2237_vm3, %v20997_v21 }
 0x5f2   :  { %16659 = vmatmul.mubr.msk.f32.gmra.mxu1 %vm2237_vm3, %v20995_v36  ;;  %16635 = vmatprep.mubr.msk.f32.mxu0 %vm2237_vm3, %v20981_v23 }
 0x5f3   :  { %16661 = vmatprep.mubr.msk.f32.mxu1 %vm2237_vm3, %v20979_v4 }
 0x5f5   :  { %16636 = vmatmul.mubr.msk.f32.gmra.mxu0 %vm2237_vm3, %v21042_v37 }
 0x5f6   :  { %16662 = vmatmul.mubr.msk.f32.gmra.mxu1 %vm2237_vm3, %v21040_v3  ;;  %16638 = vmatprep.mubr.msk.f32.mxu0 %vm2237_vm3, %v21019_v9  ;;  %v10862_v9 = vld [vmem:[#allocation4 + $0x1] sm:$0xff] }
 0x5f7   :  { %16664 = vmatprep.mubr.msk.f32.mxu1 %vm2237_vm3, %v21021_v46  ;;  %v10845_v46 = vld [vmem:[#allocation4] sm:$0xff] }
 0x5f9   :  { %16639 = vmatmul.mubr.msk.f32.gmra.mxu0 %vm2237_vm3, %v21030_v59 }
 0x5fa   :  { %16665 = vmatmul.mubr.msk.f32.gmra.mxu1 %vm2237_vm3, %v21032_v33  ;;  %16641 = vmatprep.mubr.msk.f32.mxu0 %vm2237_vm3, %v21069_v40 }
 0x5fb   :  { %16667 = vmatprep.mubr.msk.f32.mxu1 %vm2237_vm3, %v21067_v25 }
 0x5fd   :  { %16642 = vmatmul.mubr.msk.f32.gmra.mxu0 %vm2237_vm3, %v21119_v13 }
 0x5fe   :  { %16668 = vmatmul.mubr.msk.f32.gmra.mxu1 %vm2237_vm3, %v21117_v56  ;;  %16644 = vmatprep.mubr.msk.f32.mxu0 %vm2237_vm3, %v21107_v44 }
 0x5ff   :  { %16670 = vmatprep.mubr.msk.f32.mxu1 %vm2237_vm3, %v21105_v22 }
 0x601   :  { %16645 = vmatmul.mubr.msk.f32.gmra.mxu0 %vm2237_vm3, %v21148_v58  ;;  %v21483_v58 = vld [vmem:[#allocation7 + $0x10] sm:$0xff] }
 0x602   :  { %16671 = vmatmul.mubr.msk.f32.gmra.mxu1 %vm2237_vm3, %v21146_v62  ;;  %16647 = vmatprep.mubr.msk.f32.mxu0 %vm2237_vm3, %v21138_v34  ;;  %23245 = vst [vmem:[#allocation59_spill] sm:$0xff] %v21483_v58 }
 0x603   :  { %16673 = vmatprep.mubr.msk.f32.mxu1 %vm2237_vm3, %v21136_v32 }
 0x605   :  { %16648 = vmatmul.mubr.msk.f32.gmra.mxu0 %vm2237_vm3, %v21182_v27 }
 0x606   :  { %16674 = vmatmul.mubr.msk.f32.gmra.mxu1 %vm2237_vm3, %v21180_v51  ;;  %16650 = vmatprep.mubr.msk.f32.mxu0 %vm2237_vm3, %v21164_v11 }
 0x607   :  { %16676 = vmatprep.mubr.msk.f32.mxu1 %vm2237_vm3, %v21166_v54 }
 0x609   :  { %16651 = vmatmul.mubr.msk.f32.gmra.mxu0 %vm2237_vm3, %v21170_v48 }
 0x60a   :  { %16677 = vmatmul.mubr.msk.f32.gmra.mxu1 %vm2237_vm3, %v21172_v39  ;;  %16681 = vmatprep.mubr.msk.f32.mxu0 %vm2237_vm3, %v20879_v18 }
 0x60b   :  { %16707 = vmatprep.mubr.msk.f32.mxu1 %vm2237_vm3, %v10862_v9 }
 0x60d   :  { %16682 = vmatmul.mubr.msk.f32.vlgmr.msra.gmra.mxu0 %vm2237_vm3, %v20956_v47  ;;  %v10879_v47 = vld [vmem:[#allocation7 + $0x8] sm:$0xff] }
 0x60e   :  { %16684 = vmatprep.mubr.msk.f32.mxu0 %vm2237_vm3, %v20936_v30  ;;  %16705 = vmatprep.subr.mxu1 %v10879_v47 }
 0x60f   :  { %16706 = vmatpush3.msra.mxu1 %v10879_v47  ;;  %v21504_v47 = vld [vmem:[#allocation7 + $0x18] sm:$0xff] }
 0x610   :  { %16757 = vmatprep.subr.mxu1 %v21483_v58  ;;  %23246 = vst [vmem:[#allocation55_spill] sm:$0xff] %v21504_v47 }
 0x611   :  { %16685 = vmatmul.mubr.msk.f32.gmra.mxu0 %vm2237_vm3, %v20999_v57  ;;  %v10861_v57 = vld [vmem:[#allocation7] sm:$0xff] }
 0x612   :  { %16687 = vmatprep.mubr.msk.f32.mxu0 %vm2237_vm3, %v20983_v31  ;;  %16731 = vmatprep.subr.mxu0 %v10861_v57 }
 0x613   :  { %16732 = vmatpush3.msra.mxu0 %v10861_v57 }
 0x614   :  { %16783 = vmatprep.subr.mxu0 %v21504_v47 }
 0x615   :  { %16688 = vmatmul.mubr.msk.f32.gmra.mxu0 %vm2237_vm3, %v21044_v5 }
 0x616   :  { %16690 = vmatprep.mubr.msk.f32.mxu0 %vm2237_vm3, %v21023_v42 }
 0x619   :  { %16691 = vmatmul.mubr.msk.f32.gmra.mxu0 %vm2237_vm3, %v21038_v60 }
 0x61a   :  { %16693 = vmatprep.mubr.msk.f32.mxu0 %vm2237_vm3, %v21071_v15 }
 0x61d   :  { %16694 = vmatmul.mubr.msk.f32.gmra.mxu0 %vm2237_vm3, %v21121_v55 }
 0x61e   :  { %16696 = vmatprep.mubr.msk.f32.mxu0 %vm2237_vm3, %v21109_v52 }
 0x621   :  { %16697 = vmatmul.mubr.msk.f32.gmra.mxu0 %vm2237_vm3, %v21150_v61 }
 0x622   :  { %16699 = vmatprep.mubr.msk.f32.mxu0 %vm2237_vm3, %v21140_v12 }
 0x625   :  { %16700 = vmatmul.mubr.msk.f32.gmra.mxu0 %vm2237_vm3, %v21184_v41 }
 0x626   :  { %16702 = vmatprep.mubr.msk.f32.mxu0 %vm2237_vm3, %v21168_v6 }
 0x629   :  { %16703 = vmatmul.mubr.msk.f32.gmra.mxu0 %vm2237_vm3, %v21178_v49 }
 0x62a   :  { %16733 = vmatprep.mubr.msk.f32.mxu0 %vm2237_vm3, %v10845_v46 }
 0x64b   :  { %v16475_v14 = vpop.f32.mrf.mxu0 }
 0x64c   :  { %v16501_v1 = vpop.f32.mrf.mxu1 }
 0x64d   :  { %v9064_v16 = vadd.f32 %v16501_v1, %v16475_v14  ;;  %v21433_v18 = vpop.f32.mrf.mxu0 }
 0x64e   :  { %v21435_v45 = vpop.f32.mrf.mxu1 }
 0x64f   :  { %v16478_v10 = vpop.f32.mrf.mxu0 }
 0x650   :  { %v16504_v0 = vpop.f32.mrf.mxu1 }
 0x651   :  { %v9074_v28 = vadd.f32 %v16504_v0, %v16478_v10  ;;  %v21437_v35 = vpop.f32.mrf.mxu0 }
 0x652   :  { %v21439_v2 = vpop.f32.mrf.mxu1 }
 0x655   :  { %v16481_v41 = vpop.f32.mrf.mxu0 }
 0x656   :  { %v16507_v30 = vpop.f32.mrf.mxu1 }
 0x657   :  { %v9084_v54 = vadd.f32 %v16507_v30, %v16481_v41  ;;  %v21441_v24 = vpop.f32.mrf.mxu0 }
 0x658   :  { %v21443_v7 = vpop.f32.mrf.mxu1 }
 0x659   :  { %v16484_v11 = vpop.f32.mrf.mxu0 }
 0x65a   :  { %v16510_v4 = vpop.f32.mrf.mxu1 }
 0x65b   :  { %v9094_v23 = vadd.f32 %v16510_v4, %v16484_v11  ;;  %v21445_v31 = vpop.f32.mrf.mxu0 }
 0x65c   :  { %v21447_v48 = vpop.f32.mrf.mxu1 }
 0x65d   :  { %v16487_v36 = vpop.f32.mrf.mxu0 }
 0x65e   :  { %v16513_v21 = vpop.f32.mrf.mxu1 }
 0x65f   :  { %v9104_v6 = vadd.f32 %v16513_v21, %v16487_v36  ;;  %v21449_v42 = vpop.f32.mrf.mxu0 }
 0x660   :  { %v21451_v49 = vpop.f32.mrf.mxu1 }
 0x661   :  { %v16490_v59 = vpop.f32.mrf.mxu0 }
 0x662   :  { %v16516_v33 = vpop.f32.mrf.mxu1 }
 0x663   :  { %v9114_v60 = vadd.f32 %v16516_v33, %v16490_v59  ;;  %v21455_v3 = vpop.f32.mrf.mxu0 }
 0x664   :  { %v21457_v37 = vpop.f32.mrf.mxu1 }
 0x665   :  { %v16493_v5 = vpop.f32.mrf.mxu0 }
 0x666   :  { %v16519_v39 = vpop.f32.mrf.mxu1 }
 0x667   :  { %v9124_v25 = vadd.f32 %v16519_v39, %v16493_v5  ;;  %v21459_v40 = vpop.f32.mrf.mxu0 }
 0x668   :  { %v21461_v15 = vpop.f32.mrf.mxu1 }
 0x669   :  { %v16496_v27 = vpop.f32.mrf.mxu0 }
 0x66a   :  { %v16522_v29 = vpop.f32.mrf.mxu1 }
 0x66b   :  { %v9134_v26 = vadd.f32 %v16522_v29, %v16496_v27  ;;  %v21463_v17 = vpop.f32.mrf.mxu0 }
 0x66c   :  { %v21465_v51 = vpop.f32.mrf.mxu1 }
 0x66d   :  { %v16527_v22 = vpop.f32.mrf.mxu0 }
 0x66e   :  { %v21467_v44 = vpop.f32.mrf.mxu1  ;;  %v21469_v52 = vadd.f32 %v16527_v22, %v9064_v16 }
 0x66f   :  { %v21471_v56 = vpop.f32.mrf.mxu0 }
 0x670   :  { %v21473_v13 = vpop.f32.mrf.mxu1 }
 0x671   :  { %v16530_v55 = vpop.f32.mrf.mxu0 }
 0x672   :  { %v21475_v32 = vpop.f32.mrf.mxu1  ;;  %v21477_v34 = vadd.f32 %v16530_v55, %v9074_v28 }
 0x673   :  { %v21479_v12 = vpop.f32.mrf.mxu0 }
 0x674   :  { %v21481_v62 = vpop.f32.mrf.mxu1 }
 0x675   :  { %v16533_v61 = vpop.f32.mrf.mxu0 }
 0x676   :  { %v21485_v53 = vpop.f32.mrf.mxu1  ;;  %v21488_v63 = vadd.f32 %v16533_v61, %v9084_v54 }
 0x677   :  { %v21490_v20 = vpop.f32.mrf.mxu0 }
 0x678   :  { %v21492_v14 = vpop.f32.mrf.mxu1 }
 0x679   :  { %v16536_v1 = vpop.f32.mrf.mxu0 }
 0x67a   :  { %v21494_v16 = vpop.f32.mrf.mxu1  ;;  %v21496_v10 = vadd.f32 %v16536_v1, %v9094_v23 }
 0x67b   :  { %v21498_v0 = vpop.f32.mrf.mxu0 }
 0x67c   :  { %v21500_v28 = vpop.f32.mrf.mxu1 }
 0x67d   :  { %v16539_v41 = vpop.f32.mrf.mxu0 }
 0x67e   :  { %v21502_v30 = vpop.f32.mrf.mxu1  ;;  %v21506_v54 = vadd.f32 %v16539_v41, %v9104_v6 }
 0x67f   :  { %v21509_v11 = vpop.f32.mrf.mxu0 }
 0x680   :  { %v21511_v4 = vpop.f32.mrf.mxu1 }
 0x681   :  { %v16542_v36 = vpop.f32.mrf.mxu0 }
 0x682   :  { %v21513_v23 = vpop.f32.mrf.mxu1  ;;  %v21515_v21 = vadd.f32 %v16542_v36, %v9114_v60 }
 0x683   :  { %v21517_v57 = vpop.f32.mrf.mxu0 }
 0x684   :  { %v21519_v9 = vpop.f32.mrf.mxu1 }
 0x685   :  { %23247 = vst [vmem:[#allocation36_spill] sm:$0xff] %v21519_v9  ;;  %v16545_v46 = vpop.f32.mrf.mxu0 }
 0x686   :  { %v21521_v59 = vpop.f32.mrf.mxu1  ;;  %v21523_v6 = vadd.f32 %v16545_v46, %v9124_v25 }
 0x687   :  { %23248 = vst [vmem:[#allocation40_spill] sm:$0xff] %v21521_v59  ;;  %v21525_v33 = vpop.f32.mrf.mxu0 }
 0x688   :  { %23249 = vst [vmem:[#allocation11_spill] sm:$0xff] %v21523_v6  ;;  %v21527_v5 = vpop.f32.mrf.mxu1 }
 0x689   :  { %23250 = vst [vmem:[#allocation45_spill] sm:$0xff] %v21527_v5  ;;  %v16548_v39 = vpop.f32.mrf.mxu0 }
 0x68a   :  { %v21529_v27 = vpop.f32.mrf.mxu1  ;;  %v21531_v29 = vadd.f32 %v16548_v39, %v9134_v26 }
 0x68b   :  { %23251 = vst [vmem:[#allocation43_spill] sm:$0xff] %v21529_v27  ;;  %v21533_v60 = vpop.f32.mrf.mxu0 }
 0x68c   :  { %23252 = vst [vmem:[#allocation12_spill] sm:$0xff] %v21531_v29  ;;  %23253 = vst [vmem:[#allocation50_spill] sm:$0xff] %v21533_v60  ;;  %v21535_v22 = vpop.f32.mrf.mxu1 }
 0x68d   :  { %23254 = vst [vmem:[#allocation69_spill] sm:$0xff] %v21535_v22  ;;  %v16579_v55 = vpop.f32.mrf.mxu0 }
 0x68e   :  { %v21537_v61 = vpop.f32.mrf.mxu1 }
 0x68f   :  { %v9723_v1 = vpop.f32.mrf.mxu0 }
 0x690   :  { %v21539_v41 = vpop.f32.mrf.mxu1 }
 0x691   :  { %v21541_v25 = vpop.f32.mrf.mxu0 }
 0x692   :  { %v21543_v36 = vpop.f32.mrf.mxu1 }
 0x693   :  { %v21545_v46 = vpop.f32.mrf.mxu0 }
 0x694   :  { %v21547_v8 = vpop.f32.mrf.mxu1 }
 0x695   :  { %v21549_v26 = vpop.f32.mrf.mxu0 }
 0x696   :  { %v21551_v39 = vpop.f32.mrf.mxu1 }
 0x697   :  { %23255 = vst [vmem:[#allocation13_spill] sm:$0xff] %v21551_v39  ;;  %v21553_v43 = vpop.f32.mrf.mxu0 }
 0x698   :  { %v21555_v38 = vpop.f32.mrf.mxu1 }
 0x699   :  { %23256 = vst [vmem:[#allocation67_spill] sm:$0xff] %v21555_v38  ;;  %v21557_v19 = vpop.f32.mrf.mxu0 }
 0x69a   :  { %23257 = vst [vmem:[#allocation58_spill] sm:$0xff] %v21557_v19  ;;  %v21559_v50 = vpop.f32.mrf.mxu1 }
 0x69b   :  { %23258 = vst [vmem:[#allocation16_spill] sm:$0xff] %v21559_v50  ;;  %v21561_v47 = vpop.f32.mrf.mxu0 }
 0x69c   :  { %23259 = vst [vmem:[#allocation62_spill] sm:$0xff] %v21561_v47  ;;  %v21563_v58 = vpop.f32.mrf.mxu1 }
 0x69d   :  { %23260 = vst [vmem:[#allocation39_spill] sm:$0xff] %v21563_v58  ;;  %v21565_v22 = vpop.f32.mrf.mxu0 }
 0x69e   :  { %23261 = vst [vmem:[#allocation63_spill] sm:$0xff] %v21565_v22  ;;  %v21567_v27 = vpop.f32.mrf.mxu1 }
 0x69f   :  { %23262 = vst [vmem:[#allocation65_spill] sm:$0xff] %v21567_v27  ;;  %v21569_v29 = vpop.f32.mrf.mxu0 }
 0x6a0   :  { %23263 = vst [vmem:[#allocation66_spill] sm:$0xff] %v21569_v29  ;;  %v21571_v5 = vpop.f32.mrf.mxu1 }
 0x6a1   :  { %23264 = vst [vmem:[#allocation46_spill] sm:$0xff] %v21571_v5  ;;  %v21573_v59 = vpop.f32.mrf.mxu0 }
 0x6a2   :  { %23265 = vst [vmem:[#allocation56_spill] sm:$0xff] %v21573_v59  ;;  %v21575_v6 = vpop.f32.mrf.mxu1 }
 0x6a3   :  { %23266 = vst [vmem:[#allocation42_spill] sm:$0xff] %v21575_v6  ;;  %v21577_v38 = vpop.f32.mrf.mxu0 }
 0x6a4   :  { %23267 = vst [vmem:[#allocation60_spill] sm:$0xff] %v21577_v38  ;;  %v21579_v19 = vpop.f32.mrf.mxu1 }
 0x6a5   :  { %23268 = vst [vmem:[#allocation54_spill] sm:$0xff] %v21579_v19  ;;  %v21581_v50 = vpop.f32.mrf.mxu0 }
 0x6a6   :  { %23269 = vst [vmem:[#allocation61_spill] sm:$0xff] %v21581_v50  ;;  %v21583_v47 = vpop.f32.mrf.mxu1 }
 0x6a7   :  { %23270 = vst [vmem:[#allocation44_spill] sm:$0xff] %v21583_v47  ;;  %v21585_v58 = vpop.f32.mrf.mxu0 }
 0x6a8   :  { %23271 = vst [vmem:[#allocation15_spill] sm:$0xff] %v21585_v58  ;;  %v21587_v22 = vpop.f32.mrf.mxu1 }
 0x6a9   :  { %23272 = vst [vmem:[#allocation25_spill] sm:$0xff] %v21587_v22  ;;  %v21589_v27 = vpop.f32.mrf.mxu0 }
 0x6aa   :  { %23273 = vst [vmem:[#allocation21_spill] sm:$0xff] %v21589_v27  ;;  %v21591_v29 = vpop.f32.mrf.mxu1 }
 0x6ab   :  { %23274 = vst [vmem:[#allocation14_spill] sm:$0xff] %v21591_v29  ;;  %v21593_v5 = vpop.f32.mrf.mxu0 }
 0x6ac   :  { %23275 = vst [vmem:[#allocation68_spill] sm:$0xff] %v21593_v5  ;;  %v21595_v59 = vpop.f32.mrf.mxu1 }
 0x6ad   :  { %23276 = vst [vmem:[#allocation38_spill] sm:$0xff] %v21595_v59  ;;  %v16631_v6 = vpop.f32.mrf.mxu0  ;;  %v9059_v59 = vadd.f32 %v21435_v45, %v21433_v18 }
 0x6ae   :  { %v16657_v38 = vpop.f32.mrf.mxu1 }
 0x6af   :  { %v10178_v39 = vpop.f32.mrf.mxu0 }
 0x6b0   :  { %v21597_v19 = vpop.f32.mrf.mxu1 }
 0x6b1   :  { %23277 = vst [vmem:[#allocation70_spill] sm:$0xff] %v21597_v19  ;;  %v16634_v50 = vpop.f32.mrf.mxu0 }
 0x6b2   :  { %v21601_v47 = vpop.f32.mrf.mxu1 }
 0x6b3   :  { %v21599_v60 = vpop.f32.mrf.mxu0  ;;  %23279 = vst [vmem:[#allocation19_spill] sm:$0xff] %v21601_v47 }
 0x6b4   :  { %23278 = vst [vmem:[#allocation29_spill] sm:$0xff] %v21599_v60  ;;  %v21607_v27 = vpop.f32.mrf.mxu1  ;;  %v9348_v60 = vadd.f32 %v21471_v56, %v9059_v59  ;;  %v9079_v56 = vadd.f32 %v21443_v7, %v21441_v24 }
 0x6b5   :  { %v21603_v58 = vpop.f32.mrf.mxu0  ;;  %23281 = vst [vmem:[#allocation41_spill] sm:$0xff] %v21607_v27  ;;  %v9576_v27 = vadd.f32 %v21467_v44, %v21469_v52 }
 0x6b6   :  { %v21615_v9 = vpop.f32.mrf.mxu1  ;;  %v9575_v18 = vadd.f32 %v21473_v13, %v9348_v60  ;;  %v9099_v13 = vadd.f32 %v21451_v49, %v21449_v42 }
 0x6b7   :  { %v21605_v22 = vpop.f32.mrf.mxu0  ;;  %23284 = vst [vmem:[#allocation31_spill] sm:$0xff] %v21615_v9  ;;  %v9803_v9 = vadd.f32 %v16579_v55, %v9576_v27  ;;  %v9584_v55 = vadd.f32 %v21502_v30, %v21506_v54  ;;  %v23286_v30 = vld [vmem:[#allocation50_spill] sm:$0xff] }
 0x6b8   :  { %23280 = vst [vmem:[#allocation18_spill] sm:$0xff] %v21605_v22  ;;  %v9069_v22 = vadd.f32 %v21439_v2, %v21437_v35  ;;  %v9089_v35 = vadd.f32 %v21447_v48, %v21445_v31  ;;  %v9578_v2 = vadd.f32 %v21475_v32, %v21477_v34  ;;  %v9802_v44 = vadd.f32 %v9723_v1, %v9575_v18 }
 0x6b9   :  { %v21609_v29 = vpop.f32.mrf.mxu0  ;;  %v10030_v60 = vadd.f32 %v21537_v61, %v9803_v9  ;;  %v9109_v48 = vadd.f32 %v21457_v37, %v21455_v3  ;;  %v9580_v32 = vadd.f32 %v21485_v53, %v21488_v63  ;;  %v9356_v42 = vadd.f32 %v21509_v11, %v9099_v13  ;;  %v23295_v13 = vld [vmem:[#allocation62_spill] sm:$0xff] }
 0x6ba   :  { %23282 = vst [vmem:[#allocation23_spill] sm:$0xff] %v21609_v29  ;;  %v21626_v29 = vpop.f32.mrf.mxu1  ;;  %v9350_v45 = vadd.f32 %v21479_v12, %v9069_v22  ;;  %v9352_v12 = vadd.f32 %v21490_v20, %v9079_v56  ;;  %v9354_v7 = vadd.f32 %v21498_v0, %v9089_v35  ;;  %v9805_v31 = vadd.f32 %v21541_v25, %v9578_v2  ;;  %v23293_v56 = vld [vmem:[#allocation45_spill] sm:$0xff]  ;;  %v23294_v2 = vld [vmem:[#allocation67_spill] sm:$0xff] }
 0x6bb   :  { %v21611_v5 = vpop.f32.mrf.mxu0  ;;  %v9119_v34 = vadd.f32 %v21461_v15, %v21459_v40  ;;  %v10258_v0 = vadd.f32 %v16631_v6, %v10030_v60  ;;  %v9129_v3 = vadd.f32 %v21465_v51, %v21463_v17  ;;  %v9358_v53 = vadd.f32 %v21517_v57, %v9109_v48  ;;  %v23297_v48 = vld [vmem:[#allocation43_spill] sm:$0xff] }
 0x6bc   :  { %23283 = vst [vmem:[#allocation48_spill] sm:$0xff] %v21611_v5  ;;  %v21640_v52 = vpop.f32.mrf.mxu1  ;;  %v9577_v24 = vadd.f32 %v21481_v62, %v9350_v45  ;;  %v10029_v62 = vadd.f32 %v21539_v41, %v9802_v44  ;;  %v9579_v37 = vadd.f32 %v21492_v14, %v9352_v12  ;;  %v9807_v63 = vadd.f32 %v21549_v26, %v9580_v32  ;;  %v23285_v41 = vld [vmem:[#allocation36_spill] sm:$0xff]  ;;  %v21694_v26 = vld [vmem:[%s22787_s13] ss:$0 sm:$0xff] }
 0x6bd   :  { %v21617_v19 = vpop.f32.mrf.mxu0  ;;  %v9582_v40 = vadd.f32 %v21494_v16, %v21496_v10  ;;  %v9581_v15 = vadd.f32 %v21500_v28, %v9354_v7  ;;  %v10032_v6 = vadd.f32 %v21543_v36, %v9805_v31  ;;  %v9583_v17 = vadd.f32 %v21511_v4, %v9356_v42  ;;  %v23287_v4 = vld [vmem:[#allocation13_spill] sm:$0xff]  ;;  %v23296_v31 = vld [vmem:[#allocation12_spill] sm:$0xff]  ;;  %v23298_v42 = vld [vmem:[#allocation19_spill] sm:$0xff] }
 0x6be   :  { %v9804_v20 = vadd.f32 %v21545_v46, %v9577_v24  ;;  %v21662_v9 = vpop.f32.mrf.mxu1  ;;  %v10257_v22 = vadd.f32 %v10178_v39, %v10029_v62  ;;  %v9360_v51 = vadd.f32 %v21525_v33, %v9119_v34  ;;  %v9806_v14 = vadd.f32 %v21553_v43, %v9579_v37  ;;  %v23288_v33 = vld [vmem:[#allocation58_spill] sm:$0xff]  ;;  %v23292_v39 = vld [vmem:[#allocation29_spill] sm:$0xff] }
 0x6bf   :  { %v21620_v47 = vpop.f32.mrf.mxu0  ;;  %v9586_v61 = vadd.f32 %v21513_v23, %v21515_v21  ;;  %v10485_v10 = vadd.f32 %v16657_v38, %v10258_v0  ;;  %v10260_v28 = vadd.f32 %v16634_v50, %v10032_v6  ;;  %v9585_v25 = vadd.f32 %v23285_v41, %v9358_v53  ;;  %v23289_v23 = vld [vmem:[#allocation11_spill] sm:$0xff]  ;;  %v23291_v50 = vld [vmem:[#allocation70_spill] sm:$0xff]  ;;  %v21707_v7 = vld [vmem:[%s22788_s14] ss:$0 sm:$0xff] }
 0x6c0   :  { %v10031_v16 = vadd.f32 %v21547_v8, %v9804_v20  ;;  %v21685_v1 = vpop.f32.mrf.mxu1  ;;  %v9362_v54 = vadd.f32 %v23286_v30, %v9129_v3  ;;  %v10034_v36 = vadd.f32 %v23287_v4, %v9807_v63  ;;  %v9809_v46 = vadd.f32 %v23288_v33, %v9582_v40  ;;  %v23290_v8 = vld [vmem:[#allocation40_spill] sm:$0xff]  ;;  %v23299_v3 = vld [vmem:[#allocation69_spill] sm:$0xff]  ;;  %v23301_v63 = vld [vmem:[#allocation63_spill] sm:$0xff] }
 0x6c1   :  { %v21628_v5 = vpop.f32.mrf.mxu0  ;;  %v9588_v38 = vadd.f32 %v23290_v8, %v23289_v23  ;;  %v10484_v21 = vadd.f32 %v23291_v50, %v10257_v22  ;;  %v9587_v35 = vadd.f32 %v23293_v56, %v9360_v51  ;;  %v10033_v44 = vadd.f32 %v23294_v2, %v9806_v14  ;;  %v23303_v51 = vld [vmem:[#allocation41_spill] sm:$0xff]  ;;  %v23304_v41 = vld [vmem:[#allocation39_spill] sm:$0xff]  ;;  %v23305_v4 = vld [vmem:[#allocation66_spill] sm:$0xff] }
 0x6c2   :  { %v10259_v18 = vadd.f32 %v23292_v39, %v10031_v16  ;;  %v9808_v12 = vadd.f32 %v23295_v13, %v9581_v15  ;;  %v10262_v24 = vadd.f32 %v21603_v58, %v10034_v36  ;;  %v21711_v32 = vadd.f32 %v23297_v48, %v23296_v31  ;;  %v21714_v62 = vpop.f32.mrf.mxu1  ;;  %v23300_v58 = vld [vmem:[#allocation16_spill] sm:$0xff]  ;;  %v23302_v15 = vld [vmem:[#allocation18_spill] sm:$0xff] }
 0x6c3   :  { %v21634_v59 = vpop.f32.mrf.mxu0  ;;  %v10487_v34 = vadd.f32 %v23298_v42, %v10260_v28  ;;  %v21718_v37 = vadd.f32 %v23299_v3, %v9362_v54  ;;  %v10036_v53 = vadd.f32 %v23300_v58, %v9809_v46  ;;  %v9811_v40 = vadd.f32 %v23301_v63, %v9584_v55  ;;  %v23306_v54 = vld [vmem:[#allocation31_spill] sm:$0xff]  ;;  %v23309_v56 = vld [vmem:[#allocation56_spill] sm:$0xff]  ;;  %v23311_v42 = vld [vmem:[#allocation46_spill] sm:$0xff] }
 0x6c4   :  { %v10261_v6 = vadd.f32 %v23302_v15, %v10033_v44  ;;  %v10486_v14 = vadd.f32 %v23303_v51, %v10259_v18  ;;  %v10035_v30 = vadd.f32 %v23304_v41, %v9808_v12  ;;  %v9810_v36 = vadd.f32 %v23305_v4, %v9583_v17  ;;  %v16672_v55 = vpop.f32.mrf.mxu1  ;;  %v23308_v18 = vld [vmem:[#allocation65_spill] sm:$0xff]  ;;  %v23310_v13 = vld [vmem:[#allocation48_spill] sm:$0xff] }
 0x6c5   :  { %v21645_v27 = vpop.f32.mrf.mxu0  ;;  %v10489_v33 = vadd.f32 %v23306_v54, %v10262_v24  ;;  %v9813_v2 = vadd.f32 %v23309_v56, %v9586_v61  ;;  %v23314_v51 = vld [vmem:[#allocation61_spill] sm:$0xff] }
 0x6c6   :  { %v10488_v44 = vadd.f32 %v21626_v29, %v10261_v6  ;;  %v10263_v17 = vadd.f32 %v23310_v13, %v10035_v30  ;;  %v10455_v58 = vpop.f32.mrf.mxu1  ;;  %v23313_v6 = vld [vmem:[#allocation42_spill] sm:$0xff]  ;;  %v23319_v13 = vld [vmem:[#allocation25_spill] sm:$0xff] }
 0x6c7   :  { %v21656_v49 = vpop.f32.mrf.mxu0  ;;  %v23315_v30 = vld [vmem:[#allocation54_spill] sm:$0xff] }
 0x6c9   :  { %v21669_v11 = vpop.f32.mrf.mxu0 }
 0x6cb   :  { %v21680_v57 = vpop.f32.mrf.mxu0 }
 0x6cd   :  { %v16683_v43 = vpop.f32.mrf.mxu0 }
 0x6ce   :  { %v10712_v45 = vadd.f32 %v16683_v43, %v10485_v10  ;;  %v23307_v43 = vld [vmem:[#allocation23_spill] sm:$0xff] }
 0x6cf   :  { %v10632_v60 = vpop.f32.mrf.mxu0  ;;  %v10264_v46 = vadd.f32 %v23307_v43, %v10036_v53  ;;  %v16675_v43 = vpop.f32.mrf.mxu1 }
 0x6d0   :  { %v10735_v20 = vmul.f32 %v21694_v26, %v10712_v45  ;;  %v10711_v0 = vadd.f32 %v10632_v60, %v10484_v21  ;;  %v10038_v45 = vadd.f32 %v23308_v18, %v9811_v40 }
 0x6d1   :  { %v16686_v22 = vpop.f32.mrf.mxu0  ;;  %v10491_v3 = vadd.f32 %v21640_v52, %v10264_v46 }
 0x6d2   :  { %v10758_v16 = vadd.f32 %v21707_v7, %v10735_v20  ;;  %v10734_v10 = vmul.f32 %v21694_v26, %v10711_v0  ;;  %v10714_v28 = vadd.f32 %v16686_v22, %v10487_v34  ;;  %v10037_v34 = vadd.f32 %v23311_v42, %v9810_v36  ;;  %v23312_v20 = vld [vmem:[#allocation60_spill] sm:$0xff]  ;;  %v23316_v36 = vld [vmem:[#allocation15_spill] sm:$0xff]  ;;  %v10465_v42 = vpop.f32.mrf.mxu1 }
 0x6d3   :  { %v10642_v23 = vpop.f32.mrf.mxu0  ;;  %v9812_v0 = vadd.f32 %v23312_v20, %v9585_v25  ;;  %v10266_v61 = vadd.f32 %v21617_v19, %v10038_v45  ;;  %v10040_v22 = vadd.f32 %v23313_v6, %v9813_v2  ;;  %v10490_v25 = vadd.f32 %v21662_v9, %v10263_v17 }
 0x6d4   :  { %v10774_v8 = vmax.f32 %v10758_v16, 0.0  ;;  %v10757_v50 = vadd.f32 %v21707_v7, %v10734_v10  ;;  %v10737_v21 = vmul.f32 %v21694_v26, %v10714_v28  ;;  %v10713_v39 = vadd.f32 %v10642_v23, %v10486_v14 }
 0x6d5   :  { %v16689_v12 = vpop.f32.mrf.mxu0  ;;  %v9815_v14 = vadd.f32 %v23314_v51, %v9588_v38  ;;  %v10265_v52 = vadd.f32 %v21620_v47, %v10037_v34  ;;  %v10039_v4 = vadd.f32 %v23315_v30, %v9812_v0  ;;  %v9814_v54 = vadd.f32 %v23316_v36, %v9587_v35 }
 0x6d6   :  { %10830 = vst.msk [vmem:[#allocation4 + $0x21] sm:$0xff] %vm2237_vm3, %v10774_v8  ;;  %v10773_v24 = vmax.f32 %v10757_v50, 0.0  ;;  %v10760_v60 = vadd.f32 %v21707_v7, %v10737_v21  ;;  %v10736_v31 = vmul.f32 %v21694_v26, %v10713_v39  ;;  %v10716_v48 = vadd.f32 %v16689_v12, %v10489_v33  ;;  %v23317_v50 = vld [vmem:[#allocation44_spill] sm:$0xff]  ;;  %v23318_v39 = vld [vmem:[#allocation21_spill] sm:$0xff] }
 0x6d7   :  { %v10652_v29 = vpop.f32.mrf.mxu0  ;;  %v10493_v33 = vadd.f32 %v21685_v1, %v10266_v61  ;;  %v10268_v38 = vadd.f32 %v21628_v5, %v10040_v22  ;;  %v10042_v21 = vadd.f32 %v23317_v50, %v9815_v14  ;;  %v9817_v18 = vadd.f32 %v23318_v39, %v21711_v32  ;;  %v23320_v12 = vld [vmem:[#allocation68_spill] sm:$0xff]  ;;  %v23321_v61 = vld [vmem:[#allocation14_spill] sm:$0xff] }
 0x6d8   :  { %10829 = vst.msk [vmem:[#allocation4 + $0x11] sm:$0xff] %vm2237_vm3, %v10773_v24  ;;  %v10776_v53 = vmax.f32 %v10760_v60, 0.0  ;;  %v10759_v63 = vadd.f32 %v21707_v7, %v10736_v31  ;;  %v10739_v40 = vmul.f32 %v21694_v26, %v10716_v48  ;;  %v10715_v15 = vadd.f32 %v10652_v29, %v10488_v44  ;;  %v21776_v48 = vld [vmem:[#allocation7 + $0x20] sm:$0xff] }
 0x6d9   :  { %v16692_v16 = vpop.f32.mrf.mxu0  ;;  %v10492_v35 = vadd.f32 %v21714_v62, %v10265_v52  ;;  %v10267_v1 = vadd.f32 %v21634_v59, %v10039_v4  ;;  %v10041_v17 = vadd.f32 %v23319_v13, %v9814_v54  ;;  %v9816_v24 = vadd.f32 %v23320_v12, %v21718_v37 }
 0x6da   :  { %10832 = vst.msk [vmem:[#allocation4 + $0x41] sm:$0xff] %vm2237_vm3, %v10776_v53  ;;  %v10775_v19 = vmax.f32 %v10759_v63, 0.0  ;;  %v10762_v10 = vadd.f32 %v21707_v7, %v10739_v40  ;;  %v10738_v28 = vmul.f32 %v21694_v26, %v10715_v15  ;;  %v10718_v41 = vadd.f32 %v16692_v16, %v10491_v3  ;;  %v16678_v15 = vpop.f32.mrf.mxu1 }
 0x6db   :  { %v10662_v9 = vpop.f32.mrf.mxu0  ;;  %v10495_v60 = vadd.f32 %v16672_v55, %v10268_v38  ;;  %v10270_v32 = vadd.f32 %v21645_v27, %v10042_v21  ;;  %v21789_v55 = vld [vmem:[#allocation7 + $0x28] sm:$0xff]  ;;  %v10044_v29 = vadd.f32 %v23321_v61, %v9817_v18  ;;  %v10494_v53 = vadd.f32 %v10455_v58, %v10267_v1 }
 0x6dc   :  { %10831 = vst.msk [vmem:[#allocation4 + $0x31] sm:$0xff] %vm2237_vm3, %v10775_v19  ;;  %v10778_v47 = vmax.f32 %v10762_v10, 0.0  ;;  %v10761_v46 = vadd.f32 %v21707_v7, %v10738_v28  ;;  %v10741_v23 = vmul.f32 %v21694_v26, %v10718_v41  ;;  %v10717_v8 = vadd.f32 %v10662_v9, %v10490_v25  ;;  %v23322_v25 = vld [vmem:[#allocation59_spill] sm:$0xff] }
 0x6dd   :  { %v16695_v5 = vpop.f32.mrf.mxu0  ;;  %v21785_v27 = vld [vmem:[#allocation4 + $0x21] sm:$0xff]  ;;  %v10269_v63 = vadd.f32 %v21656_v49, %v10041_v17  ;;  %v23323_v58 = vld [vmem:[#allocation55_spill] sm:$0xff]  ;;  %v10497_v16 = vadd.f32 %v16675_v43, %v10270_v32  ;;  %v10272_v19 = vadd.f32 %v21669_v11, %v10044_v29 }
 0x6de   :  { %10834 = vst.msk [vmem:[#allocation4 + $0x61] sm:$0xff] %vm2237_vm3, %v10778_v47  ;;  %v10777_v45 = vmax.f32 %v10761_v46, 0.0  ;;  %v10764_v56 = vadd.f32 %v21707_v7, %v10741_v23  ;;  %v10740_v2 = vmul.f32 %v21694_v26, %v10717_v8  ;;  %v10720_v44 = vadd.f32 %v16695_v5, %v10493_v33  ;;  %v21787_v37 = vld [vmem:[#allocation4 + $0x20] sm:$0xff]  ;;  %v10475_v47 = vpop.f32.mrf.mxu1 }
 0x6df   :  { %v10672_v62 = vpop.f32.mrf.mxu0  ;;  %v21772_v31 = vld [vmem:[#allocation4 + $0x11] sm:$0xff]  ;;  %v23324_v49 = vld [vmem:[#allocation38_spill] sm:$0xff]  ;;  %v10496_v38 = vadd.f32 %v10465_v42, %v10269_v63  ;;  %v10499_v21 = vadd.f32 %v16678_v15, %v10272_v19 }
 0x6e0   :  { %v21774_v59 = vld [vmem:[#allocation4 + $0x10] sm:$0xff]  ;;  %10833 = vst.msk [vmem:[#allocation4 + $0x51] sm:$0xff] %vm2237_vm3, %v10777_v45  ;;  %v10780_v34 = vmax.f32 %v10764_v56, 0.0  ;;  %v10763_v20 = vadd.f32 %v21707_v7, %v10740_v2  ;;  %v10743_v0 = vmul.f32 %v21694_v26, %v10720_v44  ;;  %v10719_v3 = vadd.f32 %v10672_v62, %v10492_v35  ;;  %16708 = vmatmul.mubr.msk.f32.vlgmr.msra.gmra.mxu1 %vm2237_vm3, %v21772_v31  ;;  %v10870_v32 = vld [vmem:[#allocation4 + $0xa1] sm:$0xff] }
 0x6e1   :  { %16734 = vmatmul.mubr.msk.f32.vlgmr.msra.gmra.mxu0 %vm2237_vm3, %v21774_v59  ;;  %v16698_v40 = vpop.f32.mrf.mxu0  ;;  %16710 = vmatprep.mubr.msk.f32.mxu1 %vm2237_vm3, %v21785_v27  ;;  %v10043_v52 = vadd.f32 %v23324_v49, %v9816_v24  ;;  %v21817_v11 = vld [vmem:[#allocation4 + $0x41] sm:$0xff] }
 0x6e2   :  { %16736 = vmatprep.mubr.msk.f32.mxu0 %vm2237_vm3, %v21787_v37  ;;  %10836 = vst.msk [vmem:[#allocation4 + $0x81] sm:$0xff] %vm2237_vm3, %v10780_v34  ;;  %v10779_v6 = vmax.f32 %v10763_v20, 0.0  ;;  %v10766_v22 = vadd.f32 %v21707_v7, %v10743_v0  ;;  %v10742_v51 = vmul.f32 %v21694_v26, %v10719_v3  ;;  %v10722_v14 = vadd.f32 %v16698_v40, %v10495_v60  ;;  %v21819_v33 = vld [vmem:[#allocation4 + $0x40] sm:$0xff] }
 0x6e3   :  { %16758 = vmatpush3.msra.mxu1 %v23322_v25  ;;  %16784 = vmatpush3.msra.mxu0 %v23323_v58  ;;  %v10682_v10 = vpop.f32.mrf.mxu0  ;;  %v21804_v28 = vld [vmem:[#allocation4 + $0x31] sm:$0xff]  ;;  %v10271_v9 = vadd.f32 %v21680_v57, %v10043_v52  ;;  %v10853_v62 = vld [vmem:[#allocation4 + $0xa0] sm:$0xff] }
 0x6e4   :  { %v21806_v41 = vld [vmem:[#allocation4 + $0x30] sm:$0xff]  ;;  %16809 = vmatprep.subr.mxu1 %v21776_v48  ;;  %16835 = vmatprep.subr.mxu0 %v21789_v55  ;;  %10835 = vst.msk [vmem:[#allocation4 + $0x71] sm:$0xff] %vm2237_vm3, %v10779_v6  ;;  %v10782_v30 = vmax.f32 %v10766_v22, 0.0  ;;  %v10765_v4 = vadd.f32 %v21707_v7, %v10742_v51  ;;  %v10745_v36 = vmul.f32 %v21694_v26, %v10722_v14 }
 0x6e5   :  { %v10721_v54 = vadd.f32 %v10682_v10, %v10494_v53  ;;  %16711 = vmatmul.mubr.msk.f32.gmra.mxu1 %vm2237_vm3, %v21804_v28  ;;  %16737 = vmatmul.mubr.msk.f32.gmra.mxu0 %vm2237_vm3, %v21806_v41  ;;  %v16701_v43 = vpop.f32.mrf.mxu0  ;;  %v21840_v56 = vld [vmem:[#allocation4 + $0x61] sm:$0xff]  ;;  %v10498_v44 = vadd.f32 %v10475_v47, %v10271_v9 }
 0x6e6   :  { %16713 = vmatprep.mubr.msk.f32.mxu1 %vm2237_vm3, %v21817_v11  ;;  %16739 = vmatprep.mubr.msk.f32.mxu0 %vm2237_vm3, %v21819_v33  ;;  %10838 = vst.msk [vmem:[#allocation4 + $0xc1] sm:$0xff] %vm2237_vm3, %v10782_v30  ;;  %v10781_v46 = vmax.f32 %v10765_v4, 0.0  ;;  %v10768_v23 = vadd.f32 %v21707_v7, %v10745_v36  ;;  %v10724_v50 = vadd.f32 %v16701_v43, %v10497_v16  ;;  %v21842_v2 = vld [vmem:[#allocation4 + $0x60] sm:$0xff]  ;;  %v12191_v43 = vld [vmem:[#allocation7 + $0x30] sm:$0xff] }
 0x6e7   :  { %v10744_v8 = vmul.f32 %v21694_v26, %v10721_v54  ;;  %v10692_v39 = vpop.f32.mrf.mxu0  ;;  %v21829_v18 = vld [vmem:[#allocation4 + $0x51] sm:$0xff]  ;;  %v11266_v4 = vld [vmem:[#allocation4 + $0x2] sm:$0xff] }
 0x6e8   :  { %v21831_v57 = vld [vmem:[#allocation4 + $0x50] sm:$0xff]  ;;  %10837 = vst.msk [vmem:[#allocation4 + $0xb1] sm:$0xff] %vm2237_vm3, %v10781_v46  ;;  %v10784_v35 = vmax.f32 %v10768_v23, 0.0  ;;  %v10747_v5 = vmul.f32 %v21694_v26, %v10724_v50  ;;  %v10723_v45 = vadd.f32 %v10692_v39, %v10496_v38  ;;  %v21933_v9 = vld [vmem:[#allocation4 + $0x22] sm:$0xff] }
 0x6e9   :  { %v10767_v1 = vadd.f32 %v21707_v7, %v10744_v8  ;;  %16714 = vmatmul.mubr.msk.f32.gmra.mxu1 %vm2237_vm3, %v21829_v18  ;;  %16740 = vmatmul.mubr.msk.f32.gmra.mxu0 %vm2237_vm3, %v21831_v57  ;;  %v16704_v13 = vpop.f32.mrf.mxu0  ;;  %v11267_v38 = vld [vmem:[#allocation4 + $0x12] sm:$0xff]  ;;  %v12418_v47 = vld [vmem:[#allocation7 + $0x38] sm:$0xff] }
 0x6ea   :  { %16716 = vmatprep.mubr.msk.f32.mxu1 %vm2237_vm3, %v21840_v56  ;;  %16742 = vmatprep.mubr.msk.f32.mxu0 %vm2237_vm3, %v21842_v2  ;;  %10840 = vst.msk [vmem:[#allocation4 + $0xe1] sm:$0xff] %vm2237_vm3, %v10784_v35  ;;  %v10770_v12 = vadd.f32 %v21707_v7, %v10747_v5  ;;  %v10746_v24 = vmul.f32 %v21694_v26, %v10723_v45  ;;  %v21947_v46 = vld [vmem:[#allocation4 + $0x42] sm:$0xff] }
 0x6eb   :  { %v10783_v17 = vmax.f32 %v10767_v1, 0.0  ;;  %v10726_v60 = vadd.f32 %v16704_v13, %v10499_v21  ;;  %v10702_v42 = vpop.f32.mrf.mxu0  ;;  %v21851_v34 = vld [vmem:[#allocation4 + $0x71] sm:$0xff]  ;;  %v11274_v23 = vld [vmem:[#allocation4 + $0xa2] sm:$0xff] }
 0x6ec   :  { %v21853_v20 = vld [vmem:[#allocation4 + $0x70] sm:$0xff]  ;;  %v10786_v0 = vmax.f32 %v10770_v12, 0.0  ;;  %v10769_v3 = vadd.f32 %v21707_v7, %v10746_v24  ;;  %v10725_v29 = vadd.f32 %v10702_v42, %v10498_v44  ;;  %v21967_v50 = vld [vmem:[#allocation4 + $0x80] sm:$0xff] }
 0x6ed   :  { %10839 = vst.msk [vmem:[#allocation4 + $0xd1] sm:$0xff] %vm2237_vm3, %v10783_v17  ;;  %v10749_v61 = vmul.f32 %v21694_v26, %v10726_v60  ;;  %16717 = vmatmul.mubr.msk.f32.gmra.mxu1 %vm2237_vm3, %v21851_v34  ;;  %16743 = vmatmul.mubr.msk.f32.gmra.mxu0 %vm2237_vm3, %v21853_v20  ;;  %v21877_v14 = vld [vmem:[#allocation4 + $0xc1] sm:$0xff]  ;;  %v21965_v8 = vld [vmem:[#allocation4 + $0x72] sm:$0xff] }
 0x6ee   :  { %16719 = vmatprep.mubr.msk.f32.mxu1 %vm2237_vm3, %v10870_v32  ;;  %16745 = vmatprep.mubr.msk.f32.mxu0 %vm2237_vm3, %v10853_v62  ;;  %10842 = vst.msk [vmem:[#allocation4 + $0x101] sm:$0xff] %vm2237_vm3, %v10786_v0  ;;  %v10785_v53 = vmax.f32 %v10769_v3, 0.0  ;;  %v10748_v40 = vmul.f32 %v21694_v26, %v10725_v29  ;;  %v21879_v25 = vld [vmem:[#allocation4 + $0xc0] sm:$0xff] }
 0x6ef   :  { %v10772_v63 = vadd.f32 %v21707_v7, %v10749_v61  ;;  %v21867_v15 = vld [vmem:[#allocation4 + $0xb1] sm:$0xff]  ;;  %v21979_v39 = vld [vmem:[#allocation4 + $0xc2] sm:$0xff] }
 0x6f0   :  { %v21869_v6 = vld [vmem:[#allocation4 + $0xb0] sm:$0xff]  ;;  %10841 = vst.msk [vmem:[#allocation4 + $0xf1] sm:$0xff] %vm2237_vm3, %v10785_v53  ;;  %v10771_v51 = vadd.f32 %v21707_v7, %v10748_v40  ;;  %v12645_v17 = vld [vmem:[#allocation7 + $0x40] sm:$0xff] }
 0x6f1   :  { %v10788_v22 = vmax.f32 %v10772_v63, 0.0  ;;  %16720 = vmatmul.mubr.msk.f32.gmra.mxu1 %vm2237_vm3, %v21867_v15  ;;  %16746 = vmatmul.mubr.msk.f32.gmra.mxu0 %vm2237_vm3, %v21869_v6  ;;  %v21895_v49 = vld [vmem:[#allocation4 + $0xe1] sm:$0xff]  ;;  %v11275_v21 = vld [vmem:[#allocation4 + $0xb2] sm:$0xff] }
 0x6f2   :  { %16722 = vmatprep.mubr.msk.f32.mxu1 %vm2237_vm3, %v21877_v14  ;;  %16748 = vmatprep.mubr.msk.f32.mxu0 %vm2237_vm3, %v21879_v25  ;;  %v10787_v26 = vmax.f32 %v10771_v51, 0.0  ;;  %v21897_v52 = vld [vmem:[#allocation4 + $0xe0] sm:$0xff] }
 0x6f3   :  { %10844 = vst.msk [vmem:[#allocation4 + $0x121] sm:$0xff] %vm2237_vm3, %v10788_v22  ;;  %v21991_v1 = vld [vmem:[#allocation4 + $0xe2] sm:$0xff] }
 0x6f4   :  { %v21886_v7 = vld [vmem:[#allocation4 + $0xd1] sm:$0xff]  ;;  %10843 = vst.msk [vmem:[#allocation4 + $0x111] sm:$0xff] %vm2237_vm3, %v10787_v26  ;;  %v22044_v12 = vld [vmem:[#allocation4 + $0x82] sm:$0xff] }
 0x6f5   :  { %v21888_v58 = vld [vmem:[#allocation4 + $0xd0] sm:$0xff]  ;;  %16723 = vmatmul.mubr.msk.f32.gmra.mxu1 %vm2237_vm3, %v21886_v7  ;;  %v21911_v10 = vld [vmem:[#allocation4 + $0x101] sm:$0xff] }
 0x6f6   :  { %16749 = vmatmul.mubr.msk.f32.gmra.mxu0 %vm2237_vm3, %v21888_v58  ;;  %16725 = vmatprep.mubr.msk.f32.mxu1 %vm2237_vm3, %v21895_v49  ;;  %v21913_v30 = vld [vmem:[#allocation4 + $0x100] sm:$0xff]  ;;  %v21985_v35 = vld [vmem:[#allocation4 + $0xd2] sm:$0xff] }
 0x6f7   :  { %16751 = vmatprep.mubr.msk.f32.mxu0 %vm2237_vm3, %v21897_v52  ;;  %v21903_v16 = vld [vmem:[#allocation4 + $0xf1] sm:$0xff]  ;;  %v22003_v45 = vld [vmem:[#allocation4 + $0x102] sm:$0xff] }
 0x6f8   :  { %v21905_v19 = vld [vmem:[#allocation4 + $0xf0] sm:$0xff] }
 0x6f9   :  { %16726 = vmatmul.mubr.msk.f32.gmra.mxu1 %vm2237_vm3, %v21903_v16  ;;  %v21997_v5 = vld [vmem:[#allocation4 + $0xf2] sm:$0xff] }
 0x6fa   :  { %16752 = vmatmul.mubr.msk.f32.gmra.mxu0 %vm2237_vm3, %v21905_v19  ;;  %16728 = vmatprep.mubr.msk.f32.mxu1 %vm2237_vm3, %v21911_v10  ;;  %v22011_v13 = vld [vmem:[#allocation4 + $0x120] sm:$0xff] }
 0x6fb   :  { %16754 = vmatprep.mubr.msk.f32.mxu0 %vm2237_vm3, %v21913_v30  ;;  %v21919_v36 = vld [vmem:[#allocation4 + $0x111] sm:$0xff]  ;;  %v11735_v24 = vld [vmem:[#allocation4 + $0x121] sm:$0xff] }
 0x6fc   :  { %v21921_v54 = vld [vmem:[#allocation4 + $0x110] sm:$0xff]  ;;  %v11962_v60 = vld [vmem:[#allocation4 + $0x122] sm:$0xff] }
 0x6fd   :  { %16729 = vmatmul.mubr.msk.f32.gmra.mxu1 %vm2237_vm3, %v21919_v36  ;;  %v22009_v44 = vld [vmem:[#allocation4 + $0x112] sm:$0xff] }
 0x6fe   :  { %16755 = vmatmul.mubr.msk.f32.gmra.mxu0 %vm2237_vm3, %v21921_v54  ;;  %16759 = vmatprep.mubr.msk.f32.mxu1 %vm2237_vm3, %v11266_v4 }
 0x6ff   :  { %16785 = vmatprep.mubr.msk.f32.mxu0 %vm2237_vm3, %v21774_v59  ;;  %v21941_v59 = vld [vmem:[#allocation4 + $0x32] sm:$0xff] }
 0x701   :  { %16760 = vmatmul.mubr.msk.f32.vlgmr.msra.gmra.mxu1 %vm2237_vm3, %v11267_v38 }
 0x702   :  { %16786 = vmatmul.mubr.msk.f32.vlgmr.msra.gmra.mxu0 %vm2237_vm3, %v21787_v37  ;;  %16762 = vmatprep.mubr.msk.f32.mxu1 %vm2237_vm3, %v21933_v9 }
 0x703   :  { %16788 = vmatprep.mubr.msk.f32.mxu0 %vm2237_vm3, %v21806_v41  ;;  %16810 = vmatpush3.msra.mxu1 %v21776_v48  ;;  %v21953_v48 = vld [vmem:[#allocation4 + $0x52] sm:$0xff] }
 0x704   :  { %16836 = vmatpush3.msra.mxu0 %v21789_v55  ;;  %16861 = vmatprep.subr.mxu1 %v12191_v43  ;;  %v21959_v55 = vld [vmem:[#allocation4 + $0x62] sm:$0xff] }
 0x705   :  { %16887 = vmatprep.subr.mxu0 %v12418_v47  ;;  %16763 = vmatmul.mubr.msk.f32.gmra.mxu1 %vm2237_vm3, %v21941_v59 }
 0x706   :  { %16789 = vmatmul.mubr.msk.f32.gmra.mxu0 %vm2237_vm3, %v21819_v33  ;;  %16765 = vmatprep.mubr.msk.f32.mxu1 %vm2237_vm3, %v21947_v46 }
 0x707   :  { %16791 = vmatprep.mubr.msk.f32.mxu0 %vm2237_vm3, %v21831_v57 }
 0x709   :  { %16766 = vmatmul.mubr.msk.f32.gmra.mxu1 %vm2237_vm3, %v21953_v48 }
 0x70a   :  { %16792 = vmatmul.mubr.msk.f32.gmra.mxu0 %vm2237_vm3, %v21842_v2  ;;  %16768 = vmatprep.mubr.msk.f32.mxu1 %vm2237_vm3, %v21959_v55 }
 0x70b   :  { %16794 = vmatprep.mubr.msk.f32.mxu0 %vm2237_vm3, %v21853_v20 }
 0x70d   :  { %16769 = vmatmul.mubr.msk.f32.gmra.mxu1 %vm2237_vm3, %v21965_v8 }
 0x70e   :  { %16795 = vmatmul.mubr.msk.f32.gmra.mxu0 %vm2237_vm3, %v21967_v50  ;;  %16771 = vmatprep.mubr.msk.f32.mxu1 %vm2237_vm3, %v11274_v23 }
 0x70f   :  { %16797 = vmatprep.mubr.msk.f32.mxu0 %vm2237_vm3, %v21869_v6 }
 0x711   :  { %16772 = vmatmul.mubr.msk.f32.gmra.mxu1 %vm2237_vm3, %v11275_v21 }
 0x712   :  { %16798 = vmatmul.mubr.msk.f32.gmra.mxu0 %vm2237_vm3, %v21879_v25  ;;  %16774 = vmatprep.mubr.msk.f32.mxu1 %vm2237_vm3, %v21979_v39 }
 0x713   :  { %16800 = vmatprep.mubr.msk.f32.mxu0 %vm2237_vm3, %v21888_v58 }
 0x715   :  { %16775 = vmatmul.mubr.msk.f32.gmra.mxu1 %vm2237_vm3, %v21985_v35 }
 0x716   :  { %16801 = vmatmul.mubr.msk.f32.gmra.mxu0 %vm2237_vm3, %v21897_v52  ;;  %16777 = vmatprep.mubr.msk.f32.mxu1 %vm2237_vm3, %v21991_v1 }
 0x717   :  { %16803 = vmatprep.mubr.msk.f32.mxu0 %vm2237_vm3, %v21905_v19 }
 0x719   :  { %16778 = vmatmul.mubr.msk.f32.gmra.mxu1 %vm2237_vm3, %v21997_v5 }
 0x71a   :  { %16804 = vmatmul.mubr.msk.f32.gmra.mxu0 %vm2237_vm3, %v21913_v30  ;;  %16780 = vmatprep.mubr.msk.f32.mxu1 %vm2237_vm3, %v22003_v45 }
 0x71b   :  { %16806 = vmatprep.mubr.msk.f32.mxu0 %vm2237_vm3, %v21921_v54 }
 0x71d   :  { %16781 = vmatmul.mubr.msk.f32.gmra.mxu1 %vm2237_vm3, %v22009_v44 }
 0x71e   :  { %16807 = vmatmul.mubr.msk.f32.gmra.mxu0 %vm2237_vm3, %v22011_v13  ;;  %16811 = vmatprep.mubr.msk.f32.mxu1 %vm2237_vm3, %v21772_v31  ;;  %v11727_v31 = vld [vmem:[#allocation4 + $0x81] sm:$0xff] }
 0x71f   :  { %16837 = vmatprep.mubr.msk.f32.mxu0 %vm2237_vm3, %v11267_v38 }
 0x721   :  { %16812 = vmatmul.mubr.msk.f32.vlgmr.msra.gmra.mxu1 %vm2237_vm3, %v21785_v27 }
 0x722   :  { %16838 = vmatmul.mubr.msk.f32.vlgmr.msra.gmra.mxu0 %vm2237_vm3, %v21933_v9  ;;  %16814 = vmatprep.mubr.msk.f32.mxu1 %vm2237_vm3, %v21804_v28 }
 0x723   :  { %16840 = vmatprep.mubr.msk.f32.mxu0 %vm2237_vm3, %v21941_v59  ;;  %16862 = vmatpush3.msra.mxu1 %v12191_v43 }
 0x724   :  { %16888 = vmatpush3.msra.mxu0 %v12418_v47  ;;  %16913 = vmatprep.subr.mxu1 %v12645_v17 }
 0x725   :  { %16815 = vmatmul.mubr.msk.f32.gmra.mxu1 %vm2237_vm3, %v21817_v11 }
 0x726   :  { %16841 = vmatmul.mubr.msk.f32.gmra.mxu0 %vm2237_vm3, %v21947_v46  ;;  %16817 = vmatprep.mubr.msk.f32.mxu1 %vm2237_vm3, %v21829_v18 }
 0x727   :  { %16843 = vmatprep.mubr.msk.f32.mxu0 %vm2237_vm3, %v21953_v48 }
 0x729   :  { %16818 = vmatmul.mubr.msk.f32.gmra.mxu1 %vm2237_vm3, %v21840_v56 }
 0x72a   :  { %16844 = vmatmul.mubr.msk.f32.gmra.mxu0 %vm2237_vm3, %v21959_v55  ;;  %16820 = vmatprep.mubr.msk.f32.mxu1 %vm2237_vm3, %v21851_v34 }
 0x72b   :  { %16846 = vmatprep.mubr.msk.f32.mxu0 %vm2237_vm3, %v21965_v8 }
 0x72d   :  { %16821 = vmatmul.mubr.msk.f32.gmra.mxu1 %vm2237_vm3, %v11727_v31 }
 0x72e   :  { %16847 = vmatmul.mubr.msk.f32.gmra.mxu0 %vm2237_vm3, %v22044_v12  ;;  %16823 = vmatprep.mubr.msk.f32.mxu1 %vm2237_vm3, %v21867_v15 }
 0x72f   :  { %16849 = vmatprep.mubr.msk.f32.mxu0 %vm2237_vm3, %v11275_v21 }
 0x731   :  { %16824 = vmatmul.mubr.msk.f32.gmra.mxu1 %vm2237_vm3, %v21877_v14 }
 0x732   :  { %16850 = vmatmul.mubr.msk.f32.gmra.mxu0 %vm2237_vm3, %v21979_v39  ;;  %16826 = vmatprep.mubr.msk.f32.mxu1 %vm2237_vm3, %v21886_v7 }
 0x733   :  { %16852 = vmatprep.mubr.msk.f32.mxu0 %vm2237_vm3, %v21985_v35 }
 0x735   :  { %16827 = vmatmul.mubr.msk.f32.gmra.mxu1 %vm2237_vm3, %v21895_v49 }
 0x736   :  { %16853 = vmatmul.mubr.msk.f32.gmra.mxu0 %vm2237_vm3, %v21991_v1  ;;  %16829 = vmatprep.mubr.msk.f32.mxu1 %vm2237_vm3, %v21903_v16 }
 0x737   :  { %16855 = vmatprep.mubr.msk.f32.mxu0 %vm2237_vm3, %v21997_v5 }
 0x739   :  { %16830 = vmatmul.mubr.msk.f32.gmra.mxu1 %vm2237_vm3, %v21911_v10 }
 0x73a   :  { %16856 = vmatmul.mubr.msk.f32.gmra.mxu0 %vm2237_vm3, %v22003_v45  ;;  %16832 = vmatprep.mubr.msk.f32.mxu1 %vm2237_vm3, %v21919_v36 }
 0x73b   :  { %16858 = vmatprep.mubr.msk.f32.mxu0 %vm2237_vm3, %v22009_v44 }
 0x73d   :  { %16833 = vmatmul.mubr.msk.f32.gmra.mxu1 %vm2237_vm3, %v11735_v24 }
 0x73e   :  { %16859 = vmatmul.mubr.msk.f32.gmra.mxu0 %vm2237_vm3, %v11962_v60  ;;  %16863 = vmatprep.mubr.msk.f32.mxu1 %vm2237_vm3, %v21787_v37  ;;  %v12408_v37 = vld [vmem:[#allocation4 + $0x91] sm:$0xff] }
 0x73f   :  { %16889 = vmatprep.mubr.msk.f32.mxu0 %vm2237_vm3, %v21785_v27  ;;  %v12181_v27 = vld [vmem:[#allocation4 + $0x90] sm:$0xff] }
 0x741   :  { %16864 = vmatmul.mubr.msk.f32.vlgmr.msra.gmra.mxu1 %vm2237_vm3, %v21806_v41  ;;  %v12416_v41 = vld [vmem:[#allocation4 + $0x131] sm:$0xff] }
 0x742   :  { %16890 = vmatmul.mubr.msk.f32.vlgmr.msra.gmra.mxu0 %vm2237_vm3, %v21804_v28  ;;  %16866 = vmatprep.mubr.msk.f32.mxu1 %vm2237_vm3, %v21819_v33  ;;  %v12189_v28 = vld [vmem:[#allocation4 + $0x130] sm:$0xff] }
 0x743   :  { %16892 = vmatprep.mubr.msk.f32.mxu0 %vm2237_vm3, %v21817_v11  ;;  %16914 = vmatpush3.msra.mxu1 %v12645_v17  ;;  %v12635_v11 = vld [vmem:[#allocation4 + $0x92] sm:$0xff] }
 0x744   :  { %v12643_v33 = vld [vmem:[#allocation4 + $0x132] sm:$0xff] }
 0x745   :  { %16867 = vmatmul.mubr.msk.f32.gmra.mxu1 %vm2237_vm3, %v21831_v57 }
 0x746   :  { %16893 = vmatmul.mubr.msk.f32.gmra.mxu0 %vm2237_vm3, %v21829_v18  ;;  %16869 = vmatprep.mubr.msk.f32.mxu1 %vm2237_vm3, %v21842_v2 }
 0x747   :  { %16895 = vmatprep.mubr.msk.f32.mxu0 %vm2237_vm3, %v21840_v56 }
 0x749   :  { %16870 = vmatmul.mubr.msk.f32.gmra.mxu1 %vm2237_vm3, %v21853_v20 }
 0x74a   :  { %16896 = vmatmul.mubr.msk.f32.gmra.mxu0 %vm2237_vm3, %v21851_v34  ;;  %16872 = vmatprep.mubr.msk.f32.mxu1 %vm2237_vm3, %v21967_v50 }
 0x74b   :  { %16898 = vmatprep.mubr.msk.f32.mxu0 %vm2237_vm3, %v11727_v31 }
 0x74d   :  { %16873 = vmatmul.mubr.msk.f32.gmra.mxu1 %vm2237_vm3, %v12181_v27 }
 0x74e   :  { %16899 = vmatmul.mubr.msk.f32.gmra.mxu0 %vm2237_vm3, %v12408_v37  ;;  %16875 = vmatprep.mubr.msk.f32.mxu1 %vm2237_vm3, %v21879_v25 }
 0x74f   :  { %16901 = vmatprep.mubr.msk.f32.mxu0 %vm2237_vm3, %v21877_v14 }
 0x751   :  { %16876 = vmatmul.mubr.msk.f32.gmra.mxu1 %vm2237_vm3, %v21888_v58 }
 0x752   :  { %16902 = vmatmul.mubr.msk.f32.gmra.mxu0 %vm2237_vm3, %v21886_v7  ;;  %16878 = vmatprep.mubr.msk.f32.mxu1 %vm2237_vm3, %v21897_v52 }
 0x753   :  { %16904 = vmatprep.mubr.msk.f32.mxu0 %vm2237_vm3, %v21895_v49 }
 0x755   :  { %16879 = vmatmul.mubr.msk.f32.gmra.mxu1 %vm2237_vm3, %v21905_v19 }
 0x756   :  { %16905 = vmatmul.mubr.msk.f32.gmra.mxu0 %vm2237_vm3, %v21903_v16  ;;  %16881 = vmatprep.mubr.msk.f32.mxu1 %vm2237_vm3, %v21913_v30 }
 0x757   :  { %16907 = vmatprep.mubr.msk.f32.mxu0 %vm2237_vm3, %v21911_v10 }
 0x759   :  { %16882 = vmatmul.mubr.msk.f32.gmra.mxu1 %vm2237_vm3, %v21921_v54 }
 0x75a   :  { %16908 = vmatmul.mubr.msk.f32.gmra.mxu0 %vm2237_vm3, %v21919_v36  ;;  %16884 = vmatprep.mubr.msk.f32.mxu1 %vm2237_vm3, %v22011_v13 }
 0x75b   :  { %16910 = vmatprep.mubr.msk.f32.mxu0 %vm2237_vm3, %v11735_v24 }
 0x75d   :  { %16885 = vmatmul.mubr.msk.f32.gmra.mxu1 %vm2237_vm3, %v12189_v28 }
 0x75e   :  { %16911 = vmatmul.mubr.msk.f32.gmra.mxu0 %vm2237_vm3, %v12416_v41  ;;  %16915 = vmatprep.mubr.msk.f32.mxu1 %vm2237_vm3, %v21933_v9 }
 0x761   :  { %16916 = vmatmul.mubr.msk.f32.vlgmr.msra.gmra.mxu1 %vm2237_vm3, %v21941_v59 }
 0x762   :  { %16918 = vmatprep.mubr.msk.f32.mxu1 %vm2237_vm3, %v21947_v46 }
 0x765   :  { %16919 = vmatmul.mubr.msk.f32.gmra.mxu1 %vm2237_vm3, %v21953_v48 }
 0x766   :  { %16921 = vmatprep.mubr.msk.f32.mxu1 %vm2237_vm3, %v21959_v55 }
 0x769   :  { %16922 = vmatmul.mubr.msk.f32.gmra.mxu1 %vm2237_vm3, %v21965_v8 }
 0x76a   :  { %16924 = vmatprep.mubr.msk.f32.mxu1 %vm2237_vm3, %v22044_v12 }
 0x76d   :  { %16925 = vmatmul.mubr.msk.f32.gmra.mxu1 %vm2237_vm3, %v12635_v11 }
 0x76e   :  { %16927 = vmatprep.mubr.msk.f32.mxu1 %vm2237_vm3, %v21979_v39 }
 0x771   :  { %16928 = vmatmul.mubr.msk.f32.gmra.mxu1 %vm2237_vm3, %v21985_v35 }
 0x772   :  { %16930 = vmatprep.mubr.msk.f32.mxu1 %vm2237_vm3, %v21991_v1 }
 0x775   :  { %16931 = vmatmul.mubr.msk.f32.gmra.mxu1 %vm2237_vm3, %v21997_v5 }
 0x776   :  { %16933 = vmatprep.mubr.msk.f32.mxu1 %vm2237_vm3, %v22003_v45 }
 0x779   :  { %16934 = vmatmul.mubr.msk.f32.gmra.mxu1 %vm2237_vm3, %v22009_v44 }
 0x77a   :  { %16936 = vmatprep.mubr.msk.f32.mxu1 %vm2237_vm3, %v11962_v60 }
 0x77d   :  { %16937 = vmatmul.mubr.msk.f32.gmra.mxu1 %vm2237_vm3, %v12643_v33 }
 0x7a0   :  { %v16709_v18 = vpop.f32.mrf.mxu1 }
 0x7a1   :  { %v16735_v57 = vpop.f32.mrf.mxu0 }
 0x7a2   :  { %v11193_v56 = vadd.f32 %v16735_v57, %v16709_v18  ;;  %v10994_v2 = vpop.f32.mrf.mxu1 }
 0x7a3   :  { %v11187_v32 = vpop.f32.mrf.mxu0 }
 0x7a4   :  { %v11188_v62 = vadd.f32 %v11187_v32, %v10994_v2 }
 0x7a5   :  { %v16712_v42 = vpop.f32.mrf.mxu1  ;;  %v16738_v34 = vpop.f32.mrf.mxu0 }
 0x7a6   :  { %v11203_v20 = vadd.f32 %v16738_v34, %v16712_v42 }
 0x7a7   :  { %v11004_v0 = vpop.f32.mrf.mxu1  ;;  %v11197_v3 = vpop.f32.mrf.mxu0 }
 0x7a8   :  { %v11198_v61 = vadd.f32 %v11197_v3, %v11004_v0 }
 0x7a9   :  { %v16715_v29 = vpop.f32.mrf.mxu1  ;;  %v16741_v53 = vpop.f32.mrf.mxu0 }
 0x7aa   :  { %v11213_v63 = vadd.f32 %v16741_v53, %v16715_v29 }
 0x7ab   :  { %v11014_v40 = vpop.f32.mrf.mxu1  ;;  %v11207_v15 = vpop.f32.mrf.mxu0 }
 0x7ac   :  { %v11208_v6 = vadd.f32 %v11207_v15, %v11014_v40 }
 0x7ad   :  { %v16718_v22 = vpop.f32.mrf.mxu1  ;;  %v16744_v51 = vpop.f32.mrf.mxu0 }
 0x7ae   :  { %v11223_v14 = vadd.f32 %v16744_v51, %v16718_v22 }
 0x7af   :  { %v11024_v25 = vpop.f32.mrf.mxu1  ;;  %v11217_v26 = vpop.f32.mrf.mxu0 }
 0x7b0   :  { %v11218_v7 = vadd.f32 %v11217_v26, %v11024_v25 }
 0x7b1   :  { %v16721_v58 = vpop.f32.mrf.mxu1  ;;  %v16747_v49 = vpop.f32.mrf.mxu0 }
 0x7b2   :  { %v11233_v52 = vadd.f32 %v16747_v49, %v16721_v58 }
 0x7b3   :  { %v11034_v16 = vpop.f32.mrf.mxu1  ;;  %v11227_v19 = vpop.f32.mrf.mxu0 }
 0x7b4   :  { %v11228_v10 = vadd.f32 %v11227_v19, %v11034_v16 }
 0x7b5   :  { %v16724_v30 = vpop.f32.mrf.mxu1 }
 0x7b6   :  { %v16750_v4 = vpop.f32.mrf.mxu0 }
 0x7b7   :  { %v11243_v36 = vadd.f32 %v16750_v4, %v16724_v30  ;;  %v11044_v54 = vpop.f32.mrf.mxu1 }
 0x7b8   :  { %v11237_v38 = vpop.f32.mrf.mxu0 }
 0x7b9   :  { %v11238_v9 = vadd.f32 %v11237_v38, %v11044_v54  ;;  %v16727_v43 = vpop.f32.mrf.mxu1 }
 0x7ba   :  { %v16753_v47 = vpop.f32.mrf.mxu0 }
 0x7bb   :  { %v11253_v59 = vadd.f32 %v16753_v47, %v16727_v43  ;;  %v11054_v46 = vpop.f32.mrf.mxu1 }
 0x7bc   :  { %v11247_v48 = vpop.f32.mrf.mxu0 }
 0x7bd   :  { %v22165_v55 = vadd.f32 %v11247_v48, %v11054_v46  ;;  %v16730_v23 = vpop.f32.mrf.mxu1 }
 0x7be   :  { %v16756_v8 = vpop.f32.mrf.mxu0 }
 0x7bf   :  { %v22167_v50 = vadd.f32 %v16756_v8, %v16730_v23  ;;  %v11064_v21 = vpop.f32.mrf.mxu1 }
 0x7c0   :  { %v11257_v39 = vpop.f32.mrf.mxu0 }
 0x7c1   :  { %v22169_v35 = vadd.f32 %v11257_v39, %v11064_v21  ;;  %v16761_v1 = vpop.f32.mrf.mxu1 }
 0x7c2   :  { %v16787_v5 = vpop.f32.mrf.mxu0  ;;  %v11478_v45 = vadd.f32 %v16761_v1, %v11193_v56 }
 0x7c3   :  { %v11398_v44 = vpop.f32.mrf.mxu1 }
 0x7c4   :  { %v11625_v13 = vpop.f32.mrf.mxu0  ;;  %v11705_v17 = vadd.f32 %v16787_v5, %v11478_v45  ;;  %v11477_v31 = vadd.f32 %v11398_v44, %v11188_v62 }
 0x7c5   :  { %v16764_v12 = vpop.f32.mrf.mxu1 }
 0x7c6   :  { %v16790_v24 = vpop.f32.mrf.mxu0  ;;  %v11704_v60 = vadd.f32 %v11625_v13, %v11477_v31  ;;  %v11480_v27 = vadd.f32 %v16764_v12, %v11203_v20 }
 0x7c7   :  { %v11408_v37 = vpop.f32.mrf.mxu1 }
 0x7c8   :  { %v11635_v28 = vpop.f32.mrf.mxu0  ;;  %v11707_v41 = vadd.f32 %v16790_v24, %v11480_v27  ;;  %v11479_v11 = vadd.f32 %v11408_v37, %v11198_v61 }
 0x7c9   :  { %v16767_v33 = vpop.f32.mrf.mxu1 }
 0x7ca   :  { %v16793_v18 = vpop.f32.mrf.mxu0  ;;  %v11706_v57 = vadd.f32 %v11635_v28, %v11479_v11  ;;  %v11482_v2 = vadd.f32 %v16767_v33, %v11213_v63  ;;  %v6522_v63 = vld [vmem:[%s22776_s2] sm:$0xff] }
 0x7cb   :  { %v11418_v32 = vpop.f32.mrf.mxu1  ;;  %16955 = vmatprep.mubr.msk.f32.mxu0 %vm12910_vm5, %v6522_v63  ;;  %17019 = vmatprep.mubr.msk.f32.mxu1 %vm12910_vm5, %v6522_v63 }
 0x7cc   :  { %v11645_v42 = vpop.f32.mrf.mxu0  ;;  %v11709_v34 = vadd.f32 %v16793_v18, %v11482_v2  ;;  %v11481_v56 = vadd.f32 %v11418_v32, %v11208_v6 }
 0x7cd   :  { %v16770_v0 = vpop.f32.mrf.mxu1 }
 0x7ce   :  { %v22171_v3 = vpop.f32.mrf.mxu0  ;;  %v11708_v62 = vadd.f32 %v11645_v42, %v11481_v56  ;;  %v22173_v29 = vadd.f32 %v16770_v0, %v11223_v14 }
 0x7cf   :  { %v11428_v53 = vpop.f32.mrf.mxu1 }
 0x7d0   :  { %v22175_v20 = vpop.f32.mrf.mxu0  ;;  %v22177_v40 = vadd.f32 %v11428_v53, %v11218_v7 }
 0x7d1   :  { %v16773_v61 = vpop.f32.mrf.mxu1 }
 0x7d2   :  { %v16799_v15 = vpop.f32.mrf.mxu0  ;;  %v11486_v22 = vadd.f32 %v16773_v61, %v11233_v52 }
 0x7d3   :  { %v11438_v6 = vpop.f32.mrf.mxu1 }
 0x7d4   :  { %v11665_v51 = vpop.f32.mrf.mxu0  ;;  %v11713_v14 = vadd.f32 %v16799_v15, %v11486_v22  ;;  %v11485_v25 = vadd.f32 %v11438_v6, %v11228_v10 }
 0x7d5   :  { %v16776_v26 = vpop.f32.mrf.mxu1 }
 0x7d6   :  { %v16802_v58 = vpop.f32.mrf.mxu0  ;;  %v11712_v7 = vadd.f32 %v11665_v51, %v11485_v25  ;;  %v11488_v49 = vadd.f32 %v16776_v26, %v11243_v36 }
 0x7d7   :  { %v11448_v16 = vpop.f32.mrf.mxu1 }
 0x7d8   :  { %v11675_v19 = vpop.f32.mrf.mxu0  ;;  %v11715_v52 = vadd.f32 %v16802_v58, %v11488_v49  ;;  %v11487_v30 = vadd.f32 %v11448_v16, %v11238_v9 }
 0x7d9   :  { %v16779_v4 = vpop.f32.mrf.mxu1 }
 0x7da   :  { %v16805_v54 = vpop.f32.mrf.mxu0  ;;  %v11714_v38 = vadd.f32 %v11675_v19, %v11487_v30  ;;  %v11490_v43 = vadd.f32 %v16779_v4, %v11253_v59 }
 0x7db   :  { %v11458_v47 = vpop.f32.mrf.mxu1 }
 0x7dc   :  { %v11685_v46 = vpop.f32.mrf.mxu0  ;;  %v11717_v48 = vadd.f32 %v16805_v54, %v11490_v43  ;;  %v11489_v23 = vadd.f32 %v11458_v47, %v22165_v55 }
 0x7dd   :  { %v16782_v8 = vpop.f32.mrf.mxu1 }
 0x7de   :  { %v22185_v21 = vpop.f32.mrf.mxu0  ;;  %v11716_v10 = vadd.f32 %v11685_v46, %v11489_v23  ;;  %v22188_v39 = vadd.f32 %v16782_v8, %v22167_v50 }
 0x7df   :  { %v11468_v36 = vpop.f32.mrf.mxu1 }
 0x7e0   :  { %v22190_v1 = vpop.f32.mrf.mxu0  ;;  %v22193_v9 = vadd.f32 %v11468_v36, %v22169_v35 }
 0x7e1   :  { %v16813_v5 = vpop.f32.mrf.mxu1 }
 0x7e2   :  { %v22195_v59 = vpop.f32.mrf.mxu0  ;;  %v22197_v45 = vadd.f32 %v16813_v5, %v11705_v17 }
 0x7e3   :  { %v11852_v44 = vpop.f32.mrf.mxu1 }
 0x7e4   :  { %v22199_v55 = vpop.f32.mrf.mxu0  ;;  %v22201_v13 = vadd.f32 %v11852_v44, %v11704_v60 }
 0x7e5   :  { %v16816_v31 = vpop.f32.mrf.mxu1 }
 0x7e6   :  { %v22203_v12 = vpop.f32.mrf.mxu0  ;;  %v22205_v50 = vadd.f32 %v16816_v31, %v11707_v41 }
 0x7e7   :  { %v11862_v24 = vpop.f32.mrf.mxu1 }
 0x7e8   :  { %v22207_v27 = vpop.f32.mrf.mxu0  ;;  %v22209_v35 = vadd.f32 %v11862_v24, %v11706_v57 }
 0x7e9   :  { %v16819_v37 = vpop.f32.mrf.mxu1 }
 0x7ea   :  { %v16845_v28 = vpop.f32.mrf.mxu0  ;;  %v11936_v11 = vadd.f32 %v16819_v37, %v11709_v34 }
 0x7eb   :  { %v11872_v17 = vpop.f32.mrf.mxu1 }
 0x7ec   :  { %v12099_v33 = vpop.f32.mrf.mxu0  ;;  %v11935_v18 = vadd.f32 %v11872_v17, %v11708_v62 }
 0x7ed   :  { %v16822_v2 = vpop.f32.mrf.mxu1 }
 0x7ee   :  { %v16848_v32 = vpop.f32.mrf.mxu0 }
 0x7ef   :  { %v11882_v60 = vpop.f32.mrf.mxu1 }
 0x7f0   :  { %v12109_v42 = vpop.f32.mrf.mxu0 }
 0x7f1   :  { %v16825_v56 = vpop.f32.mrf.mxu1 }
 0x7f2   :  { %v22211_v0 = vpop.f32.mrf.mxu0  ;;  %v22213_v41 = vadd.f32 %v16825_v56, %v11713_v14 }
 0x7f3   :  { %23325 = vst [vmem:[#allocation47_spill] sm:$0xff] %v22211_v0  ;;  %v11892_v53 = vpop.f32.mrf.mxu1 }
 0x7f4   :  { %23326 = vst [vmem:[#allocation64_spill] sm:$0xff] %v22213_v41  ;;  %v22215_v61 = vpop.f32.mrf.mxu0  ;;  %v22217_v57 = vadd.f32 %v11892_v53, %v11712_v7  ;;  %v12163_v41 = vadd.f32 %v16845_v28, %v11936_v11 }
 0x7f5   :  { %23327 = vst [vmem:[#allocation34_spill] sm:$0xff] %v22215_v61  ;;  %v16828_v15 = vpop.f32.mrf.mxu1 }
 0x7f6   :  { %23328 = vst [vmem:[#allocation57_spill] sm:$0xff] %v22217_v57  ;;  %v22219_v22 = vpop.f32.mrf.mxu0  ;;  %v22221_v34 = vadd.f32 %v16828_v15, %v11715_v52  ;;  %v11710_v57 = vadd.f32 %v22175_v20, %v22177_v40  ;;  %v12160_v20 = vadd.f32 %v22207_v27, %v22209_v35 }
 0x7f7   :  { %23329 = vst [vmem:[#allocation36_spill] sm:$0xff] %v22219_v22  ;;  %v11902_v62 = vpop.f32.mrf.mxu1 }
 0x7f8   :  { %v22223_v63 = vpop.f32.mrf.mxu0  ;;  %v22225_v6 = vadd.f32 %v11902_v62, %v11714_v38 }
 0x7f9   :  { %23330 = vst [vmem:[#allocation50_spill] sm:$0xff] %v22223_v63  ;;  %v16831_v51 = vpop.f32.mrf.mxu1 }
 0x7fa   :  { %23331 = vst [vmem:[#allocation13_spill] sm:$0xff] %v22225_v6  ;;  %v22227_v25 = vpop.f32.mrf.mxu0  ;;  %v22229_v14 = vadd.f32 %v16831_v51, %v11717_v48 }
 0x7fb   :  { %v11912_v26 = vpop.f32.mrf.mxu1 }
 0x7fc   :  { %v22231_v58 = vpop.f32.mrf.mxu0  ;;  %v22233_v7 = vadd.f32 %v11912_v26, %v11716_v10 }
 0x7fd   :  { %v22235_v49 = vpop.f32.mrf.mxu1 }
 0x7fe   :  { %v22237_v16 = vpop.f32.mrf.mxu0 }
 0x7ff   :  { %v22239_v19 = vpop.f32.mrf.mxu1 }
 0x800   :  { %v22241_v52 = vpop.f32.mrf.mxu0 }
 0x801   :  { %23332 = vst [vmem:[#allocation58_spill] sm:$0xff] %v22241_v52  ;;  %v16865_v30 = vpop.f32.mrf.mxu1 }
 0x802   :  { %v22243_v4 = vpop.f32.mrf.mxu0 }
 0x803   :  { %v12306_v54 = vpop.f32.mrf.mxu1 }
 0x804   :  { %v22245_v38 = vpop.f32.mrf.mxu0 }
 0x805   :  { %v16868_v43 = vpop.f32.mrf.mxu1 }
 0x806   :  { %v16894_v46 = vpop.f32.mrf.mxu0 }
 0x807   :  { %v12316_v47 = vpop.f32.mrf.mxu1 }
 0x808   :  { %v12543_v8 = vpop.f32.mrf.mxu0 }
 0x809   :  { %v16871_v48 = vpop.f32.mrf.mxu1 }
 0x80a   :  { %v16897_v5 = vpop.f32.mrf.mxu0 }
 0x80b   :  { %v12326_v23 = vpop.f32.mrf.mxu1 }
 0x80c   :  { %v12553_v24 = vpop.f32.mrf.mxu0 }
 0x80d   :  { %v16874_v10 = vpop.f32.mrf.mxu1 }
 0x80e   :  { %v16900_v56 = vpop.f32.mrf.mxu0 }
 0x80f   :  { %v12336_v36 = vpop.f32.mrf.mxu1 }
 0x810   :  { %v12563_v62 = vpop.f32.mrf.mxu0 }
 0x811   :  { %v22247_v44 = vpop.f32.mrf.mxu1 }
 0x812   :  { %23333 = vst [vmem:[#allocation11_spill] sm:$0xff] %v22247_v44  ;;  %v11711_v44 = vadd.f32 %v22171_v3, %v22173_v29  ;;  %v22265_v61 = vpop.f32.mrf.mxu0  ;;  %v12161_v3 = vadd.f32 %v22203_v12, %v22205_v50  ;;  %v12158_v50 = vadd.f32 %v22199_v55, %v22201_v13 }
 0x813   :  { %v22249_v31 = vpop.f32.mrf.mxu1  ;;  %23340 = vst [vmem:[#allocation12_spill] sm:$0xff] %v22265_v61 }
 0x814   :  { %23334 = vst [vmem:[#allocation40_spill] sm:$0xff] %v22249_v31  ;;  %v22271_v63 = vpop.f32.mrf.mxu0  ;;  %v12388_v11 = vadd.f32 %v16868_v43, %v12161_v3  ;;  %v12170_v3 = vadd.f32 %v22231_v58, %v22233_v7 }
 0x815   :  { %v22251_v37 = vpop.f32.mrf.mxu1 }
 0x816   :  { %23335 = vst [vmem:[#allocation70_spill] sm:$0xff] %v22251_v37  ;;  %v11937_v37 = vadd.f32 %v11882_v60, %v11710_v57  ;;  %v22277_v40 = vpop.f32.mrf.mxu0  ;;  %v12615_v35 = vadd.f32 %v16894_v46, %v12388_v11  ;;  %v11718_v46 = vadd.f32 %v22190_v1, %v22193_v9 }
 0x817   :  { %v22253_v17 = vpop.f32.mrf.mxu1 }
 0x818   :  { %23336 = vst [vmem:[#allocation29_spill] sm:$0xff] %v22253_v17  ;;  %v11938_v17 = vadd.f32 %v16822_v2, %v11711_v44  ;;  %v12164_v29 = vadd.f32 %v12109_v42, %v11937_v37 }
 0x819   :  { %v22255_v53 = vpop.f32.mrf.mxu1 }
 0x81a   :  { %v12391_v60 = vadd.f32 %v12336_v36, %v12164_v29  ;;  %v11719_v36 = vadd.f32 %v22185_v21, %v22188_v39 }
 0x81b   :  { %v22257_v15 = vpop.f32.mrf.mxu1 }
 0x81c   :  { %23337 = vst [vmem:[#allocation45_spill] sm:$0xff] %v22257_v15  ;;  %v12165_v15 = vadd.f32 %v16848_v32, %v11938_v17  ;;  %v12171_v17 = vadd.f32 %v22227_v25, %v22229_v14 }
 0x81d   :  { %v22259_v51 = vpop.f32.mrf.mxu1 }
 0x81e   :  { %23338 = vst [vmem:[#allocation67_spill] sm:$0xff] %v22259_v51  ;;  %v12162_v51 = vadd.f32 %v12099_v33, %v11935_v18  ;;  %v12392_v22 = vadd.f32 %v16874_v10, %v12165_v15  ;;  %v12159_v33 = vadd.f32 %v22195_v59, %v22197_v45  ;;  %v12387_v18 = vadd.f32 %v12316_v47, %v12160_v20 }
 0x81f   :  { %v22261_v26 = vpop.f32.mrf.mxu1  ;;  %v12385_v59 = vadd.f32 %v12306_v54, %v12158_v50 }
 0x820   :  { %23339 = vst [vmem:[#allocation62_spill] sm:$0xff] %v22261_v26  ;;  %v12390_v26 = vadd.f32 %v16871_v48, %v12163_v41  ;;  %v12389_v61 = vadd.f32 %v12326_v23, %v12162_v51  ;;  %v12619_v57 = vadd.f32 %v16900_v56, %v12392_v22  ;;  %v12386_v42 = vadd.f32 %v16865_v30, %v12159_v33  ;;  %v22283_v48 = vpop.f32.mrf.mxu0  ;;  %v23343_v51 = vld [vmem:[#allocation28_spill] sm:$0xff]  ;;  %v23346_v33 = vld [vmem:[#allocation58_spill] sm:$0xff] }
 0x821   :  { %v16917_v31 = vpop.f32.mrf.mxu1  ;;  %v12618_v23 = vadd.f32 %v12563_v62, %v12391_v60  ;;  %v12614_v45 = vadd.f32 %v12543_v8, %v12387_v18  ;;  %v11945_v56 = vadd.f32 %v22239_v19, %v11718_v46  ;;  %v12612_v1 = vadd.f32 %v22245_v38, %v12385_v59 }
 0x822   :  { %v12617_v2 = vadd.f32 %v16897_v5, %v12390_v26  ;;  %v12616_v41 = vadd.f32 %v12553_v24, %v12389_v61  ;;  %v22290_v61 = vld [vmem:[%s22790_s16] ss:$0 sm:$0xff]  ;;  %v11946_v5 = vadd.f32 %v22235_v49, %v11719_v36  ;;  %v12613_v21 = vadd.f32 %v22243_v4, %v12386_v42  ;;  %v16909_v39 = vpop.f32.mrf.mxu0 }
 0x823   :  { %v22269_v0 = vpop.f32.mrf.mxu1  ;;  %v23341_v24 = vld [vmem:[#allocation37_spill] sm:$0xff]  ;;  %v12398_v38 = vadd.f32 %v22255_v53, %v12171_v17  ;;  %v12172_v18 = vadd.f32 %v23346_v33, %v11945_v56 }
 0x824   :  { %v12840_v9 = vadd.f32 %v16917_v31, %v12613_v21  ;;  %v12173_v29 = vadd.f32 %v22237_v16, %v11946_v5  ;;  %v12593_v25 = vpop.f32.mrf.mxu0  ;;  %v12839_v14 = vadd.f32 %v22269_v0, %v12612_v1  ;;  %v23347_v0 = vld [vmem:[#allocation45_spill] sm:$0xff] }
 0x825   :  { %v16920_v6 = vpop.f32.mrf.mxu1  ;;  %v23350_v42 = vld [vmem:[#allocation13_spill] sm:$0xff]  ;;  %v12625_v36 = vadd.f32 %v16909_v39, %v12398_v38 }
 0x826   :  { %v12842_v55 = vadd.f32 %v16920_v6, %v12615_v35  ;;  %v16912_v58 = vpop.f32.mrf.mxu0  ;;  %v12863_v7 = vadd.f32 %v22290_v61, %v12840_v9  ;;  %v23357_v5 = vld [vmem:[#allocation29_spill] sm:$0xff]  ;;  %v23360_v9 = vld [vmem:[#allocation34_spill] sm:$0xff] }
 0x827   :  { %v12770_v52 = vpop.f32.mrf.mxu1  ;;  %v23353_v59 = vld [vmem:[#allocation62_spill] sm:$0xff]  ;;  %v23359_v1 = vld [vmem:[#allocation57_spill] sm:$0xff] }
 0x828   :  { %v12841_v8 = vadd.f32 %v12770_v52, %v12614_v45  ;;  %v12865_v4 = vadd.f32 %v22290_v61, %v12842_v55  ;;  %v23342_v52 = vld [vmem:[#allocation24_spill] sm:$0xff]  ;;  %v12399_v45 = vadd.f32 %v23353_v59, %v12172_v18  ;;  %v23354_v55 = vld [vmem:[#allocation27_spill] sm:$0xff] }
 0x829   :  { %v16923_v28 = vpop.f32.mrf.mxu1 }
 0x82a   :  { %v12844_v12 = vadd.f32 %v16923_v28, %v12617_v2  ;;  %v12864_v31 = vadd.f32 %v22290_v61, %v12841_v8  ;;  %v23344_v28 = vld [vmem:[#allocation30_spill] sm:$0xff]  ;;  %v23345_v2 = vld [vmem:[#allocation36_spill] sm:$0xff]  ;;  %v12603_v8 = vpop.f32.mrf.mxu0 }
 0x82b   :  { %v12780_v32 = vpop.f32.mrf.mxu1  ;;  %v12169_v60 = vadd.f32 %v23345_v2, %v22221_v34 }
 0x82c   :  { %v12843_v43 = vadd.f32 %v12780_v32, %v12616_v41  ;;  %v12867_v13 = vadd.f32 %v22290_v61, %v12844_v12  ;;  %v12397_v32 = vadd.f32 %v23347_v0, %v12170_v3  ;;  %v23348_v41 = vld [vmem:[#allocation67_spill] sm:$0xff]  ;;  %v23349_v12 = vld [vmem:[#allocation17_spill] sm:$0xff] }
 0x82d   :  { %v16926_v27 = vpop.f32.mrf.mxu1  ;;  %v12400_v53 = vadd.f32 %v23348_v41, %v12173_v29  ;;  %v12881_v50 = vadd.f32 %v12865_v4, %v23349_v12  ;;  %v12166_v4 = vadd.f32 %v23360_v9, %v23359_v1  ;;  %v12626_v29 = vadd.f32 %v12603_v8, %v12399_v45  ;;  %v6525_v45 = vld [vmem:[%s22776_s2 + $0x18] sm:$0xff]  ;;  %v6527_v8 = vld [vmem:[%s22776_s2 + $0x28] sm:$0xff]  ;;  %v6530_v9 = vld [vmem:[%s22776_s2 + $0x40] sm:$0xff] }
 0x82e   :  { %v12846_v10 = vadd.f32 %v16926_v27, %v12619_v57  ;;  %v12866_v44 = vadd.f32 %v22290_v61, %v12843_v43  ;;  %v12883_v26 = vadd.f32 %v12867_v13, %v23343_v51  ;;  %v23351_v27 = vld [vmem:[#allocation50_spill] sm:$0xff]  ;;  %v12862_v43 = vadd.f32 %v22290_v61, %v12839_v14 }
 0x82f   :  { %v12790_v22 = vpop.f32.mrf.mxu1  ;;  %v12168_v35 = vadd.f32 %v23351_v27, %v23350_v42  ;;  %v12880_v13 = vadd.f32 %v12864_v31, %v23354_v55  ;;  %v12627_v17 = vadd.f32 %v16912_v58, %v12400_v53  ;;  %v12897_v39 = vmax.f32 %v12881_v50, 0.0  ;;  %v23363_v31 = vld [vmem:[#allocation40_spill] sm:$0xff]  ;;  %v6523_v50 = vld [vmem:[%s22776_s2 + $0x8] sm:$0xff] }
 0x830   :  { %v12869_v30 = vadd.f32 %v22290_v61, %v12846_v10  ;;  %v12845_v47 = vadd.f32 %v12790_v22, %v12618_v23  ;;  %v12882_v11 = vadd.f32 %v12866_v44, %v23344_v28  ;;  %v12899_v57 = vmax.f32 %v12883_v26, 0.0  ;;  %v23352_v23 = vld [vmem:[#allocation70_spill] sm:$0xff]  ;;  %v23362_v26 = vld [vmem:[#allocation49_spill] sm:$0xff]  ;;  %v23364_v58 = vld [vmem:[#allocation12_spill] sm:$0xff] }
 0x831   :  { %v22298_v54 = vpop.f32.mrf.mxu1  ;;  %v12396_v34 = vadd.f32 %v23352_v23, %v12169_v60  ;;  %v12395_v21 = vadd.f32 %v23357_v5, %v12168_v35  ;;  %v12878_v3 = vadd.f32 %v12862_v43, %v23362_v26  ;;  %v23366_v27 = vld [vmem:[#allocation22_spill] sm:$0xff]  ;;  %v23367_v23 = vld [vmem:[#allocation35_spill] sm:$0xff]  ;;  %v23370_v5 = vld [vmem:[#allocation32_spill] sm:$0xff] }
 0x832   :  { %v12868_v6 = vadd.f32 %v22290_v61, %v12845_v47  ;;  %v12885_v37 = vadd.f32 %v12869_v30, %v23341_v24  ;;  %v12898_v22 = vmax.f32 %v12882_v11, 0.0  ;;  %v23355_v30 = vld [vmem:[#allocation64_spill] sm:$0xff]  ;;  %v23356_v47 = vld [vmem:[#allocation47_spill] sm:$0xff] }
 0x833   :  { %v22307_v49 = vpop.f32.mrf.mxu1  ;;  %v12167_v46 = vadd.f32 %v23356_v47, %v23355_v30  ;;  %v12622_v28 = vadd.f32 %v22283_v48, %v12395_v21  ;;  %v12894_v0 = vmax.f32 %v12878_v3, 0.0  ;;  %v23365_v48 = vld [vmem:[#allocation52_spill] sm:$0xff]  ;;  %v6526_v30 = vld [vmem:[%s22776_s2 + $0x20] sm:$0xff]  ;;  %v6535_v26 = vld [vmem:[%s22776_s2 + $0x68] sm:$0xff] }
 0x834   :  { %v12901_v15 = vmax.f32 %v12885_v37, 0.0  ;;  %v12884_v62 = vadd.f32 %v12868_v6, %v23342_v52  ;;  %v23358_v6 = vld [vmem:[#allocation26_spill] sm:$0xff]  ;;  %v12624_v37 = vadd.f32 %v12593_v25, %v12397_v32  ;;  %v12896_v25 = vmax.f32 %v12880_v13, 0.0  ;;  %v6524_v43 = vld [vmem:[%s22776_s2 + $0x10] sm:$0xff] }
 0x835   :  { %v16932_v19 = vpop.f32.mrf.mxu1  ;;  %v12879_v24 = vadd.f32 %v12863_v7, %v23358_v6  ;;  %v23371_v6 = vld [vmem:[#allocation33_spill] sm:$0xff]  ;;  %v6536_v3 = vld [vmem:[%s22776_s2 + $0x70] sm:$0xff] }
 0x836   :  { %16939 = vmatprep.subr.mxu0 %v12901_v15  ;;  %v12900_v20 = vmax.f32 %v12884_v62, 0.0  ;;  %v12623_v62 = vadd.f32 %v22277_v40, %v12396_v34 }
 0x837   :  { %v12810_v16 = vpop.f32.mrf.mxu1  ;;  %16940 = vmatpush3.msra.mxu0 %v12901_v15  ;;  %v23361_v15 = vld [vmem:[#allocation11_spill] sm:$0xff]  ;;  %v12895_v2 = vmax.f32 %v12879_v24, 0.0 }
 0x838   :  { %16941 = vmatprep.subr.mxu0 %v12900_v20  ;;  %v12394_v52 = vadd.f32 %v23361_v15, %v12167_v46  ;;  %v12850_v60 = vadd.f32 %v16932_v19, %v12623_v62  ;;  %v12849_v32 = vadd.f32 %v12810_v16, %v12622_v28  ;;  %v6531_v15 = vld [vmem:[%s22776_s2 + $0x48] sm:$0xff]  ;;  %v6533_v62 = vld [vmem:[%s22776_s2 + $0x58] sm:$0xff] }
 0x839   :  { %v16935_v10 = vpop.f32.mrf.mxu1  ;;  %16942 = vmatpush3.msra.mxu0 %v12900_v20  ;;  %v12393_v20 = vadd.f32 %v23363_v31, %v12166_v4  ;;  %v6541_v31 = vld [vmem:[%s22776_s2 + $0x98] sm:$0xff]  ;;  %v6543_v28 = vld [vmem:[%s22776_s2 + $0xa8] sm:$0xff] }
 0x83a   :  { %16943 = vmatprep.subr.mxu0 %v12899_v57  ;;  %v12852_v56 = vadd.f32 %v16935_v10, %v12625_v36  ;;  %v12621_v7 = vadd.f32 %v23364_v58, %v12394_v52  ;;  %v12873_v42 = vadd.f32 %v22290_v61, %v12850_v60  ;;  %v23368_v36 = vld [vmem:[#allocation53_spill] sm:$0xff]  ;;  %v6532_v52 = vld [vmem:[%s22776_s2 + $0x50] sm:$0xff] }
 0x83b   :  { %v12820_v44 = vpop.f32.mrf.mxu1  ;;  %16944 = vmatpush3.msra.mxu0 %v12899_v57  ;;  %v12620_v19 = vadd.f32 %v22271_v63, %v12393_v20  ;;  %v6542_v20 = vld [vmem:[%s22776_s2 + $0xa0] sm:$0xff] }
 0x83c   :  { %16945 = vmatprep.subr.mxu0 %v12898_v22  ;;  %v12851_v14 = vadd.f32 %v12820_v44, %v12624_v37  ;;  %v12875_v33 = vadd.f32 %v22290_v61, %v12852_v56  ;;  %v12848_v12 = vadd.f32 %v22298_v54, %v12621_v7  ;;  %v12872_v54 = vadd.f32 %v22290_v61, %v12849_v32  ;;  %v6546_v60 = vld [vmem:[%s22776_s2 + $0xc0] sm:$0xff]  ;;  %v6551_v7 = vld [vmem:[%s22776_s2 + $0xe8] sm:$0xff]  ;;  %v6553_v32 = vld [vmem:[%s22776_s2 + $0xf8] sm:$0xff] }
 0x83d   :  { %v16938_v51 = vpop.f32.mrf.mxu1  ;;  %16946 = vmatpush3.msra.mxu0 %v12898_v22  ;;  %v12847_v63 = vadd.f32 %v22307_v49, %v12620_v19  ;;  %v23369_v49 = vld [vmem:[#allocation20_spill] sm:$0xff]  ;;  %v6550_v58 = vld [vmem:[%s22776_s2 + $0xe0] sm:$0xff] }
 0x83e   :  { %v12854_v38 = vadd.f32 %v16938_v51, %v12627_v17  ;;  %16947 = vmatprep.subr.mxu0 %v12897_v39  ;;  %v12874_v41 = vadd.f32 %v22290_v61, %v12851_v14  ;;  %v12891_v34 = vadd.f32 %v12875_v33, %v23367_v23  ;;  %v12871_v22 = vadd.f32 %v22290_v61, %v12848_v12  ;;  %v23372_v17 = vld [vmem:[#allocation51_spill] sm:$0xff]  ;;  %v6534_v51 = vld [vmem:[%s22776_s2 + $0x60] sm:$0xff] }
 0x83f   :  { %v12830_v11 = vpop.f32.mrf.mxu1  ;;  %16948 = vmatpush3.msra.mxu0 %v12897_v39  ;;  %v12889_v13 = vadd.f32 %v12873_v42, %v23369_v49  ;;  %v12870_v47 = vadd.f32 %v22290_v61, %v12847_v63  ;;  %v12888_v21 = vadd.f32 %v12872_v54, %v23370_v5  ;;  %v6529_v39 = vld [vmem:[%s22776_s2 + $0x38] sm:$0xff]  ;;  %v6538_v14 = vld [vmem:[%s22776_s2 + $0x80] sm:$0xff]  ;;  %v6547_v33 = vld [vmem:[%s22776_s2 + $0xc8] sm:$0xff] }
 0x840   :  { %v12877_v40 = vadd.f32 %v22290_v61, %v12854_v38  ;;  %v12853_v18 = vadd.f32 %v12830_v11, %v12626_v29  ;;  %16949 = vmatprep.subr.mxu0 %v12896_v25  ;;  %v12890_v59 = vadd.f32 %v12874_v41, %v23368_v36  ;;  %v12907_v55 = vmax.f32 %v12891_v34, 0.0  ;;  %v6537_v29 = vld [vmem:[%s22776_s2 + $0x78] sm:$0xff]  ;;  %v6539_v38 = vld [vmem:[%s22776_s2 + $0x88] sm:$0xff]  ;;  %v6544_v11 = vld [vmem:[%s22776_s2 + $0xb0] sm:$0xff] }
 0x841   :  { %16950 = vmatpush3.msra.mxu0 %v12896_v25  ;;  %v12905_v44 = vmax.f32 %v12889_v13, 0.0  ;;  %v12887_v24 = vadd.f32 %v12871_v22, %v23371_v6  ;;  %v12904_v37 = vmax.f32 %v12888_v21, 0.0  ;;  %v12886_v56 = vadd.f32 %v12870_v47, %v23372_v17  ;;  %v6540_v25 = vld [vmem:[%s22776_s2 + $0x90] sm:$0xff] }
 0x842   :  { %v12876_v53 = vadd.f32 %v22290_v61, %v12853_v18  ;;  %16951 = vmatprep.subr.mxu0 %v12895_v2  ;;  %v12893_v57 = vadd.f32 %v12877_v40, %v23365_v48  ;;  %v12906_v46 = vmax.f32 %v12890_v59, 0.0  ;;  %v6528_v61 = vld [vmem:[%s22776_s2 + $0x30] sm:$0xff]  ;;  %v6549_v18 = vld [vmem:[%s22776_s2 + $0xd8] sm:$0xff] }
 0x843   :  { %16952 = vmatpush3.msra.mxu0 %v12895_v2  ;;  %v12903_v1 = vmax.f32 %v12887_v24, 0.0  ;;  %v12902_v4 = vmax.f32 %v12886_v56, 0.0  ;;  %v6545_v2 = vld [vmem:[%s22776_s2 + $0xb8] sm:$0xff]  ;;  %v6548_v40 = vld [vmem:[%s22776_s2 + $0xd0] sm:$0xff] }
 0x844   :  { %16953 = vmatprep.subr.mxu0 %v12894_v0  ;;  %v12909_v16 = vmax.f32 %v12893_v57, 0.0  ;;  %v12892_v35 = vadd.f32 %v12876_v53, %v23366_v27 }
 0x845   :  { %16954 = vmatpush3.msra.mxu0 %v12894_v0  ;;  %v6552_v0 = vld [vmem:[%s22776_s2 + $0xf0] sm:$0xff] }
 0x846   :  { %17003 = vmatprep.subr.mxu1 %v12909_v16  ;;  %v12908_v10 = vmax.f32 %v12892_v35, 0.0  ;;  %16956 = vmatmul.mubr.msk.f32.vlgmr.msra.gmra.mxu0 %vm12910_vm5, %v6523_v50 }
 0x847   :  { %17004 = vmatpush3.msra.mxu1 %v12909_v16  ;;  %16958 = vmatprep.mubr.msk.f32.mxu0 %vm12910_vm5, %v6524_v43 }
 0x848   :  { %17005 = vmatprep.subr.mxu1 %v12908_v10 }
 0x849   :  { %17006 = vmatpush3.msra.mxu1 %v12908_v10 }
 0x84a   :  { %17007 = vmatprep.subr.mxu1 %v12907_v55  ;;  %16959 = vmatmul.mubr.msk.f32.gmra.mxu0 %vm12910_vm5, %v6525_v45 }
 0x84b   :  { %17008 = vmatpush3.msra.mxu1 %v12907_v55  ;;  %16961 = vmatprep.mubr.msk.f32.mxu0 %vm12910_vm5, %v6526_v30 }
 0x84c   :  { %17009 = vmatprep.subr.mxu1 %v12906_v46 }
 0x84d   :  { %17010 = vmatpush3.msra.mxu1 %v12906_v46 }
 0x84e   :  { %17011 = vmatprep.subr.mxu1 %v12905_v44  ;;  %16962 = vmatmul.mubr.msk.f32.gmra.mxu0 %vm12910_vm5, %v6527_v8 }
 0x84f   :  { %17012 = vmatpush3.msra.mxu1 %v12905_v44  ;;  %16964 = vmatprep.mubr.msk.f32.mxu0 %vm12910_vm5, %v6528_v61 }
 0x850   :  { %17013 = vmatprep.subr.mxu1 %v12904_v37 }
 0x851   :  { %17014 = vmatpush3.msra.mxu1 %v12904_v37 }
 0x852   :  { %17015 = vmatprep.subr.mxu1 %v12903_v1  ;;  %16965 = vmatmul.mubr.msk.f32.gmra.mxu0 %vm12910_vm5, %v6529_v39 }
 0x853   :  { %17016 = vmatpush3.msra.mxu1 %v12903_v1  ;;  %16967 = vmatprep.mubr.msk.f32.mxu0 %vm12910_vm5, %v6530_v9 }
 0x854   :  { %17017 = vmatprep.subr.mxu1 %v12902_v4 }
 0x855   :  { %17018 = vmatpush3.msra.mxu1 %v12902_v4 }
 0x856   :  { %17020 = vmatmul.mubr.msk.f32.vlgmr.msra.gmra.mxu1 %vm12910_vm5, %v6523_v50  ;;  %16968 = vmatmul.mubr.msk.f32.gmra.mxu0 %vm12910_vm5, %v6531_v15 }
 0x857   :  { %17022 = vmatprep.mubr.msk.f32.mxu1 %vm12910_vm5, %v6524_v43  ;;  %16970 = vmatprep.mubr.msk.f32.mxu0 %vm12910_vm5, %v6532_v52 }
 0x85a   :  { %17023 = vmatmul.mubr.msk.f32.gmra.mxu1 %vm12910_vm5, %v6525_v45  ;;  %16971 = vmatmul.mubr.msk.f32.gmra.mxu0 %vm12910_vm5, %v6533_v62 }
 0x85b   :  { %17025 = vmatprep.mubr.msk.f32.mxu1 %vm12910_vm5, %v6526_v30  ;;  %16973 = vmatprep.mubr.msk.f32.mxu0 %vm12910_vm5, %v6534_v51 }
 0x85e   :  { %17026 = vmatmul.mubr.msk.f32.gmra.mxu1 %vm12910_vm5, %v6527_v8  ;;  %16974 = vmatmul.mubr.msk.f32.gmra.mxu0 %vm12910_vm5, %v6535_v26 }
 0x85f   :  { %17028 = vmatprep.mubr.msk.f32.mxu1 %vm12910_vm5, %v6528_v61  ;;  %16976 = vmatprep.mubr.msk.f32.mxu0 %vm12910_vm5, %v6536_v3 }
 0x862   :  { %17029 = vmatmul.mubr.msk.f32.gmra.mxu1 %vm12910_vm5, %v6529_v39  ;;  %16977 = vmatmul.mubr.msk.f32.gmra.mxu0 %vm12910_vm5, %v6537_v29 }
 0x863   :  { %17031 = vmatprep.mubr.msk.f32.mxu1 %vm12910_vm5, %v6530_v9  ;;  %16979 = vmatprep.mubr.msk.f32.mxu0 %vm12910_vm5, %v6538_v14 }
 0x866   :  { %17032 = vmatmul.mubr.msk.f32.gmra.mxu1 %vm12910_vm5, %v6531_v15  ;;  %16980 = vmatmul.mubr.msk.f32.gmra.mxu0 %vm12910_vm5, %v6539_v38 }
 0x867   :  { %17034 = vmatprep.mubr.msk.f32.mxu1 %vm12910_vm5, %v6532_v52  ;;  %16982 = vmatprep.mubr.msk.f32.mxu0 %vm12910_vm5, %v6540_v25 }
 0x86a   :  { %17035 = vmatmul.mubr.msk.f32.gmra.mxu1 %vm12910_vm5, %v6533_v62  ;;  %16983 = vmatmul.mubr.msk.f32.gmra.mxu0 %vm12910_vm5, %v6541_v31 }
 0x86b   :  { %17037 = vmatprep.mubr.msk.f32.mxu1 %vm12910_vm5, %v6534_v51  ;;  %16985 = vmatprep.mubr.msk.f32.mxu0 %vm12910_vm5, %v6542_v20 }
 0x86e   :  { %17038 = vmatmul.mubr.msk.f32.gmra.mxu1 %vm12910_vm5, %v6535_v26  ;;  %16986 = vmatmul.mubr.msk.f32.gmra.mxu0 %vm12910_vm5, %v6543_v28 }
 0x86f   :  { %17040 = vmatprep.mubr.msk.f32.mxu1 %vm12910_vm5, %v6536_v3  ;;  %16988 = vmatprep.mubr.msk.f32.mxu0 %vm12910_vm5, %v6544_v11 }
 0x872   :  { %17041 = vmatmul.mubr.msk.f32.gmra.mxu1 %vm12910_vm5, %v6537_v29  ;;  %16989 = vmatmul.mubr.msk.f32.gmra.mxu0 %vm12910_vm5, %v6545_v2 }
 0x873   :  { %17043 = vmatprep.mubr.msk.f32.mxu1 %vm12910_vm5, %v6538_v14  ;;  %16991 = vmatprep.mubr.msk.f32.mxu0 %vm12910_vm5, %v6546_v60 }
 0x876   :  { %17044 = vmatmul.mubr.msk.f32.gmra.mxu1 %vm12910_vm5, %v6539_v38  ;;  %16992 = vmatmul.mubr.msk.f32.gmra.mxu0 %vm12910_vm5, %v6547_v33 }
 0x877   :  { %17046 = vmatprep.mubr.msk.f32.mxu1 %vm12910_vm5, %v6540_v25  ;;  %16994 = vmatprep.mubr.msk.f32.mxu0 %vm12910_vm5, %v6548_v40 }
 0x87a   :  { %17047 = vmatmul.mubr.msk.f32.gmra.mxu1 %vm12910_vm5, %v6541_v31  ;;  %16995 = vmatmul.mubr.msk.f32.gmra.mxu0 %vm12910_vm5, %v6549_v18 }
 0x87b   :  { %17049 = vmatprep.mubr.msk.f32.mxu1 %vm12910_vm5, %v6542_v20  ;;  %16997 = vmatprep.mubr.msk.f32.mxu0 %vm12910_vm5, %v6550_v58 }
 0x87e   :  { %17050 = vmatmul.mubr.msk.f32.gmra.mxu1 %vm12910_vm5, %v6543_v28  ;;  %16998 = vmatmul.mubr.msk.f32.gmra.mxu0 %vm12910_vm5, %v6551_v7 }
 0x87f   :  { %17052 = vmatprep.mubr.msk.f32.mxu1 %vm12910_vm5, %v6544_v11  ;;  %17000 = vmatprep.mubr.msk.f32.mxu0 %vm12910_vm5, %v6552_v0 }
 0x882   :  { %17053 = vmatmul.mubr.msk.f32.gmra.mxu1 %vm12910_vm5, %v6545_v2  ;;  %17001 = vmatmul.mubr.msk.f32.gmra.mxu0 %vm12910_vm5, %v6553_v32 }
 0x883   :  { %17055 = vmatprep.mubr.msk.f32.mxu1 %vm12910_vm5, %v6546_v60 }
 0x886   :  { %17056 = vmatmul.mubr.msk.f32.gmra.mxu1 %vm12910_vm5, %v6547_v33 }
 0x887   :  { %17058 = vmatprep.mubr.msk.f32.mxu1 %vm12910_vm5, %v6548_v40 }
 0x88a   :  { %17059 = vmatmul.mubr.msk.f32.gmra.mxu1 %vm12910_vm5, %v6549_v18 }
 0x88b   :  { %17061 = vmatprep.mubr.msk.f32.mxu1 %vm12910_vm5, %v6550_v58 }
 0x88e   :  { %17062 = vmatmul.mubr.msk.f32.gmra.mxu1 %vm12910_vm5, %v6551_v7 }
 0x88f   :  { %17064 = vmatprep.mubr.msk.f32.mxu1 %vm12910_vm5, %v6552_v0 }
 0x892   :  { %17065 = vmatmul.mubr.msk.f32.gmra.mxu1 %vm12910_vm5, %v6553_v32 }
 0x906   :  { %v16957_v41 = vpop.f32.mrf.mxu0 }
 0x907   :  { %13233 = vst.msk [vmem:[%s22791_s17 + $0x8] sm:$0xff] %vm2237_vm3, %v16957_v41 }
 0x908   :  { %v13073_v53 = vpop.f32.mrf.mxu0 }
 0x909   :  { %13232 = vst.msk [vmem:[%s22791_s17] sm:$0xff] %vm2237_vm3, %v13073_v53 }
 0x90a   :  { %v16960_v48 = vpop.f32.mrf.mxu0 }
 0x90b   :  { %13235 = vst.msk [vmem:[%s22791_s17 + $0x18] sm:$0xff] %vm2237_vm3, %v16960_v48 }
 0x90c   :  { %v13083_v57 = vpop.f32.mrf.mxu0 }
 0x90d   :  { %13234 = vst.msk [vmem:[%s22791_s17 + $0x10] sm:$0xff] %vm2237_vm3, %v13083_v57 }
 0x90e   :  { %v16963_v19 = vpop.f32.mrf.mxu0 }
 0x90f   :  { %13237 = vst.msk [vmem:[%s22791_s17 + $0x28] sm:$0xff] %vm2237_vm3, %v16963_v19 }
 0x910   :  { %v13093_v12 = vpop.f32.mrf.mxu0 }
 0x911   :  { %13236 = vst.msk [vmem:[%s22791_s17 + $0x20] sm:$0xff] %vm2237_vm3, %v13093_v12 }
 0x912   :  { %v16966_v50 = vpop.f32.mrf.mxu0 }
 0x913   :  { %13239 = vst.msk [vmem:[%s22791_s17 + $0x38] sm:$0xff] %vm2237_vm3, %v16966_v50 }
 0x914   :  { %v13103_v42 = vpop.f32.mrf.mxu0 }
 0x915   :  { %13238 = vst.msk [vmem:[%s22791_s17 + $0x30] sm:$0xff] %vm2237_vm3, %v13103_v42 }
 0x916   :  { %v17021_v16 = vpop.f32.mrf.mxu1  ;;  %v16969_v27 = vpop.f32.mrf.mxu0 }
 0x917   :  { %14506 = vst.msk [vmem:[%s22791_s17 + $0x108] sm:$0xff] %vm2237_vm3, %v17021_v16  ;;  %13241 = vst.msk [vmem:[%s22791_s17 + $0x48] sm:$0xff] %vm2237_vm3, %v16969_v27 }
 0x918   :  { %v13330_v35 = vpop.f32.mrf.mxu1  ;;  %v13113_v23 = vpop.f32.mrf.mxu0 }
 0x919   :  { %14505 = vst.msk [vmem:[%s22791_s17 + $0x100] sm:$0xff] %vm2237_vm3, %v13330_v35  ;;  %13240 = vst.msk [vmem:[%s22791_s17 + $0x40] sm:$0xff] %vm2237_vm3, %v13113_v23 }
 0x91a   :  { %v17024_v34 = vpop.f32.mrf.mxu1  ;;  %v16972_v43 = vpop.f32.mrf.mxu0 }
 0x91b   :  { %14508 = vst.msk [vmem:[%s22791_s17 + $0x118] sm:$0xff] %vm2237_vm3, %v17024_v34  ;;  %13243 = vst.msk [vmem:[%s22791_s17 + $0x58] sm:$0xff] %vm2237_vm3, %v16972_v43 }
 0x91c   :  { %v13340_v63 = vpop.f32.mrf.mxu1  ;;  %v13123_v54 = vpop.f32.mrf.mxu0 }
 0x91d   :  { %14507 = vst.msk [vmem:[%s22791_s17 + $0x110] sm:$0xff] %vm2237_vm3, %v13340_v63  ;;  %13242 = vst.msk [vmem:[%s22791_s17 + $0x50] sm:$0xff] %vm2237_vm3, %v13123_v54 }
 0x91e   :  { %v17027_v10 = vpop.f32.mrf.mxu1  ;;  %v16975_v36 = vpop.f32.mrf.mxu0 }
 0x91f   :  { %14510 = vst.msk [vmem:[%s22791_s17 + $0x128] sm:$0xff] %vm2237_vm3, %v17027_v10  ;;  %13245 = vst.msk [vmem:[%s22791_s17 + $0x68] sm:$0xff] %vm2237_vm3, %v16975_v36 }
 0x920   :  { %v13350_v59 = vpop.f32.mrf.mxu1  ;;  %v13133_v45 = vpop.f32.mrf.mxu0 }
 0x921   :  { %14509 = vst.msk [vmem:[%s22791_s17 + $0x120] sm:$0xff] %vm2237_vm3, %v13350_v59  ;;  %13244 = vst.msk [vmem:[%s22791_s17 + $0x60] sm:$0xff] %vm2237_vm3, %v13133_v45 }
 0x922   :  { %v17030_v22 = vpop.f32.mrf.mxu1  ;;  %v16978_v55 = vpop.f32.mrf.mxu0 }
 0x923   :  { %14512 = vst.msk [vmem:[%s22791_s17 + $0x138] sm:$0xff] %vm2237_vm3, %v17030_v22  ;;  %13247 = vst.msk [vmem:[%s22791_s17 + $0x78] sm:$0xff] %vm2237_vm3, %v16978_v55 }
 0x924   :  { %v13360_v49 = vpop.f32.mrf.mxu1  ;;  %v13143_v13 = vpop.f32.mrf.mxu0 }
 0x925   :  { %14511 = vst.msk [vmem:[%s22791_s17 + $0x130] sm:$0xff] %vm2237_vm3, %v13360_v49  ;;  %13246 = vst.msk [vmem:[%s22791_s17 + $0x70] sm:$0xff] %vm2237_vm3, %v13143_v13 }
 0x926   :  { %v17033_v30 = vpop.f32.mrf.mxu1  ;;  %v16981_v47 = vpop.f32.mrf.mxu0 }
 0x927   :  { %14514 = vst.msk [vmem:[%s22791_s17 + $0x148] sm:$0xff] %vm2237_vm3, %v17033_v30  ;;  %13249 = vst.msk [vmem:[%s22791_s17 + $0x88] sm:$0xff] %vm2237_vm3, %v16981_v47 }
 0x928   :  { %v13370_v46 = vpop.f32.mrf.mxu1  ;;  %v13153_v5 = vpop.f32.mrf.mxu0 }
 0x929   :  { %14513 = vst.msk [vmem:[%s22791_s17 + $0x140] sm:$0xff] %vm2237_vm3, %v13370_v46  ;;  %13248 = vst.msk [vmem:[%s22791_s17 + $0x80] sm:$0xff] %vm2237_vm3, %v13153_v5 }
 0x92a   :  { %v17036_v21 = vpop.f32.mrf.mxu1  ;;  %v16984_v8 = vpop.f32.mrf.mxu0 }
 0x92b   :  { %14516 = vst.msk [vmem:[%s22791_s17 + $0x158] sm:$0xff] %vm2237_vm3, %v17036_v21  ;;  %13251 = vst.msk [vmem:[%s22791_s17 + $0x98] sm:$0xff] %vm2237_vm3, %v16984_v8 }
 0x92c   :  { %v13380_v44 = vpop.f32.mrf.mxu1  ;;  %v13163_v6 = vpop.f32.mrf.mxu0 }
 0x92d   :  { %14515 = vst.msk [vmem:[%s22791_s17 + $0x150] sm:$0xff] %vm2237_vm3, %v13380_v44  ;;  %13250 = vst.msk [vmem:[%s22791_s17 + $0x90] sm:$0xff] %vm2237_vm3, %v13163_v6 }
 0x92e   :  { %v17039_v24 = vpop.f32.mrf.mxu1  ;;  %v16987_v61 = vpop.f32.mrf.mxu0 }
 0x92f   :  { %14518 = vst.msk [vmem:[%s22791_s17 + $0x168] sm:$0xff] %vm2237_vm3, %v17039_v24  ;;  %13253 = vst.msk [vmem:[%s22791_s17 + $0xa8] sm:$0xff] %vm2237_vm3, %v16987_v61 }
 0x930   :  { %v13390_v37 = vpop.f32.mrf.mxu1  ;;  %v13173_v17 = vpop.f32.mrf.mxu0 }
 0x931   :  { %14517 = vst.msk [vmem:[%s22791_s17 + $0x160] sm:$0xff] %vm2237_vm3, %v13390_v37  ;;  %13252 = vst.msk [vmem:[%s22791_s17 + $0xa0] sm:$0xff] %vm2237_vm3, %v13173_v17 }
 0x932   :  { %v17042_v56 = vpop.f32.mrf.mxu1  ;;  %v16990_v39 = vpop.f32.mrf.mxu0 }
 0x933   :  { %14520 = vst.msk [vmem:[%s22791_s17 + $0x178] sm:$0xff] %vm2237_vm3, %v17042_v56  ;;  %13255 = vst.msk [vmem:[%s22791_s17 + $0xb8] sm:$0xff] %vm2237_vm3, %v16990_v39 }
 0x934   :  { %v13400_v1 = vpop.f32.mrf.mxu1  ;;  %v13183_v9 = vpop.f32.mrf.mxu0 }
 0x935   :  { %14519 = vst.msk [vmem:[%s22791_s17 + $0x170] sm:$0xff] %vm2237_vm3, %v13400_v1  ;;  %13254 = vst.msk [vmem:[%s22791_s17 + $0xb0] sm:$0xff] %vm2237_vm3, %v13183_v9 }
 0x936   :  { %v17045_v4 = vpop.f32.mrf.mxu1  ;;  %v16993_v15 = vpop.f32.mrf.mxu0 }
 0x937   :  { %14522 = vst.msk [vmem:[%s22791_s17 + $0x188] sm:$0xff] %vm2237_vm3, %v17045_v4  ;;  %13257 = vst.msk [vmem:[%s22791_s17 + $0xc8] sm:$0xff] %vm2237_vm3, %v16993_v15 }
 0x938   :  { %v13410_v52 = vpop.f32.mrf.mxu1  ;;  %v13193_v62 = vpop.f32.mrf.mxu0 }
 0x939   :  { %14521 = vst.msk [vmem:[%s22791_s17 + $0x180] sm:$0xff] %vm2237_vm3, %v13410_v52  ;;  %13256 = vst.msk [vmem:[%s22791_s17 + $0xc0] sm:$0xff] %vm2237_vm3, %v13193_v62 }
 0x93a   :  { %v17048_v51 = vpop.f32.mrf.mxu1  ;;  %v16996_v26 = vpop.f32.mrf.mxu0 }
 0x93b   :  { %14524 = vst.msk [vmem:[%s22791_s17 + $0x198] sm:$0xff] %vm2237_vm3, %v17048_v51  ;;  %13259 = vst.msk [vmem:[%s22791_s17 + $0xd8] sm:$0xff] %vm2237_vm3, %v16996_v26 }
 0x93c   :  { %v13420_v3 = vpop.f32.mrf.mxu1  ;;  %v13203_v29 = vpop.f32.mrf.mxu0 }
 0x93d   :  { %14523 = vst.msk [vmem:[%s22791_s17 + $0x190] sm:$0xff] %vm2237_vm3, %v13420_v3  ;;  %13258 = vst.msk [vmem:[%s22791_s17 + $0xd0] sm:$0xff] %vm2237_vm3, %v13203_v29 }
 0x93e   :  { %v17051_v14 = vpop.f32.mrf.mxu1  ;;  %v16999_v38 = vpop.f32.mrf.mxu0 }
 0x93f   :  { %14526 = vst.msk [vmem:[%s22791_s17 + $0x1a8] sm:$0xff] %vm2237_vm3, %v17051_v14  ;;  %13261 = vst.msk [vmem:[%s22791_s17 + $0xe8] sm:$0xff] %vm2237_vm3, %v16999_v38 }
 0x940   :  { %v13430_v25 = vpop.f32.mrf.mxu1  ;;  %v13213_v31 = vpop.f32.mrf.mxu0 }
 0x941   :  { %14525 = vst.msk [vmem:[%s22791_s17 + $0x1a0] sm:$0xff] %vm2237_vm3, %v13430_v25  ;;  %13260 = vst.msk [vmem:[%s22791_s17 + $0xe0] sm:$0xff] %vm2237_vm3, %v13213_v31 }
 0x942   :  { %v17054_v20 = vpop.f32.mrf.mxu1  ;;  %v17002_v28 = vpop.f32.mrf.mxu0 }
 0x943   :  { %14528 = vst.msk [vmem:[%s22791_s17 + $0x1b8] sm:$0xff] %vm2237_vm3, %v17054_v20  ;;  %13263 = vst.msk [vmem:[%s22791_s17 + $0xf8] sm:$0xff] %vm2237_vm3, %v17002_v28 }
 0x944   :  { %v13440_v11 = vpop.f32.mrf.mxu1  ;;  %v13223_v2 = vpop.f32.mrf.mxu0 }
 0x945   :  { %14527 = vst.msk [vmem:[%s22791_s17 + $0x1b0] sm:$0xff] %vm2237_vm3, %v13440_v11  ;;  %13262 = vst.msk [vmem:[%s22791_s17 + $0xf0] sm:$0xff] %vm2237_vm3, %v13223_v2 }
 0x946   :  { %v17057_v60 = vpop.f32.mrf.mxu1 }
 0x947   :  { %14530 = vst.msk [vmem:[%s22791_s17 + $0x1c8] sm:$0xff] %vm2237_vm3, %v17057_v60 }
 0x948   :  { %v13450_v33 = vpop.f32.mrf.mxu1 }
 0x949   :  { %14529 = vst.msk [vmem:[%s22791_s17 + $0x1c0] sm:$0xff] %vm2237_vm3, %v13450_v33 }
 0x94a   :  { %v17060_v40 = vpop.f32.mrf.mxu1 }
 0x94b   :  { %14532 = vst.msk [vmem:[%s22791_s17 + $0x1d8] sm:$0xff] %vm2237_vm3, %v17060_v40 }
 0x94c   :  { %v13460_v18 = vpop.f32.mrf.mxu1 }
 0x94d   :  { %14531 = vst.msk [vmem:[%s22791_s17 + $0x1d0] sm:$0xff] %vm2237_vm3, %v13460_v18 }
 0x94e   :  { %v17063_v58 = vpop.f32.mrf.mxu1 }
 0x94f   :  { %14534 = vst.msk [vmem:[%s22791_s17 + $0x1e8] sm:$0xff] %vm2237_vm3, %v17063_v58 }
 0x950   :  { %v13470_v7 = vpop.f32.mrf.mxu1 }
 0x951   :  { %14533 = vst.msk [vmem:[%s22791_s17 + $0x1e0] sm:$0xff] %vm2237_vm3, %v13470_v7 }
 0x952   :  { %v17066_v0 = vpop.f32.mrf.mxu1 }
 0x953   :  { %14536 = vst.msk [vmem:[%s22791_s17 + $0x1f8] sm:$0xff] %vm2237_vm3, %v17066_v0 }
 0x954   :  { %v13480_v32 = vpop.f32.mrf.mxu1 }
 0x955   :  { %14535 = vst.msk [vmem:[%s22791_s17 + $0x1f0] sm:$0xff] %vm2237_vm3, %v13480_v32 }
 0x956   :  { %13526 = vsyncpa [#allocation6], 1 }
 0x957   :  { %13527 = vsyncpa [#allocation8], 1 }

</bundles_post_ra>
